<compile_context>
chip_gen: v7x
topology: tpu7x:2x2x1
jax: 0.10.0
libtpu: 0.0.40
codegen_flags: <defaults>
</compile_context>

<pallas_src>
import functools

import jax
import jax.numpy as jnp
from jax.experimental import pallas as pl
from jax.experimental.pallas import tpu as pltpu

# Model hyperparameters (mirrors the PyTorch module's globals).
EMBEDDING_DIM = 32
NUM_HEADS = 4
HEAD_SIZE = EMBEDDING_DIM // NUM_HEADS   # 8
BLOCK_SIZE = 8                           # max sequence length (== position table rows)
VOCAB_SIZE = 16
VOCAB_PAD = 128                          # lane-dense logits width (sliced back to 16 outside)

_MASK_NEG = -1e30                        # big-negative (not -inf); exp() underflows to 0


def gpt_kernel(idx_ref, tok_ref, posr_ref, a_ref, b_ref, ffb_ref,
               lmw_ref, lmb_ref, out_ref, *, block_b, seq_len):
    """One batch-block (block_b sequences, R = block_b*seq_len rows) per grid step.

    idx_ref : (R, 1)       int32 token ids
    tok_ref : (V, E)       token embedding table            (resident)
    posr_ref: (R, E)       position embeddings pre-tiled to rows (resident)
    a_ref   : (NH, E, E)   A_h = scale * Wq_h @ Wk_h^T      (resident)
    b_ref   : (NH, E, E)   B_h = Wv_h @ W1_h                (resident)
    ffb_ref : (1, E)       feed-forward bias
    lmw_ref : (E, 128)     LM head weight, zero-padded to 128 lanes
    lmb_ref : (1, 128)     LM head bias,   zero-padded to 128 lanes
    out_ref : (R, 128)     logits (lane-dense; cols >= VOCAB_SIZE are zeros)
    """
    E, NH, V = EMBEDDING_DIM, NUM_HEADS, VOCAB_SIZE
    T = seq_len
    R = block_b * T

    # ---- embeddings: one-hot token lookup via MXU + resident tiled positions ----
    idx = idx_ref[...]                                                     # (R, 1)
    tok_oh = (jax.lax.broadcasted_iota(jnp.int32, (R, V), 1) == idx
              ).astype(jnp.float32)                                        # (R, V)
    x = (jnp.dot(tok_oh, tok_ref[...], preferred_element_type=jnp.float32)
         + posr_ref[...])                                                  # (R, E)

    # ---- block-diagonal causal additive mask over the flat (R, R) score matrix,
    #      built once per step and shared by every head ----
    ri = jax.lax.broadcasted_iota(jnp.int32, (R, R), 0)
    ci = jax.lax.broadcasted_iota(jnp.int32, (R, R), 1)
    rpos = jnp.bitwise_and(ri, T - 1) if (T & (T - 1)) == 0 else ri % T
    valid = jnp.logical_and(ci <= ri, ci >= ri - rpos)   # same sequence AND causal
    mask_add = jnp.where(valid, 0.0, _MASK_NEG).astype(jnp.float32)        # (R, R)

    # dot_general contracting last-vs-last (flash-attention style, no explicit k^T)
    dn_nt = (((1,), (1,)), ((), ()))

    ff_acc = None
    for h in range(NH):                    # tiny static unroll over 4 heads
        # S_h = scale * (x Wq_h)(x Wk_h)^T == (x @ A_h) @ x^T, full-width MXU ops
        xa = jnp.dot(x, a_ref[h], preferred_element_type=jnp.float32)      # (R, E)
        s = jax.lax.dot_general(xa, x, dn_nt,
                                preferred_element_type=jnp.float32)        # (R, R)
        s = s + mask_add
        # hand-rolled softmax; reciprocal on the EUP slot
        m = jnp.max(s, axis=-1, keepdims=True)
        e = jnp.exp(s - m)
        l = jnp.sum(e, axis=-1, keepdims=True)
        p = e * pl.reciprocal(l, approx=True)                              # (R, R)
        # concat-free head merge: (P_h @ v_h) @ W1_h == P_h @ (x @ B_h)
        xb = jnp.dot(x, b_ref[h], preferred_element_type=jnp.float32)      # (R, E)
        o = jnp.dot(p, xb, preferred_element_type=jnp.float32)             # (R, E)
        ff_acc = o if h == 0 else ff_acc + o

    # FeedForward: Linear(E, E) + ReLU (weight already folded into B_h).
    ff = jnp.maximum(ff_acc + ffb_ref[...], 0.0)                           # (R, E)

    # LM head against lane-padded weights -> full-width 128-lane stores.
    logits = (jnp.dot(ff, lmw_ref[...], preferred_element_type=jnp.float32)
              + lmb_ref[...])                                              # (R, 128)
    out_ref[...] = logits.astype(out_ref.dtype)


def prepare_params(params):
    """One-time parameter transform (do NOT call per forward pass)."""
    E, H, NH, V = EMBEDDING_DIM, HEAD_SIZE, NUM_HEADS, VOCAB_SIZE
    scale = float(E) ** -0.5                       # reference scales by c == EMBEDDING_DIM
    wq, wk, wv = params["wq"], params["wk"], params["wv"]          # (NH, E, H)
    # A_h = scale * Wq_h @ Wk_h^T   (scale folded into the score weights)
    A = scale * jnp.einsum("hek,hfk->hef", wq, wk)                 # (NH, E, E)
    # B_h = Wv_h @ W1[h*H:(h+1)*H, :]   (value proj fused with head-merge into ff_w)
    w1h = params["ff_w"].reshape(NH, H, E)
    B = jnp.einsum("hek,hkf->hef", wv, w1h)                        # (NH, E, E)
    lm_w_pad = jnp.pad(params["lm_w"], ((0, 0), (0, VOCAB_PAD - V)))
    lm_b_pad = jnp.pad(params["lm_b"], ((0, 0), (0, VOCAB_PAD - V)))
    return {
        "tok_emb": params["tok_emb"],
        "pos_emb": params["pos_emb"],
        "A": A, "B": B,
        "ff_b": params["ff_b"],
        "lm_w_pad": lm_w_pad,
        "lm_b_pad": lm_b_pad,
    }


def gpt_forward(indices, prepared, block_b=None):
    """indices: (B, T) int32 token ids. Returns (B, T, VOCAB_SIZE) float32 logits."""
    B, T = indices.shape
    E, V = EMBEDDING_DIM, VOCAB_SIZE
    assert T <= BLOCK_SIZE, "sequence length exceeds position table"

    if block_b is None:
        # Cap rows per step near 256 so the (R, R) score tile stays small, and get
        # >=2 "parallel" steps when B allows (keeps both v7x TensorCores busy).
        block_b = min(B, max(1, 256 // T))
    block_b = max(1, min(block_b, B))

    n_blocks = -(-B // block_b)
    Bp = n_blocks * block_b
    R_blk = block_b * T
    assert (R_blk % 8 == 0) or n_blocks == 1, "rows per block must be a multiple of 8"

    idx = indices.astype(jnp.int32)
    if Bp != B:
        idx = jnp.pad(idx, ((0, Bp - B), (0, 0)))       # padded rows: token 0, discarded later
    idx2d = idx.reshape(Bp * T, 1)

    # Positions pre-tiled to the per-block row layout (row = b_local*T + t).
    pos_rows = jnp.tile(prepared["pos_emb"][:T], (block_b, 1))              # (R_blk, E)

    out2d = pl.pallas_call(
        functools.partial(gpt_kernel, block_b=block_b, seq_len=T),
        out_shape=jax.ShapeDtypeStruct((Bp * T, VOCAB_PAD), jnp.float32),
        grid_spec=pltpu.PrefetchScalarGridSpec(
            num_scalar_prefetch=0,
            grid=(n_blocks,),
            in_specs=[
                pl.BlockSpec((R_blk, 1), lambda i: (i, 0)),                 # token ids (per block)
                pl.BlockSpec((V, E), lambda i: (0, 0)),                     # token embedding table
                pl.BlockSpec((R_blk, E), lambda i: (0, 0)),                 # tiled positions
                pl.BlockSpec((NUM_HEADS, E, E), lambda i: (0, 0, 0)),       # A (scaled Wq Wk^T)
                pl.BlockSpec((NUM_HEADS, E, E), lambda i: (0, 0, 0)),       # B (Wv W1)
                pl.BlockSpec((1, E), lambda i: (0, 0)),                     # ff bias
                pl.BlockSpec((E, VOCAB_PAD), lambda i: (0, 0)),             # lm head W (padded)
                pl.BlockSpec((1, VOCAB_PAD), lambda i: (0, 0)),             # lm head b (padded)
            ],
            out_specs=pl.BlockSpec((R_blk, VOCAB_PAD), lambda i: (i, 0)),
        ),
        compiler_params=pltpu.CompilerParams(
            dimension_semantics=("parallel",)),
    )(idx2d, prepared["tok_emb"], pos_rows, prepared["A"], prepared["B"],
      prepared["ff_b"], prepared["lm_w_pad"], prepared["lm_b_pad"])

    return out2d.reshape(Bp, T, VOCAB_PAD)[:B, :, :V]


def gpt_reference(indices, params):
    """Pure-JAX reference mirroring the PyTorch forward exactly."""
    B, T = indices.shape
    E = EMBEDDING_DIM
    tok = jnp.take(params["tok_emb"], indices, axis=0)
    pos = jnp.take(params["pos_emb"], jnp.arange(T), axis=0)
    x = tok + pos[None, :, :]                                    # (B, T, E)

    causal = jnp.tril(jnp.ones((T, T), jnp.float32)) != 0
    heads = []
    for h in range(NUM_HEADS):
        q = x @ params["wq"][h]
        k = x @ params["wk"][h]
        v = x @ params["wv"][h]
        s = jnp.einsum("btd,bsd->bts", q, k) * (E ** -0.5)       # scaled by c == E (as PyTorch)
        s = jnp.where(causal[None], s, -jnp.inf)
        p = jax.nn.softmax(s, axis=-1)
        heads.append(p @ v)
    attn = jnp.concatenate(heads, axis=-1)
    ff = jnp.maximum(attn @ params["ff_w"] + params["ff_b"], 0.0)
    return ff @ params["lm_w"] + params["lm_b"]


def init_params(key):
    ks = jax.random.split(key, 9)
    s = 0.02
    return {
        "tok_emb": s * jax.random.normal(ks[0], (VOCAB_SIZE, EMBEDDING_DIM), jnp.float32),
        "pos_emb": s * jax.random.normal(ks[1], (BLOCK_SIZE, EMBEDDING_DIM), jnp.float32),
        "wq": s * jax.random.normal(ks[2], (NUM_HEADS, EMBEDDING_DIM, HEAD_SIZE), jnp.float32),
        "wk": s * jax.random.normal(ks[3], (NUM_HEADS, EMBEDDING_DIM, HEAD_SIZE), jnp.float32),
        "wv": s * jax.random.normal(ks[4], (NUM_HEADS, EMBEDDING_DIM, HEAD_SIZE), jnp.float32),
        "ff_w": s * jax.random.normal(ks[5], (EMBEDDING_DIM, EMBEDDING_DIM), jnp.float32),
        "ff_b": s * jax.random.normal(ks[6], (1, EMBEDDING_DIM), jnp.float32),
        "lm_w": s * jax.random.normal(ks[7], (EMBEDDING_DIM, VOCAB_SIZE), jnp.float32),
        "lm_b": s * jax.random.normal(ks[8], (1, VOCAB_SIZE), jnp.float32),
    }


if __name__ == "__main__":
    key = jax.random.PRNGKey(0)
    pkey, ikey = jax.random.split(key)
    params = init_params(pkey)
    prepared = jax.tree_util.tree_map(jnp.asarray, prepare_params(params))  # one-time weight prep

    # T only needs T <= BLOCK_SIZE; B=64 gives a 2-step "parallel" grid (both v7x
    # TensorCores busy; one extra ~0.35us step is negligible on v5e/v6e).
    B, T = 64, BLOCK_SIZE
    indices = jax.random.randint(ikey, (B, T), 0, VOCAB_SIZE, dtype=jnp.int32)

    fwd = jax.jit(lambda idx: gpt_forward(idx, prepared))
    logits = jax.block_until_ready(fwd(indices))
    ref = jax.block_until_ready(gpt_reference(indices, params))

    assert logits.shape == (B, T, VOCAB_SIZE)
    assert jnp.allclose(logits, ref, atol=1e-4, rtol=1e-4), "mismatch vs reference"

    print("KERNEL_OK")
</pallas_src>

<mosaic_0001>
module attributes {stable_mosaic.version = 11 : i64} {
  func.func @gpt_kernel(%arg0: i32, %arg1: memref<256x1xi32, #tpu.memory_space<vmem>>, %arg2: memref<16x32xf32, #tpu.memory_space<vmem>>, %arg3: memref<256x32xf32, #tpu.memory_space<vmem>>, %arg4: memref<4x32x32xf32, #tpu.memory_space<vmem>>, %arg5: memref<4x32x32xf32, #tpu.memory_space<vmem>>, %arg6: memref<1x32xf32, #tpu.memory_space<vmem>>, %arg7: memref<32x128xf32, #tpu.memory_space<vmem>>, %arg8: memref<1x128xf32, #tpu.memory_space<vmem>>, %arg9: memref<256x128xf32, #tpu.memory_space<vmem>>) attributes {dimension_semantics = [#tpu.dimension_semantics<parallel>], iteration_bounds = array<i64: 2>, scalar_prefetch = 0 : i64, scratch_operands = 0 : i64, tpu.core_type = #tpu.core_type<tc>, window_params = [{transform_indices = @transform_0, window_bounds = array<i64: 256, 1>}, {pipeline_mode = #tpu.pipeline_mode<synchronous>, transform_indices = @transform_1, window_bounds = array<i64: 16, 32>}, {pipeline_mode = #tpu.pipeline_mode<synchronous>, transform_indices = @transform_2, window_bounds = array<i64: 256, 32>}, {pipeline_mode = #tpu.pipeline_mode<synchronous>, transform_indices = @transform_3, window_bounds = array<i64: 4, 32, 32>}, {pipeline_mode = #tpu.pipeline_mode<synchronous>, transform_indices = @transform_4, window_bounds = array<i64: 4, 32, 32>}, {pipeline_mode = #tpu.pipeline_mode<synchronous>, transform_indices = @transform_5, window_bounds = array<i64: 1, 32>}, {pipeline_mode = #tpu.pipeline_mode<synchronous>, transform_indices = @transform_6, window_bounds = array<i64: 32, 128>}, {pipeline_mode = #tpu.pipeline_mode<synchronous>, transform_indices = @transform_7, window_bounds = array<i64: 1, 128>}, {transform_indices = @transform_8, window_bounds = array<i64: 256, 128>}]} {
    %c0 = arith.constant 0 : index
    %c0_0 = arith.constant 0 : index
    %0 = vector.load %arg1[%c0, %c0_0] : memref<256x1xi32, #tpu.memory_space<vmem>>, vector<256x1xi32>
    %1 = tpu.iota {dimensions = array<i32: 1>} : vector<256x16xi32>
    %2 = vector.broadcast %0 : vector<256x1xi32> to vector<256x16xi32>
    %3 = arith.cmpi eq, %1, %2 : vector<256x16xi32>
    %4 = arith.extui %3 : vector<256x16xi1> to vector<256x16xi32>
    %5 = arith.sitofp %4 : vector<256x16xi32> to vector<256x16xf32>
    %c0_1 = arith.constant 0 : index
    %c0_2 = arith.constant 0 : index
    %6 = vector.load %arg2[%c0_1, %c0_2] : memref<16x32xf32, #tpu.memory_space<vmem>>, vector<16x32xf32>
    %cst = arith.constant dense<0.000000e+00> : vector<256x32xf32>
    %7 = tpu.matmul %5, %6, %cst {dimension_numbers = #tpu.dot_dimension_numbers<[1], [0], [0], [1], [0, 0, 1, 1], [], []>} : vector<256x16xf32>, vector<16x32xf32>, vector<256x32xf32> -> vector<256x32xf32>
    %c0_3 = arith.constant 0 : index
    %c0_4 = arith.constant 0 : index
    %8 = vector.load %arg3[%c0_3, %c0_4] : memref<256x32xf32, #tpu.memory_space<vmem>>, vector<256x32xf32>
    %9 = arith.addf %7, %8 : vector<256x32xf32>
    %10 = tpu.iota {dimensions = array<i32: 0>} : vector<256x256xi32>
    %11 = tpu.iota {dimensions = array<i32: 1>} : vector<256x256xi32>
    %c7_i32 = arith.constant 7 : i32
    %12 = vector.broadcast %c7_i32 : i32 to vector<256x256xi32>
    %13 = arith.andi %10, %12 : vector<256x256xi32>
    %14 = arith.cmpi sle, %11, %10 : vector<256x256xi32>
    %15 = arith.subi %10, %13 : vector<256x256xi32>
    %16 = arith.cmpi sge, %11, %15 : vector<256x256xi32>
    %17 = arith.andi %14, %16 : vector<256x256xi1>
    %cst_5 = arith.constant 0.000000e+00 : f32
    %cst_6 = arith.constant -1.000000e+30 : f32
    %18 = vector.broadcast %cst_5 : f32 to vector<256x256xf32>
    %19 = vector.broadcast %cst_6 : f32 to vector<256x256xf32>
    %20 = arith.select %17, %18, %19 : vector<256x256xi1>, vector<256x256xf32>
    %c0_7 = arith.constant 0 : index
    %c0_8 = arith.constant 0 : index
    %c0_9 = arith.constant 0 : index
    %21 = vector.load %arg4[%c0_7, %c0_8, %c0_9] : memref<4x32x32xf32, #tpu.memory_space<vmem>>, vector<1x32x32xf32>
    %22 = vector.shape_cast %21 : vector<1x32x32xf32> to vector<32x32xf32>
    %cst_10 = arith.constant dense<0.000000e+00> : vector<256x32xf32>
    %23 = tpu.matmul %9, %22, %cst_10 {dimension_numbers = #tpu.dot_dimension_numbers<[1], [0], [0], [1], [0, 0, 1, 1], [], []>} : vector<256x32xf32>, vector<32x32xf32>, vector<256x32xf32> -> vector<256x32xf32>
    %cst_11 = arith.constant dense<0.000000e+00> : vector<256x256xf32>
    %24 = tpu.matmul %23, %9, %cst_11 {dimension_numbers = #tpu.dot_dimension_numbers<[1], [1], [0], [0], [0, 0, 1, 0], [], []>} : vector<256x32xf32>, vector<256x32xf32>, vector<256x256xf32> -> vector<256x256xf32>
    %25 = arith.addf %24, %20 : vector<256x256xf32>
    %cst_12 = arith.constant dense<0xFF800000> : vector<256xf32>
    %26 = vector.multi_reduction <maximumf>, %25, %cst_12 [1] : vector<256x256xf32> to vector<256xf32>
    %27 = vector.shape_cast %26 : vector<256xf32> to vector<256x1xf32>
    %28 = vector.broadcast %27 : vector<256x1xf32> to vector<256x256xf32>
    %29 = arith.subf %25, %28 : vector<256x256xf32>
    %30 = math.exp %29 : vector<256x256xf32>
    %cst_13 = arith.constant dense<0.000000e+00> : vector<256xf32>
    %31 = vector.multi_reduction <add>, %30, %cst_13 [1] : vector<256x256xf32> to vector<256xf32>
    %32 = vector.shape_cast %31 : vector<256xf32> to vector<256x1xf32>
    %33 = tpu.reciprocal %32 {approx = true} : vector<256x1xf32> -> vector<256x1xf32>
    %34 = vector.broadcast %33 : vector<256x1xf32> to vector<256x256xf32>
    %35 = arith.mulf %30, %34 : vector<256x256xf32>
    %c0_14 = arith.constant 0 : index
    %c0_15 = arith.constant 0 : index
    %c0_16 = arith.constant 0 : index
    %36 = vector.load %arg5[%c0_14, %c0_15, %c0_16] : memref<4x32x32xf32, #tpu.memory_space<vmem>>, vector<1x32x32xf32>
    %37 = vector.shape_cast %36 : vector<1x32x32xf32> to vector<32x32xf32>
    %cst_17 = arith.constant dense<0.000000e+00> : vector<256x32xf32>
    %38 = tpu.matmul %9, %37, %cst_17 {dimension_numbers = #tpu.dot_dimension_numbers<[1], [0], [0], [1], [0, 0, 1, 1], [], []>} : vector<256x32xf32>, vector<32x32xf32>, vector<256x32xf32> -> vector<256x32xf32>
    %cst_18 = arith.constant dense<0.000000e+00> : vector<256x32xf32>
    %39 = tpu.matmul %35, %38, %cst_18 {dimension_numbers = #tpu.dot_dimension_numbers<[1], [0], [0], [1], [0, 0, 1, 1], [], []>} : vector<256x256xf32>, vector<256x32xf32>, vector<256x32xf32> -> vector<256x32xf32>
    %c1 = arith.constant 1 : index
    %c0_19 = arith.constant 0 : index
    %c0_20 = arith.constant 0 : index
    %40 = vector.load %arg4[%c1, %c0_19, %c0_20] : memref<4x32x32xf32, #tpu.memory_space<vmem>>, vector<1x32x32xf32>
    %41 = vector.shape_cast %40 : vector<1x32x32xf32> to vector<32x32xf32>
    %cst_21 = arith.constant dense<0.000000e+00> : vector<256x32xf32>
    %42 = tpu.matmul %9, %41, %cst_21 {dimension_numbers = #tpu.dot_dimension_numbers<[1], [0], [0], [1], [0, 0, 1, 1], [], []>} : vector<256x32xf32>, vector<32x32xf32>, vector<256x32xf32> -> vector<256x32xf32>
    %cst_22 = arith.constant dense<0.000000e+00> : vector<256x256xf32>
    %43 = tpu.matmul %42, %9, %cst_22 {dimension_numbers = #tpu.dot_dimension_numbers<[1], [1], [0], [0], [0, 0, 1, 0], [], []>} : vector<256x32xf32>, vector<256x32xf32>, vector<256x256xf32> -> vector<256x256xf32>
    %44 = arith.addf %43, %20 : vector<256x256xf32>
    %cst_23 = arith.constant dense<0xFF800000> : vector<256xf32>
    %45 = vector.multi_reduction <maximumf>, %44, %cst_23 [1] : vector<256x256xf32> to vector<256xf32>
    %46 = vector.shape_cast %45 : vector<256xf32> to vector<256x1xf32>
    %47 = vector.broadcast %46 : vector<256x1xf32> to vector<256x256xf32>
    %48 = arith.subf %44, %47 : vector<256x256xf32>
    %49 = math.exp %48 : vector<256x256xf32>
    %cst_24 = arith.constant dense<0.000000e+00> : vector<256xf32>
    %50 = vector.multi_reduction <add>, %49, %cst_24 [1] : vector<256x256xf32> to vector<256xf32>
    %51 = vector.shape_cast %50 : vector<256xf32> to vector<256x1xf32>
    %52 = tpu.reciprocal %51 {approx = true} : vector<256x1xf32> -> vector<256x1xf32>
    %53 = vector.broadcast %52 : vector<256x1xf32> to vector<256x256xf32>
    %54 = arith.mulf %49, %53 : vector<256x256xf32>
    %c1_25 = arith.constant 1 : index
    %c0_26 = arith.constant 0 : index
    %c0_27 = arith.constant 0 : index
    %55 = vector.load %arg5[%c1_25, %c0_26, %c0_27] : memref<4x32x32xf32, #tpu.memory_space<vmem>>, vector<1x32x32xf32>
    %56 = vector.shape_cast %55 : vector<1x32x32xf32> to vector<32x32xf32>
    %cst_28 = arith.constant dense<0.000000e+00> : vector<256x32xf32>
    %57 = tpu.matmul %9, %56, %cst_28 {dimension_numbers = #tpu.dot_dimension_numbers<[1], [0], [0], [1], [0, 0, 1, 1], [], []>} : vector<256x32xf32>, vector<32x32xf32>, vector<256x32xf32> -> vector<256x32xf32>
    %cst_29 = arith.constant dense<0.000000e+00> : vector<256x32xf32>
    %58 = tpu.matmul %54, %57, %cst_29 {dimension_numbers = #tpu.dot_dimension_numbers<[1], [0], [0], [1], [0, 0, 1, 1], [], []>} : vector<256x256xf32>, vector<256x32xf32>, vector<256x32xf32> -> vector<256x32xf32>
    %59 = arith.addf %39, %58 : vector<256x32xf32>
    %c2 = arith.constant 2 : index
    %c0_30 = arith.constant 0 : index
    %c0_31 = arith.constant 0 : index
    %60 = vector.load %arg4[%c2, %c0_30, %c0_31] : memref<4x32x32xf32, #tpu.memory_space<vmem>>, vector<1x32x32xf32>
    %61 = vector.shape_cast %60 : vector<1x32x32xf32> to vector<32x32xf32>
    %cst_32 = arith.constant dense<0.000000e+00> : vector<256x32xf32>
    %62 = tpu.matmul %9, %61, %cst_32 {dimension_numbers = #tpu.dot_dimension_numbers<[1], [0], [0], [1], [0, 0, 1, 1], [], []>} : vector<256x32xf32>, vector<32x32xf32>, vector<256x32xf32> -> vector<256x32xf32>
    %cst_33 = arith.constant dense<0.000000e+00> : vector<256x256xf32>
    %63 = tpu.matmul %62, %9, %cst_33 {dimension_numbers = #tpu.dot_dimension_numbers<[1], [1], [0], [0], [0, 0, 1, 0], [], []>} : vector<256x32xf32>, vector<256x32xf32>, vector<256x256xf32> -> vector<256x256xf32>
    %64 = arith.addf %63, %20 : vector<256x256xf32>
    %cst_34 = arith.constant dense<0xFF800000> : vector<256xf32>
    %65 = vector.multi_reduction <maximumf>, %64, %cst_34 [1] : vector<256x256xf32> to vector<256xf32>
    %66 = vector.shape_cast %65 : vector<256xf32> to vector<256x1xf32>
    %67 = vector.broadcast %66 : vector<256x1xf32> to vector<256x256xf32>
    %68 = arith.subf %64, %67 : vector<256x256xf32>
    %69 = math.exp %68 : vector<256x256xf32>
    %cst_35 = arith.constant dense<0.000000e+00> : vector<256xf32>
    %70 = vector.multi_reduction <add>, %69, %cst_35 [1] : vector<256x256xf32> to vector<256xf32>
    %71 = vector.shape_cast %70 : vector<256xf32> to vector<256x1xf32>
    %72 = tpu.reciprocal %71 {approx = true} : vector<256x1xf32> -> vector<256x1xf32>
    %73 = vector.broadcast %72 : vector<256x1xf32> to vector<256x256xf32>
    %74 = arith.mulf %69, %73 : vector<256x256xf32>
    %c2_36 = arith.constant 2 : index
    %c0_37 = arith.constant 0 : index
    %c0_38 = arith.constant 0 : index
    %75 = vector.load %arg5[%c2_36, %c0_37, %c0_38] : memref<4x32x32xf32, #tpu.memory_space<vmem>>, vector<1x32x32xf32>
    %76 = vector.shape_cast %75 : vector<1x32x32xf32> to vector<32x32xf32>
    %cst_39 = arith.constant dense<0.000000e+00> : vector<256x32xf32>
    %77 = tpu.matmul %9, %76, %cst_39 {dimension_numbers = #tpu.dot_dimension_numbers<[1], [0], [0], [1], [0, 0, 1, 1], [], []>} : vector<256x32xf32>, vector<32x32xf32>, vector<256x32xf32> -> vector<256x32xf32>
    %cst_40 = arith.constant dense<0.000000e+00> : vector<256x32xf32>
    %78 = tpu.matmul %74, %77, %cst_40 {dimension_numbers = #tpu.dot_dimension_numbers<[1], [0], [0], [1], [0, 0, 1, 1], [], []>} : vector<256x256xf32>, vector<256x32xf32>, vector<256x32xf32> -> vector<256x32xf32>
    %79 = arith.addf %59, %78 : vector<256x32xf32>
    %c3 = arith.constant 3 : index
    %c0_41 = arith.constant 0 : index
    %c0_42 = arith.constant 0 : index
    %80 = vector.load %arg4[%c3, %c0_41, %c0_42] : memref<4x32x32xf32, #tpu.memory_space<vmem>>, vector<1x32x32xf32>
    %81 = vector.shape_cast %80 : vector<1x32x32xf32> to vector<32x32xf32>
    %cst_43 = arith.constant dense<0.000000e+00> : vector<256x32xf32>
    %82 = tpu.matmul %9, %81, %cst_43 {dimension_numbers = #tpu.dot_dimension_numbers<[1], [0], [0], [1], [0, 0, 1, 1], [], []>} : vector<256x32xf32>, vector<32x32xf32>, vector<256x32xf32> -> vector<256x32xf32>
    %cst_44 = arith.constant dense<0.000000e+00> : vector<256x256xf32>
    %83 = tpu.matmul %82, %9, %cst_44 {dimension_numbers = #tpu.dot_dimension_numbers<[1], [1], [0], [0], [0, 0, 1, 0], [], []>} : vector<256x32xf32>, vector<256x32xf32>, vector<256x256xf32> -> vector<256x256xf32>
    %84 = arith.addf %83, %20 : vector<256x256xf32>
    %cst_45 = arith.constant dense<0xFF800000> : vector<256xf32>
    %85 = vector.multi_reduction <maximumf>, %84, %cst_45 [1] : vector<256x256xf32> to vector<256xf32>
    %86 = vector.shape_cast %85 : vector<256xf32> to vector<256x1xf32>
    %87 = vector.broadcast %86 : vector<256x1xf32> to vector<256x256xf32>
    %88 = arith.subf %84, %87 : vector<256x256xf32>
    %89 = math.exp %88 : vector<256x256xf32>
    %cst_46 = arith.constant dense<0.000000e+00> : vector<256xf32>
    %90 = vector.multi_reduction <add>, %89, %cst_46 [1] : vector<256x256xf32> to vector<256xf32>
    %91 = vector.shape_cast %90 : vector<256xf32> to vector<256x1xf32>
    %92 = tpu.reciprocal %91 {approx = true} : vector<256x1xf32> -> vector<256x1xf32>
    %93 = vector.broadcast %92 : vector<256x1xf32> to vector<256x256xf32>
    %94 = arith.mulf %89, %93 : vector<256x256xf32>
    %c3_47 = arith.constant 3 : index
    %c0_48 = arith.constant 0 : index
    %c0_49 = arith.constant 0 : index
    %95 = vector.load %arg5[%c3_47, %c0_48, %c0_49] : memref<4x32x32xf32, #tpu.memory_space<vmem>>, vector<1x32x32xf32>
    %96 = vector.shape_cast %95 : vector<1x32x32xf32> to vector<32x32xf32>
    %cst_50 = arith.constant dense<0.000000e+00> : vector<256x32xf32>
    %97 = tpu.matmul %9, %96, %cst_50 {dimension_numbers = #tpu.dot_dimension_numbers<[1], [0], [0], [1], [0, 0, 1, 1], [], []>} : vector<256x32xf32>, vector<32x32xf32>, vector<256x32xf32> -> vector<256x32xf32>
    %cst_51 = arith.constant dense<0.000000e+00> : vector<256x32xf32>
    %98 = tpu.matmul %94, %97, %cst_51 {dimension_numbers = #tpu.dot_dimension_numbers<[1], [0], [0], [1], [0, 0, 1, 1], [], []>} : vector<256x256xf32>, vector<256x32xf32>, vector<256x32xf32> -> vector<256x32xf32>
    %99 = arith.addf %79, %98 : vector<256x32xf32>
    %c0_52 = arith.constant 0 : index
    %c0_53 = arith.constant 0 : index
    %100 = vector.load %arg6[%c0_52, %c0_53] : memref<1x32xf32, #tpu.memory_space<vmem>>, vector<1x32xf32>
    %101 = vector.broadcast %100 : vector<1x32xf32> to vector<256x32xf32>
    %102 = arith.addf %99, %101 : vector<256x32xf32>
    %cst_54 = arith.constant 0.000000e+00 : f32
    %103 = vector.broadcast %cst_54 : f32 to vector<256x32xf32>
    %104 = arith.maximumf %102, %103 : vector<256x32xf32>
    %c0_55 = arith.constant 0 : index
    %c0_56 = arith.constant 0 : index
    %105 = vector.load %arg7[%c0_55, %c0_56] : memref<32x128xf32, #tpu.memory_space<vmem>>, vector<32x128xf32>
    %cst_57 = arith.constant dense<0.000000e+00> : vector<256x128xf32>
    %106 = tpu.matmul %104, %105, %cst_57 {dimension_numbers = #tpu.dot_dimension_numbers<[1], [0], [0], [1], [0, 0, 1, 1], [], []>} : vector<256x32xf32>, vector<32x128xf32>, vector<256x128xf32> -> vector<256x128xf32>
    %c0_58 = arith.constant 0 : index
    %c0_59 = arith.constant 0 : index
    %107 = vector.load %arg8[%c0_58, %c0_59] : memref<1x128xf32, #tpu.memory_space<vmem>>, vector<1x128xf32>
    %108 = vector.broadcast %107 : vector<1x128xf32> to vector<256x128xf32>
    %109 = arith.addf %106, %108 : vector<256x128xf32>
    %c0_60 = arith.constant 0 : index
    %c0_61 = arith.constant 0 : index
    %110 = vector.load %arg9[%c0_60, %c0_61] : memref<256x128xf32, #tpu.memory_space<vmem>>, vector<256x128xf32>
    tpu.vector_store %arg9[%c0_60, %c0_61], %109 {strides = array<i32>} : memref<256x128xf32, #tpu.memory_space<vmem>>, vector<256x128xf32>,
    return
  }
  func.func @transform_0(%arg0: i32) -> (i32, i32) {
    %c0_i32 = arith.constant 0 : i32
    %c0_i32_0 = arith.constant 0 : i32
    return %arg0, %c0_i32 : i32, i32
  }
  func.func @transform_1(%arg0: i32) -> (i32, i32) {
    %c0_i32 = arith.constant 0 : i32
    %c0_i32_0 = arith.constant 0 : i32
    %c0_i32_1 = arith.constant 0 : i32
    return %c0_i32, %c0_i32_0 : i32, i32
  }
  func.func @transform_2(%arg0: i32) -> (i32, i32) {
    %c0_i32 = arith.constant 0 : i32
    %c0_i32_0 = arith.constant 0 : i32
    %c0_i32_1 = arith.constant 0 : i32
    return %c0_i32, %c0_i32_0 : i32, i32
  }
  func.func @transform_3(%arg0: i32) -> (i32, i32, i32) {
    %c0_i32 = arith.constant 0 : i32
    %c0_i32_0 = arith.constant 0 : i32
    %c0_i32_1 = arith.constant 0 : i32
    %c0_i32_2 = arith.constant 0 : i32
    return %c0_i32, %c0_i32_0, %c0_i32_1 : i32, i32, i32
  }
  func.func @transform_4(%arg0: i32) -> (i32, i32, i32) {
    %c0_i32 = arith.constant 0 : i32
    %c0_i32_0 = arith.constant 0 : i32
    %c0_i32_1 = arith.constant 0 : i32
    %c0_i32_2 = arith.constant 0 : i32
    return %c0_i32, %c0_i32_0, %c0_i32_1 : i32, i32, i32
  }
  func.func @transform_5(%arg0: i32) -> (i32, i32) {
    %c0_i32 = arith.constant 0 : i32
    %c0_i32_0 = arith.constant 0 : i32
    %c0_i32_1 = arith.constant 0 : i32
    return %c0_i32, %c0_i32_0 : i32, i32
  }
  func.func @transform_6(%arg0: i32) -> (i32, i32) {
    %c0_i32 = arith.constant 0 : i32
    %c0_i32_0 = arith.constant 0 : i32
    %c0_i32_1 = arith.constant 0 : i32
    return %c0_i32, %c0_i32_0 : i32, i32
  }
  func.func @transform_7(%arg0: i32) -> (i32, i32) {
    %c0_i32 = arith.constant 0 : i32
    %c0_i32_0 = arith.constant 0 : i32
    %c0_i32_1 = arith.constant 0 : i32
    return %c0_i32, %c0_i32_0 : i32, i32
  }
  func.func @transform_8(%arg0: i32) -> (i32, i32) {
    %c0_i32 = arith.constant 0 : i32
    %c0_i32_0 = arith.constant 0 : i32
    return %arg0, %c0_i32 : i32, i32
  }
}

</mosaic_0001>

<bundles_post_ra>
// kernel: _lambda_.1
= control target key start
LH: loop header
LB: loop body
LE: loop exit
PB: predicated region body
PF: predicated region fallthrough
CT: control target
= control target key end

     0   :  { %s11209_s27 = smov 0   ;;  %s16230_s0 = inlined_call_operand.vmem [shape: s32[512,1], index: 0, kind: input, shape index: {}]   ;;  %s16231_s1 = inlined_call_operand.vmem [shape: f32[16,32], index: 1, kind: input, shape index: {}]   ;;  %s16232_s2 = inlined_call_operand.vmem [shape: f32[256,32], index: 2, kind: input, shape index: {}]   ;;  %s16233_s3 = inlined_call_operand.vmem [shape: f32[4,32,32], index: 3, kind: input, shape index: {}]   ;;  %s16234_s4 = inlined_call_operand.vmem [shape: f32[4,32,32], index: 4, kind: input, shape index: {}]   ;;  %s16235_s5 = inlined_call_operand.vmem [shape: f32[1,32], index: 5, kind: input, shape index: {}]   ;;  %s16236_s6 = inlined_call_operand.vmem [shape: f32[32,128], index: 6, kind: input, shape index: {}]   ;;  %s16237_s7 = inlined_call_operand.vmem [shape: f32[1,128], index: 7, kind: input, shape index: {}]   ;;  %s16238_s8 = inlined_call_operand.vmem [shape: f32[512,128], index: 8, kind: output, shape index: {}]  }
   0x1 LB: > { %s7967_s28 = sadd.s32 4294967295, %s11158_s27   ;;  %p7971_p0 = scmp.ge.s32.totalorder %s11158_s27, 1  ;;  %s11158_s27 = sphi %s11209_s27, %s18_s27  }
   0x2   : > { %p263_p1 = scmp.lt.s32.totalorder %s11158_s27, 3 }
   0x4   : > { %p264_p2 = pnand %p7971_p0, %p263_p1 }
   0x6   : > { %267 = sbr.rel (%p264_p2) target bundleno = 3157 (0xc55), region = 52 }
   0xd   : > { %s7972_s29 = sshll.u32 %s7967_s28, 5  ;;  %v11160_v0 = vmov 0   ;;  %v535_v9 = vld [vmem:[%s16231_s1] sm:$0xff]  ;;  %v536_v10 = vld [vmem:[%s16231_s1 + $0x8] sm:$0xff]  ;;  %v16239_v39 = vlaneseq  ;;  %vm569_vm0 = vcmask 130048   ;;  %v11161_v43 = vmov 0.0  }
   0xe   : > { %10383 = vset.pattern.permute.xlu1 %v11160_v0  ;;  %10382 = vset.pattern.permute.xlu0 %v11160_v0  ;;  %p298_p3 = scmp.lt.s32.totalorder %s7972_s29, 63  ;;  %v9910_v11 = vpack.c.bf16 %v536_v10, %v535_v9  ;;  %v1245_v36 = vld [vmem:[%s16233_s3] sm:$0xff]  ;;  %v1246_v37 = vld [vmem:[%s16233_s3 + $0x8] sm:$0xff] }
   0xf   : > { %v9914_v38 = vpack.c.bf16 %v1246_v37, %v1245_v36  ;;  %v11272_v40 = vand.u32 127, %v16239_v39 }
  0x10   : > { %s17544_s29 = smov (!%p298_p3, %s7972_s29), 63  ;;  %9911 = vmatprep.subr.bf16.mxu0 %v9910_v11 }
  0x11   : > { %s7973_s30 = sshll.u32 %s17544_s29, 3  ;;  %9913 = vmatpush3.bf16.msra.mxu0 %v9910_v11  ;;  %9915 = vmatprep.subr.bf16.mxu1 %v9914_v38 }
  0x12   : > { %s11225_s11 = scalar_lea.vmem %s16230_s0, %s7973_s30  ;;  %9917 = vmatpush3.bf16.msra.mxu1 %v9914_v38  ;;  %s16161_s25 = scalar_lea.vmem %s16238_s8, %s7973_s30 }
  0x13   : > { %v311_v1 = vld [vmem:[%s11225_s11 + $0x10] sm:$0xff]  ;;  %v309_v2 = vld [vmem:[%s11225_s11] sm:$0xff]  ;;  %v312_v3 = vld [vmem:[%s11225_s11 + $0x18] sm:$0xff] }
  0x14   : > { %350 = vperm.xlu1 %10383, %v311_v1   ;;  %344 = vperm.xlu0 %10382, %v309_v2   ;;  %v310_v4 = vld [vmem:[%s11225_s11 + $0x8] sm:$0xff]  ;;  %v313_v6 = vld [vmem:[%s11225_s11 + $0x20] sm:$0xff]  ;;  %v316_v7 = vld [vmem:[%s11225_s11 + $0x38] sm:$0xff] }
  0x15   : > { %v314_v5 = vld [vmem:[%s11225_s11 + $0x28] sm:$0xff]  ;;  %v315_v8 = vld [vmem:[%s11225_s11 + $0x30] sm:$0xff]  ;;  %v317_v13 = vld [vmem:[%s11225_s11 + $0x40] sm:$0xff] }
  0x16   : > { %v318_v12 = vld [vmem:[%s11225_s11 + $0x48] sm:$0xff]  ;;  %v320_v14 = vld [vmem:[%s11225_s11 + $0x58] sm:$0xff]  ;;  %v319_v15 = vld [vmem:[%s11225_s11 + $0x50] sm:$0xff] }
  0x17   : > { %v322_v16 = vld [vmem:[%s11225_s11 + $0x68] sm:$0xff]  ;;  %v321_v17 = vld [vmem:[%s11225_s11 + $0x60] sm:$0xff]  ;;  %v324_v18 = vld [vmem:[%s11225_s11 + $0x78] sm:$0xff] }
  0x18   : > { %353 = vperm.xlu1 %10383, %v312_v3   ;;  %347 = vperm.xlu0 %10382, %v310_v4   ;;  %v323_v19 = vld [vmem:[%s11225_s11 + $0x70] sm:$0xff]  ;;  %v326_v20 = vld [vmem:[%s11225_s11 + $0x88] sm:$0xff]  ;;  %v325_v21 = vld [vmem:[%s11225_s11 + $0x80] sm:$0xff] }
  0x19   : > { %v328_v22 = vld [vmem:[%s11225_s11 + $0x98] sm:$0xff]  ;;  %v327_v23 = vld [vmem:[%s11225_s11 + $0x90] sm:$0xff]  ;;  %v330_v24 = vld [vmem:[%s11225_s11 + $0xa8] sm:$0xff] }
  0x1a   : > { %v329_v25 = vld [vmem:[%s11225_s11 + $0xa0] sm:$0xff]  ;;  %v332_v26 = vld [vmem:[%s11225_s11 + $0xb8] sm:$0xff]  ;;  %v331_v27 = vld [vmem:[%s11225_s11 + $0xb0] sm:$0xff] }
  0x1b   : > { %v334_v28 = vld [vmem:[%s11225_s11 + $0xc8] sm:$0xff]  ;;  %v333_v29 = vld [vmem:[%s11225_s11 + $0xc0] sm:$0xff]  ;;  %v336_v30 = vld [vmem:[%s11225_s11 + $0xd8] sm:$0xff] }
  0x1c   : > { %359 = vperm.xlu1 %10383, %v314_v5   ;;  %356 = vperm.xlu0 %10382, %v313_v6   ;;  %v335_v31 = vld [vmem:[%s11225_s11 + $0xd0] sm:$0xff]  ;;  %v338_v32 = vld [vmem:[%s11225_s11 + $0xe8] sm:$0xff]  ;;  %v337_v33 = vld [vmem:[%s11225_s11 + $0xe0] sm:$0xff] }
  0x1d   : > { %v340_v34 = vld [vmem:[%s11225_s11 + $0xf8] sm:$0xff]  ;;  %v339_v35 = vld [vmem:[%s11225_s11 + $0xf0] sm:$0xff] }
  0x20   : > { %365 = vperm.xlu1 %10383, %v316_v7   ;;  %362 = vperm.xlu0 %10382, %v315_v8  }
  0x24   : > { %371 = vperm.xlu1 %10383, %v318_v12   ;;  %368 = vperm.xlu0 %10382, %v317_v13  }
  0x28   : > { %377 = vperm.xlu1 %10383, %v320_v14   ;;  %374 = vperm.xlu0 %10382, %v319_v15  }
  0x2c   : > { %383 = vperm.xlu1 %10383, %v322_v16   ;;  %380 = vperm.xlu0 %10382, %v321_v17  }
  0x30   : > { %389 = vperm.xlu1 %10383, %v324_v18   ;;  %386 = vperm.xlu0 %10382, %v323_v19  }
  0x34   : > { %395 = vperm.xlu1 %10383, %v326_v20   ;;  %392 = vperm.xlu0 %10382, %v325_v21  }
  0x38   : > { %401 = vperm.xlu1 %10383, %v328_v22   ;;  %398 = vperm.xlu0 %10382, %v327_v23  }
  0x3c   : > { %407 = vperm.xlu1 %10383, %v330_v24   ;;  %404 = vperm.xlu0 %10382, %v329_v25  }
  0x40   : > { %413 = vperm.xlu1 %10383, %v332_v26   ;;  %410 = vperm.xlu0 %10382, %v331_v27  }
  0x44   : > { %419 = vperm.xlu1 %10383, %v334_v28   ;;  %416 = vperm.xlu0 %10382, %v333_v29  }
  0x48   : > { %425 = vperm.xlu1 %10383, %v336_v30   ;;  %422 = vperm.xlu0 %10382, %v335_v31  }
  0x4c   : > { %431 = vperm.xlu1 %10383, %v338_v32   ;;  %428 = vperm.xlu0 %10382, %v337_v33  }
  0x50   : > { %437 = vperm.xlu1 %10383, %v340_v34   ;;  %434 = vperm.xlu0 %10382, %v339_v35  }
  0x93   : > { %v351_v41 = vpop.permute.xlu1 %350  ;;  %v345_v42 = vpop.permute.xlu0 %344 }
  0x94   : > { %vm439_vm1 = vcmp.eq.s32.totalorder %v11272_v40, %v345_v42  ;;  %vm441_vm2 = vcmp.eq.s32.totalorder %v11272_v40, %v351_v41 }
  0x95   : > { %v7976_v44 = vsel %vm439_vm1, 1.0, %v11161_v43  ;;  %v7978_v47 = vsel %vm441_vm2, 1.0, %v11161_v43 }
  0x96   : > { %9358 = vmatprep.mubr.msk.f32.mxu0 %vm569_vm0, %v7976_v44 }
  0x97   : > { %v354_v45 = vpop.permute.xlu1 %353  ;;  %v348_v46 = vpop.permute.xlu0 %347 }
  0x98   : > { %vm440_vm3 = vcmp.eq.s32.totalorder %v11272_v40, %v348_v46  ;;  %vm442_vm4 = vcmp.eq.s32.totalorder %v11272_v40, %v354_v45  ;;  %v1247_v45 = vld [vmem:[%s16233_s3 + $0x10] sm:$0xff]  ;;  %v1248_v46 = vld [vmem:[%s16233_s3 + $0x18] sm:$0xff] }
  0x99   : > { %v7977_v48 = vsel %vm440_vm3, 1.0, %v11161_v43  ;;  %v7979_v51 = vsel %vm442_vm4, 1.0, %v11161_v43 }
  0x9a   : > { %9359 = vmatmul.mubr.msk.f32.vlgmr.msra.gmra.mrb[0].mxu0 %vm569_vm0, %v7977_v48  ;;  %v2404_v48 = vld [vmem:[%s16234_s4] sm:$0xff] }
  0x9b   : > { %v360_v49 = vpop.permute.xlu1 %359  ;;  %9361 = vmatprep.mubr.msk.f32.mxu0 %vm569_vm0, %v7978_v47  ;;  %v357_v50 = vpop.permute.xlu0 %356  ;;  %v9918_v47 = vpack.c.bf16 %v1248_v46, %v1247_v45 }
  0x9c   : > { %vm443_vm5 = vcmp.eq.s32.totalorder %v11272_v40, %v357_v50  ;;  %vm444_vm6 = vcmp.eq.s32.totalorder %v11272_v40, %v360_v49  ;;  %v537_v50 = vld [vmem:[%s16232_s2] sm:$0xff] }
  0x9d   : > { %v7980_v52 = vsel %vm443_vm5, 1.0, %v11161_v43  ;;  %v7981_v55 = vsel %vm444_vm6, 1.0, %v11161_v43  ;;  %9919 = vmatprep.subr.bf16.mxu1 %v9918_v47 }
  0x9e   : > { %9362 = vmatmul.mubr.msk.f32.gmra.mrb[2].mxu0 %vm569_vm0, %v7979_v51  ;;  %9921 = vmatpush3.bf16.msra.mxu1 %v9918_v47  ;;  %v538_v51 = vld [vmem:[%s16232_s2 + $0x8] sm:$0xff] }
  0x9f   : > { %v366_v53 = vpop.permute.xlu1 %365  ;;  %9364 = vmatprep.mubr.msk.f32.mxu0 %vm569_vm0, %v7980_v52  ;;  %v363_v54 = vpop.permute.xlu0 %362 }
  0xa0   : > { %vm445_vm7 = vcmp.eq.s32.totalorder %v11272_v40, %v363_v54  ;;  %vm446_vm8 = vcmp.eq.s32.totalorder %v11272_v40, %v366_v53  ;;  %v2406_v53 = vld [vmem:[%s16234_s4 + $0x10] sm:$0xff]  ;;  %v2407_v54 = vld [vmem:[%s16234_s4 + $0x18] sm:$0xff] }
  0xa1   : > { %v7982_v56 = vsel %vm445_vm7, 1.0, %v11161_v43  ;;  %v7983_v59 = vsel %vm446_vm8, 1.0, %v11161_v43 }
  0xa2   : > { %9365 = vmatmul.mubr.msk.f32.gmra.mrb[4].mxu0 %vm569_vm0, %v7981_v55 }
  0xa3   : > { %v372_v57 = vpop.permute.xlu1 %371  ;;  %9367 = vmatprep.mubr.msk.f32.mxu0 %vm569_vm0, %v7982_v56  ;;  %v369_v58 = vpop.permute.xlu0 %368 }
  0xa4   : > { %vm447_vm9 = vcmp.eq.s32.totalorder %v11272_v40, %v369_v58  ;;  %vm448_vm10 = vcmp.eq.s32.totalorder %v11272_v40, %v372_v57  ;;  %v539_v58 = vld [vmem:[%s16232_s2 + $0x10] sm:$0xff] }
  0xa5   : > { %v7984_v60 = vsel %vm447_vm9, 1.0, %v11161_v43  ;;  %v7985_v63 = vsel %vm448_vm10, 1.0, %v11161_v43 }
  0xa6   : > { %9368 = vmatmul.mubr.msk.f32.gmra.mrb[6].mxu0 %vm569_vm0, %v7983_v59  ;;  %v9974_v59 = vpack.c.bf16 %v2407_v54, %v2406_v53 }
  0xa7   : > { %v378_v61 = vpop.permute.xlu1 %377  ;;  %9370 = vmatprep.mubr.msk.f32.mxu0 %vm569_vm0, %v7984_v60  ;;  %v375_v62 = vpop.permute.xlu0 %374  ;;  %v540_v60 = vld [vmem:[%s16232_s2 + $0x18] sm:$0xff] }
  0xa8   : > { %vm449_vm11 = vcmp.eq.s32.totalorder %v11272_v40, %v375_v62  ;;  %vm450_vm12 = vcmp.eq.s32.totalorder %v11272_v40, %v378_v61  ;;  %v8168_v62 = vld [vmem:[%s16233_s3 + $0x20] sm:$0xff] }
  0xa9   : > { %v7986_v0 = vsel %vm449_vm11, 1.0, %v11161_v43  ;;  %v7987_v3 = vsel %vm450_vm12, 1.0, %v11161_v43 }
  0xaa   : > { %9371 = vmatmul.mubr.msk.f32.gmra.mrb[8].mxu0 %vm569_vm0, %v7985_v63  ;;  %v8169_v63 = vld [vmem:[%s16233_s3 + $0x28] sm:$0xff] }
  0xab   : > { %v384_v1 = vpop.permute.xlu1 %383  ;;  %9373 = vmatprep.mubr.msk.f32.mxu0 %vm569_vm0, %v7986_v0  ;;  %v381_v2 = vpop.permute.xlu0 %380 }
  0xac   : > { %vm451_vm13 = vcmp.eq.s32.totalorder %v11272_v40, %v381_v2  ;;  %vm452_vm14 = vcmp.eq.s32.totalorder %v11272_v40, %v384_v1 }
  0xad   : > { %v7988_v4 = vsel %vm451_vm13, 1.0, %v11161_v43  ;;  %v7989_v7 = vsel %vm452_vm14, 1.0, %v11161_v43 }
  0xae   : > { %9374 = vmatmul.mubr.msk.f32.gmra.mrb[10].mxu0 %vm569_vm0, %v7987_v3  ;;  %v541_v3 = vld [vmem:[%s16232_s2 + $0x20] sm:$0xff] }
  0xaf   : > { %v390_v5 = vpop.permute.xlu1 %389  ;;  %9376 = vmatprep.mubr.msk.f32.mxu0 %vm569_vm0, %v7988_v4  ;;  %v387_v6 = vpop.permute.xlu0 %386  ;;  %v11421_v4 = vpack.c.bf16 %v8169_v63, %v8168_v62 }
  0xb0   : > { %vm453_vm15 = vcmp.eq.s32.totalorder %v11272_v40, %v387_v6  ;;  %vm454_vm1 = vcmp.eq.s32.totalorder %v11272_v40, %v390_v5  ;;  %v542_v5 = vld [vmem:[%s16232_s2 + $0x28] sm:$0xff] }
  0xb1   : > { %v7990_v8 = vsel %vm453_vm15, 1.0, %v11161_v43  ;;  %v7991_v11 = vsel %vm454_vm1, 1.0, %v11161_v43 }
  0xb2   : > { %9377 = vmatmul.mubr.msk.f32.gmra.mrb[12].mxu0 %vm569_vm0, %v7989_v7 }
  0xb3   : > { %v396_v9 = vpop.permute.xlu1 %395  ;;  %9379 = vmatprep.mubr.msk.f32.mxu0 %vm569_vm0, %v7990_v8  ;;  %v393_v10 = vpop.permute.xlu0 %392 }
  0xb4   : > { %vm455_vm2 = vcmp.eq.s32.totalorder %v11272_v40, %v393_v10  ;;  %vm456_vm3 = vcmp.eq.s32.totalorder %v11272_v40, %v396_v9  ;;  %v543_v10 = vld [vmem:[%s16232_s2 + $0x30] sm:$0xff] }
  0xb5   : > { %v7992_v12 = vsel %vm455_vm2, 1.0, %v11161_v43  ;;  %v7993_v15 = vsel %vm456_vm3, 1.0, %v11161_v43 }
  0xb6   : > { %9380 = vmatmul.mubr.msk.f32.gmra.mrb[14].mxu0 %vm569_vm0, %v7991_v11  ;;  %v544_v11 = vld [vmem:[%s16232_s2 + $0x38] sm:$0xff] }
  0xb7   : > { %v402_v13 = vpop.permute.xlu1 %401  ;;  %9382 = vmatprep.mubr.msk.f32.mxu0 %vm569_vm0, %v7992_v12  ;;  %v399_v14 = vpop.permute.xlu0 %398 }
  0xb8   : > { %vm457_vm4 = vcmp.eq.s32.totalorder %v11272_v40, %v399_v14  ;;  %vm458_vm5 = vcmp.eq.s32.totalorder %v11272_v40, %v402_v13 }
  0xb9   : > { %v7994_v16 = vsel %vm457_vm4, 1.0, %v11161_v43  ;;  %v7995_v19 = vsel %vm458_vm5, 1.0, %v11161_v43 }
  0xba   : > { %9383 = vmatmul.mubr.msk.f32.gmra.mrb[16].mxu0 %vm569_vm0, %v7993_v15 }
  0xbb   : > { %v408_v17 = vpop.permute.xlu1 %407  ;;  %9385 = vmatprep.mubr.msk.f32.mxu0 %vm569_vm0, %v7994_v16  ;;  %v405_v18 = vpop.permute.xlu0 %404  ;;  %v545_v16 = vld [vmem:[%s16232_s2 + $0x40] sm:$0xff] }
  0xbc   : > { %vm459_vm6 = vcmp.eq.s32.totalorder %v11272_v40, %v405_v18  ;;  %vm460_vm7 = vcmp.eq.s32.totalorder %v11272_v40, %v408_v17  ;;  %v546_v17 = vld [vmem:[%s16232_s2 + $0x48] sm:$0xff] }
  0xbd   : > { %v7996_v20 = vsel %vm459_vm6, 1.0, %v11161_v43  ;;  %v7997_v23 = vsel %vm460_vm7, 1.0, %v11161_v43 }
  0xbe   : > { %9386 = vmatmul.mubr.msk.f32.gmra.mrb[18].mxu0 %vm569_vm0, %v7995_v19 }
  0xbf   : > { %v414_v21 = vpop.permute.xlu1 %413  ;;  %9388 = vmatprep.mubr.msk.f32.mxu0 %vm569_vm0, %v7996_v20  ;;  %v411_v22 = vpop.permute.xlu0 %410 }
  0xc0   : > { %vm461_vm8 = vcmp.eq.s32.totalorder %v11272_v40, %v411_v22  ;;  %vm462_vm9 = vcmp.eq.s32.totalorder %v11272_v40, %v414_v21  ;;  %v547_v22 = vld [vmem:[%s16232_s2 + $0x50] sm:$0xff] }
  0xc1   : > { %v7998_v24 = vsel %vm461_vm8, 1.0, %v11161_v43  ;;  %v7999_v27 = vsel %vm462_vm9, 1.0, %v11161_v43 }
  0xc2   : > { %9389 = vmatmul.mubr.msk.f32.gmra.mrb[20].mxu0 %vm569_vm0, %v7997_v23  ;;  %v548_v23 = vld [vmem:[%s16232_s2 + $0x58] sm:$0xff] }
  0xc3   : > { %v420_v25 = vpop.permute.xlu1 %419  ;;  %9391 = vmatprep.mubr.msk.f32.mxu0 %vm569_vm0, %v7998_v24  ;;  %v417_v26 = vpop.permute.xlu0 %416 }
  0xc4   : > { %vm463_vm10 = vcmp.eq.s32.totalorder %v11272_v40, %v417_v26  ;;  %vm464_vm11 = vcmp.eq.s32.totalorder %v11272_v40, %v420_v25 }
  0xc5   : > { %v8000_v28 = vsel %vm463_vm10, 1.0, %v11161_v43  ;;  %v8001_v31 = vsel %vm464_vm11, 1.0, %v11161_v43 }
  0xc6   : > { %9392 = vmatmul.mubr.msk.f32.gmra.mrb[22].mxu0 %vm569_vm0, %v7999_v27 }
  0xc7   : > { %v426_v29 = vpop.permute.xlu1 %425  ;;  %9394 = vmatprep.mubr.msk.f32.mxu0 %vm569_vm0, %v8000_v28  ;;  %v423_v30 = vpop.permute.xlu0 %422  ;;  %v549_v28 = vld [vmem:[%s16232_s2 + $0x60] sm:$0xff] }
  0xc8   : > { %vm465_vm12 = vcmp.eq.s32.totalorder %v11272_v40, %v423_v30  ;;  %vm466_vm13 = vcmp.eq.s32.totalorder %v11272_v40, %v426_v29  ;;  %v550_v29 = vld [vmem:[%s16232_s2 + $0x68] sm:$0xff] }
  0xc9   : > { %v8002_v32 = vsel %vm465_vm12, 1.0, %v11161_v43  ;;  %v8003_v35 = vsel %vm466_vm13, 1.0, %v11161_v43 }
  0xca   : > { %9395 = vmatmul.mubr.msk.f32.gmra.mrb[24].mxu0 %vm569_vm0, %v8001_v31 }
  0xcb   : > { %v432_v33 = vpop.permute.xlu1 %431  ;;  %9397 = vmatprep.mubr.msk.f32.mxu0 %vm569_vm0, %v8002_v32  ;;  %v429_v34 = vpop.permute.xlu0 %428 }
  0xcc   : > { %vm467_vm14 = vcmp.eq.s32.totalorder %v11272_v40, %v429_v34  ;;  %vm468_vm15 = vcmp.eq.s32.totalorder %v11272_v40, %v432_v33  ;;  %v551_v34 = vld [vmem:[%s16232_s2 + $0x70] sm:$0xff] }
  0xcd   : > { %v8004_v36 = vsel %vm467_vm14, 1.0, %v11161_v43  ;;  %v8005_v41 = vsel %vm468_vm15, 1.0, %v11161_v43 }
  0xce   : > { %9398 = vmatmul.mubr.msk.f32.gmra.mrb[26].mxu0 %vm569_vm0, %v8003_v35  ;;  %v552_v35 = vld [vmem:[%s16232_s2 + $0x78] sm:$0xff] }
  0xcf   : > { %v438_v37 = vpop.permute.xlu1 %437  ;;  %9400 = vmatprep.mubr.msk.f32.mxu0 %vm569_vm0, %v8004_v36  ;;  %v435_v38 = vpop.permute.xlu0 %434 }
  0xd0   : > { %vm469_vm1 = vcmp.eq.s32.totalorder %v11272_v40, %v435_v38  ;;  %vm470_vm2 = vcmp.eq.s32.totalorder %v11272_v40, %v438_v37 }
  0xd1   : > { %v8006_v42 = vsel %vm469_vm1, 1.0, %v11161_v43  ;;  %v8007_v44 = vsel %vm470_vm2, 1.0, %v11161_v43  ;;  %v2405_v43 = vld [vmem:[%s16234_s4 + $0x8] sm:$0xff] }
  0xd2   : > { %9401 = vmatmul.mubr.msk.f32.gmra.mrb[28].mxu0 %vm569_vm0, %v8005_v41  ;;  %v9970_v49 = vpack.c.bf16 %v2405_v43, %v2404_v48  ;;  %v554_v41 = vld [vmem:[%s16232_s2 + $0x88] sm:$0xff]  ;;  %v556_v43 = vld [vmem:[%s16232_s2 + $0x98] sm:$0xff] }
  0xd3   : > { %9403 = vmatprep.mubr.msk.f32.mxu0 %vm569_vm0, %v8006_v42 }
  0xd4   : > { %9971 = vmatprep.subr.bf16.mxu1 %v9970_v49 }
  0xd6   : > { %9404 = vmatmul.mubr.msk.f32.gmra.mrb[30].mxu0 %vm569_vm0, %v8007_v44  ;;  %vm1249_vm0 = vcmask 261120   ;;  %v553_v44 = vld [vmem:[%s16232_s2 + $0x80] sm:$0xff] }
  0xd7   : > { %vm11527_vm3 = vmpackc.low %vm1249_vm0, %vm1249_vm0 }
 0x16d   : > { %v9360_v52 = vpop.f32.mrb[0].mxu0 }
 0x16e   : > { %v732_v55 = vpop.f32.mrb[1].mxu0  ;;  %v11396_v57 = vadd.f32 %v9360_v52, %v538_v51 }
 0x16f   : > { %v11394_v56 = vadd.f32 %v732_v55, %v537_v50  ;;  %v16617_v50 = vmov 0 }
 0x170   : > { %16600 = vst [vmem:[#allocation3_spill] sm:$0xff] %v11396_v57  ;;  %v16618_v50 = vsel %vm11527_vm3, 4294967295, %v16617_v50 }
 0x171   : > { %16599 = vst [vmem:[#allocation2_spill] sm:$0xff] %v11394_v56  ;;  %v9363_v61 = vpop.f32.mrb[2].mxu0  ;;  %9414 = vmatprep.mubr.msk.f32.mxu1 %vm1249_vm0, %v11394_v56  ;;  %16619 = vst [vmem:[#allocation20_spill] sm:$0xff] %v16618_v50  ;;  %v11543_v55 = vpack.c.bf16 %v11396_v57, %v11394_v56 }
 0x172   : > { %v742_v0 = vpop.f32.mrb[3].mxu0  ;;  %9415 = vmatmul.mubr.msk.f32.vlgmr.msra.gmra.mrb[0].mxu1 %vm1249_vm0, %v11396_v57  ;;  %v11416_v2 = vadd.f32 %v9363_v61, %v540_v60  ;;  %v557_v60 = vld [vmem:[%s16232_s2 + $0xa0] sm:$0xff] }
 0x173   : > { %v11414_v1 = vadd.f32 %v742_v0, %v539_v58  ;;  %9973 = vmatpush3.bf16.msra.mxu1 %v9970_v49  ;;  %v555_v49 = vld [vmem:[%s16232_s2 + $0x90] sm:$0xff]  ;;  %16622 = vst [vmem:[#allocation23_spill] sm:$0xff] %v11543_v55 }
 0x174   : > { %16602 = vst [vmem:[#allocation5_spill] sm:$0xff] %v11416_v2  ;;  %9975 = vmatprep.subr.bf16.mxu1 %v9974_v59 }
 0x175   : > { %16601 = vst [vmem:[#allocation4_spill] sm:$0xff] %v11414_v1  ;;  %v9366_v6 = vpop.f32.mrb[4].mxu0  ;;  %9417 = vmatprep.mubr.msk.f32.mxu1 %vm1249_vm0, %v11414_v1 }
 0x176   : > { %v752_v7 = vpop.f32.mrb[5].mxu0  ;;  %9418 = vmatmul.mubr.msk.f32.gmra.mrb[2].mxu1 %vm1249_vm0, %v11416_v2  ;;  %v11432_v9 = vadd.f32 %v9366_v6, %v542_v5  ;;  %v559_v5 = vld [vmem:[%s16232_s2 + $0xb0] sm:$0xff]  ;;  %v560_v6 = vld [vmem:[%s16232_s2 + $0xb8] sm:$0xff] }
 0x177   : > { %v11430_v8 = vadd.f32 %v752_v7, %v541_v3  ;;  %9977 = vmatpush3.bf16.msra.mxu1 %v9974_v59  ;;  %v558_v59 = vld [vmem:[%s16232_s2 + $0xa8] sm:$0xff] }
 0x178   : > { %16604 = vst [vmem:[#allocation7_spill] sm:$0xff] %v11432_v9  ;;  %9979 = vmatprep.subr.bf16.mxu1 %v11421_v4 }
 0x179   : > { %16603 = vst [vmem:[#allocation6_spill] sm:$0xff] %v11430_v8  ;;  %v9369_v12 = vpop.f32.mrb[6].mxu0  ;;  %9420 = vmatprep.mubr.msk.f32.mxu1 %vm1249_vm0, %v11430_v8 }
 0x17a   : > { %v762_v13 = vpop.f32.mrb[7].mxu0  ;;  %9421 = vmatmul.mubr.msk.f32.gmra.mrb[4].mxu1 %vm1249_vm0, %v11432_v9  ;;  %v11447_v15 = vadd.f32 %v9369_v12, %v544_v11  ;;  %v11586_v11 = vpack.c.bf16 %v11416_v2, %v11414_v1 }
 0x17b   : > { %v11445_v14 = vadd.f32 %v762_v13, %v543_v10 }
 0x17c   : > { %16606 = vst [vmem:[#allocation9_spill] sm:$0xff] %v11447_v15  ;;  %16627 = vst [vmem:[#allocation28_spill] sm:$0xff] %v11586_v11 }
 0x17d   : > { %16605 = vst [vmem:[#allocation8_spill] sm:$0xff] %v11445_v14  ;;  %v9372_v18 = vpop.f32.mrb[8].mxu0  ;;  %9423 = vmatprep.mubr.msk.f32.mxu1 %vm1249_vm0, %v11445_v14 }
 0x17e   : > { %v772_v19 = vpop.f32.mrb[9].mxu0  ;;  %9424 = vmatmul.mubr.msk.f32.gmra.mrb[6].mxu1 %vm1249_vm0, %v11447_v15  ;;  %v11461_v21 = vadd.f32 %v9372_v18, %v546_v17  ;;  %v561_v17 = vld [vmem:[%s16232_s2 + $0xc0] sm:$0xff]  ;;  %v562_v18 = vld [vmem:[%s16232_s2 + $0xc8] sm:$0xff] }
 0x17f   : > { %v11459_v20 = vadd.f32 %v772_v19, %v545_v16 }
 0x180   : > { %16608 = vst [vmem:[#allocation11_spill] sm:$0xff] %v11461_v21 }
 0x181   : > { %16607 = vst [vmem:[#allocation10_spill] sm:$0xff] %v11459_v20  ;;  %v9375_v24 = vpop.f32.mrb[10].mxu0  ;;  %9426 = vmatprep.mubr.msk.f32.mxu1 %vm1249_vm0, %v11459_v20 }
 0x182   : > { %v782_v25 = vpop.f32.mrb[11].mxu0  ;;  %9427 = vmatmul.mubr.msk.f32.gmra.mrb[8].mxu1 %vm1249_vm0, %v11461_v21  ;;  %v11475_v27 = vadd.f32 %v9375_v24, %v548_v23 }
 0x183   : > { %v11473_v26 = vadd.f32 %v782_v25, %v547_v22  ;;  %v563_v25 = vld [vmem:[%s16232_s2 + $0xd0] sm:$0xff] }
 0x184   : > { %16610 = vst [vmem:[#allocation13_spill] sm:$0xff] %v11475_v27 }
 0x185   : > { %16609 = vst [vmem:[#allocation12_spill] sm:$0xff] %v11473_v26  ;;  %v9378_v30 = vpop.f32.mrb[12].mxu0  ;;  %9429 = vmatprep.mubr.msk.f32.mxu1 %vm1249_vm0, %v11473_v26 }
 0x186   : > { %v792_v31 = vpop.f32.mrb[13].mxu0  ;;  %9430 = vmatmul.mubr.msk.f32.gmra.mrb[10].mxu1 %vm1249_vm0, %v11475_v27  ;;  %v11489_v33 = vadd.f32 %v9378_v30, %v550_v29 }
 0x187   : > { %v11487_v32 = vadd.f32 %v792_v31, %v549_v28  ;;  %v564_v28 = vld [vmem:[%s16232_s2 + $0xd8] sm:$0xff]  ;;  %v11628_v31 = vpack.c.bf16 %v11432_v9, %v11430_v8 }
 0x188   : > { %16612 = vst [vmem:[#allocation15_spill] sm:$0xff] %v11489_v33 }
 0x189   : > { %16611 = vst [vmem:[#allocation14_spill] sm:$0xff] %v11487_v32  ;;  %v9381_v36 = vpop.f32.mrb[14].mxu0  ;;  %9432 = vmatprep.mubr.msk.f32.mxu1 %vm1249_vm0, %v11487_v32  ;;  %16633 = vst [vmem:[#allocation34_spill] sm:$0xff] %v11628_v31 }
 0x18a   : > { %v802_v37 = vpop.f32.mrb[15].mxu0  ;;  %9433 = vmatmul.mubr.msk.f32.gmra.mrb[12].mxu1 %vm1249_vm0, %v11489_v33  ;;  %v11506_v42 = vadd.f32 %v9381_v36, %v552_v35 }
 0x18b   : > { %v11501_v38 = vadd.f32 %v802_v37, %v551_v34  ;;  %v565_v37 = vld [vmem:[%s16232_s2 + $0xe0] sm:$0xff] }
 0x18c   : > { %16614 = vst [vmem:[#allocation17_spill] sm:$0xff] %v11506_v42 }
 0x18d   : > { %16613 = vst [vmem:[#allocation16_spill] sm:$0xff] %v11501_v38  ;;  %v9384_v45 = vpop.f32.mrb[16].mxu0  ;;  %9435 = vmatprep.mubr.msk.f32.mxu1 %vm1249_vm0, %v11501_v38 }
 0x18e   : > { %v11513_v46 = vadd.f32 %v9384_v45, %v554_v41  ;;  %v812_v47 = vpop.f32.mrb[17].mxu0  ;;  %9436 = vmatmul.mubr.msk.f32.gmra.mrb[14].mxu1 %vm1249_vm0, %v11506_v42  ;;  %v566_v41 = vld [vmem:[%s16232_s2 + $0xe8] sm:$0xff] }
 0x18f   : > { %v11517_v48 = vadd.f32 %v812_v47, %v553_v44 }
 0x190   : > { %16615 = vst [vmem:[#allocation18_spill] sm:$0xff] %v11513_v46 }
 0x191   : > { %16616 = vst [vmem:[#allocation19_spill] sm:$0xff] %v11517_v48  ;;  %v9387_v51 = vpop.f32.mrb[18].mxu0  ;;  %9438 = vmatprep.mubr.msk.f32.mxu1 %vm1249_vm0, %v11517_v48  ;;  %v11535_v52 = vpack.c.bf16 %v11513_v46, %v11517_v48 }
 0x192   : > { %v11537_v53 = vadd.f32 %v9387_v51, %v556_v43  ;;  %v822_v54 = vpop.f32.mrb[19].mxu0  ;;  %9439 = vmatmul.mubr.msk.f32.gmra.mrb[16].mxu1 %vm1249_vm0, %v11513_v46  ;;  %v568_v51 = vld [vmem:[%s16232_s2 + $0xf8] sm:$0xff] }
 0x193   : > { %16620 = vst [vmem:[#allocation21_spill] sm:$0xff] %v11535_v52  ;;  %v11545_v58 = vadd.f32 %v822_v54, %v555_v49  ;;  %9924 = vmatprep.subr.msk.bf16.mxu0 %vm11527_vm3, %v11535_v52  ;;  %v567_v49 = vld [vmem:[%s16232_s2 + $0xf0] sm:$0xff] }
 0x194   : > { %16621 = vst [vmem:[#allocation22_spill] sm:$0xff] %v11537_v53  ;;  %9927 = vmatpush3.bf16.xpose.msk.msra.mxu0 %vm11527_vm3, %v11543_v55 }
 0x195   : > { %16623 = vst [vmem:[#allocation24_spill] sm:$0xff] %v11545_v58  ;;  %v9390_v61 = vpop.f32.mrb[20].mxu0  ;;  %9441 = vmatprep.mubr.msk.f32.mxu1 %vm1249_vm0, %v11545_v58  ;;  %v11563_v62 = vpack.c.bf16 %v11537_v53, %v11545_v58 }
 0x196   : > { %v832_v63 = vpop.f32.mrb[21].mxu0  ;;  %9442 = vmatmul.mubr.msk.f32.gmra.mrb[18].mxu1 %vm1249_vm0, %v11537_v53  ;;  %v11567_v0 = vadd.f32 %v9390_v61, %v558_v59 }
 0x197   : > { %16624 = vst [vmem:[#allocation25_spill] sm:$0xff] %v11563_v62  ;;  %v11569_v3 = vadd.f32 %v832_v63, %v557_v60  ;;  %9930 = vmatprep.subr.msk.bf16.mxu0 %vm11527_vm3, %v11563_v62  ;;  %v11670_v60 = vpack.c.bf16 %v11447_v15, %v11445_v14 }
 0x198   : > { %16625 = vst [vmem:[#allocation26_spill] sm:$0xff] %v11567_v0 }
 0x199   : > { %16626 = vst [vmem:[#allocation27_spill] sm:$0xff] %v11569_v3  ;;  %v9393_v7 = vpop.f32.mrb[22].mxu0  ;;  %9444 = vmatprep.mubr.msk.f32.mxu1 %vm1249_vm0, %v11569_v3  ;;  %v11592_v13 = vpack.c.bf16 %v11567_v0, %v11569_v3  ;;  %16639 = vst [vmem:[#allocation40_spill] sm:$0xff] %v11670_v60 }
 0x19a   : > { %v842_v10 = vpop.f32.mrb[23].mxu0  ;;  %9445 = vmatmul.mubr.msk.f32.gmra.mrb[20].mxu1 %vm1249_vm0, %v11567_v0  ;;  %v11594_v16 = vadd.f32 %v9393_v7, %v560_v6  ;;  %v8170_v6 = vld [vmem:[%s16233_s3 + $0x30] sm:$0xff]  ;;  %v8171_v7 = vld [vmem:[%s16233_s3 + $0x38] sm:$0xff] }
 0x19b   : > { %v11588_v12 = vadd.f32 %v842_v10, %v559_v5  ;;  %16629 = vst [vmem:[#allocation30_spill] sm:$0xff] %v11592_v13  ;;  %v9982_v10 = vpack.c.bf16 %v8171_v7, %v8170_v6 }
 0x19c   : > { %16630 = vst [vmem:[#allocation31_spill] sm:$0xff] %v11594_v16  ;;  %9933 = vmatpush3.bf16.xpose.msk.msra.mxu0 %vm11527_vm3, %v11586_v11 }
 0x19d   : > { %16628 = vst [vmem:[#allocation29_spill] sm:$0xff] %v11588_v12  ;;  %v9396_v19 = vpop.f32.mrb[24].mxu0  ;;  %9447 = vmatprep.mubr.msk.f32.mxu1 %vm1249_vm0, %v11588_v12  ;;  %9936 = vmatprep.subr.msk.bf16.mxu0 %vm11527_vm3, %v11592_v13  ;;  %v11634_v35 = vpack.c.bf16 %v11594_v16, %v11588_v12 }
 0x19e   : > { %v852_v22 = vpop.f32.mrb[25].mxu0  ;;  %9448 = vmatmul.mubr.msk.f32.gmra.mrb[22].mxu1 %vm1249_vm0, %v11594_v16  ;;  %v11614_v24 = vadd.f32 %v9396_v19, %v562_v18  ;;  %v8269_v18 = vld [vmem:[%s16234_s4 + $0x28] sm:$0xff]  ;;  %v11708_v19 = vpack.c.bf16 %v11461_v21, %v11459_v20 }
 0x19f   : > { %v11612_v23 = vadd.f32 %v852_v22, %v561_v17  ;;  %16635 = vst [vmem:[#allocation36_spill] sm:$0xff] %v11634_v35  ;;  %v8268_v17 = vld [vmem:[%s16234_s4 + $0x20] sm:$0xff] }
 0x1a0   : > { %16632 = vst [vmem:[#allocation33_spill] sm:$0xff] %v11614_v24  ;;  %16643 = vst [vmem:[#allocation44_spill] sm:$0xff] %v11708_v19 }
 0x1a1   : > { %16631 = vst [vmem:[#allocation32_spill] sm:$0xff] %v11612_v23  ;;  %v9399_v29 = vpop.f32.mrb[26].mxu0  ;;  %9450 = vmatprep.mubr.msk.f32.mxu1 %vm1249_vm0, %v11612_v23  ;;  %v11676_v63 = vpack.c.bf16 %v11614_v24, %v11612_v23 }
 0x1a2   : > { %v862_v30 = vpop.f32.mrb[27].mxu0  ;;  %9451 = vmatmul.mubr.msk.f32.gmra.mrb[24].mxu1 %vm1249_vm0, %v11614_v24  ;;  %v11636_v36 = vadd.f32 %v9399_v29, %v564_v28  ;;  %v11753_v29 = vpack.c.bf16 %v11489_v33, %v11487_v32 }
 0x1a3   : > { %v11630_v34 = vadd.f32 %v862_v30, %v563_v25  ;;  %16641 = vst [vmem:[#allocation42_spill] sm:$0xff] %v11676_v63  ;;  %v10034_v25 = vpack.c.bf16 %v8269_v18, %v8268_v17 }
 0x1a4   : > { %16636 = vst [vmem:[#allocation37_spill] sm:$0xff] %v11636_v36  ;;  %9939 = vmatpush3.bf16.xpose.msk.msra.mxu0 %vm11527_vm3, %v11628_v31  ;;  %16647 = vst [vmem:[#allocation48_spill] sm:$0xff] %v11753_v29 }
 0x1a5   : > { %16634 = vst [vmem:[#allocation35_spill] sm:$0xff] %v11630_v34  ;;  %v9402_v44 = vpop.f32.mrb[28].mxu0  ;;  %9453 = vmatprep.mubr.msk.f32.mxu1 %vm1249_vm0, %v11630_v34  ;;  %9942 = vmatprep.subr.msk.bf16.mxu0 %vm11527_vm3, %v11634_v35  ;;  %v11715_v22 = vpack.c.bf16 %v11636_v36, %v11630_v34 }
 0x1a6   : > { %v872_v45 = vpop.f32.mrb[29].mxu0  ;;  %9454 = vmatmul.mubr.msk.f32.gmra.mrb[26].mxu1 %vm1249_vm0, %v11636_v36  ;;  %v11656_v43 = vadd.f32 %v9402_v44, %v566_v41  ;;  %v8270_v41 = vld [vmem:[%s16234_s4 + $0x30] sm:$0xff]  ;;  %v8271_v44 = vld [vmem:[%s16234_s4 + $0x38] sm:$0xff] }
 0x1a7   : > { %v11654_v47 = vadd.f32 %v872_v45, %v565_v37  ;;  %16644 = vst [vmem:[#allocation45_spill] sm:$0xff] %v11715_v22  ;;  %v11775_v37 = vpack.c.bf16 %v11506_v42, %v11501_v38  ;;  %v10038_v45 = vpack.c.bf16 %v8271_v44, %v8270_v41 }
 0x1a8   : > { %16638 = vst [vmem:[#allocation39_spill] sm:$0xff] %v11656_v43 }
 0x1a9   : > { %16637 = vst [vmem:[#allocation38_spill] sm:$0xff] %v11654_v47  ;;  %v9405_v54 = vpop.f32.mrb[30].mxu0  ;;  %9456 = vmatprep.mubr.msk.f32.mxu1 %vm1249_vm0, %v11654_v47  ;;  %v11737_v28 = vpack.c.bf16 %v11656_v43, %v11654_v47  ;;  %16649 = vst [vmem:[#allocation50_spill] sm:$0xff] %v11775_v37 }
 0x1aa   : > { %v882_v59 = vpop.f32.mrb[31].mxu0  ;;  %9457 = vmatmul.mubr.msk.f32.gmra.mrb[28].mxu1 %vm1249_vm0, %v11656_v43  ;;  %v11678_v5 = vadd.f32 %v9405_v54, %v568_v51  ;;  %v16240_v54 = vmov 0.0|0.0  }
 0x1ab   : > { %v11672_v61 = vadd.f32 %v882_v59, %v567_v49  ;;  %16646 = vst [vmem:[#allocation47_spill] sm:$0xff] %v11737_v28 }
 0x1ac   : > { %16642 = vst [vmem:[#allocation43_spill] sm:$0xff] %v11678_v5  ;;  %9945 = vmatpush3.bf16.xpose.msk.msra.mxu0 %vm11527_vm3, %v11670_v60 }
 0x1ad   : > { %16640 = vst [vmem:[#allocation41_spill] sm:$0xff] %v11672_v61  ;;  %9459 = vmatprep.mubr.msk.f32.mxu1 %vm1249_vm0, %v11672_v61  ;;  %9948 = vmatprep.subr.msk.bf16.mxu0 %vm11527_vm3, %v11676_v63  ;;  %v11759_v30 = vpack.c.bf16 %v11678_v5, %v11672_v61 }
 0x1ae   : > { %9460 = vmatmul.mubr.msk.f32.gmra.mrb[30].mxu1 %vm1249_vm0, %v11678_v5 }
 0x1af   : > { %9470 = vmatprep.mubr.msk.f32.mxu1 %vm1249_vm0, %v11394_v56  ;;  %16648 = vst [vmem:[#allocation49_spill] sm:$0xff] %v11759_v30 }
 0x1b2   : > { %9471 = vmatmul.mubr.msk.f32.vlgmr.msra.gmra.mrb[32].mxu1 %vm1249_vm0, %v11396_v57 }
 0x1b3   : > { %9473 = vmatprep.mubr.msk.f32.mxu1 %vm1249_vm0, %v11414_v1  ;;  %9981 = vmatpush3.bf16.msra.mxu1 %v11421_v4  ;;  %v11731_v4 = vpack.c.bf16 %v11475_v27, %v11473_v26 }
 0x1b4   : > { %9951 = vmatpush3.bf16.xpose.msk.msra.mxu0 %vm11527_vm3, %v11708_v19  ;;  %9983 = vmatprep.subr.bf16.mxu1 %v9982_v10 }
 0x1b5   : > { %9954 = vmatprep.subr.msk.bf16.mxu0 %vm11527_vm3, %v11715_v22  ;;  %16645 = vst [vmem:[#allocation46_spill] sm:$0xff] %v11731_v4 }
 0x1b6   : > { %9474 = vmatmul.mubr.msk.f32.gmra.mrb[34].mxu1 %vm1249_vm0, %v11416_v2 }
 0x1b7   : > { %9476 = vmatprep.mubr.msk.f32.mxu1 %vm1249_vm0, %v11430_v8  ;;  %9985 = vmatpush3.bf16.msra.mxu1 %v9982_v10 }
 0x1b8   : > { %10035 = vmatprep.subr.bf16.mxu1 %v10034_v25 }
 0x1ba   : > { %9477 = vmatmul.mubr.msk.f32.gmra.mrb[36].mxu1 %vm1249_vm0, %v11432_v9 }
 0x1bb   : > { %9479 = vmatprep.mubr.msk.f32.mxu1 %vm1249_vm0, %v11445_v14 }
 0x1bc   : > { %9957 = vmatpush3.bf16.xpose.msk.msra.mxu0 %vm11527_vm3, %v11731_v4 }
 0x1bd   : > { %9960 = vmatprep.subr.msk.bf16.mxu0 %vm11527_vm3, %v11737_v28 }
 0x1be   : > { %9480 = vmatmul.mubr.msk.f32.gmra.mrb[38].mxu1 %vm1249_vm0, %v11447_v15 }
 0x1bf   : > { %9482 = vmatprep.mubr.msk.f32.mxu1 %vm1249_vm0, %v11459_v20 }
 0x1c2   : > { %9483 = vmatmul.mubr.msk.f32.gmra.mrb[40].mxu1 %vm1249_vm0, %v11461_v21 }
 0x1c3   : > { %9485 = vmatprep.mubr.msk.f32.mxu1 %vm1249_vm0, %v11473_v26 }
 0x1c4   : > { %9963 = vmatpush3.bf16.xpose.msk.msra.mxu0 %vm11527_vm3, %v11753_v29 }
 0x1c5   : > { %9966 = vmatprep.subr.msk.bf16.mxu0 %vm11527_vm3, %v11759_v30 }
 0x1c6   : > { %9486 = vmatmul.mubr.msk.f32.gmra.mrb[42].mxu1 %vm1249_vm0, %v11475_v27 }
 0x1c7   : > { %9488 = vmatprep.mubr.msk.f32.mxu1 %vm1249_vm0, %v11487_v32 }
 0x1ca   : > { %9489 = vmatmul.mubr.msk.f32.gmra.mrb[44].mxu1 %vm1249_vm0, %v11489_v33 }
 0x1cb   : > { %9491 = vmatprep.mubr.msk.f32.mxu1 %vm1249_vm0, %v11501_v38 }
 0x1cc   : > { %9969 = vmatpush3.bf16.xpose.msk.msra.mxu0 %vm11527_vm3, %v11775_v37 }
 0x1cd   : > { %9988 = vmatprep.subr.msk.bf16.mxu0 %vm11527_vm3, %v11535_v52 }
 0x1ce   : > { %9492 = vmatmul.mubr.msk.f32.gmra.mrb[46].mxu1 %vm1249_vm0, %v11506_v42 }
 0x1cf   : > { %9494 = vmatprep.mubr.msk.f32.mxu1 %vm1249_vm0, %v11517_v48 }
 0x1d2   : > { %9495 = vmatmul.mubr.msk.f32.gmra.mrb[48].mxu1 %vm1249_vm0, %v11513_v46 }
 0x1d3   : > { %9497 = vmatprep.mubr.msk.f32.mxu1 %vm1249_vm0, %v11545_v58 }
 0x1d6   : > { %9498 = vmatmul.mubr.msk.f32.gmra.mrb[50].mxu1 %vm1249_vm0, %v11537_v53 }
 0x1d7   : > { %9500 = vmatprep.mubr.msk.f32.mxu1 %vm1249_vm0, %v11569_v3 }
 0x1da   : > { %9501 = vmatmul.mubr.msk.f32.gmra.mrb[52].mxu1 %vm1249_vm0, %v11567_v0 }
 0x1db   : > { %9503 = vmatprep.mubr.msk.f32.mxu1 %vm1249_vm0, %v11588_v12 }
 0x1de   : > { %9504 = vmatmul.mubr.msk.f32.gmra.mrb[54].mxu1 %vm1249_vm0, %v11594_v16 }
 0x1df   : > { %9506 = vmatprep.mubr.msk.f32.mxu1 %vm1249_vm0, %v11612_v23 }
 0x1e2   : > { %9507 = vmatmul.mubr.msk.f32.gmra.mrb[56].mxu1 %vm1249_vm0, %v11614_v24 }
 0x1e3   : > { %9509 = vmatprep.mubr.msk.f32.mxu1 %vm1249_vm0, %v11630_v34 }
 0x1e6   : > { %9510 = vmatmul.mubr.msk.f32.gmra.mrb[58].mxu1 %vm1249_vm0, %v11636_v36 }
 0x1e7   : > { %9512 = vmatprep.mubr.msk.f32.mxu1 %vm1249_vm0, %v11654_v47 }
 0x1ea   : > { %9513 = vmatmul.mubr.msk.f32.gmra.mrb[60].mxu1 %vm1249_vm0, %v11656_v43 }
 0x1eb   : > { %9515 = vmatprep.mubr.msk.f32.mxu1 %vm1249_vm0, %v11672_v61 }
 0x1ee   : > { %9516 = vmatmul.mubr.msk.f32.gmra.mrb[62].mxu1 %vm1249_vm0, %v11678_v5 }
 0x1ef   : > { %9526 = vmatprep.mubr.msk.f32.mxu1 %vm1249_vm0, %v11394_v56 }
 0x1f2   : > { %9527 = vmatmul.mubr.msk.f32.vlgmr.msra.gmra.mrb[64].mxu1 %vm1249_vm0, %v11396_v57 }
 0x1f3   : > { %9529 = vmatprep.mubr.msk.f32.mxu1 %vm1249_vm0, %v11414_v1  ;;  %10037 = vmatpush3.bf16.msra.mxu1 %v10034_v25 }
 0x1f4   : > { %10039 = vmatprep.subr.bf16.mxu1 %v10038_v45 }
 0x1f6   : > { %9530 = vmatmul.mubr.msk.f32.gmra.mrb[66].mxu1 %vm1249_vm0, %v11416_v2 }
 0x1f7   : > { %9532 = vmatprep.mubr.msk.f32.mxu1 %vm1249_vm0, %v11430_v8  ;;  %10041 = vmatpush3.bf16.msra.mxu1 %v10038_v45 }
 0x1f8   : > { %10042 = vmatprep.subr.bf16.mxu1 %v16240_v54 }
 0x1fa   : > { %9533 = vmatmul.mubr.msk.f32.gmra.mrb[68].mxu1 %vm1249_vm0, %v11432_v9 }
 0x1fb   : > { %9535 = vmatprep.mubr.msk.f32.mxu1 %vm1249_vm0, %v11445_v14 }
 0x1fe   : > { %9536 = vmatmul.mubr.msk.f32.gmra.mrb[70].mxu1 %vm1249_vm0, %v11447_v15 }
 0x1ff   : > { %9538 = vmatprep.mubr.msk.f32.mxu1 %vm1249_vm0, %v11459_v20 }
 0x202   : > { %9539 = vmatmul.mubr.msk.f32.gmra.mrb[72].mxu1 %vm1249_vm0, %v11461_v21 }
 0x203   : > { %9541 = vmatprep.mubr.msk.f32.mxu1 %vm1249_vm0, %v11473_v26 }
 0x206   : > { %9542 = vmatmul.mubr.msk.f32.gmra.mrb[74].mxu1 %vm1249_vm0, %v11475_v27 }
 0x207   : > { %9544 = vmatprep.mubr.msk.f32.mxu1 %vm1249_vm0, %v11487_v32 }
 0x20a   : > { %9545 = vmatmul.mubr.msk.f32.gmra.mrb[76].mxu1 %vm1249_vm0, %v11489_v33 }
 0x20b   : > { %9547 = vmatprep.mubr.msk.f32.mxu1 %vm1249_vm0, %v11501_v38 }
 0x20e   : > { %9548 = vmatmul.mubr.msk.f32.gmra.mrb[78].mxu1 %vm1249_vm0, %v11506_v42 }
 0x20f   : > { %9550 = vmatprep.mubr.msk.f32.mxu1 %vm1249_vm0, %v11517_v48 }
 0x212   : > { %9551 = vmatmul.mubr.msk.f32.gmra.mrb[80].mxu1 %vm1249_vm0, %v11513_v46 }
 0x213   : > { %9553 = vmatprep.mubr.msk.f32.mxu1 %vm1249_vm0, %v11545_v58 }
 0x216   : > { %9554 = vmatmul.mubr.msk.f32.gmra.mrb[82].mxu1 %vm1249_vm0, %v11537_v53 }
 0x217   : > { %9556 = vmatprep.mubr.msk.f32.mxu1 %vm1249_vm0, %v11569_v3 }
 0x21a   : > { %9557 = vmatmul.mubr.msk.f32.gmra.mrb[84].mxu1 %vm1249_vm0, %v11567_v0 }
 0x21b   : > { %9559 = vmatprep.mubr.msk.f32.mxu1 %vm1249_vm0, %v11588_v12 }
 0x21e   : > { %9560 = vmatmul.mubr.msk.f32.gmra.mrb[86].mxu1 %vm1249_vm0, %v11594_v16 }
 0x21f   : > { %9562 = vmatprep.mubr.msk.f32.mxu1 %vm1249_vm0, %v11612_v23 }
 0x222   : > { %9563 = vmatmul.mubr.msk.f32.gmra.mrb[88].mxu1 %vm1249_vm0, %v11614_v24 }
 0x223   : > { %9565 = vmatprep.mubr.msk.f32.mxu1 %vm1249_vm0, %v11630_v34 }
 0x226   : > { %9566 = vmatmul.mubr.msk.f32.gmra.mrb[90].mxu1 %vm1249_vm0, %v11636_v36 }
 0x227   : > { %9568 = vmatprep.mubr.msk.f32.mxu1 %vm1249_vm0, %v11654_v47 }
 0x22a   : > { %9569 = vmatmul.mubr.msk.f32.gmra.mrb[92].mxu1 %vm1249_vm0, %v11656_v43 }
 0x22b   : > { %9571 = vmatprep.mubr.msk.f32.mxu1 %vm1249_vm0, %v11672_v61 }
 0x22e   : > { %9572 = vmatmul.mubr.msk.f32.gmra.mrb[94].mxu1 %vm1249_vm0, %v11678_v5 }
 0x22f   : > { %9582 = vmatprep.mubr.msk.f32.mxu1 %vm1249_vm0, %v11394_v56 }
 0x232   : > { %9583 = vmatmul.mubr.msk.f32.vlgmr.msra.gmra.mrb[96].mxu1 %vm1249_vm0, %v11396_v57 }
 0x233   : > { %9585 = vmatprep.mubr.msk.f32.mxu1 %vm1249_vm0, %v11414_v1 }
 0x236   : > { %9586 = vmatmul.mubr.msk.f32.gmra.mrb[98].mxu1 %vm1249_vm0, %v11416_v2 }
 0x237   : > { %9588 = vmatprep.mubr.msk.f32.mxu1 %vm1249_vm0, %v11430_v8 }
 0x23a   : > { %9589 = vmatmul.mubr.msk.f32.gmra.mrb[100].mxu1 %vm1249_vm0, %v11432_v9  ;;  %v16723_v9 = vlaneseq }
 0x23b   : > { %9591 = vmatprep.mubr.msk.f32.mxu1 %vm1249_vm0, %v11445_v14 }
 0x23e   : > { %9592 = vmatmul.mubr.msk.f32.gmra.mrb[102].mxu1 %vm1249_vm0, %v11447_v15 }
 0x23f   : > { %9594 = vmatprep.mubr.msk.f32.mxu1 %vm1249_vm0, %v11459_v20 }
 0x242   : > { %9595 = vmatmul.mubr.msk.f32.gmra.mrb[104].mxu1 %vm1249_vm0, %v11461_v21 }
 0x243   : > { %9597 = vmatprep.mubr.msk.f32.mxu1 %vm1249_vm0, %v11473_v26 }
 0x245   : > { %v9416_v49 = vpop.f32.mrb[0].mxu1 }
 0x246   : > { %v1412_v51 = vpop.f32.mrb[1].mxu1  ;;  %9598 = vmatmul.mubr.msk.f32.gmra.mrb[106].mxu1 %vm1249_vm0, %v11475_v27 }
 0x247   : > { %8714 = vmatprep.mubr.msk.f32.mxu0 %vm1249_vm0, %v1412_v51  ;;  %9600 = vmatprep.mubr.msk.f32.mxu1 %vm1249_vm0, %v11487_v32 }
 0x248   : > { %8715 = vmatmul.mubr.msk.f32.vlgmr.msra.gmra.mrb[32].mxu0 %vm1249_vm0, %v1412_v51 }
 0x249   : > { %9991 = vmatpush3.bf16.xpose.msk.msra.mxu0 %vm11527_vm3, %v11543_v55  ;;  %v9419_v59 = vpop.f32.mrb[2].mxu1  ;;  %8716 = vmatprep.mubr.msk.f32.mxu0 %vm1249_vm0, %v9416_v49 }
 0x24a   : > { %9994 = vmatprep.subr.msk.bf16.mxu0 %vm11527_vm3, %v11563_v62  ;;  %v1422_v6 = vpop.f32.mrb[3].mxu1  ;;  %9601 = vmatmul.mubr.msk.f32.gmra.mrb[108].mxu1 %vm1249_vm0, %v11489_v33 }
 0x24b   : > { %9603 = vmatprep.mubr.msk.f32.mxu1 %vm1249_vm0, %v11501_v38 }
 0x24c   : > { %8717 = vmatmul.mubr.msk.f32.gmra.mrb[34].mxu0 %vm1249_vm0, %v9416_v49 }
 0x24d   : > { %v9422_v7 = vpop.f32.mrb[4].mxu1  ;;  %8718 = vmatprep.mubr.msk.f32.mxu0 %vm1249_vm0, %v1422_v6 }
 0x24e   : > { %v1432_v10 = vpop.f32.mrb[5].mxu1  ;;  %9604 = vmatmul.mubr.msk.f32.gmra.mrb[110].mxu1 %vm1249_vm0, %v11506_v42 }
 0x24f   : > { %9606 = vmatprep.mubr.msk.f32.mxu1 %vm1249_vm0, %v11517_v48 }
 0x250   : > { %8719 = vmatmul.mubr.msk.f32.gmra.mrb[36].mxu0 %vm1249_vm0, %v1422_v6 }
 0x251   : > { %9997 = vmatpush3.bf16.xpose.msk.msra.mxu0 %vm11527_vm3, %v11586_v11  ;;  %v9425_v17 = vpop.f32.mrb[6].mxu1  ;;  %8720 = vmatprep.mubr.msk.f32.mxu0 %vm1249_vm0, %v9419_v59 }
 0x252   : > { %10000 = vmatprep.subr.msk.bf16.mxu0 %vm11527_vm3, %v11592_v13  ;;  %v1442_v18 = vpop.f32.mrb[7].mxu1  ;;  %9607 = vmatmul.mubr.msk.f32.gmra.mrb[112].mxu1 %vm1249_vm0, %v11513_v46 }
 0x253   : > { %9609 = vmatprep.mubr.msk.f32.mxu1 %vm1249_vm0, %v11545_v58 }
 0x254   : > { %8721 = vmatmul.mubr.msk.f32.gmra.mrb[38].mxu0 %vm1249_vm0, %v9419_v59 }
 0x255   : > { %v9428_v25 = vpop.f32.mrb[8].mxu1  ;;  %8722 = vmatprep.mubr.msk.f32.mxu0 %vm1249_vm0, %v1432_v10 }
 0x256   : > { %v1452_v41 = vpop.f32.mrb[9].mxu1  ;;  %9610 = vmatmul.mubr.msk.f32.gmra.mrb[114].mxu1 %vm1249_vm0, %v11537_v53 }
 0x257   : > { %9612 = vmatprep.mubr.msk.f32.mxu1 %vm1249_vm0, %v11569_v3 }
 0x258   : > { %8723 = vmatmul.mubr.msk.f32.gmra.mrb[40].mxu0 %vm1249_vm0, %v1432_v10 }
 0x259   : > { %10003 = vmatpush3.bf16.xpose.msk.msra.mxu0 %vm11527_vm3, %v11628_v31  ;;  %v9431_v44 = vpop.f32.mrb[10].mxu1  ;;  %8724 = vmatprep.mubr.msk.f32.mxu0 %vm1249_vm0, %v9422_v7 }
 0x25a   : > { %10006 = vmatprep.subr.msk.bf16.mxu0 %vm11527_vm3, %v11634_v35  ;;  %v1462_v45 = vpop.f32.mrb[11].mxu1  ;;  %9613 = vmatmul.mubr.msk.f32.gmra.mrb[116].mxu1 %vm1249_vm0, %v11567_v0 }
 0x25b   : > { %9615 = vmatprep.mubr.msk.f32.mxu1 %vm1249_vm0, %v11588_v12 }
 0x25c   : > { %8725 = vmatmul.mubr.msk.f32.gmra.mrb[42].mxu0 %vm1249_vm0, %v9422_v7 }
 0x25d   : > { %v9434_v49 = vpop.f32.mrb[12].mxu1  ;;  %8726 = vmatprep.mubr.msk.f32.mxu0 %vm1249_vm0, %v1442_v18 }
 0x25e   : > { %v1472_v51 = vpop.f32.mrb[13].mxu1  ;;  %9616 = vmatmul.mubr.msk.f32.gmra.mrb[118].mxu1 %vm1249_vm0, %v11594_v16 }
 0x25f   : > { %9618 = vmatprep.mubr.msk.f32.mxu1 %vm1249_vm0, %v11612_v23 }
 0x260   : > { %8727 = vmatmul.mubr.msk.f32.gmra.mrb[44].mxu0 %vm1249_vm0, %v1442_v18 }
 0x261   : > { %10009 = vmatpush3.bf16.xpose.msk.msra.mxu0 %vm11527_vm3, %v11670_v60  ;;  %v9437_v59 = vpop.f32.mrb[14].mxu1  ;;  %8728 = vmatprep.mubr.msk.f32.mxu0 %vm1249_vm0, %v9425_v17 }
 0x262   : > { %10012 = vmatprep.subr.msk.bf16.mxu0 %vm11527_vm3, %v11676_v63  ;;  %v1482_v6 = vpop.f32.mrb[15].mxu1  ;;  %9619 = vmatmul.mubr.msk.f32.gmra.mrb[120].mxu1 %vm1249_vm0, %v11614_v24 }
 0x263   : > { %9621 = vmatprep.mubr.msk.f32.mxu1 %vm1249_vm0, %v11630_v34 }
 0x264   : > { %8729 = vmatmul.mubr.msk.f32.gmra.mrb[46].mxu0 %vm1249_vm0, %v9425_v17 }
 0x265   : > { %v9440_v7 = vpop.f32.mrb[16].mxu1  ;;  %8730 = vmatprep.mubr.msk.f32.mxu0 %vm1249_vm0, %v1452_v41 }
 0x266   : > { %v1492_v10 = vpop.f32.mrb[17].mxu1  ;;  %9622 = vmatmul.mubr.msk.f32.gmra.mrb[122].mxu1 %vm1249_vm0, %v11636_v36 }
 0x267   : > { %9624 = vmatprep.mubr.msk.f32.mxu1 %vm1249_vm0, %v11654_v47 }
 0x268   : > { %8731 = vmatmul.mubr.msk.f32.gmra.mrb[48].mxu0 %vm1249_vm0, %v1452_v41 }
 0x269   : > { %10015 = vmatpush3.bf16.xpose.msk.msra.mxu0 %vm11527_vm3, %v11708_v19  ;;  %v9443_v18 = vpop.f32.mrb[18].mxu1  ;;  %8732 = vmatprep.mubr.msk.f32.mxu0 %vm1249_vm0, %v9428_v25  ;;  %v16650_v19 = vmov 0.0|0.0  }
 0x26a   : > { %10018 = vmatprep.subr.msk.bf16.mxu0 %vm11527_vm3, %v11715_v22  ;;  %v1502_v17 = vpop.f32.mrb[19].mxu1  ;;  %9625 = vmatmul.mubr.msk.f32.gmra.mrb[124].mxu1 %vm1249_vm0, %v11656_v43 }
 0x26b   : > { %9627 = vmatprep.mubr.msk.f32.mxu1 %vm1249_vm0, %v11672_v61 }
 0x26c   : > { %8733 = vmatmul.mubr.msk.f32.gmra.mrb[50].mxu0 %vm1249_vm0, %v9428_v25 }
 0x26d   : > { %v9446_v41 = vpop.f32.mrb[20].mxu1  ;;  %8734 = vmatprep.mubr.msk.f32.mxu0 %vm1249_vm0, %v1462_v45 }
 0x26e   : > { %v1512_v39 = vpop.f32.mrb[21].mxu1  ;;  %9628 = vmatmul.mubr.msk.f32.gmra.mrb[126].mxu1 %vm1249_vm0, %v11678_v5 }
 0x270   : > { %8735 = vmatmul.mubr.msk.f32.gmra.mrb[52].mxu0 %vm1249_vm0, %v1462_v45 }
 0x271   : > { %10021 = vmatpush3.bf16.xpose.msk.msra.mxu0 %vm11527_vm3, %v11731_v4  ;;  %v12009_v54 = vpop.f32.mrb[22].mxu1  ;;  %8736 = vmatprep.mubr.msk.f32.mxu0 %vm1249_vm0, %v9431_v44 }
 0x272   : > { %10024 = vmatprep.subr.msk.bf16.mxu0 %vm11527_vm3, %v11737_v28  ;;  %v1522_v25 = vpop.f32.mrb[23].mxu1 }
 0x274   : > { %8737 = vmatmul.mubr.msk.f32.gmra.mrb[54].mxu0 %vm1249_vm0, %v9431_v44 }
 0x275   : > { %v12016_v22 = vpop.f32.mrb[24].mxu1  ;;  %8738 = vmatprep.mubr.msk.f32.mxu0 %vm1249_vm0, %v1472_v51 }
 0x276   : > { %v1532_v45 = vpop.f32.mrb[25].mxu1 }
 0x278   : > { %8739 = vmatmul.mubr.msk.f32.gmra.mrb[56].mxu0 %vm1249_vm0, %v1472_v51 }
 0x279   : > { %10027 = vmatpush3.bf16.xpose.msk.msra.mxu0 %vm11527_vm3, %v11753_v29  ;;  %v12023_v4 = vpop.f32.mrb[26].mxu1  ;;  %8740 = vmatprep.mubr.msk.f32.mxu0 %vm1249_vm0, %v9434_v49 }
 0x27a   : > { %10030 = vmatprep.subr.msk.bf16.mxu0 %vm11527_vm3, %v11759_v30  ;;  %v12029_v44 = vpop.f32.mrb[27].mxu1 }
 0x27c   : > { %8741 = vmatmul.mubr.msk.f32.gmra.mrb[58].mxu0 %vm1249_vm0, %v9434_v49 }
 0x27d   : > { %v12032_v28 = vpop.f32.mrb[28].mxu1  ;;  %8742 = vmatprep.mubr.msk.f32.mxu0 %vm1249_vm0, %v1482_v6 }
 0x27e   : > { %v12035_v51 = vpop.f32.mrb[29].mxu1 }
 0x280   : > { %8743 = vmatmul.mubr.msk.f32.gmra.mrb[60].mxu0 %vm1249_vm0, %v1482_v6 }
 0x281   : > { %10033 = vmatpush3.bf16.xpose.msk.msra.mxu0 %vm11527_vm3, %v11775_v37  ;;  %v12041_v29 = vpop.f32.mrb[30].mxu1  ;;  %8744 = vmatprep.mubr.msk.f32.mxu0 %vm1249_vm0, %v9437_v59 }
 0x282   : > { %v12044_v30 = vpop.f32.mrb[31].mxu1  ;;  %10090 = vmatprep.subr.bf16.mxu0 %v16650_v19 }
 0x284   : > { %8745 = vmatmul.mubr.msk.f32.gmra.mrb[62].mxu0 %vm1249_vm0, %v9437_v59 }
 0x285   : > { %8746 = vmatprep.mubr.msk.f32.mxu0 %vm1249_vm0, %v1492_v10  ;;  %v12049_v49 = vpop.f32.mrb[32].mxu1 }
 0x286   : > { %v12051_v63 = vpop.f32.mrb[33].mxu1 }
 0x288   : > { %8747 = vmatmul.mubr.msk.f32.gmra.mrb[64].mxu0 %vm1249_vm0, %v1492_v10 }
 0x289   : > { %8748 = vmatprep.mubr.msk.f32.mxu0 %vm1249_vm0, %v9440_v7  ;;  %v12057_v37 = vpop.f32.mrb[34].mxu1 }
 0x28a   : > { %v12059_v60 = vpop.f32.mrb[35].mxu1 }
 0x28c   : > { %8749 = vmatmul.mubr.msk.f32.gmra.mrb[66].mxu0 %vm1249_vm0, %v9440_v7 }
 0x28d   : > { %8750 = vmatprep.mubr.msk.f32.mxu0 %vm1249_vm0, %v1502_v17  ;;  %v12065_v35 = vpop.f32.mrb[36].mxu1 }
 0x28e   : > { %v12067_v31 = vpop.f32.mrb[37].mxu1 }
 0x290   : > { %8751 = vmatmul.mubr.msk.f32.gmra.mrb[68].mxu0 %vm1249_vm0, %v1502_v17 }
 0x291   : > { %8752 = vmatprep.mubr.msk.f32.mxu0 %vm1249_vm0, %v9443_v18  ;;  %v12073_v6 = vpop.f32.mrb[38].mxu1 }
 0x292   : > { %v12075_v13 = vpop.f32.mrb[39].mxu1 }
 0x294   : > { %8753 = vmatmul.mubr.msk.f32.gmra.mrb[70].mxu0 %vm1249_vm0, %v9443_v18 }
 0x295   : > { %8754 = vmatprep.mubr.msk.f32.mxu0 %vm1249_vm0, %v1512_v39  ;;  %v12081_v59 = vpop.f32.mrb[40].mxu1 }
 0x296   : > { %v12083_v11 = vpop.f32.mrb[41].mxu1 }
 0x298   : > { %8755 = vmatmul.mubr.msk.f32.gmra.mrb[72].mxu0 %vm1249_vm0, %v1512_v39 }
 0x299   : > { %8756 = vmatprep.mubr.msk.f32.mxu0 %vm1249_vm0, %v9446_v41  ;;  %v12089_v10 = vpop.f32.mrb[42].mxu1 }
 0x29a   : > { %v12091_v62 = vpop.f32.mrb[43].mxu1 }
 0x29c   : > { %8757 = vmatmul.mubr.msk.f32.gmra.mrb[74].mxu0 %vm1249_vm0, %v9446_v41 }
 0x29d   : > { %8758 = vmatprep.mubr.msk.f32.mxu0 %vm1249_vm0, %v1522_v25  ;;  %v12097_v7 = vpop.f32.mrb[44].mxu1 }
 0x29e   : > { %v12099_v55 = vpop.f32.mrb[45].mxu1 }
 0x2a0   : > { %8759 = vmatmul.mubr.msk.f32.gmra.mrb[76].mxu0 %vm1249_vm0, %v1522_v25 }
 0x2a1   : > { %8760 = vmatprep.mubr.msk.f32.mxu0 %vm1249_vm0, %v12009_v54  ;;  %v12106_v17 = vpop.f32.mrb[46].mxu1 }
 0x2a2   : > { %v12108_v5 = vpop.f32.mrb[47].mxu1 }
 0x2a4   : > { %8761 = vmatmul.mubr.msk.f32.gmra.mrb[78].mxu0 %vm1249_vm0, %v12009_v54 }
 0x2a5   : > { %8762 = vmatprep.mubr.msk.f32.mxu0 %vm1249_vm0, %v1532_v45  ;;  %v12115_v18 = vpop.f32.mrb[48].mxu1 }
 0x2a6   : > { %v12117_v39 = vpop.f32.mrb[49].mxu1 }
 0x2a8   : > { %8763 = vmatmul.mubr.msk.f32.gmra.mrb[80].mxu0 %vm1249_vm0, %v1532_v45 }
 0x2a9   : > { %8764 = vmatprep.mubr.msk.f32.mxu0 %vm1249_vm0, %v12016_v22  ;;  %v12124_v61 = vpop.f32.mrb[50].mxu1 }
 0x2aa   : > { %v12126_v41 = vpop.f32.mrb[51].mxu1 }
 0x2ac   : > { %8765 = vmatmul.mubr.msk.f32.gmra.mrb[82].mxu0 %vm1249_vm0, %v12016_v22 }
 0x2ad   : > { %8766 = vmatprep.mubr.msk.f32.mxu0 %vm1249_vm0, %v12029_v44  ;;  %v12134_v43 = vpop.f32.mrb[52].mxu1 }
 0x2ae   : > { %v12136_v25 = vpop.f32.mrb[53].mxu1 }
 0x2b0   : > { %8767 = vmatmul.mubr.msk.f32.gmra.mrb[84].mxu0 %vm1249_vm0, %v12029_v44 }
 0x2b1   : > { %8768 = vmatprep.mubr.msk.f32.mxu0 %vm1249_vm0, %v12023_v4  ;;  %v12144_v54 = vpop.f32.mrb[54].mxu1 }
 0x2b2   : > { %v12146_v47 = vpop.f32.mrb[55].mxu1 }
 0x2b4   : > { %8769 = vmatmul.mubr.msk.f32.gmra.mrb[86].mxu0 %vm1249_vm0, %v12023_v4 }
 0x2b5   : > { %8770 = vmatprep.mubr.msk.f32.mxu0 %vm1249_vm0, %v12035_v51  ;;  %v12154_v45 = vpop.f32.mrb[56].mxu1 }
 0x2b6   : > { %v12156_v36 = vpop.f32.mrb[57].mxu1 }
 0x2b8   : > { %8771 = vmatmul.mubr.msk.f32.gmra.mrb[88].mxu0 %vm1249_vm0, %v12035_v51 }
 0x2b9   : > { %8772 = vmatprep.mubr.msk.f32.mxu0 %vm1249_vm0, %v12032_v28  ;;  %v12164_v22 = vpop.f32.mrb[58].mxu1 }
 0x2ba   : > { %v12166_v34 = vpop.f32.mrb[59].mxu1 }
 0x2bc   : > { %8773 = vmatmul.mubr.msk.f32.gmra.mrb[90].mxu0 %vm1249_vm0, %v12032_v28 }
 0x2bd   : > { %8774 = vmatprep.mubr.msk.f32.mxu0 %vm1249_vm0, %v12044_v30  ;;  %v12174_v44 = vpop.f32.mrb[60].mxu1 }
 0x2be   : > { %v12176_v24 = vpop.f32.mrb[61].mxu1 }
 0x2c0   : > { %8775 = vmatmul.mubr.msk.f32.gmra.mrb[92].mxu0 %vm1249_vm0, %v12044_v30  ;;  %v16651_v30 = vpack.c.bf16 %v12049_v49, %v12051_v63  ;;  %v16653_v63 = vpack.c.bf16 %v12065_v35, %v12067_v31  ;;  %v16655_v31 = vpack.c.bf16 %v12081_v59, %v12083_v11  ;;  %v16657_v11 = vpack.c.bf16 %v12097_v7, %v12099_v55 }
 0x2c1   : > { %8776 = vmatprep.mubr.msk.f32.mxu0 %vm1249_vm0, %v12041_v29  ;;  %v12184_v4 = vpop.f32.mrb[62].mxu1  ;;  %v16659_v55 = vpack.c.bf16 %v12115_v18, %v12117_v39  ;;  %v16661_v18 = vpack.c.bf16 %v12134_v43, %v12136_v25  ;;  %v16663_v25 = vpack.c.bf16 %v12154_v45, %v12156_v36  ;;  %v16665_v45 = vpack.c.bf16 %v12174_v44, %v12176_v24 }
 0x2c2   : > { %v12186_v23 = vpop.f32.mrb[63].mxu1 }
 0x2c4   : > { %8777 = vmatmul.mubr.msk.f32.gmra.mrb[94].mxu0 %vm1249_vm0, %v12041_v29  ;;  %v16652_v29 = vpack.c.bf16 %v12057_v37, %v12059_v60  ;;  %v16654_v60 = vpack.c.bf16 %v12073_v6, %v12075_v13  ;;  %v16656_v13 = vpack.c.bf16 %v12089_v10, %v12091_v62  ;;  %v16658_v62 = vpack.c.bf16 %v12106_v17, %v12108_v5 }
 0x2c5   : > { %v9528_v16 = vpop.f32.mrb[64].mxu1  ;;  %v16660_v5 = vpack.c.bf16 %v12124_v61, %v12126_v41  ;;  %v16662_v41 = vpack.c.bf16 %v12144_v54, %v12146_v47  ;;  %v16664_v54 = vpack.c.bf16 %v12164_v22, %v12166_v34  ;;  %v16666_v22 = vpack.c.bf16 %v12184_v4, %v12186_v23 }
 0x2c6   : > { %v2704_v12 = vpop.f32.mrb[65].mxu1 }
 0x2c7   : > { %8882 = vmatprep.mubr.msk.f32.mxu0 %vm1249_vm0, %v2704_v12 }
 0x2c8   : > { %8883 = vmatmul.mubr.msk.f32.vlgmr.msra.gmra.mrb[96].mxu0 %vm1249_vm0, %v2704_v12 }
 0x2c9   : > { %10092 = vmatpush1.bf16.msra.mxu0 %v16651_v30  ;;  %v9531_v51 = vpop.f32.mrb[66].mxu1  ;;  %8884 = vmatprep.mubr.msk.f32.mxu0 %vm1249_vm0, %v9528_v16 }
 0x2ca   : > { %v2714_v0 = vpop.f32.mrb[67].mxu1  ;;  %10093 = vmatprep.subr.bf16.mxu0 %v16650_v19 }
 0x2cc   : > { %8885 = vmatmul.mubr.msk.f32.gmra.mrb[98].mxu0 %vm1249_vm0, %v9528_v16 }
 0x2cd   : > { %10095 = vmatpush1.bf16.msra.mxu0 %v16652_v29  ;;  %v9534_v28 = vpop.f32.mrb[68].mxu1  ;;  %8886 = vmatprep.mubr.msk.f32.mxu0 %vm1249_vm0, %v2714_v0 }
 0x2ce   : > { %v2724_v12 = vpop.f32.mrb[69].mxu1  ;;  %10096 = vmatprep.subr.bf16.mxu0 %v16650_v19 }
 0x2d0   : > { %8887 = vmatmul.mubr.msk.f32.gmra.mrb[100].mxu0 %vm1249_vm0, %v2714_v0 }
 0x2d1   : > { %10098 = vmatpush1.bf16.msra.mxu0 %v16653_v63  ;;  %v9537_v49 = vpop.f32.mrb[70].mxu1  ;;  %8888 = vmatprep.mubr.msk.f32.mxu0 %vm1249_vm0, %v9531_v51 }
 0x2d2   : > { %v2734_v16 = vpop.f32.mrb[71].mxu1  ;;  %10099 = vmatprep.subr.bf16.mxu0 %v16650_v19 }
 0x2d4   : > { %8889 = vmatmul.mubr.msk.f32.gmra.mrb[102].mxu0 %vm1249_vm0, %v9531_v51 }
 0x2d5   : > { %10101 = vmatpush1.bf16.msra.mxu0 %v16654_v60  ;;  %v9540_v37 = vpop.f32.mrb[72].mxu1  ;;  %8890 = vmatprep.mubr.msk.f32.mxu0 %vm1249_vm0, %v2724_v12 }
 0x2d6   : > { %v2744_v0 = vpop.f32.mrb[73].mxu1  ;;  %10102 = vmatprep.subr.bf16.mxu0 %v16650_v19 }
 0x2d8   : > { %8891 = vmatmul.mubr.msk.f32.gmra.mrb[104].mxu0 %vm1249_vm0, %v2724_v12 }
 0x2d9   : > { %10104 = vmatpush1.bf16.msra.mxu0 %v16655_v31  ;;  %v9543_v35 = vpop.f32.mrb[74].mxu1  ;;  %8892 = vmatprep.mubr.msk.f32.mxu0 %vm1249_vm0, %v9534_v28 }
 0x2da   : > { %v2754_v51 = vpop.f32.mrb[75].mxu1  ;;  %10105 = vmatprep.subr.bf16.mxu0 %v16650_v19 }
 0x2dc   : > { %8893 = vmatmul.mubr.msk.f32.gmra.mrb[106].mxu0 %vm1249_vm0, %v9534_v28 }
 0x2dd   : > { %10107 = vmatpush1.bf16.msra.mxu0 %v16656_v13  ;;  %v9546_v6 = vpop.f32.mrb[76].mxu1  ;;  %8894 = vmatprep.mubr.msk.f32.mxu0 %vm1249_vm0, %v2734_v16 }
 0x2de   : > { %v2764_v30 = vpop.f32.mrb[77].mxu1  ;;  %10108 = vmatprep.subr.bf16.mxu0 %v16650_v19 }
 0x2e0   : > { %8895 = vmatmul.mubr.msk.f32.gmra.mrb[108].mxu0 %vm1249_vm0, %v2734_v16 }
 0x2e1   : > { %10110 = vmatpush1.bf16.msra.mxu0 %v16657_v11  ;;  %v9549_v59 = vpop.f32.mrb[78].mxu1  ;;  %8896 = vmatprep.mubr.msk.f32.mxu0 %vm1249_vm0, %v9537_v49 }
 0x2e2   : > { %v2774_v28 = vpop.f32.mrb[79].mxu1  ;;  %10111 = vmatprep.subr.bf16.mxu0 %v16650_v19 }
 0x2e4   : > { %8897 = vmatmul.mubr.msk.f32.gmra.mrb[110].mxu0 %vm1249_vm0, %v9537_v49 }
 0x2e5   : > { %10113 = vmatpush1.bf16.msra.mxu0 %v16658_v62  ;;  %v9552_v10 = vpop.f32.mrb[80].mxu1  ;;  %8898 = vmatprep.mubr.msk.f32.mxu0 %vm1249_vm0, %v2744_v0 }
 0x2e6   : > { %v2784_v29 = vpop.f32.mrb[81].mxu1  ;;  %10114 = vmatprep.subr.bf16.mxu0 %v16650_v19 }
 0x2e8   : > { %8899 = vmatmul.mubr.msk.f32.gmra.mrb[112].mxu0 %vm1249_vm0, %v2744_v0 }
 0x2e9   : > { %10116 = vmatpush1.bf16.msra.mxu0 %v16659_v55  ;;  %v12245_v7 = vpop.f32.mrb[82].mxu1  ;;  %8900 = vmatprep.mubr.msk.f32.mxu0 %vm1249_vm0, %v9540_v37 }
 0x2ea   : > { %v2794_v12 = vpop.f32.mrb[83].mxu1  ;;  %10117 = vmatprep.subr.bf16.mxu0 %v16650_v19 }
 0x2ec   : > { %8901 = vmatmul.mubr.msk.f32.gmra.mrb[114].mxu0 %vm1249_vm0, %v9540_v37 }
 0x2ed   : > { %10119 = vmatpush1.bf16.msra.mxu0 %v16660_v5  ;;  %v12253_v17 = vpop.f32.mrb[84].mxu1  ;;  %8902 = vmatprep.mubr.msk.f32.mxu0 %vm1249_vm0, %v2754_v51 }
 0x2ee   : > { %v12256_v63 = vpop.f32.mrb[85].mxu1  ;;  %10120 = vmatprep.subr.bf16.mxu0 %v16650_v19 }
 0x2f0   : > { %8903 = vmatmul.mubr.msk.f32.gmra.mrb[116].mxu0 %vm1249_vm0, %v2754_v51 }
 0x2f1   : > { %10122 = vmatpush1.bf16.msra.mxu0 %v16661_v18  ;;  %v12263_v39 = vpop.f32.mrb[86].mxu1  ;;  %8904 = vmatprep.mubr.msk.f32.mxu0 %vm1249_vm0, %v9543_v35 }
 0x2f2   : > { %v12266_v61 = vpop.f32.mrb[87].mxu1  ;;  %10123 = vmatprep.subr.bf16.mxu0 %v16650_v19 }
 0x2f4   : > { %8905 = vmatmul.mubr.msk.f32.gmra.mrb[118].mxu0 %vm1249_vm0, %v9543_v35 }
 0x2f5   : > { %10125 = vmatpush1.bf16.msra.mxu0 %v16662_v41  ;;  %v12273_v49 = vpop.f32.mrb[88].mxu1  ;;  %8906 = vmatprep.mubr.msk.f32.mxu0 %vm1249_vm0, %v2764_v30 }
 0x2f6   : > { %v12276_v43 = vpop.f32.mrb[89].mxu1  ;;  %10126 = vmatprep.subr.bf16.mxu0 %v16650_v19 }
 0x2f8   : > { %8907 = vmatmul.mubr.msk.f32.gmra.mrb[120].mxu0 %vm1249_vm0, %v2764_v30 }
 0x2f9   : > { %10128 = vmatpush1.bf16.msra.mxu0 %v16663_v25  ;;  %v12283_v16 = vpop.f32.mrb[90].mxu1  ;;  %8908 = vmatprep.mubr.msk.f32.mxu0 %vm1249_vm0, %v9546_v6 }
 0x2fa   : > { %v12286_v47 = vpop.f32.mrb[91].mxu1  ;;  %10129 = vmatprep.subr.bf16.mxu0 %v16650_v19 }
 0x2fc   : > { %8909 = vmatmul.mubr.msk.f32.gmra.mrb[122].mxu0 %vm1249_vm0, %v9546_v6 }
 0x2fd   : > { %10131 = vmatpush1.bf16.msra.mxu0 %v16664_v54  ;;  %v12293_v60 = vpop.f32.mrb[92].mxu1  ;;  %8910 = vmatprep.mubr.msk.f32.mxu0 %vm1249_vm0, %v2774_v28 }
 0x2fe   : > { %v12296_v36 = vpop.f32.mrb[93].mxu1  ;;  %10132 = vmatprep.subr.bf16.mxu0 %v16650_v19 }
 0x300   : > { %8911 = vmatmul.mubr.msk.f32.gmra.mrb[124].mxu0 %vm1249_vm0, %v2774_v28 }
 0x301   : > { %10134 = vmatpush1.bf16.msra.mxu0 %v16665_v45  ;;  %v12303_v37 = vpop.f32.mrb[94].mxu1  ;;  %8912 = vmatprep.mubr.msk.f32.mxu0 %vm1249_vm0, %v9549_v59 }
 0x302   : > { %v12306_v34 = vpop.f32.mrb[95].mxu1  ;;  %10135 = vmatprep.subr.bf16.mxu0 %v16650_v19 }
 0x304   : > { %8913 = vmatmul.mubr.msk.f32.gmra.mrb[126].mxu0 %vm1249_vm0, %v9549_v59 }
 0x305   : > { %10137 = vmatpush1.bf16.msra.mxu0 %v16666_v22  ;;  %8914 = vmatprep.mubr.msk.f32.mxu0 %vm1249_vm0, %v2784_v29  ;;  %v9584_v0 = vpop.f32.mrb[96].mxu1 }
 0x306   : > { %10148 = vmatprep.subr.msk.bf16.mxu0 %vm11527_vm3, %v11535_v52  ;;  %v3767_v24 = vpop.f32.mrb[97].mxu1 }
 0x307   : > { %v10043_v44 = vpack.c.bf16 %v9584_v0, %v3767_v24 }
 0x308   : > { %8915 = vmatmul.mubr.msk.f32.gmra.mrb[128].mxu0 %vm1249_vm0, %v2784_v29 }
 0x309   : > { %8916 = vmatprep.mubr.msk.f32.mxu0 %vm1249_vm0, %v9552_v10  ;;  %v9587_v31 = vpop.f32.mrb[98].mxu1  ;;  %10044 = vmatpush1.bf16.msra.mxu1 %v10043_v44 }
 0x30a   : > { %v3777_v35 = vpop.f32.mrb[99].mxu1  ;;  %10045 = vmatprep.subr.bf16.mxu1 %v16650_v19 }
 0x30b   : > { %v10046_v23 = vpack.c.bf16 %v9587_v31, %v3777_v35 }
 0x30c   : > { %8917 = vmatmul.mubr.msk.f32.gmra.mrb[130].mxu0 %vm1249_vm0, %v9552_v10 }
 0x30d   : > { %8918 = vmatprep.mubr.msk.f32.mxu0 %vm1249_vm0, %v2794_v12  ;;  %v9590_v4 = vpop.f32.mrb[100].mxu1  ;;  %10047 = vmatpush1.bf16.msra.mxu1 %v10046_v23 }
 0x30e   : > { %v3787_v51 = vpop.f32.mrb[101].mxu1  ;;  %10048 = vmatprep.subr.bf16.mxu1 %v16650_v19 }
 0x30f   : > { %v10049_v13 = vpack.c.bf16 %v9590_v4, %v3787_v51 }
 0x310   : > { %8919 = vmatmul.mubr.msk.f32.gmra.mrb[132].mxu0 %vm1249_vm0, %v2794_v12 }
 0x311   : > { %8920 = vmatprep.mubr.msk.f32.mxu0 %vm1249_vm0, %v12245_v7  ;;  %v9593_v6 = vpop.f32.mrb[102].mxu1  ;;  %10050 = vmatpush1.bf16.msra.mxu1 %v10049_v13 }
 0x312   : > { %v3797_v30 = vpop.f32.mrb[103].mxu1  ;;  %10051 = vmatprep.subr.bf16.mxu1 %v16650_v19 }
 0x313   : > { %v10052_v11 = vpack.c.bf16 %v9593_v6, %v3797_v30 }
 0x314   : > { %8921 = vmatmul.mubr.msk.f32.gmra.mrb[134].mxu0 %vm1249_vm0, %v12245_v7 }
 0x315   : > { %8922 = vmatprep.mubr.msk.f32.mxu0 %vm1249_vm0, %v12256_v63  ;;  %v9596_v59 = vpop.f32.mrb[104].mxu1  ;;  %10053 = vmatpush1.bf16.msra.mxu1 %v10052_v11 }
 0x316   : > { %v3807_v28 = vpop.f32.mrb[105].mxu1  ;;  %10054 = vmatprep.subr.bf16.mxu1 %v16650_v19 }
 0x317   : > { %v10055_v62 = vpack.c.bf16 %v9596_v59, %v3807_v28 }
 0x318   : > { %8923 = vmatmul.mubr.msk.f32.gmra.mrb[136].mxu0 %vm1249_vm0, %v12256_v63 }
 0x319   : > { %8924 = vmatprep.mubr.msk.f32.mxu0 %vm1249_vm0, %v12253_v17  ;;  %v9599_v10 = vpop.f32.mrb[106].mxu1  ;;  %10056 = vmatpush1.bf16.msra.mxu1 %v10055_v62 }
 0x31a   : > { %v3817_v29 = vpop.f32.mrb[107].mxu1  ;;  %10057 = vmatprep.subr.bf16.mxu1 %v16650_v19 }
 0x31b   : > { %v10058_v55 = vpack.c.bf16 %v9599_v10, %v3817_v29  ;;  %v12337_v7 = vpop.f32.mrb[32].mxu0 }
 0x31c   : > { %16667 = vst [vmem:[#allocation51_spill] sm:$0xff] %v12337_v7  ;;  %v12339_v12 = vpop.f32.mrb[33].mxu0  ;;  %8925 = vmatmul.mubr.msk.f32.gmra.mrb[138].mxu0 %vm1249_vm0, %v12253_v17 }
 0x31d   : > { %16668 = vst [vmem:[#allocation52_spill] sm:$0xff] %v12339_v12  ;;  %8926 = vmatprep.mubr.msk.f32.mxu0 %vm1249_vm0, %v12266_v61  ;;  %v9602_v5 = vpop.f32.mrb[108].mxu1  ;;  %10059 = vmatpush1.bf16.msra.mxu1 %v10058_v55 }
 0x31e   : > { %v3827_v63 = vpop.f32.mrb[109].mxu1  ;;  %10060 = vmatprep.subr.bf16.mxu1 %v16650_v19 }
 0x31f   : > { %v10061_v18 = vpack.c.bf16 %v9602_v5, %v3827_v63  ;;  %v12346_v41 = vpop.f32.mrb[34].mxu0 }
 0x320   : > { %16669 = vst [vmem:[#allocation53_spill] sm:$0xff] %v12346_v41  ;;  %v12348_v25 = vpop.f32.mrb[35].mxu0  ;;  %8927 = vmatmul.mubr.msk.f32.gmra.mrb[140].mxu0 %vm1249_vm0, %v12266_v61 }
 0x321   : > { %16670 = vst [vmem:[#allocation54_spill] sm:$0xff] %v12348_v25  ;;  %8928 = vmatprep.mubr.msk.f32.mxu0 %vm1249_vm0, %v12263_v39  ;;  %v9605_v17 = vpop.f32.mrb[110].mxu1  ;;  %10062 = vmatpush1.bf16.msra.mxu1 %v10061_v18 }
 0x322   : > { %v3837_v54 = vpop.f32.mrb[111].mxu1  ;;  %10063 = vmatprep.subr.bf16.mxu1 %v16650_v19 }
 0x323   : > { %v10064_v45 = vpack.c.bf16 %v9605_v17, %v3837_v54  ;;  %v12355_v22 = vpop.f32.mrb[36].mxu0 }
 0x324   : > { %16671 = vst [vmem:[#allocation55_spill] sm:$0xff] %v12355_v22  ;;  %v12357_v0 = vpop.f32.mrb[37].mxu0  ;;  %8929 = vmatmul.mubr.msk.f32.gmra.mrb[142].mxu0 %vm1249_vm0, %v12263_v39 }
 0x325   : > { %16672 = vst [vmem:[#allocation56_spill] sm:$0xff] %v12357_v0  ;;  %8930 = vmatprep.mubr.msk.f32.mxu0 %vm1249_vm0, %v12276_v43  ;;  %v9608_v61 = vpop.f32.mrb[112].mxu1  ;;  %10065 = vmatpush1.bf16.msra.mxu1 %v10064_v45 }
 0x326   : > { %v3847_v24 = vpop.f32.mrb[113].mxu1  ;;  %10066 = vmatprep.subr.bf16.mxu1 %v16650_v19 }
 0x327   : > { %v10067_v44 = vpack.c.bf16 %v9608_v61, %v3847_v24  ;;  %v12364_v31 = vpop.f32.mrb[38].mxu0 }
 0x328   : > { %16673 = vst [vmem:[#allocation57_spill] sm:$0xff] %v12364_v31  ;;  %v12366_v35 = vpop.f32.mrb[39].mxu0  ;;  %8931 = vmatmul.mubr.msk.f32.gmra.mrb[144].mxu0 %vm1249_vm0, %v12276_v43 }
 0x329   : > { %16674 = vst [vmem:[#allocation58_spill] sm:$0xff] %v12366_v35  ;;  %8932 = vmatprep.mubr.msk.f32.mxu0 %vm1249_vm0, %v12273_v49  ;;  %v9611_v39 = vpop.f32.mrb[114].mxu1  ;;  %10068 = vmatpush1.bf16.msra.mxu1 %v10067_v44 }
 0x32a   : > { %v3857_v23 = vpop.f32.mrb[115].mxu1  ;;  %10069 = vmatprep.subr.bf16.mxu1 %v16650_v19 }
 0x32b   : > { %v10070_v4 = vpack.c.bf16 %v9611_v39, %v3857_v23  ;;  %v12373_v51 = vpop.f32.mrb[40].mxu0 }
 0x32c   : > { %16675 = vst [vmem:[#allocation59_spill] sm:$0xff] %v12373_v51  ;;  %v12375_v13 = vpop.f32.mrb[41].mxu0  ;;  %8933 = vmatmul.mubr.msk.f32.gmra.mrb[146].mxu0 %vm1249_vm0, %v12273_v49 }
 0x32d   : > { %16676 = vst [vmem:[#allocation60_spill] sm:$0xff] %v12375_v13  ;;  %8934 = vmatprep.mubr.msk.f32.mxu0 %vm1249_vm0, %v12286_v47  ;;  %v9614_v43 = vpop.f32.mrb[116].mxu1  ;;  %10071 = vmatpush1.bf16.msra.mxu1 %v10070_v4 }
 0x32e   : > { %v3867_v6 = vpop.f32.mrb[117].mxu1  ;;  %10072 = vmatprep.subr.bf16.mxu1 %v16650_v19 }
 0x32f   : > { %v10073_v30 = vpack.c.bf16 %v9614_v43, %v3867_v6  ;;  %v12382_v11 = vpop.f32.mrb[42].mxu0 }
 0x330   : > { %16677 = vst [vmem:[#allocation61_spill] sm:$0xff] %v12382_v11  ;;  %v12384_v59 = vpop.f32.mrb[43].mxu0  ;;  %8935 = vmatmul.mubr.msk.f32.gmra.mrb[148].mxu0 %vm1249_vm0, %v12286_v47 }
 0x331   : > { %16678 = vst [vmem:[#allocation62_spill] sm:$0xff] %v12384_v59  ;;  %8936 = vmatprep.mubr.msk.f32.mxu0 %vm1249_vm0, %v12283_v16  ;;  %v9617_v49 = vpop.f32.mrb[118].mxu1  ;;  %10074 = vmatpush1.bf16.msra.mxu1 %v10073_v30 }
 0x332   : > { %v3877_v28 = vpop.f32.mrb[119].mxu1  ;;  %10075 = vmatprep.subr.bf16.mxu1 %v16650_v19 }
 0x333   : > { %v10076_v62 = vpack.c.bf16 %v9617_v49, %v3877_v28  ;;  %v12391_v10 = vpop.f32.mrb[44].mxu0 }
 0x334   : > { %16679 = vst [vmem:[#allocation63_spill] sm:$0xff] %v12391_v10  ;;  %v12393_v29 = vpop.f32.mrb[45].mxu0  ;;  %8937 = vmatmul.mubr.msk.f32.gmra.mrb[150].mxu0 %vm1249_vm0, %v12283_v16 }
 0x335   : > { %16680 = vst [vmem:[#allocation64_spill] sm:$0xff] %v12393_v29  ;;  %8938 = vmatprep.mubr.msk.f32.mxu0 %vm1249_vm0, %v12296_v36  ;;  %v9620_v47 = vpop.f32.mrb[120].mxu1  ;;  %10077 = vmatpush1.bf16.msra.mxu1 %v10076_v62 }
 0x336   : > { %v3887_v55 = vpop.f32.mrb[121].mxu1  ;;  %10078 = vmatprep.subr.bf16.mxu1 %v16650_v19 }
 0x337   : > { %v10079_v5 = vpack.c.bf16 %v9620_v47, %v3887_v55  ;;  %v12400_v63 = vpop.f32.mrb[46].mxu0 }
 0x338   : > { %16681 = vst [vmem:[#allocation65_spill] sm:$0xff] %v12400_v63  ;;  %v12402_v18 = vpop.f32.mrb[47].mxu0  ;;  %8939 = vmatmul.mubr.msk.f32.gmra.mrb[152].mxu0 %vm1249_vm0, %v12296_v36 }
 0x339   : > { %16682 = vst [vmem:[#allocation66_spill] sm:$0xff] %v12402_v18  ;;  %8940 = vmatprep.mubr.msk.f32.mxu0 %vm1249_vm0, %v12293_v60  ;;  %v9623_v16 = vpop.f32.mrb[122].mxu1  ;;  %10080 = vmatpush1.bf16.msra.mxu1 %v10079_v5 }
 0x33a   : > { %v3897_v17 = vpop.f32.mrb[123].mxu1  ;;  %10081 = vmatprep.subr.bf16.mxu1 %v16650_v19 }
 0x33b   : > { %v10082_v54 = vpack.c.bf16 %v9623_v16, %v3897_v17  ;;  %v12409_v45 = vpop.f32.mrb[48].mxu0 }
 0x33c   : > { %16683 = vst [vmem:[#allocation67_spill] sm:$0xff] %v12409_v45  ;;  %v12411_v61 = vpop.f32.mrb[49].mxu0  ;;  %8941 = vmatmul.mubr.msk.f32.gmra.mrb[154].mxu0 %vm1249_vm0, %v12293_v60 }
 0x33d   : > { %16684 = vst [vmem:[#allocation68_spill] sm:$0xff] %v12411_v61  ;;  %8942 = vmatprep.mubr.msk.f32.mxu0 %vm1249_vm0, %v12306_v34  ;;  %v9626_v36 = vpop.f32.mrb[124].mxu1  ;;  %10083 = vmatpush1.bf16.msra.mxu1 %v10082_v54 }
 0x33e   : > { %v3907_v24 = vpop.f32.mrb[125].mxu1  ;;  %10084 = vmatprep.subr.bf16.mxu1 %v16650_v19 }
 0x33f   : > { %v10085_v44 = vpack.c.bf16 %v9626_v36, %v3907_v24  ;;  %v12418_v39 = vpop.f32.mrb[50].mxu0 }
 0x340   : > { %16685 = vst [vmem:[#allocation69_spill] sm:$0xff] %v12418_v39  ;;  %v12420_v23 = vpop.f32.mrb[51].mxu0  ;;  %8943 = vmatmul.mubr.msk.f32.gmra.mrb[156].mxu0 %vm1249_vm0, %v12306_v34 }
 0x341   : > { %16686 = vst [vmem:[#allocation70_spill] sm:$0xff] %v12420_v23  ;;  %8944 = vmatprep.mubr.msk.f32.mxu0 %vm1249_vm0, %v12303_v37  ;;  %v9629_v60 = vpop.f32.mrb[126].mxu1  ;;  %10086 = vmatpush1.bf16.msra.mxu1 %v10085_v44 }
 0x342   : > { %v3917_v4 = vpop.f32.mrb[127].mxu1  ;;  %10087 = vmatprep.subr.bf16.mxu1 %v16650_v19  ;;  %v12502_v19 = vshrl.u32 %v16723_v9, 7 }
 0x343   : > { %v10088_v43 = vpack.c.bf16 %v9629_v60, %v3917_v4  ;;  %v12427_v6 = vpop.f32.mrb[52].mxu0 }
 0x344   : > { %16687 = vst [vmem:[#allocation71_spill] sm:$0xff] %v12427_v6  ;;  %v12429_v30 = vpop.f32.mrb[53].mxu0  ;;  %8945 = vmatmul.mubr.msk.f32.gmra.mrb[158].mxu0 %vm1249_vm0, %v12303_v37  ;;  %v893_v1 = vadd.s32 8, %v12502_v19  ;;  %v895_v9 = vadd.s32 24, %v12502_v19  ;;  %vm957_vm4 = vcmp.le.s32.totalorder %v11272_v40, %v12502_v19  ;;  %v911_v10 = vadd.s32 152, %v12502_v19 }
 0x345   : > { %16688 = vst [vmem:[#allocation72_spill] sm:$0xff] %v12429_v30  ;;  %10089 = vmatpush1.bf16.msra.mxu1 %v10088_v43 }
 0x346   : > { %vm959_vm5 = vcmp.le.s32.totalorder %v11272_v40, %v893_v1  ;;  %vm963_vm10 = vcmp.le.s32.totalorder %v11272_v40, %v895_v9 }
 0x347   : > { %v12433_v49 = vpop.f32.mrb[54].mxu0 }
 0x348   : > { %16689 = vst [vmem:[#allocation73_spill] sm:$0xff] %v12433_v49  ;;  %v12435_v34 = vpop.f32.mrb[55].mxu0 }
 0x349   : > { %16690 = vst [vmem:[#allocation74_spill] sm:$0xff] %v12435_v34 }
 0x34b   : > { %v12437_v28 = vpop.f32.mrb[56].mxu0 }
 0x34c   : > { %16691 = vst [vmem:[#allocation75_spill] sm:$0xff] %v12437_v28  ;;  %v12439_v62 = vpop.f32.mrb[57].mxu0 }
 0x34d   : > { %16692 = vst [vmem:[#allocation76_spill] sm:$0xff] %v12439_v62 }
 0x34f   : > { %v12441_v47 = vpop.f32.mrb[58].mxu0 }
 0x350   : > { %16693 = vst [vmem:[#allocation77_spill] sm:$0xff] %v12441_v47  ;;  %v12443_v55 = vpop.f32.mrb[59].mxu0 }
 0x351   : > { %16694 = vst [vmem:[#allocation78_spill] sm:$0xff] %v12443_v55 }
 0x353   : > { %v12445_v5 = vpop.f32.mrb[60].mxu0 }
 0x354   : > { %16695 = vst [vmem:[#allocation79_spill] sm:$0xff] %v12445_v5  ;;  %v12447_v16 = vpop.f32.mrb[61].mxu0 }
 0x355   : > { %16696 = vst [vmem:[#allocation80_spill] sm:$0xff] %v12447_v16 }
 0x357   : > { %v12449_v17 = vpop.f32.mrb[62].mxu0 }
 0x358   : > { %16697 = vst [vmem:[#allocation81_spill] sm:$0xff] %v12449_v17  ;;  %v12451_v37 = vpop.f32.mrb[63].mxu0 }
 0x359   : > { %16698 = vst [vmem:[#allocation82_spill] sm:$0xff] %v12451_v37 }
 0x35b   : > { %v12453_v54 = vpop.f32.mrb[64].mxu0 }
 0x35c   : > { %16699 = vst [vmem:[#allocation83_spill] sm:$0xff] %v12453_v54  ;;  %v12455_v36 = vpop.f32.mrb[65].mxu0 }
 0x35d   : > { %16700 = vst [vmem:[#allocation84_spill] sm:$0xff] %v12455_v36 }
 0x35f   : > { %v12457_v24 = vpop.f32.mrb[66].mxu0 }
 0x360   : > { %16701 = vst [vmem:[#allocation85_spill] sm:$0xff] %v12457_v24  ;;  %v12459_v44 = vpop.f32.mrb[67].mxu0 }
 0x361   : > { %16702 = vst [vmem:[#allocation86_spill] sm:$0xff] %v12459_v44 }
 0x363   : > { %v12461_v60 = vpop.f32.mrb[68].mxu0 }
 0x364   : > { %16703 = vst [vmem:[#allocation87_spill] sm:$0xff] %v12461_v60  ;;  %v12463_v4 = vpop.f32.mrb[69].mxu0 }
 0x365   : > { %16704 = vst [vmem:[#allocation88_spill] sm:$0xff] %v12463_v4 }
 0x367   : > { %v12465_v43 = vpop.f32.mrb[70].mxu0 }
 0x368   : > { %16705 = vst [vmem:[#allocation89_spill] sm:$0xff] %v12465_v43  ;;  %v12467_v52 = vpop.f32.mrb[71].mxu0 }
 0x369   : > { %16706 = vst [vmem:[#allocation90_spill] sm:$0xff] %v12467_v52 }
 0x36b   : > { %v12469_v50 = vpop.f32.mrb[72].mxu0 }
 0x36c   : > { %16707 = vst [vmem:[#allocation91_spill] sm:$0xff] %v12469_v50  ;;  %v12471_v3 = vpop.f32.mrb[73].mxu0 }
 0x36d   : > { %16708 = vst [vmem:[#allocation92_spill] sm:$0xff] %v12471_v3 }
 0x36f   : > { %v12473_v53 = vpop.f32.mrb[74].mxu0 }
 0x370   : > { %16709 = vst [vmem:[#allocation93_spill] sm:$0xff] %v12473_v53  ;;  %v12475_v58 = vpop.f32.mrb[75].mxu0  ;;  %v16734_v53 = vmov -1e+30  }
 0x371   : > { %16710 = vst [vmem:[#allocation94_spill] sm:$0xff] %v12475_v58 }
 0x373   : > { %v12477_v46 = vpop.f32.mrb[76].mxu0 }
 0x374   : > { %16711 = vst [vmem:[#allocation95_spill] sm:$0xff] %v12477_v46  ;;  %v12479_v48 = vpop.f32.mrb[77].mxu0 }
 0x375   : > { %16712 = vst [vmem:[#allocation96_spill] sm:$0xff] %v12479_v48 }
 0x377   : > { %v12481_v42 = vpop.f32.mrb[78].mxu0 }
 0x378   : > { %16713 = vst [vmem:[#allocation97_spill] sm:$0xff] %v12481_v42  ;;  %v12483_v38 = vpop.f32.mrb[79].mxu0 }
 0x379   : > { %16714 = vst [vmem:[#allocation98_spill] sm:$0xff] %v12483_v38 }
 0x37b   : > { %v12485_v33 = vpop.f32.mrb[80].mxu0 }
 0x37c   : > { %16715 = vst [vmem:[#allocation99_spill] sm:$0xff] %v12485_v33  ;;  %v12487_v32 = vpop.f32.mrb[81].mxu0 }
 0x37d   : > { %16716 = vst [vmem:[#allocation100_spill] sm:$0xff] %v12487_v32 }
 0x37f   : > { %v12489_v27 = vpop.f32.mrb[82].mxu0 }
 0x380   : > { %16717 = vst [vmem:[#allocation101_spill] sm:$0xff] %v12489_v27  ;;  %v12491_v26 = vpop.f32.mrb[83].mxu0 }
 0x381   : > { %16718 = vst [vmem:[#allocation102_spill] sm:$0xff] %v12491_v26 }
 0x383   : > { %v12493_v21 = vpop.f32.mrb[84].mxu0 }
 0x384   : > { %16719 = vst [vmem:[#allocation103_spill] sm:$0xff] %v12493_v21  ;;  %v12495_v20 = vpop.f32.mrb[85].mxu0  ;;  %v926_v21 = vand.u32 7, %v893_v1 }
 0x385   : > { %16720 = vst [vmem:[#allocation104_spill] sm:$0xff] %v12495_v20  ;;  %v894_v20 = vadd.s32 16, %v12502_v19 }
 0x387   : > { %v12497_v15 = vpop.f32.mrb[86].mxu0  ;;  %v927_v27 = vand.u32 7, %v894_v20  ;;  %vm961_vm8 = vcmp.le.s32.totalorder %v11272_v40, %v894_v20 }
 0x388   : > { %16721 = vst [vmem:[#allocation105_spill] sm:$0xff] %v12497_v15  ;;  %v12499_v14 = vpop.f32.mrb[87].mxu0 }
 0x389   : > { %16722 = vst [vmem:[#allocation106_spill] sm:$0xff] %v12499_v14  ;;  %v1022_v14 = vsub.s32 %v893_v1, %v926_v21  ;;  %v16340_v21 = vmov -1e+30   ;;  %v897_v1 = vadd.s32 40, %v12502_v19 }
 0x38b   : > { %v12504_v8 = vpop.f32.mrb[88].mxu0  ;;  %vm1055_vm6 = vcmp.ge.s32.totalorder %v11272_v40, %v1022_v14  ;;  %vm967_vm2 = vcmp.le.s32.totalorder %v11272_v40, %v897_v1 }
 0x38c   : > { %16724 = vst [vmem:[#allocation107_spill] sm:$0xff] %v12504_v8  ;;  %v12506_v2 = vpop.f32.mrb[89].mxu0  ;;  %vm1119_vm7 = vmand %vm959_vm5, %vm1055_vm6 }
 0x38d   : > { %16725 = vst [vmem:[#allocation108_spill] sm:$0xff] %v12506_v2  ;;  %v896_v2 = vadd.s32 32, %v12502_v19  ;;  %v12540_v14 = vsel %vm1119_vm7, 0.0, %v16340_v21 }
 0x38e   : > { %16733 = vst [vmem:[#allocation116_spill] sm:$0xff] %v12540_v14 }
 0x38f   : > { %v12509_v57 = vpop.f32.mrb[90].mxu0  ;;  %vm965_vm14 = vcmp.le.s32.totalorder %v11272_v40, %v896_v2 }
 0x390   : > { %16726 = vst [vmem:[#allocation109_spill] sm:$0xff] %v12509_v57  ;;  %v12511_v56 = vpop.f32.mrb[91].mxu0  ;;  %v12529_v57 = vsel %vm957_vm4, 0.0, %v16340_v21 }
 0x391   : > { %16727 = vst [vmem:[#allocation110_spill] sm:$0xff] %v12511_v56  ;;  %v1023_v56 = vsub.s32 %v894_v20, %v927_v27  ;;  %16732 = vst [vmem:[#allocation115_spill] sm:$0xff] %v12529_v57 }
 0x393   : > { %v12514_v26 = vpop.f32.mrb[92].mxu0  ;;  %vm1057_vm9 = vcmp.ge.s32.totalorder %v11272_v40, %v1023_v56  ;;  %v898_v56 = vadd.s32 48, %v12502_v19 }
 0x394   : > { %16728 = vst [vmem:[#allocation111_spill] sm:$0xff] %v12514_v26  ;;  %v12516_v15 = vpop.f32.mrb[93].mxu0  ;;  %v928_v26 = vand.u32 7, %v895_v9  ;;  %vm1121_vm11 = vmand %vm961_vm8, %vm1057_vm9 }
 0x395   : > { %16729 = vst [vmem:[#allocation112_spill] sm:$0xff] %v12516_v15  ;;  %vm969_vm6 = vcmp.le.s32.totalorder %v11272_v40, %v898_v56 }
 0x397   : > { %v12519_v8 = vpop.f32.mrb[94].mxu0 }
 0x398   : > { %16730 = vst [vmem:[#allocation113_spill] sm:$0xff] %v12519_v8  ;;  %v12522_v32 = vpop.f32.mrb[95].mxu0  ;;  %v929_v8 = vand.u32 7, %v896_v2 }
 0x399   : > { %16731 = vst [vmem:[#allocation114_spill] sm:$0xff] %v12522_v32  ;;  %v1024_v32 = vsub.s32 %v895_v9, %v928_v26  ;;  %v930_v26 = vand.u32 7, %v897_v1  ;;  %v12555_v9 = vsel %vm1121_vm11, 0.0, %v16734_v53 }
 0x39a   : > { %16735 = vst [vmem:[#allocation117_spill] sm:$0xff] %v12555_v9 }
 0x39b   : > { %v3025_v15 = vpop.f32.mrb[96].mxu0  ;;  %vm1059_vm12 = vcmp.ge.s32.totalorder %v11272_v40, %v1024_v32 }
 0x39c   : > { %v3027_v33 = vpop.f32.mrb[97].mxu0  ;;  %v12532_v38 = vadd.f32 %v3025_v15, %v12529_v57  ;;  %v1025_v15 = vsub.s32 %v896_v2, %v929_v8  ;;  %vm1123_vm13 = vmand %vm963_vm10, %vm1059_vm12 }
 0x39d   : > { %v12536_v42 = vadd.f32 -1e+30, %v3027_v33  ;;  %v12566_v50 = vsel %vm1123_vm13, 0.0, %v16734_v53 }
 0x39e   : > { %vm1061_vm15 = vcmp.ge.s32.totalorder %v11272_v40, %v1025_v15  ;;  %16736 = vst [vmem:[#allocation118_spill] sm:$0xff] %v12566_v50 }
 0x39f   : > { %v3031_v27 = vpop.f32.mrb[98].mxu0  ;;  %v3216_v48 = vmax.f32 %v12532_v38, %v12536_v42  ;;  %vm1125_vm1 = vmand %vm965_vm14, %vm1061_vm15 }
 0x3a0   : > { %v3033_v46 = vpop.f32.mrb[99].mxu0  ;;  %v12546_v20 = vadd.f32 %v3031_v27, %v12540_v14  ;;  %v1026_v27 = vsub.s32 %v897_v1, %v930_v26  ;;  %v12579_v4 = vsel %vm1125_vm1, 0.0, %v16734_v53 }
 0x3a1   : > { %3217 = vmax.xlane.f32.xlu0 %v3216_v48  ;;  %v12550_v33 = vadd.f32 -1e+30, %v3033_v46  ;;  %v931_v48 = vand.u32 7, %v898_v56  ;;  %v899_v46 = vadd.s32 56, %v12502_v19  ;;  %16737 = vst [vmem:[#allocation119_spill] sm:$0xff] %v12579_v4 }
 0x3a2   : > { %vm1063_vm4 = vcmp.ge.s32.totalorder %v11272_v40, %v1026_v27 }
 0x3a3   : > { %v3037_v21 = vpop.f32.mrb[100].mxu0  ;;  %v3219_v58 = vmax.f32 %v12546_v20, %v12550_v33  ;;  %vm1127_vm5 = vmand %vm967_vm2, %vm1063_vm4  ;;  %vm971_vm9 = vcmp.le.s32.totalorder %v11272_v40, %v899_v46 }
 0x3a4   : > { %v3039_v8 = vpop.f32.mrb[101].mxu0  ;;  %v12560_v32 = vadd.f32 %v3037_v21, %v12555_v9  ;;  %v900_v21 = vadd.s32 64, %v12502_v19 }
 0x3a5   : > { %3220 = vmax.xlane.f32.xlu1 %v3219_v58  ;;  %v12563_v3 = vadd.f32 -1e+30, %v3039_v8  ;;  %v1027_v58 = vsub.s32 %v898_v56, %v931_v48  ;;  %v932_v8 = vand.u32 7, %v899_v46  ;;  %v901_v48 = vadd.s32 72, %v12502_v19 }
 0x3a6   : > { %v933_v44 = vand.u32 7, %v900_v21  ;;  %vm973_vm12 = vcmp.le.s32.totalorder %v11272_v40, %v900_v21 }
 0x3a7   : > { %v3043_v52 = vpop.f32.mrb[102].mxu0  ;;  %v3222_v2 = vmax.f32 %v12560_v32, %v12563_v3  ;;  %vm1065_vm7 = vcmp.ge.s32.totalorder %v11272_v40, %v1027_v58  ;;  %v1028_v27 = vsub.s32 %v899_v46, %v932_v8  ;;  %v934_v8 = vand.u32 7, %v901_v48 }
 0x3a8   : > { %v3045_v15 = vpop.f32.mrb[103].mxu0  ;;  %v12573_v26 = vadd.f32 %v3043_v52, %v12566_v50  ;;  %vm1129_vm8 = vmand %vm969_vm6, %vm1065_vm7  ;;  %vm975_vm15 = vcmp.le.s32.totalorder %v11272_v40, %v901_v48 }
 0x3a9   : > { %3223 = vmax.xlane.f32.xlu0 %v3222_v2  ;;  %v12576_v43 = vadd.f32 -1e+30, %v3045_v15  ;;  %v12592_v15 = vsel %vm1127_vm5, 0.0, %v16734_v53  ;;  %vm1067_vm10 = vcmp.ge.s32.totalorder %v11272_v40, %v1028_v27  ;;  %v12605_v37 = vsel %vm1129_vm8, 0.0, %v16734_v53 }
 0x3aa   : > { %16738 = vst [vmem:[#allocation120_spill] sm:$0xff] %v12592_v15  ;;  %16739 = vst [vmem:[#allocation121_spill] sm:$0xff] %v12605_v37  ;;  %v1030_v27 = vsub.s32 %v901_v48, %v934_v8 }
 0x3ab   : > { %v3049_v60 = vpop.f32.mrb[104].mxu0  ;;  %v3225_v1 = vmax.f32 %v12573_v26, %v12576_v43  ;;  %vm1131_vm11 = vmand %vm971_vm9, %vm1067_vm10 }
 0x3ac   : > { %v3051_v52 = vpop.f32.mrb[105].mxu0  ;;  %v12585_v24 = vadd.f32 %v3049_v60, %v12579_v4  ;;  %v1029_v60 = vsub.s32 %v900_v21, %v933_v44  ;;  %v12618_v5 = vsel %vm1131_vm11, 0.0, %v16734_v53  ;;  %vm1071_vm1 = vcmp.ge.s32.totalorder %v11272_v40, %v1030_v27 }
 0x3ad   : > { %3226 = vmax.xlane.f32.xlu0 %v3225_v1  ;;  %v12589_v2 = vadd.f32 -1e+30, %v3051_v52  ;;  %v902_v1 = vadd.s32 80, %v12502_v19  ;;  %16740 = vst [vmem:[#allocation122_spill] sm:$0xff] %v12618_v5  ;;  %vm1135_vm2 = vmand %vm975_vm15, %vm1071_vm1 }
 0x3ae   : > { %vm1069_vm13 = vcmp.ge.s32.totalorder %v11272_v40, %v1029_v60 }
 0x3af   : > { %v3055_v36 = vpop.f32.mrb[106].mxu0  ;;  %v3228_v56 = vmax.f32 %v12585_v24, %v12589_v2  ;;  %vm1133_vm14 = vmand %vm973_vm12, %vm1069_vm13  ;;  %vm977_vm4 = vcmp.le.s32.totalorder %v11272_v40, %v902_v1 }
 0x3b0   : > { %v3057_v54 = vpop.f32.mrb[107].mxu0  ;;  %v12598_v58 = vadd.f32 %v3055_v36, %v12592_v15  ;;  %v12631_v62 = vsel %vm1133_vm14, 0.0, %v16734_v53 }
 0x3b1   : > { %3229 = vmax.xlane.f32.xlu1 %v3228_v56  ;;  %v12602_v52 = vadd.f32 -1e+30, %v3057_v54  ;;  %v935_v56 = vand.u32 7, %v902_v1  ;;  %v903_v54 = vadd.s32 88, %v12502_v19  ;;  %16741 = vst [vmem:[#allocation123_spill] sm:$0xff] %v12631_v62 }
 0x3b3   : > { %v3061_v17 = vpop.f32.mrb[108].mxu0  ;;  %v3231_v46 = vmax.f32 %v12598_v58, %v12602_v52  ;;  %vm979_vm7 = vcmp.le.s32.totalorder %v11272_v40, %v903_v54 }
 0x3b4   : > { %v3063_v36 = vpop.f32.mrb[109].mxu0  ;;  %v12612_v44 = vadd.f32 %v3061_v17, %v12605_v37  ;;  %v904_v17 = vadd.s32 96, %v12502_v19 }
 0x3b5   : > { %3232 = vmax.xlane.f32.xlu0 %v3231_v46  ;;  %v12615_v16 = vadd.f32 -1e+30, %v3063_v36  ;;  %v1031_v46 = vsub.s32 %v902_v1, %v935_v56  ;;  %v936_v36 = vand.u32 7, %v903_v54  ;;  %v905_v56 = vadd.s32 104, %v12502_v19 }
 0x3b6   : > { %v937_v34 = vand.u32 7, %v904_v17  ;;  %vm981_vm10 = vcmp.le.s32.totalorder %v11272_v40, %v904_v17 }
 0x3b7   : > { %v3067_v55 = vpop.f32.mrb[110].mxu0  ;;  %v3234_v21 = vmax.f32 %v12612_v44, %v12615_v16  ;;  %vm1073_vm5 = vcmp.ge.s32.totalorder %v11272_v40, %v1031_v46  ;;  %v1032_v27 = vsub.s32 %v903_v54, %v936_v36  ;;  %v938_v36 = vand.u32 7, %v905_v56 }
 0x3b8   : > { %v3069_v60 = vpop.f32.mrb[111].mxu0  ;;  %v12625_v8 = vadd.f32 %v3067_v55, %v12618_v5  ;;  %vm1137_vm6 = vmand %vm977_vm4, %vm1073_vm5  ;;  %vm983_vm13 = vcmp.le.s32.totalorder %v11272_v40, %v905_v56 }
 0x3b9   : > { %3235 = vmax.xlane.f32.xlu1 %v3234_v21  ;;  %v12628_v47 = vadd.f32 -1e+30, %v3069_v60  ;;  %v12644_v60 = vsel %vm1135_vm2, 0.0, %v16734_v53  ;;  %vm1075_vm8 = vcmp.ge.s32.totalorder %v11272_v40, %v1032_v27  ;;  %v12657_v23 = vsel %vm1137_vm6, 0.0, %v16734_v53 }
 0x3ba   : > { %16742 = vst [vmem:[#allocation124_spill] sm:$0xff] %v12644_v60  ;;  %16743 = vst [vmem:[#allocation125_spill] sm:$0xff] %v12657_v23  ;;  %v1034_v27 = vsub.s32 %v905_v56, %v938_v36 }
 0x3bb   : > { %v3073_v28 = vpop.f32.mrb[112].mxu0  ;;  %v3237_v48 = vmax.f32 %v12625_v8, %v12628_v47  ;;  %vm1139_vm9 = vmand %vm979_vm7, %vm1075_vm8 }
 0x3bc   : > { %v3075_v55 = vpop.f32.mrb[113].mxu0  ;;  %v12637_v49 = vadd.f32 %v3073_v28, %v12631_v62  ;;  %v1033_v28 = vsub.s32 %v904_v17, %v937_v34  ;;  %v12670_v61 = vsel %vm1139_vm9, 0.0, %v16734_v53  ;;  %vm1079_vm14 = vcmp.ge.s32.totalorder %v11272_v40, %v1034_v27 }
 0x3bd   : > { %3238 = vmax.xlane.f32.xlu0 %v3237_v48  ;;  %v12641_v21 = vadd.f32 -1e+30, %v3075_v55  ;;  %v906_v48 = vadd.s32 112, %v12502_v19  ;;  %16744 = vst [vmem:[#allocation126_spill] sm:$0xff] %v12670_v61  ;;  %vm1143_vm15 = vmand %vm983_vm13, %vm1079_vm14 }
 0x3be   : > { %vm1077_vm11 = vcmp.ge.s32.totalorder %v11272_v40, %v1033_v28 }
 0x3bf   : > { %v3079_v30 = vpop.f32.mrb[114].mxu0  ;;  %v3240_v1 = vmax.f32 %v12637_v49, %v12641_v21  ;;  %vm1141_vm12 = vmand %vm981_vm10, %vm1077_vm11  ;;  %vm985_vm1 = vcmp.le.s32.totalorder %v11272_v40, %v906_v48 }
 0x3c0   : > { %v3081_v6 = vpop.f32.mrb[115].mxu0  ;;  %v12650_v46 = vadd.f32 %v3079_v30, %v12644_v60 }
 0x3c1   : > { %3241 = vmax.xlane.f32.xlu1 %v3240_v1  ;;  %v12654_v55 = vadd.f32 -1e+30, %v3081_v6  ;;  %v939_v1 = vand.u32 7, %v906_v48  ;;  %v907_v6 = vadd.s32 120, %v12502_v19 }
 0x3c3   : > { %v3085_v39 = vpop.f32.mrb[116].mxu0  ;;  %v3243_v54 = vmax.f32 %v12650_v46, %v12654_v55  ;;  %v1035_v36 = vsub.s32 %v906_v48, %v939_v1  ;;  %v909_v1 = vadd.s32 136, %v12502_v19  ;;  %vm987_vm5 = vcmp.le.s32.totalorder %v11272_v40, %v907_v6 }
 0x3c4   : > { %v3087_v30 = vpop.f32.mrb[117].mxu0  ;;  %v12664_v34 = vadd.f32 %v3085_v39, %v12657_v23  ;;  %v12682_v23 = vsel %vm1141_vm12, 0.0, %v16734_v53 }
 0x3c5   : > { %3244 = vmax.xlane.f32.xlu0 %v3243_v54  ;;  %v12667_v60 = vadd.f32 -1e+30, %v3087_v30  ;;  %v940_v54 = vand.u32 7, %v907_v6  ;;  %16745 = vst [vmem:[#allocation127_spill] sm:$0xff] %v12682_v23  ;;  %vm1081_vm2 = vcmp.ge.s32.totalorder %v11272_v40, %v1035_v36  ;;  %v942_v48 = vand.u32 7, %v909_v1 }
 0x3c6   : > { %vm1145_vm4 = vmand %vm985_vm1, %vm1081_vm2  ;;  %v910_v36 = vadd.s32 144, %v12502_v19 }
 0x3c7   : > { %v3091_v45 = vpop.f32.mrb[118].mxu0  ;;  %v3246_v17 = vmax.f32 %v12664_v34, %v12667_v60 }
 0x3c8   : > { %v3093_v28 = vpop.f32.mrb[119].mxu0  ;;  %v12676_v39 = vadd.f32 %v3091_v45, %v12670_v61  ;;  %v1036_v45 = vsub.s32 %v907_v6, %v940_v54  ;;  %v12708_v54 = vsel %vm1145_vm4, 0.0, %v16734_v53  ;;  %v908_v6 = vadd.s32 128, %v12502_v19 }
 0x3c9   : > { %3247 = vmax.xlane.f32.xlu1 %v3246_v17  ;;  %v12679_v30 = vadd.f32 -1e+30, %v3093_v28  ;;  %v12695_v17 = vsel %vm1143_vm15, 0.0, %v16734_v53  ;;  %16747 = vst [vmem:[#allocation129_spill] sm:$0xff] %v12708_v54  ;;  %v943_v29 = vand.u32 7, %v910_v36 }
 0x3ca   : > { %16746 = vst [vmem:[#allocation128_spill] sm:$0xff] %v12695_v17  ;;  %vm1083_vm6 = vcmp.ge.s32.totalorder %v11272_v40, %v1036_v45 }
 0x3cb   : > { %v3097_v62 = vpop.f32.mrb[120].mxu0  ;;  %v3249_v18 = vmax.f32 %v12676_v39, %v12679_v30  ;;  %vm1147_vm7 = vmand %vm987_vm5, %vm1083_vm6 }
 0x3cc   : > { %v3099_v56 = vpop.f32.mrb[121].mxu0  ;;  %v12687_v63 = vadd.f32 %v3097_v62, %v12682_v23  ;;  %v12723_v37 = vsel %vm1147_vm7, 0.0, %v16734_v53 }
 0x3cd   : > { %3250 = vmax.xlane.f32.xlu0 %v3249_v18  ;;  %v12691_v27 = vadd.f32 -1e+30, %v3099_v56  ;;  %16748 = vst [vmem:[#allocation130_spill] sm:$0xff] %v12723_v37 }
 0x3cf   : > { %v3103_v28 = vpop.f32.mrb[122].mxu0  ;;  %v3252_v61 = vmax.f32 %v12687_v63, %v12691_v27 }
 0x3d0   : > { %v3105_v62 = vpop.f32.mrb[123].mxu0  ;;  %v12700_v23 = vadd.f32 %v3103_v28, %v12695_v17 }
 0x3d1   : > { %3253 = vmax.xlane.f32.xlu1 %v3252_v61  ;;  %v12704_v18 = vadd.f32 -1e+30, %v3105_v62  ;;  %v12717_v61 = vadd.s32 128, %v11272_v40  ;;  %v1038_v62 = vsub.s32 %v909_v1, %v942_v48  ;;  %v944_v48 = vand.u32 7, %v911_v10 }
 0x3d3   : > { %v3109_v56 = vpop.f32.mrb[124].mxu0  ;;  %v3255_v5 = vmax.f32 %v12700_v23, %v12704_v18  ;;  %vm990_vm8 = vcmp.le.s32.totalorder %v12717_v61, %v908_v6  ;;  %vm992_vm9 = vcmp.le.s32.totalorder %v12717_v61, %v909_v1  ;;  %vm1088_vm10 = vcmp.ge.s32.totalorder %v12717_v61, %v1038_v62 }
 0x3d4   : > { %v3111_v28 = vpop.f32.mrb[125].mxu0  ;;  %v12713_v17 = vadd.f32 %v3109_v56, %v12708_v54  ;;  %vm1152_vm11 = vmand %vm992_vm9, %vm1088_vm10  ;;  %vm994_vm12 = vcmp.le.s32.totalorder %v12717_v61, %v910_v36  ;;  %v913_v62 = vadd.s32 168, %v12502_v19  ;;  %vm996_vm15 = vcmp.le.s32.totalorder %v12717_v61, %v911_v10 }
 0x3d5   : > { %3256 = vmax.xlane.f32.xlu0 %v3255_v5  ;;  %v12719_v45 = vadd.f32 -1e+30, %v3111_v28  ;;  %v1039_v5 = vsub.s32 %v910_v36, %v943_v29  ;;  %v912_v28 = vadd.s32 160, %v12502_v19  ;;  %v1040_v29 = vsub.s32 %v911_v10, %v944_v48 }
 0x3d6   : > { %v946_v36 = vand.u32 7, %v913_v62  ;;  %vm1000_vm7 = vcmp.le.s32.totalorder %v12717_v61, %v913_v62 }
 0x3d7   : > { %v3115_v59 = vpop.f32.mrb[126].mxu0  ;;  %v3258_v56 = vmax.f32 %v12713_v17, %v12719_v45  ;;  %vm1090_vm13 = vcmp.ge.s32.totalorder %v12717_v61, %v1039_v5  ;;  %vm1092_vm1 = vcmp.ge.s32.totalorder %v12717_v61, %v1040_v29  ;;  %v914_v5 = vadd.s32 176, %v12502_v19 }
 0x3d8   : > { %v3117_v54 = vpop.f32.mrb[127].mxu0  ;;  %v12728_v11 = vadd.f32 %v3115_v59, %v12723_v37  ;;  %v12739_v59 = vsel %vm990_vm8, 0.0, %v16734_v53  ;;  %vm1154_vm14 = vmand %vm994_vm12, %vm1090_vm13  ;;  %vm998_vm4 = vcmp.le.s32.totalorder %v12717_v61, %v912_v28  ;;  %v1042_v10 = vsub.s32 %v913_v62, %v946_v36 }
 0x3d9   : > { %3259 = vmax.xlane.f32.xlu1 %v3258_v56  ;;  %v12732_v40 = vadd.f32 -1e+30, %v3117_v54  ;;  %16749 = vst [vmem:[#allocation131_spill] sm:$0xff] %v12739_v59  ;;  %v945_v54 = vand.u32 7, %v912_v28  ;;  %vm1156_vm2 = vmand %vm996_vm15, %vm1092_vm1  ;;  %v915_v29 = vadd.s32 184, %v12502_v19  ;;  %vm1002_vm10 = vcmp.le.s32.totalorder %v12717_v61, %v914_v5 }
 0x3da   : > { %vm1096_vm8 = vcmp.ge.s32.totalorder %v12717_v61, %v1042_v10  ;;  %v917_v10 = vadd.s32 200, %v12502_v19 }
 0x3db   : > { %v3121_v15 = vpop.f32.mrb[128].mxu0  ;;  %v3261_v13 = vmax.f32 %v12728_v11, %v12732_v40  ;;  %vm1160_vm9 = vmand %vm1000_vm7, %vm1096_vm8  ;;  %vm1004_vm13 = vcmp.le.s32.totalorder %v12717_v61, %v915_v29 }
 0x3dc   : > { %v3123_v37 = vpop.f32.mrb[129].mxu0  ;;  %v12741_v6 = vadd.f32 -1e+30, %v3121_v15  ;;  %v12752_v15 = vsel %vm1152_vm11, 0.0, %v16734_v53 }
 0x3dd   : > { %3262 = vmax.xlane.f32.xlu0 %v3261_v13  ;;  %v12745_v1 = vadd.f32 %v3123_v37, %v12739_v59  ;;  %16750 = vst [vmem:[#allocation132_spill] sm:$0xff] %v12752_v15  ;;  %v1041_v37 = vsub.s32 %v912_v28, %v945_v54 }
 0x3df   : > { %v3127_v56 = vpop.f32.mrb[130].mxu0  ;;  %v3264_v51 = vmax.f32 %v12741_v6, %v12745_v1  ;;  %vm1094_vm5 = vcmp.ge.s32.totalorder %v12717_v61, %v1041_v37  ;;  %v916_v37 = vadd.s32 192, %v12502_v19 }
 0x3e0   : > { %v3129_v4 = vpop.f32.mrb[131].mxu0  ;;  %v12754_v35 = vadd.f32 -1e+30, %v3127_v56  ;;  %v12765_v56 = vsel %vm1154_vm14, 0.0, %v16734_v53  ;;  %vm1158_vm6 = vmand %vm998_vm4, %vm1094_vm5  ;;  %vm1008_vm5 = vcmp.le.s32.totalorder %v12717_v61, %v917_v10 }
 0x3e1   : > { %3265 = vmax.xlane.f32.xlu1 %v3264_v51  ;;  %v12758_v13 = vadd.f32 %v3129_v4, %v12752_v15  ;;  %16751 = vst [vmem:[#allocation133_spill] sm:$0xff] %v12765_v56  ;;  %v947_v4 = vand.u32 7, %v914_v5  ;;  %vm1006_vm1 = vcmp.le.s32.totalorder %v12717_v61, %v916_v37 }
 0x3e3   : > { %v3133_v48 = vpop.f32.mrb[132].mxu0  ;;  %v3267_v59 = vmax.f32 %v12754_v35, %v12758_v13  ;;  %v1043_v28 = vsub.s32 %v914_v5, %v947_v4 }
 0x3e4   : > { %v3135_v31 = vpop.f32.mrb[133].mxu0  ;;  %v12767_v50 = vadd.f32 -1e+30, %v3133_v48  ;;  %v12778_v48 = vsel %vm1156_vm2, 0.0, %v16734_v53 }
 0x3e5   : > { %3268 = vmax.xlane.f32.xlu0 %v3267_v59  ;;  %v12771_v51 = vadd.f32 %v3135_v31, %v12765_v56  ;;  %16752 = vst [vmem:[#allocation134_spill] sm:$0xff] %v12778_v48  ;;  %v948_v59 = vand.u32 7, %v915_v29  ;;  %vm1098_vm11 = vcmp.ge.s32.totalorder %v12717_v61, %v1043_v28  ;;  %v918_v28 = vadd.s32 208, %v12502_v19 }
 0x3e6   : > { %vm1162_vm12 = vmand %vm1002_vm10, %vm1098_vm11 }
 0x3e7   : > { %v3139_v54 = vpop.f32.mrb[134].mxu0  ;;  %v3270_v15 = vmax.f32 %v12767_v50, %v12771_v51  ;;  %v1044_v62 = vsub.s32 %v915_v29, %v948_v59  ;;  %vm1010_vm8 = vcmp.le.s32.totalorder %v12717_v61, %v918_v28 }
 0x3e8   : > { %v3141_v0 = vpop.f32.mrb[135].mxu0  ;;  %v12780_v22 = vadd.f32 -1e+30, %v3139_v54  ;;  %v12791_v54 = vsel %vm1158_vm6, 0.0, %v16734_v53 }
 0x3e9   : > { %3271 = vmax.xlane.f32.xlu1 %v3270_v15  ;;  %v12784_v31 = vadd.f32 %v3141_v0, %v12778_v48  ;;  %16753 = vst [vmem:[#allocation135_spill] sm:$0xff] %v12791_v54  ;;  %v949_v15 = vand.u32 7, %v916_v37  ;;  %vm1100_vm14 = vcmp.ge.s32.totalorder %v12717_v61, %v1044_v62  ;;  %v919_v62 = vadd.s32 216, %v12502_v19 }
 0x3ea   : > { %vm1164_vm15 = vmand %vm1004_vm13, %vm1100_vm14 }
 0x3eb   : > { %v3145_v36 = vpop.f32.mrb[136].mxu0  ;;  %v3273_v56 = vmax.f32 %v12780_v22, %v12784_v31  ;;  %v1045_v5 = vsub.s32 %v916_v37, %v949_v15  ;;  %vm1012_vm11 = vcmp.le.s32.totalorder %v12717_v61, %v919_v62 }
 0x3ec   : > { %v3147_v9 = vpop.f32.mrb[137].mxu0  ;;  %v12793_v25 = vadd.f32 -1e+30, %v3145_v36  ;;  %v12804_v36 = vsel %vm1160_vm9, 0.0, %v16734_v53 }
 0x3ed   : > { %3274 = vmax.xlane.f32.xlu0 %v3273_v56  ;;  %v12797_v0 = vadd.f32 %v3147_v9, %v12791_v54  ;;  %16754 = vst [vmem:[#allocation136_spill] sm:$0xff] %v12804_v36  ;;  %v950_v56 = vand.u32 7, %v917_v10  ;;  %vm1102_vm2 = vcmp.ge.s32.totalorder %v12717_v61, %v1045_v5  ;;  %v920_v5 = vadd.s32 224, %v12502_v19 }
 0x3ee   : > { %vm1166_vm4 = vmand %vm1006_vm1, %vm1102_vm2 }
 0x3ef   : > { %v3151_v4 = vpop.f32.mrb[138].mxu0  ;;  %v3276_v48 = vmax.f32 %v12793_v25, %v12797_v0  ;;  %v1046_v29 = vsub.s32 %v917_v10, %v950_v56  ;;  %vm1014_vm14 = vcmp.le.s32.totalorder %v12717_v61, %v920_v5 }
 0x3f0   : > { %v3153_v41 = vpop.f32.mrb[139].mxu0  ;;  %v12806_v14 = vadd.f32 -1e+30, %v3151_v4  ;;  %v12817_v4 = vsel %vm1162_vm12, 0.0, %v16734_v53 }
 0x3f1   : > { %3277 = vmax.xlane.f32.xlu1 %v3276_v48  ;;  %v12810_v9 = vadd.f32 %v3153_v41, %v12804_v36  ;;  %16756 = vst [vmem:[#allocation138_spill] sm:$0xff] %v12817_v4  ;;  %v951_v48 = vand.u32 7, %v918_v28  ;;  %vm1104_vm6 = vcmp.ge.s32.totalorder %v12717_v61, %v1046_v29  ;;  %v921_v29 = vadd.s32 232, %v12502_v19 }
 0x3f2   : > { %vm1168_vm7 = vmand %vm1008_vm5, %vm1104_vm6 }
 0x3f3   : > { %16755 = vst [vmem:[#allocation137_spill] sm:$0xff] %v12810_v9  ;;  %v3157_v59 = vpop.f32.mrb[140].mxu0  ;;  %v3279_v54 = vmax.f32 %v12806_v14, %v12810_v9  ;;  %v1047_v37 = vsub.s32 %v918_v28, %v951_v48  ;;  %vm1016_vm2 = vcmp.le.s32.totalorder %v12717_v61, %v921_v29 }
 0x3f4   : > { %v3159_v12 = vpop.f32.mrb[141].mxu0  ;;  %v12819_v7 = vadd.f32 -1e+30, %v3157_v59  ;;  %v12830_v59 = vsel %vm1164_vm15, 0.0, %v16734_v53 }
 0x3f5   : > { %3280 = vmax.xlane.f32.xlu0 %v3279_v54  ;;  %v12823_v41 = vadd.f32 %v3159_v12, %v12817_v4  ;;  %16759 = vst [vmem:[#allocation141_spill] sm:$0xff] %v12830_v59  ;;  %v952_v54 = vand.u32 7, %v919_v62  ;;  %vm1106_vm9 = vcmp.ge.s32.totalorder %v12717_v61, %v1047_v37  ;;  %v922_v37 = vadd.s32 240, %v12502_v19 }
 0x3f6   : > { %16757 = vst [vmem:[#allocation139_spill] sm:$0xff] %v12819_v7  ;;  %vm1170_vm10 = vmand %vm1010_vm8, %vm1106_vm9 }
 0x3f7   : > { %16758 = vst [vmem:[#allocation140_spill] sm:$0xff] %v12823_v41  ;;  %v3163_v15 = vpop.f32.mrb[142].mxu0  ;;  %v3282_v36 = vmax.f32 %v12819_v7, %v12823_v41  ;;  %v1048_v10 = vsub.s32 %v919_v62, %v952_v54  ;;  %vm1018_vm6 = vcmp.le.s32.totalorder %v12717_v61, %v922_v37 }
 0x3f8   : > { %v3165_v57 = vpop.f32.mrb[143].mxu0  ;;  %v12832_v9 = vadd.f32 -1e+30, %v3163_v15  ;;  %v12843_v15 = vsel %vm1166_vm4, 0.0, %v16734_v53 }
 0x3f9   : > { %3283 = vmax.xlane.f32.xlu1 %v3282_v36  ;;  %v12836_v12 = vadd.f32 %v3165_v57, %v12830_v59  ;;  %16762 = vst [vmem:[#allocation144_spill] sm:$0xff] %v12843_v15  ;;  %v953_v36 = vand.u32 7, %v920_v5  ;;  %vm1108_vm12 = vcmp.ge.s32.totalorder %v12717_v61, %v1048_v10  ;;  %v923_v10 = vadd.s32 248, %v12502_v19 }
 0x3fa   : > { %16760 = vst [vmem:[#allocation142_spill] sm:$0xff] %v12832_v9  ;;  %vm1172_vm13 = vmand %vm1012_vm11, %vm1108_vm12 }
 0x3fb   : > { %16761 = vst [vmem:[#allocation143_spill] sm:$0xff] %v12836_v12  ;;  %v3169_v56 = vpop.f32.mrb[144].mxu0  ;;  %v3285_v4 = vmax.f32 %v12832_v9, %v12836_v12  ;;  %vm1020_vm9 = vcmp.le.s32.totalorder %v12717_v61, %v923_v10 }
 0x3fc   : > { %v3171_v41 = vpop.f32.mrb[145].mxu0  ;;  %v12845_v7 = vadd.f32 -1e+30, %v3169_v56  ;;  %v12856_v56 = vsel %vm1168_vm7, 0.0, %v16734_v53 }
 0x3fd   : > { %3286 = vmax.xlane.f32.xlu1 %v3285_v4  ;;  %v12849_v57 = vadd.f32 %v3171_v41, %v12843_v15  ;;  %16765 = vst [vmem:[#allocation147_spill] sm:$0xff] %v12856_v56  ;;  %v1049_v4 = vsub.s32 %v920_v5, %v953_v36  ;;  %v954_v41 = vand.u32 7, %v921_v29 }
 0x3fe   : > { %16763 = vst [vmem:[#allocation145_spill] sm:$0xff] %v12845_v7 }
 0x3ff   : > { %16764 = vst [vmem:[#allocation146_spill] sm:$0xff] %v12849_v57  ;;  %v3175_v48 = vpop.f32.mrb[146].mxu0  ;;  %v3288_v59 = vmax.f32 %v12845_v7, %v12849_v57  ;;  %vm1110_vm15 = vcmp.ge.s32.totalorder %v12717_v61, %v1049_v4 }
 0x400   : > { %v3177_v12 = vpop.f32.mrb[147].mxu0  ;;  %v12858_v9 = vadd.f32 -1e+30, %v3175_v48  ;;  %v12869_v48 = vsel %vm1170_vm10, 0.0, %v16734_v53  ;;  %vm1174_vm1 = vmand %vm1014_vm14, %vm1110_vm15 }
 0x401   : > { %3289 = vmax.xlane.f32.xlu1 %v3288_v59  ;;  %v12862_v28 = vadd.f32 %v3177_v12, %v12856_v56  ;;  %16768 = vst [vmem:[#allocation150_spill] sm:$0xff] %v12869_v48  ;;  %v1050_v59 = vsub.s32 %v921_v29, %v954_v41  ;;  %v955_v12 = vand.u32 7, %v922_v37  ;;  %v12894_v41 = vsel %vm1174_vm1, 0.0, %v16734_v53 }
 0x402   : > { %16766 = vst [vmem:[#allocation148_spill] sm:$0xff] %v12858_v9  ;;  %16770 = vst [vmem:[#allocation152_spill] sm:$0xff] %v12894_v41 }
 0x403   : > { %16767 = vst [vmem:[#allocation149_spill] sm:$0xff] %v12862_v28  ;;  %v3181_v54 = vpop.f32.mrb[148].mxu0  ;;  %v3291_v15 = vmax.f32 %v12858_v9, %v12862_v28  ;;  %vm1112_vm4 = vcmp.ge.s32.totalorder %v12717_v61, %v1050_v59  ;;  %v1051_v19 = vsub.s32 %v922_v37, %v955_v12 }
 0x404   : > { %v3183_v57 = vpop.f32.mrb[149].mxu0  ;;  %v12871_v7 = vadd.f32 -1e+30, %v3181_v54  ;;  %v12882_v54 = vsel %vm1172_vm13, 0.0, %v16734_v53  ;;  %vm1176_vm5 = vmand %vm1016_vm2, %vm1112_vm4 }
 0x405   : > { %3292 = vmax.xlane.f32.xlu1 %v3291_v15  ;;  %v12875_v62 = vadd.f32 %v3183_v57, %v12869_v48  ;;  %16769 = vst [vmem:[#allocation151_spill] sm:$0xff] %v12882_v54  ;;  %v956_v15 = vand.u32 7, %v923_v10  ;;  %vm1114_vm7 = vcmp.ge.s32.totalorder %v12717_v61, %v1051_v19  ;;  %v12906_v12 = vsel %vm1176_vm5, 0.0, %v16734_v53 }
 0x406   : > { %16771 = vst [vmem:[#allocation153_spill] sm:$0xff] %v12906_v12  ;;  %vm1178_vm8 = vmand %vm1018_vm6, %vm1114_vm7 }
 0x407   : > { %v3187_v36 = vpop.f32.mrb[150].mxu0  ;;  %v3294_v56 = vmax.f32 %v12871_v7, %v12875_v62  ;;  %v1052_v29 = vsub.s32 %v923_v10, %v956_v15  ;;  %v12918_v15 = vsel %vm1178_vm8, 0.0, %v16734_v53 }
 0x408   : > { %v3189_v28 = vpop.f32.mrb[151].mxu0  ;;  %v12884_v9 = vadd.f32 -1e+30, %v3187_v36  ;;  %16773 = vst [vmem:[#allocation155_spill] sm:$0xff] %v12918_v15 }
 0x409   : > { %3295 = vmax.xlane.f32.xlu1 %v3294_v56  ;;  %v12887_v5 = vadd.f32 %v3189_v28, %v12882_v54  ;;  %vm1116_vm10 = vcmp.ge.s32.totalorder %v12717_v61, %v1052_v29 }
 0x40a   : > { %vm1180_vm11 = vmand %vm1020_vm9, %vm1116_vm10 }
 0x40b   : > { %v3193_v57 = vpop.f32.mrb[152].mxu0  ;;  %v3297_v4 = vmax.f32 %v12884_v9, %v12887_v5  ;;  %v12928_v61 = vsel %vm1180_vm11, 0.0, %v16734_v53 }
 0x40c   : > { %v3195_v36 = vpop.f32.mrb[153].mxu0  ;;  %v12896_v48 = vadd.f32 -1e+30, %v3193_v57  ;;  %16776 = vst [vmem:[#allocation158_spill] sm:$0xff] %v12928_v61 }
 0x40d   : > { %3298 = vmax.xlane.f32.xlu1 %v3297_v4  ;;  %v12899_v56 = vadd.f32 %v3195_v36, %v12894_v41 }
 0x40f   : > { %v3199_v28 = vpop.f32.mrb[154].mxu0  ;;  %v3300_v59 = vmax.f32 %v12896_v48, %v12899_v56 }
 0x410   : > { %v3201_v54 = vpop.f32.mrb[155].mxu0  ;;  %v12908_v57 = vadd.f32 -1e+30, %v3199_v28 }
 0x411   : > { %3301 = vmax.xlane.f32.xlu1 %v3300_v59  ;;  %v12911_v4 = vadd.f32 %v3201_v54, %v12906_v12 }
 0x413   : > { %16772 = vst [vmem:[#allocation154_spill] sm:$0xff] %v12911_v4  ;;  %v3205_v37 = vpop.f32.mrb[156].mxu0  ;;  %v3303_v19 = vmax.f32 %v12908_v57, %v12911_v4 }
 0x414   : > { %v3207_v36 = vpop.f32.mrb[157].mxu0  ;;  %v12920_v41 = vadd.f32 -1e+30, %v3205_v37 }
 0x415   : > { %3304 = vmax.xlane.f32.xlu1 %v3303_v19  ;;  %v12923_v28 = vadd.f32 %v3207_v36, %v12918_v15 }
 0x416   : > { %16774 = vst [vmem:[#allocation156_spill] sm:$0xff] %v12920_v41 }
 0x417   : > { %16775 = vst [vmem:[#allocation157_spill] sm:$0xff] %v12923_v28  ;;  %v3211_v54 = vpop.f32.mrb[158].mxu0  ;;  %v3306_v10 = vmax.f32 %v12920_v41, %v12923_v28 }
 0x418   : > { %v3213_v29 = vpop.f32.mrb[159].mxu0  ;;  %v12930_v59 = vadd.f32 -1e+30, %v3211_v54 }
 0x419   : > { %3307 = vmax.xlane.f32.xlu1 %v3306_v10  ;;  %v12933_v12 = vadd.f32 %v3213_v29, %v12928_v61 }
 0x41b   : > { %16777 = vst [vmem:[#allocation159_spill] sm:$0xff] %v12933_v12  ;;  %v3309_v37 = vmax.f32 %v12930_v59, %v12933_v12 }
 0x41d   : > { %3310 = vmax.xlane.f32.xlu1 %v3309_v37 }
 0x42e   : > { %v3218_v19 = vpop.xlane.xlu0 %3217 }
 0x42f   : > { %v3312_v36 = vsub.f32 %v12532_v38, %v3218_v19  ;;  %v3313_v15 = vsub.f32 %v12536_v42, %v3218_v19 }
 0x431   : > { %v3376_v28 = vmul.f32 1.442695, %v3312_v36  ;;  %v3378_v41 = vmul.f32 1.442695, %v3313_v15 }
 0x432   : > { %v3221_v53 = vpop.xlane.xlu1 %3220 }
 0x433   : > { %10384 = vpow2.f32 %v3376_v28  ;;  %v3314_v54 = vsub.f32 %v12546_v20, %v3221_v53  ;;  %v3315_v10 = vsub.f32 %v12550_v33, %v3221_v53 }
 0x434   : > { %10386 = vpow2.f32 %v3378_v41 }
 0x435   : > { %v3380_v29 = vmul.f32 1.442695, %v3314_v54  ;;  %v3382_v61 = vmul.f32 1.442695, %v3315_v10 }
 0x436   : > { %v3224_v4 = vpop.xlane.xlu0 %3223 }
 0x437   : > { %10388 = vpow2.f32 %v3380_v29  ;;  %v3316_v37 = vsub.f32 %v12560_v32, %v3224_v4  ;;  %v3317_v12 = vsub.f32 %v12563_v3, %v3224_v4 }
 0x438   : > { %10390 = vpow2.f32 %v3382_v61 }
 0x439   : > { %v3384_v38 = vmul.f32 1.442695, %v3316_v37  ;;  %v3386_v42 = vmul.f32 1.442695, %v3317_v12 }
 0x43a   : > { %v3227_v19 = vpop.xlane.xlu0 %3226 }
 0x43b   : > { %10392 = vpow2.f32 %v3384_v38  ;;  %v3318_v15 = vsub.f32 %v12573_v26, %v3227_v19  ;;  %v3319_v20 = vsub.f32 %v12576_v43, %v3227_v19 }
 0x43c   : > { %10394 = vpow2.f32 %v3386_v42 }
 0x43d   : > { %v12945_v33 = vpop.eup %10384  ;;  %v3388_v41 = vmul.f32 1.442695, %v3318_v15  ;;  %v3390_v28 = vmul.f32 1.442695, %v3319_v20 }
 0x43e   : > { %v12947_v36 = vpop.eup %10386  ;;  %v3230_v53 = vpop.xlane.xlu1 %3229 }
 0x43f   : > { %10396 = vpow2.f32 %v3388_v41  ;;  %v3320_v3 = vsub.f32 %v12585_v24, %v3230_v53  ;;  %v3321_v32 = vsub.f32 %v12589_v2, %v3230_v53  ;;  %v3504_v12 = vadd.f32 %v12947_v36, %v12945_v33 }
 0x440   : > { %10398 = vpow2.f32 %v3390_v28 }
 0x441   : > { %v12953_v26 = vpop.eup %10388  ;;  %v3392_v43 = vmul.f32 1.442695, %v3320_v3  ;;  %v3394_v4 = vmul.f32 1.442695, %v3321_v32  ;;  %3505 = vadd.xlane.f32.xlu0 %v3504_v12 }
 0x442   : > { %v12955_v61 = vpop.eup %10390  ;;  %v3233_v54 = vpop.xlane.xlu0 %3232 }
 0x443   : > { %10400 = vpow2.f32 %v3392_v43  ;;  %v3322_v10 = vsub.f32 %v12598_v58, %v3233_v54  ;;  %v3323_v29 = vsub.f32 %v12602_v52, %v3233_v54  ;;  %v3507_v24 = vadd.f32 %v12955_v61, %v12953_v26 }
 0x444   : > { %10402 = vpow2.f32 %v3394_v4 }
 0x445   : > { %v12961_v2 = vpop.eup %10392  ;;  %v3396_v37 = vmul.f32 1.442695, %v3322_v10  ;;  %v3398_v38 = vmul.f32 1.442695, %v3323_v29  ;;  %3508 = vadd.xlane.f32.xlu0 %v3507_v24 }
 0x446   : > { %v12963_v42 = vpop.eup %10394  ;;  %v3236_v19 = vpop.xlane.xlu1 %3235 }
 0x447   : > { %10404 = vpow2.f32 %v3396_v37  ;;  %v3324_v15 = vsub.f32 %v12612_v44, %v3236_v19  ;;  %v3325_v20 = vsub.f32 %v12615_v16, %v3236_v19  ;;  %v3510_v58 = vadd.f32 %v12963_v42, %v12961_v2 }
 0x448   : > { %10406 = vpow2.f32 %v3398_v38 }
 0x449   : > { %v12969_v52 = vpop.eup %10396  ;;  %v3400_v41 = vmul.f32 1.442695, %v3324_v15  ;;  %v3402_v28 = vmul.f32 1.442695, %v3325_v20  ;;  %3511 = vadd.xlane.f32.xlu0 %v3510_v58 }
 0x44a   : > { %v12971_v53 = vpop.eup %10398  ;;  %v3239_v3 = vpop.xlane.xlu0 %3238 }
 0x44b   : > { %10408 = vpow2.f32 %v3400_v41  ;;  %v3326_v32 = vsub.f32 %v12625_v8, %v3239_v3  ;;  %v3327_v12 = vsub.f32 %v12628_v47, %v3239_v3  ;;  %v3513_v16 = vadd.f32 %v12971_v53, %v12969_v52 }
 0x44c   : > { %10410 = vpow2.f32 %v3402_v28 }
 0x44d   : > { %v12977_v44 = vpop.eup %10400  ;;  %v3404_v43 = vmul.f32 1.442695, %v3326_v32  ;;  %v3406_v4 = vmul.f32 1.442695, %v3327_v12  ;;  %3514 = vadd.xlane.f32.xlu0 %v3513_v16 }
 0x44e   : > { %v12979_v54 = vpop.eup %10402  ;;  %v3242_v10 = vpop.xlane.xlu1 %3241 }
 0x44f   : > { %10412 = vpow2.f32 %v3404_v43  ;;  %v3328_v29 = vsub.f32 %v12637_v49, %v3242_v10  ;;  %v3329_v24 = vsub.f32 %v12641_v21, %v3242_v10  ;;  %v3516_v47 = vadd.f32 %v12979_v54, %v12977_v44 }
 0x450   : > { %10414 = vpow2.f32 %v3406_v4 }
 0x451   : > { %v12985_v8 = vpop.eup %10404  ;;  %v3408_v37 = vmul.f32 1.442695, %v3328_v29  ;;  %v3410_v38 = vmul.f32 1.442695, %v3329_v24  ;;  %3517 = vadd.xlane.f32.xlu0 %v3516_v47 }
 0x452   : > { %v12987_v19 = vpop.eup %10406  ;;  %v3245_v15 = vpop.xlane.xlu0 %3244 }
 0x453   : > { %10416 = vpow2.f32 %v3408_v37  ;;  %v3330_v20 = vsub.f32 %v12650_v46, %v3245_v15  ;;  %v3331_v58 = vsub.f32 %v12654_v55, %v3245_v15  ;;  %v3519_v49 = vadd.f32 %v12987_v19, %v12985_v8 }
 0x454   : > { %10418 = vpow2.f32 %v3410_v38 }
 0x455   : > { %v12993_v21 = vpop.eup %10408  ;;  %v3412_v41 = vmul.f32 1.442695, %v3330_v20  ;;  %v3414_v28 = vmul.f32 1.442695, %v3331_v58  ;;  %3520 = vadd.xlane.f32.xlu0 %v3519_v49 }
 0x456   : > { %v12995_v3 = vpop.eup %10410  ;;  %v3248_v32 = vpop.xlane.xlu1 %3247 }
 0x457   : > { %10420 = vpow2.f32 %v3412_v41  ;;  %v3332_v12 = vsub.f32 %v12664_v34, %v3248_v32  ;;  %v3333_v16 = vsub.f32 %v12667_v60, %v3248_v32  ;;  %v3522_v46 = vadd.f32 %v12995_v3, %v12993_v21 }
 0x458   : > { %10422 = vpow2.f32 %v3414_v28 }
 0x459   : > { %v13001_v55 = vpop.eup %10412  ;;  %v3416_v43 = vmul.f32 1.442695, %v3332_v12  ;;  %v3418_v4 = vmul.f32 1.442695, %v3333_v16  ;;  %3523 = vadd.xlane.f32.xlu0 %v3522_v46 }
 0x45a   : > { %v13003_v10 = vpop.eup %10414  ;;  %v3251_v29 = vpop.xlane.xlu0 %3250 }
 0x45b   : > { %10424 = vpow2.f32 %v3416_v43  ;;  %v3334_v24 = vsub.f32 %v12676_v39, %v3251_v29  ;;  %v3335_v47 = vsub.f32 %v12679_v30, %v3251_v29  ;;  %v3525_v60 = vadd.f32 %v13003_v10, %v13001_v55 }
 0x45c   : > { %10426 = vpow2.f32 %v3418_v4 }
 0x45d   : > { %v13009_v34 = vpop.eup %10416  ;;  %v3420_v37 = vmul.f32 1.442695, %v3334_v24  ;;  %v3422_v38 = vmul.f32 1.442695, %v3335_v47  ;;  %3526 = vadd.xlane.f32.xlu0 %v3525_v60 }
 0x45e   : > { %v13011_v15 = vpop.eup %10418  ;;  %v3254_v20 = vpop.xlane.xlu1 %3253 }
 0x45f   : > { %10428 = vpow2.f32 %v3420_v37  ;;  %v3336_v58 = vsub.f32 %v12687_v63, %v3254_v20  ;;  %v3337_v49 = vsub.f32 %v12691_v27, %v3254_v20  ;;  %v3528_v39 = vadd.f32 %v13011_v15, %v13009_v34 }
 0x460   : > { %10430 = vpow2.f32 %v3422_v38 }
 0x461   : > { %v13017_v30 = vpop.eup %10420  ;;  %v3424_v41 = vmul.f32 1.442695, %v3336_v58  ;;  %v3426_v28 = vmul.f32 1.442695, %v3337_v49  ;;  %3529 = vadd.xlane.f32.xlu0 %v3528_v39 }
 0x462   : > { %v13019_v32 = vpop.eup %10422  ;;  %v3257_v12 = vpop.xlane.xlu0 %3256 }
 0x463   : > { %10432 = vpow2.f32 %v3424_v41  ;;  %v3338_v16 = vsub.f32 %v12700_v23, %v3257_v12  ;;  %v3339_v46 = vsub.f32 %v12704_v18, %v3257_v12  ;;  %v3531_v63 = vadd.f32 %v13019_v32, %v13017_v30 }
 0x464   : > { %10434 = vpow2.f32 %v3426_v28 }
 0x465   : > { %v13025_v27 = vpop.eup %10424  ;;  %v3428_v43 = vmul.f32 1.442695, %v3338_v16  ;;  %v3430_v4 = vmul.f32 1.442695, %v3339_v46  ;;  %3532 = vadd.xlane.f32.xlu0 %v3531_v63 }
 0x466   : > { %v13027_v29 = vpop.eup %10426  ;;  %v3260_v24 = vpop.xlane.xlu1 %3259 }
 0x467   : > { %10436 = vpow2.f32 %v3428_v43  ;;  %v3340_v47 = vsub.f32 %v12713_v17, %v3260_v24  ;;  %v3341_v60 = vsub.f32 %v12719_v45, %v3260_v24  ;;  %v3534_v23 = vadd.f32 %v13027_v29, %v13025_v27 }
 0x468   : > { %10438 = vpow2.f32 %v3430_v4 }
 0x469   : > { %v13033_v18 = vpop.eup %10428  ;;  %v3432_v37 = vmul.f32 1.442695, %v3340_v47  ;;  %v3434_v38 = vmul.f32 1.442695, %v3341_v60  ;;  %3535 = vadd.xlane.f32.xlu1 %v3534_v23 }
 0x46a   : > { %v13035_v20 = vpop.eup %10430  ;;  %v3263_v58 = vpop.xlane.xlu0 %3262 }
 0x46b   : > { %10440 = vpow2.f32 %v3432_v37  ;;  %v3342_v49 = vsub.f32 %v12728_v11, %v3263_v58  ;;  %v3343_v39 = vsub.f32 %v12732_v40, %v3263_v58  ;;  %v3537_v17 = vadd.f32 %v13035_v20, %v13033_v18 }
 0x46c   : > { %10442 = vpow2.f32 %v3434_v38 }
 0x46d   : > { %v13041_v45 = vpop.eup %10432  ;;  %v3436_v41 = vmul.f32 1.442695, %v3342_v49  ;;  %v3438_v28 = vmul.f32 1.442695, %v3343_v39  ;;  %3538 = vadd.xlane.f32.xlu0 %v3537_v17 }
 0x46e   : > { %v13043_v12 = vpop.eup %10434  ;;  %v3266_v16 = vpop.xlane.xlu1 %3265 }
 0x46f   : > { %10444 = vpow2.f32 %v3436_v41  ;;  %v3344_v46 = vsub.f32 %v12741_v6, %v3266_v16  ;;  %v3345_v63 = vsub.f32 %v12745_v1, %v3266_v16  ;;  %v3540_v11 = vadd.f32 %v13043_v12, %v13041_v45 }
 0x470   : > { %10446 = vpow2.f32 %v3438_v28 }
 0x471   : > { %v13049_v40 = vpop.eup %10436  ;;  %v3440_v43 = vmul.f32 1.442695, %v3344_v46  ;;  %v3442_v4 = vmul.f32 1.442695, %v3345_v63  ;;  %3541 = vadd.xlane.f32.xlu1 %v3540_v11 }
 0x472   : > { %v13051_v24 = vpop.eup %10438  ;;  %v3269_v47 = vpop.xlane.xlu0 %3268 }
 0x473   : > { %10448 = vpow2.f32 %v3440_v43  ;;  %v3346_v60 = vsub.f32 %v12754_v35, %v3269_v47  ;;  %v3347_v23 = vsub.f32 %v12758_v13, %v3269_v47  ;;  %v3543_v6 = vadd.f32 %v13051_v24, %v13049_v40 }
 0x474   : > { %10450 = vpow2.f32 %v3442_v4 }
 0x475   : > { %v13057_v1 = vpop.eup %10440  ;;  %v3444_v37 = vmul.f32 1.442695, %v3346_v60  ;;  %v3446_v38 = vmul.f32 1.442695, %v3347_v23  ;;  %3544 = vadd.xlane.f32.xlu0 %v3543_v6 }
 0x476   : > { %v13059_v58 = vpop.eup %10442  ;;  %v3272_v49 = vpop.xlane.xlu1 %3271 }
 0x477   : > { %10452 = vpow2.f32 %v3444_v37  ;;  %v3348_v39 = vsub.f32 %v12767_v50, %v3272_v49  ;;  %v3349_v17 = vsub.f32 %v12771_v51, %v3272_v49  ;;  %v3546_v35 = vadd.f32 %v13059_v58, %v13057_v1 }
 0x478   : > { %10454 = vpow2.f32 %v3446_v38 }
 0x479   : > { %v13065_v13 = vpop.eup %10444  ;;  %v3448_v41 = vmul.f32 1.442695, %v3348_v39  ;;  %v3450_v28 = vmul.f32 1.442695, %v3349_v17  ;;  %3547 = vadd.xlane.f32.xlu1 %v3546_v35  ;;  %v16778_v35 = vld [vmem:[#allocation137_spill] sm:$0xff] }
 0x47a   : > { %v13067_v16 = vpop.eup %10446  ;;  %v3275_v46 = vpop.xlane.xlu0 %3274 }
 0x47b   : > { %10456 = vpow2.f32 %v3448_v41  ;;  %v3350_v63 = vsub.f32 %v12780_v22, %v3275_v46  ;;  %v3351_v11 = vsub.f32 %v12784_v31, %v3275_v46  ;;  %v3549_v50 = vadd.f32 %v13067_v16, %v13065_v13 }
 0x47c   : > { %10458 = vpow2.f32 %v3450_v28 }
 0x47d   : > { %v13073_v51 = vpop.eup %10448  ;;  %v3452_v43 = vmul.f32 1.442695, %v3350_v63  ;;  %v3454_v4 = vmul.f32 1.442695, %v3351_v11  ;;  %3550 = vadd.xlane.f32.xlu0 %v3549_v50  ;;  %v16779_v50 = vld [vmem:[#allocation139_spill] sm:$0xff] }
 0x47e   : > { %v13075_v47 = vpop.eup %10450  ;;  %v3278_v60 = vpop.xlane.xlu1 %3277 }
 0x47f   : > { %10460 = vpow2.f32 %v3452_v43  ;;  %v3352_v23 = vsub.f32 %v12793_v25, %v3278_v60  ;;  %v3353_v6 = vsub.f32 %v12797_v0, %v3278_v60  ;;  %v3552_v22 = vadd.f32 %v13075_v47, %v13073_v51 }
 0x480   : > { %10462 = vpow2.f32 %v3454_v4  ;;  %v16780_v4 = vld [vmem:[#allocation140_spill] sm:$0xff] }
 0x481   : > { %v13081_v31 = vpop.eup %10452  ;;  %v3456_v37 = vmul.f32 1.442695, %v3352_v23  ;;  %v3458_v38 = vmul.f32 1.442695, %v3353_v6  ;;  %3553 = vadd.xlane.f32.xlu1 %v3552_v22 }
 0x482   : > { %v13083_v49 = vpop.eup %10454  ;;  %v3281_v39 = vpop.xlane.xlu0 %3280 }
 0x483   : > { %10464 = vpow2.f32 %v3456_v37  ;;  %v3354_v17 = vsub.f32 %v12806_v14, %v3281_v39  ;;  %v3355_v41 = vsub.f32 %v16778_v35, %v3281_v39  ;;  %v3555_v25 = vadd.f32 %v13083_v49, %v13081_v31  ;;  %v16783_v39 = vld [vmem:[#allocation142_spill] sm:$0xff]  ;;  %v16784_v35 = vld [vmem:[#allocation143_spill] sm:$0xff] }
 0x484   : > { %10466 = vpow2.f32 %v3458_v38 }
 0x485   : > { %v13089_v0 = vpop.eup %10456  ;;  %v3460_v28 = vmul.f32 1.442695, %v3354_v17  ;;  %v3462_v46 = vmul.f32 1.442695, %v3355_v41  ;;  %3556 = vadd.xlane.f32.xlu0 %v3555_v25 }
 0x486   : > { %v13091_v63 = vpop.eup %10458  ;;  %v3284_v11 = vpop.xlane.xlu1 %3283 }
 0x487   : > { %10468 = vpow2.f32 %v3460_v28  ;;  %v3356_v43 = vsub.f32 %v16779_v50, %v3284_v11  ;;  %v3357_v60 = vsub.f32 %v16780_v4, %v3284_v11  ;;  %v3558_v14 = vadd.f32 %v13091_v63, %v13089_v0  ;;  %v16785_v4 = vld [vmem:[#allocation145_spill] sm:$0xff] }
 0x488   : > { %10470 = vpow2.f32 %v3462_v46 }
 0x489   : > { %v13097_v23 = vpop.eup %10460  ;;  %v3464_v6 = vmul.f32 1.442695, %v3356_v43  ;;  %v3466_v22 = vmul.f32 1.442695, %v3357_v60  ;;  %3559 = vadd.xlane.f32.xlu1 %v3558_v14  ;;  %v16786_v14 = vld [vmem:[#allocation146_spill] sm:$0xff] }
 0x48a   : > { %16781 = vst [vmem:[#allocation137_spill] sm:$0xff] %v13097_v23  ;;  %v13099_v37 = vpop.eup %10462  ;;  %v3287_v38 = vpop.xlane.xlu1 %3286 }
 0x48b   : > { %16782 = vst [vmem:[#allocation139_spill] sm:$0xff] %v13099_v37  ;;  %10472 = vpow2.f32 %v3464_v6  ;;  %v3358_v17 = vsub.f32 %v16783_v39, %v3287_v38  ;;  %v3359_v41 = vsub.f32 %v16784_v35, %v3287_v38  ;;  %v3561_v25 = vadd.f32 %v13099_v37, %v13097_v23 }
 0x48c   : > { %10474 = vpow2.f32 %v3466_v22 }
 0x48d   : > { %v13105_v28 = vpop.eup %10464  ;;  %v3468_v46 = vmul.f32 1.442695, %v3358_v17  ;;  %v3470_v11 = vmul.f32 1.442695, %v3359_v41  ;;  %3562 = vadd.xlane.f32.xlu0 %v3561_v25  ;;  %v16788_v25 = vld [vmem:[#allocation148_spill] sm:$0xff] }
 0x48e   : > { %v13107_v50 = vpop.eup %10466  ;;  %v3290_v43 = vpop.xlane.xlu1 %3289 }
 0x48f   : > { %10476 = vpow2.f32 %v3468_v46  ;;  %v3360_v60 = vsub.f32 %v16785_v4, %v3290_v43  ;;  %v3361_v6 = vsub.f32 %v16786_v14, %v3290_v43  ;;  %v3564_v38 = vadd.f32 %v13107_v50, %v13105_v28  ;;  %v16789_v46 = vld [vmem:[#allocation149_spill] sm:$0xff] }
 0x490   : > { %10478 = vpow2.f32 %v3470_v11 }
 0x491   : > { %v13113_v39 = vpop.eup %10468  ;;  %v3472_v22 = vmul.f32 1.442695, %v3360_v60  ;;  %v3474_v35 = vmul.f32 1.442695, %v3361_v6  ;;  %3565 = vadd.xlane.f32.xlu1 %v3564_v38 }
 0x492   : > { %16787 = vst [vmem:[#allocation140_spill] sm:$0xff] %v13113_v39  ;;  %v13115_v17 = vpop.eup %10470  ;;  %v3293_v41 = vpop.xlane.xlu1 %3292 }
 0x493   : > { %10480 = vpow2.f32 %v3472_v22  ;;  %v3362_v23 = vsub.f32 %v16788_v25, %v3293_v41  ;;  %v3363_v37 = vsub.f32 %v16789_v46, %v3293_v41  ;;  %v3567_v43 = vadd.f32 %v13115_v17, %v13113_v39  ;;  %v16905_v39 = vld [vmem:[#allocation90_spill] sm:$0xff] }
 0x494   : > { %10482 = vpow2.f32 %v3474_v35 }
 0x495   : > { %v13121_v4 = vpop.eup %10472  ;;  %v3476_v11 = vmul.f32 1.442695, %v3362_v23  ;;  %v3478_v14 = vmul.f32 1.442695, %v3363_v37  ;;  %3568 = vadd.xlane.f32.xlu0 %v3567_v43 }
 0x496   : > { %16790 = vst [vmem:[#allocation142_spill] sm:$0xff] %v13121_v4  ;;  %v13123_v60 = vpop.eup %10474  ;;  %v3296_v6 = vpop.xlane.xlu1 %3295 }
 0x497   : > { %16791 = vst [vmem:[#allocation143_spill] sm:$0xff] %v13123_v60  ;;  %10484 = vpow2.f32 %v3476_v11  ;;  %v3364_v38 = vsub.f32 %v12871_v7, %v3296_v6  ;;  %v3365_v22 = vsub.f32 %v12875_v62, %v3296_v6  ;;  %v3570_v41 = vadd.f32 %v13123_v60, %v13121_v4 }
 0x498   : > { %10486 = vpow2.f32 %v3478_v14 }
 0x499   : > { %v13129_v25 = vpop.eup %10476  ;;  %v3480_v35 = vmul.f32 1.442695, %v3364_v38  ;;  %v3482_v46 = vmul.f32 1.442695, %v3365_v22  ;;  %3571 = vadd.xlane.f32.xlu1 %v3570_v41 }
 0x49a   : > { %16792 = vst [vmem:[#allocation145_spill] sm:$0xff] %v13129_v25  ;;  %v13131_v23 = vpop.eup %10478  ;;  %v3299_v37 = vpop.xlane.xlu1 %3298 }
 0x49b   : > { %16793 = vst [vmem:[#allocation146_spill] sm:$0xff] %v13131_v23  ;;  %10488 = vpow2.f32 %v3480_v35  ;;  %v3366_v43 = vsub.f32 %v12884_v9, %v3299_v37  ;;  %v3367_v11 = vsub.f32 %v12887_v5, %v3299_v37  ;;  %v3573_v7 = vadd.f32 %v13131_v23, %v13129_v25 }
 0x49c   : > { %10490 = vpow2.f32 %v3482_v46 }
 0x49d   : > { %v13137_v62 = vpop.eup %10480  ;;  %v3484_v14 = vmul.f32 1.442695, %v3366_v43  ;;  %v3486_v6 = vmul.f32 1.442695, %v3367_v11  ;;  %3574 = vadd.xlane.f32.xlu0 %v3573_v7  ;;  %v8304_v7 = vld [vmem:[%s16233_s3 + $0x40] sm:$0xff] }
 0x49e   : > { %16794 = vst [vmem:[#allocation148_spill] sm:$0xff] %v13137_v62  ;;  %v13139_v38 = vpop.eup %10482  ;;  %v3302_v22 = vpop.xlane.xlu1 %3301 }
 0x49f   : > { %16795 = vst [vmem:[#allocation149_spill] sm:$0xff] %v13139_v38  ;;  %10492 = vpow2.f32 %v3484_v14  ;;  %v3368_v41 = vsub.f32 %v12896_v48, %v3302_v22  ;;  %v3369_v35 = vsub.f32 %v12899_v56, %v3302_v22  ;;  %v3576_v9 = vadd.f32 %v13139_v38, %v13137_v62  ;;  %v8305_v48 = vld [vmem:[%s16233_s3 + $0x48] sm:$0xff]  ;;  %v16798_v14 = vld [vmem:[#allocation154_spill] sm:$0xff] }
 0x4a0   : > { %10494 = vpow2.f32 %v3486_v6 }
 0x4a1   : > { %v13145_v5 = vpop.eup %10484  ;;  %v3488_v46 = vmul.f32 1.442695, %v3368_v41  ;;  %v3490_v37 = vmul.f32 1.442695, %v3369_v35  ;;  %3577 = vadd.xlane.f32.xlu1 %v3576_v9  ;;  %v13159_v41 = vpack.c.bf16 %v8305_v48, %v8304_v7 }
 0x4a2   : > { %16796 = vst [vmem:[#allocation160_spill] sm:$0xff] %v13145_v5  ;;  %v13147_v43 = vpop.eup %10486  ;;  %v3305_v11 = vpop.xlane.xlu1 %3304 }
 0x4a3   : > { %16797 = vst [vmem:[#allocation161_spill] sm:$0xff] %v13147_v43  ;;  %10496 = vpow2.f32 %v3488_v46  ;;  %v3370_v56 = vsub.f32 %v12908_v57, %v3305_v11  ;;  %v3371_v6 = vsub.f32 %v16798_v14, %v3305_v11  ;;  %v3579_v22 = vadd.f32 %v13147_v43, %v13145_v5  ;;  %10139 = vmatprep.subr.bf16.mxu1 %v13159_v41  ;;  %v16801_v57 = vld [vmem:[#allocation156_spill] sm:$0xff]  ;;  %v16802_v11 = vld [vmem:[#allocation157_spill] sm:$0xff] }
 0x4a4   : > { %10498 = vpow2.f32 %v3490_v37 }
 0x4a5   : > { %v13161_v35 = vpop.eup %10488  ;;  %v3492_v9 = vmul.f32 1.442695, %v3370_v56  ;;  %v3494_v62 = vmul.f32 1.442695, %v3371_v6  ;;  %3580 = vadd.xlane.f32.xlu0 %v3579_v22 }
 0x4a6   : > { %16799 = vst [vmem:[#allocation154_spill] sm:$0xff] %v13161_v35  ;;  %v13163_v38 = vpop.eup %10490  ;;  %v3308_v25 = vpop.xlane.xlu1 %3307 }
 0x4a7   : > { %16800 = vst [vmem:[#allocation162_spill] sm:$0xff] %v13163_v38  ;;  %10500 = vpow2.f32 %v3492_v9  ;;  %v3372_v46 = vsub.f32 %v16801_v57, %v3308_v25  ;;  %v3373_v14 = vsub.f32 %v16802_v11, %v3308_v25  ;;  %v3582_v37 = vadd.f32 %v13163_v38, %v13161_v35  ;;  %v16805_v9 = vld [vmem:[#allocation159_spill] sm:$0xff] }
 0x4a8   : > { %10502 = vpow2.f32 %v3494_v62  ;;  %v16834_v38 = vld [vmem:[#allocation119_spill] sm:$0xff] }
 0x4a9   : > { %v13170_v7 = vpop.eup %10492  ;;  %v3496_v48 = vmul.f32 1.442695, %v3372_v46  ;;  %v3498_v56 = vmul.f32 1.442695, %v3373_v14  ;;  %3583 = vadd.xlane.f32.xlu1 %v3582_v37 }
 0x4aa   : > { %16803 = vst [vmem:[#allocation156_spill] sm:$0xff] %v13170_v7  ;;  %v13172_v6 = vpop.eup %10494  ;;  %v3311_v22 = vpop.xlane.xlu1 %3310 }
 0x4ab   : > { %16804 = vst [vmem:[#allocation157_spill] sm:$0xff] %v13172_v6  ;;  %10504 = vpow2.f32 %v3496_v48  ;;  %v3374_v5 = vsub.f32 %v12930_v59, %v3311_v22  ;;  %v3375_v43 = vsub.f32 %v16805_v9, %v3311_v22  ;;  %v3585_v25 = vadd.f32 %v13172_v6, %v13170_v7  ;;  %v16812_v22 = vld [vmem:[#allocation115_spill] sm:$0xff] }
 0x4ac   : > { %10506 = vpow2.f32 %v3498_v56  ;;  %v16813_v9 = vld [vmem:[#allocation51_spill] sm:$0xff] }
 0x4ad   : > { %v13178_v57 = vpop.eup %10496  ;;  %v3500_v62 = vmul.f32 1.442695, %v3374_v5  ;;  %v3502_v11 = vmul.f32 1.442695, %v3375_v43  ;;  %3586 = vadd.xlane.f32.xlu0 %v3585_v25  ;;  %v13198_v25 = vadd.f32 %v16813_v9, %v16812_v22  ;;  %v16827_v9 = vld [vmem:[#allocation56_spill] sm:$0xff] }
 0x4ae   : > { %16806 = vst [vmem:[#allocation159_spill] sm:$0xff] %v13178_v57  ;;  %v13180_v46 = vpop.eup %10498  ;;  %v13219_v22 = vadd.f32 -1e+30, %v16827_v9  ;;  %v16832_v9 = vld [vmem:[#allocation58_spill] sm:$0xff] }
 0x4af   : > { %16807 = vst [vmem:[#allocation163_spill] sm:$0xff] %v13180_v46  ;;  %10508 = vpow2.f32 %v3500_v62  ;;  %v3588_v14 = vadd.f32 %v13180_v46, %v13178_v57  ;;  %16814 = vst [vmem:[#allocation51_spill] sm:$0xff] %v13198_v25  ;;  %v16815_v62 = vld [vmem:[#allocation52_spill] sm:$0xff]  ;;  %v16822_v46 = vld [vmem:[#allocation54_spill] sm:$0xff]  ;;  %v13234_v35 = vadd.f32 -1e+30, %v16832_v9 }
 0x4b0   : > { %10510 = vpow2.f32 %v3502_v11  ;;  %v13201_v11 = vadd.f32 -1e+30, %v16815_v62  ;;  %v13212_v7 = vadd.f32 -1e+30, %v16822_v46  ;;  %16828 = vst [vmem:[#allocation56_spill] sm:$0xff] %v13219_v22 }
 0x4b1   : > { %v13184_v37 = vpop.eup %10500  ;;  %3589 = vadd.xlane.f32.xlu1 %v3588_v14  ;;  %16833 = vst [vmem:[#allocation58_spill] sm:$0xff] %v13234_v35 }
 0x4b2   : > { %16808 = vst [vmem:[#allocation164_spill] sm:$0xff] %v13184_v37  ;;  %v13186_v59 = vpop.eup %10502  ;;  %16816 = vst [vmem:[#allocation52_spill] sm:$0xff] %v13201_v11  ;;  %v1924_v62 = vmax.f32 %v13198_v25, %v13201_v11  ;;  %v16835_v11 = vld [vmem:[#allocation59_spill] sm:$0xff] }
 0x4b3   : > { %16809 = vst [vmem:[#allocation165_spill] sm:$0xff] %v13186_v59  ;;  %v3591_v48 = vadd.f32 %v13186_v59, %v13184_v37  ;;  %v16819_v37 = vld [vmem:[#allocation116_spill] sm:$0xff]  ;;  %v16820_v59 = vld [vmem:[#allocation53_spill] sm:$0xff]  ;;  %16823 = vst [vmem:[#allocation54_spill] sm:$0xff] %v13212_v7  ;;  %v13238_v25 = vadd.f32 %v16835_v11, %v16834_v38 }
 0x4b4   : > { %v16855_v38 = vld [vmem:[#allocation67_spill] sm:$0xff] }
 0x4b5   : > { %v13190_v56 = vpop.eup %10504  ;;  %3592 = vadd.xlane.f32.xlu0 %v3591_v48  ;;  %v13209_v48 = vadd.f32 %v16820_v59, %v16819_v37  ;;  %v16829_v37 = vld [vmem:[#allocation118_spill] sm:$0xff]  ;;  %16836 = vst [vmem:[#allocation59_spill] sm:$0xff] %v13238_v25 }
 0x4b6   : > { %16810 = vst [vmem:[#allocation166_spill] sm:$0xff] %v13190_v56  ;;  %v13192_v5 = vpop.eup %10506 }
 0x4b7   : > { %16811 = vst [vmem:[#allocation167_spill] sm:$0xff] %v13192_v5  ;;  %v3594_v43 = vadd.f32 %v13192_v5, %v13190_v56  ;;  %16821 = vst [vmem:[#allocation53_spill] sm:$0xff] %v13209_v48  ;;  %v16824_v56 = vld [vmem:[#allocation117_spill] sm:$0xff]  ;;  %v16825_v5 = vld [vmem:[#allocation55_spill] sm:$0xff]  ;;  %v1927_v46 = vmax.f32 %v13209_v48, %v13212_v7 }
 0x4b8   : > { %v13216_v6 = vadd.f32 %v16825_v5, %v16824_v56  ;;  %v16830_v5 = vld [vmem:[#allocation57_spill] sm:$0xff]  ;;  %v16842_v7 = vld [vmem:[#allocation62_spill] sm:$0xff]  ;;  %v16847_v48 = vld [vmem:[#allocation64_spill] sm:$0xff] }
 0x4b9   : > { %v13203_v14 = vpop.eup %10508  ;;  %3595 = vadd.xlane.f32.xlu1 %v3594_v43  ;;  %v13231_v56 = vadd.f32 %v16830_v5, %v16829_v37  ;;  %v16844_v5 = vld [vmem:[#allocation121_spill] sm:$0xff]  ;;  %v16845_v37 = vld [vmem:[#allocation63_spill] sm:$0xff]  ;;  %v13255_v23 = vadd.f32 -1e+30, %v16847_v48  ;;  %v16852_v48 = vld [vmem:[#allocation66_spill] sm:$0xff] }
 0x4ba   : > { %16817 = vst [vmem:[#allocation168_spill] sm:$0xff] %v13203_v14  ;;  %v13205_v57 = vpop.eup %10510  ;;  %16826 = vst [vmem:[#allocation55_spill] sm:$0xff] %v13216_v6  ;;  %v1930_v59 = vmax.f32 %v13216_v6, %v13219_v22  ;;  %v13248_v6 = vadd.f32 -1e+30, %v16842_v7  ;;  %v13252_v9 = vadd.f32 %v16845_v37, %v16844_v5  ;;  %v16850_v37 = vld [vmem:[#allocation65_spill] sm:$0xff] }
 0x4bb   : > { %16818 = vst [vmem:[#allocation169_spill] sm:$0xff] %v13205_v57  ;;  %v3597_v43 = vadd.f32 %v13205_v57, %v13203_v14  ;;  %16831 = vst [vmem:[#allocation57_spill] sm:$0xff] %v13231_v56  ;;  %v16837_v14 = vld [vmem:[#allocation60_spill] sm:$0xff]  ;;  %v16840_v57 = vld [vmem:[#allocation61_spill] sm:$0xff]  ;;  %v13270_v5 = vadd.f32 -1e+30, %v16852_v48 }
 0x4bc   : > { %16843 = vst [vmem:[#allocation62_spill] sm:$0xff] %v13248_v6  ;;  %16846 = vst [vmem:[#allocation63_spill] sm:$0xff] %v13252_v9 }
 0x4bd   : > { %1925 = vmax.xlane.f32.xlu1 %v1924_v62  ;;  %3598 = vadd.xlane.f32.xlu0 %v3597_v43  ;;  %v13241_v62 = vadd.f32 -1e+30, %v16837_v14  ;;  %v16839_v43 = vld [vmem:[#allocation120_spill] sm:$0xff]  ;;  %16848 = vst [vmem:[#allocation64_spill] sm:$0xff] %v13255_v23  ;;  %v1933_v14 = vmax.f32 %v13231_v56, %v13234_v35  ;;  %16853 = vst [vmem:[#allocation66_spill] sm:$0xff] %v13270_v5 }
 0x4be   : > { %v13245_v22 = vadd.f32 %v16840_v57, %v16839_v43  ;;  %v1942_v57 = vmax.f32 %v13252_v9, %v13255_v23  ;;  %v16854_v43 = vld [vmem:[#allocation123_spill] sm:$0xff]  ;;  %v16860_v23 = vld [vmem:[#allocation69_spill] sm:$0xff]  ;;  %v16867_v35 = vld [vmem:[#allocation72_spill] sm:$0xff] }
 0x4bf   : > { %16838 = vst [vmem:[#allocation60_spill] sm:$0xff] %v13241_v62  ;;  %v1936_v11 = vmax.f32 %v13238_v25, %v13241_v62  ;;  %v13274_v62 = vadd.f32 %v16855_v38, %v16854_v43  ;;  %v16857_v25 = vld [vmem:[#allocation68_spill] sm:$0xff]  ;;  %v13291_v56 = vadd.f32 -1e+30, %v16867_v35  ;;  %v16875_v43 = vld [vmem:[#allocation75_spill] sm:$0xff] }
 0x4c0   : > { %16841 = vst [vmem:[#allocation61_spill] sm:$0xff] %v13245_v22  ;;  %v1939_v7 = vmax.f32 %v13245_v22, %v13248_v6  ;;  %v16862_v6 = vld [vmem:[#allocation70_spill] sm:$0xff] }
 0x4c1   : > { %1931 = vmax.xlane.f32.xlu1 %v1930_v59  ;;  %1928 = vmax.xlane.f32.xlu0 %v1927_v46  ;;  %v16849_v59 = vld [vmem:[#allocation122_spill] sm:$0xff]  ;;  %16856 = vst [vmem:[#allocation67_spill] sm:$0xff] %v13274_v62  ;;  %v13284_v22 = vadd.f32 -1e+30, %v16862_v6  ;;  %16868 = vst [vmem:[#allocation72_spill] sm:$0xff] %v13291_v56 }
 0x4c2   : > { %v13267_v46 = vadd.f32 %v16850_v37, %v16849_v59  ;;  %v16864_v37 = vld [vmem:[#allocation125_spill] sm:$0xff]  ;;  %v16865_v59 = vld [vmem:[#allocation71_spill] sm:$0xff]  ;;  %v16872_v6 = vld [vmem:[#allocation74_spill] sm:$0xff] }
 0x4c3   : > { %16863 = vst [vmem:[#allocation70_spill] sm:$0xff] %v13284_v22  ;;  %v13288_v48 = vadd.f32 %v16865_v59, %v16864_v37  ;;  %v16874_v37 = vld [vmem:[#allocation127_spill] sm:$0xff] }
 0x4c4   : > { %16851 = vst [vmem:[#allocation65_spill] sm:$0xff] %v13267_v46  ;;  %v13308_v4 = vadd.f32 %v16875_v43, %v16874_v37  ;;  %v16884_v37 = vld [vmem:[#allocation129_spill] sm:$0xff] }
 0x4c5   : > { %1937 = vmax.xlane.f32.xlu1 %v1936_v11  ;;  %1934 = vmax.xlane.f32.xlu0 %v1933_v14  ;;  %v13277_v11 = vadd.f32 -1e+30, %v16857_v25  ;;  %v16859_v14 = vld [vmem:[#allocation124_spill] sm:$0xff]  ;;  %16866 = vst [vmem:[#allocation71_spill] sm:$0xff] %v13288_v48  ;;  %v1945_v25 = vmax.f32 %v13267_v46, %v13270_v5 }
 0x4c6   : > { %v13281_v9 = vadd.f32 %v16860_v23, %v16859_v14  ;;  %v16869_v23 = vld [vmem:[#allocation126_spill] sm:$0xff]  ;;  %v13302_v14 = vadd.f32 -1e+30, %v16872_v6  ;;  %16876 = vst [vmem:[#allocation75_spill] sm:$0xff] %v13308_v4 }
 0x4c7   : > { %16858 = vst [vmem:[#allocation68_spill] sm:$0xff] %v13277_v11  ;;  %v1948_v38 = vmax.f32 %v13274_v62, %v13277_v11  ;;  %v16877_v11 = vld [vmem:[#allocation76_spill] sm:$0xff] }
 0x4c8   : > { %16861 = vst [vmem:[#allocation69_spill] sm:$0xff] %v13281_v9  ;;  %16873 = vst [vmem:[#allocation74_spill] sm:$0xff] %v13302_v14  ;;  %v1951_v35 = vmax.f32 %v13281_v9, %v13284_v22  ;;  %v13311_v62 = vadd.f32 -1e+30, %v16877_v11  ;;  %v16885_v11 = vld [vmem:[#allocation79_spill] sm:$0xff] }
 0x4c9   : > { %1943 = vmax.xlane.f32.xlu1 %v1942_v57  ;;  %1940 = vmax.xlane.f32.xlu0 %v1939_v7  ;;  %v16870_v57 = vld [vmem:[#allocation73_spill] sm:$0xff]  ;;  %v13326_v9 = vadd.f32 %v16885_v11, %v16884_v37  ;;  %v16894_v37 = vld [vmem:[#allocation83_spill] sm:$0xff] }
 0x4ca   : > { %v13299_v7 = vadd.f32 %v16870_v57, %v16869_v23  ;;  %16878 = vst [vmem:[#allocation76_spill] sm:$0xff] %v13311_v62  ;;  %v16880_v57 = vld [vmem:[#allocation77_spill] sm:$0xff]  ;;  %v16882_v23 = vld [vmem:[#allocation78_spill] sm:$0xff] }
 0x4cb   : > { %v13320_v5 = vadd.f32 -1e+30, %v16882_v23  ;;  %16886 = vst [vmem:[#allocation79_spill] sm:$0xff] %v13326_v9  ;;  %v16892_v23 = vld [vmem:[#allocation82_spill] sm:$0xff] }
 0x4cc   : > { %16871 = vst [vmem:[#allocation73_spill] sm:$0xff] %v13299_v7  ;;  %v1957_v43 = vmax.f32 %v13299_v7, %v13302_v14  ;;  %v16896_v7 = vld [vmem:[#allocation84_spill] sm:$0xff] }
 0x4cd   : > { %1949 = vmax.xlane.f32.xlu1 %v1948_v38  ;;  %1946 = vmax.xlane.f32.xlu0 %v1945_v25  ;;  %v1954_v38 = vmax.f32 %v13288_v48, %v13291_v56  ;;  %v16879_v25 = vld [vmem:[#allocation128_spill] sm:$0xff]  ;;  %16883 = vst [vmem:[#allocation78_spill] sm:$0xff] %v13320_v5  ;;  %v13338_v56 = vadd.f32 -1e+30, %v16892_v23 }
 0x4ce   : > { %v3506_v59 = vpop.xlane.xlu0 %3505  ;;  %v13317_v6 = vadd.f32 %v16880_v57, %v16879_v25  ;;  %v16890_v57 = vld [vmem:[#allocation81_spill] sm:$0xff] }
 0x4cf   : > { %10512 = vrcp.f32 %v3506_v59  ;;  %v16887_v59 = vld [vmem:[#allocation80_spill] sm:$0xff]  ;;  %16893 = vst [vmem:[#allocation82_spill] sm:$0xff] %v13338_v56 }
 0x4d0   : > { %16881 = vst [vmem:[#allocation77_spill] sm:$0xff] %v13317_v6  ;;  %v13329_v46 = vadd.f32 -1e+30, %v16887_v59  ;;  %v1963_v11 = vmax.f32 %v13317_v6, %v13320_v5  ;;  %v13343_v59 = vadd.f32 -1e+30, %v16894_v37  ;;  %v8307_v37 = vld [vmem:[%s16233_s3 + $0x58] sm:$0xff] }
 0x4d1   : > { %1955 = vmax.xlane.f32.xlu1 %v1954_v38  ;;  %1952 = vmax.xlane.f32.xlu0 %v1951_v35  ;;  %v1960_v35 = vmax.f32 %v13308_v4, %v13311_v62  ;;  %v16889_v38 = vld [vmem:[#allocation130_spill] sm:$0xff] }
 0x4d2   : > { %v3509_v22 = vpop.xlane.xlu0 %3508  ;;  %16888 = vst [vmem:[#allocation80_spill] sm:$0xff] %v13329_v46  ;;  %v13335_v25 = vadd.f32 %v16890_v57, %v16889_v38  ;;  %v1966_v57 = vmax.f32 %v13326_v9, %v13329_v46  ;;  %v16901_v46 = vld [vmem:[#allocation133_spill] sm:$0xff]  ;;  %v16902_v9 = vld [vmem:[#allocation88_spill] sm:$0xff] }
 0x4d3   : > { %10514 = vrcp.f32 %v3509_v22  ;;  %v16895_v22 = vld [vmem:[#allocation131_spill] sm:$0xff]  ;;  %v13373_v62 = vadd.f32 %v16902_v9, %v16901_v46 }
 0x4d4   : > { %16891 = vst [vmem:[#allocation81_spill] sm:$0xff] %v13335_v25  ;;  %v13347_v48 = vadd.f32 %v16896_v7, %v16895_v22  ;;  %v16897_v7 = vld [vmem:[#allocation85_spill] sm:$0xff]  ;;  %v16899_v22 = vld [vmem:[#allocation86_spill] sm:$0xff] }
 0x4d5   : > { %1961 = vmax.xlane.f32.xlu1 %v1960_v35  ;;  %1958 = vmax.xlane.f32.xlu0 %v1957_v43  ;;  %v1969_v43 = vmax.f32 %v13335_v25, %v13338_v56  ;;  %v8306_v35 = vld [vmem:[%s16233_s3 + $0x50] sm:$0xff]  ;;  %v13360_v23 = vadd.f32 -1e+30, %v16897_v7  ;;  %v16900_v25 = vld [vmem:[#allocation87_spill] sm:$0xff] }
 0x4d6   : > { %v3512_v14 = vpop.xlane.xlu0 %3511  ;;  %v13369_v6 = vadd.f32 -1e+30, %v16900_v25  ;;  %v1972_v7 = vmax.f32 %v13343_v59, %v13347_v48  ;;  %v10142_v4 = vpack.c.bf16 %v8307_v37, %v8306_v35  ;;  %v16906_v35 = vld [vmem:[#allocation91_spill] sm:$0xff] }
 0x4d7   : > { %10516 = vrcp.f32 %v3512_v14  ;;  %v16898_v14 = vld [vmem:[#allocation132_spill] sm:$0xff]  ;;  %v13389_v37 = vadd.f32 -1e+30, %v16906_v35 }
 0x4d8   : > { %v13364_v5 = vadd.f32 %v16899_v22, %v16898_v14  ;;  %v16903_v14 = vld [vmem:[#allocation89_spill] sm:$0xff] }
 0x4d9   : > { %v10513_v38 = vpop.eup %10512  ;;  %1967 = vmax.xlane.f32.xlu1 %v1966_v57  ;;  %1964 = vmax.xlane.f32.xlu0 %v1963_v11  ;;  %v13378_v60 = vadd.f32 -1e+30, %v16903_v14  ;;  %v16907_v14 = vld [vmem:[#allocation135_spill] sm:$0xff] }
 0x4da   : > { %v3515_v57 = vpop.xlane.xlu0 %3514  ;;  %v3633_v11 = vmul.f32 %v10513_v38, %v12947_v36  ;;  %v3632_v56 = vmul.f32 %v10513_v38, %v12945_v33  ;;  %v16904_v36 = vld [vmem:[#allocation134_spill] sm:$0xff]  ;;  %v1975_v38 = vmax.f32 %v13360_v23, %v13364_v5 }
 0x4db   : > { %10518 = vrcp.f32 %v3515_v57  ;;  %v13382_v33 = vadd.f32 %v16905_v39, %v16904_v36  ;;  %v1978_v39 = vmax.f32 %v13369_v6, %v13373_v62 }
 0x4dc   : > { %3990 = vmatprep.mubr.f32.mxu1 %v3633_v11  ;;  %v16908_v11 = vld [vmem:[#allocation92_spill] sm:$0xff] }
 0x4dd   : > { %v10515_v22 = vpop.eup %10514  ;;  %1973 = vmax.xlane.f32.xlu1 %v1972_v7  ;;  %1970 = vmax.xlane.f32.xlu0 %v1969_v43  ;;  %v13393_v46 = vadd.f32 %v16908_v11, %v16907_v14  ;;  %v16910_v7 = vld [vmem:[#allocation136_spill] sm:$0xff] }
 0x4de   : > { %3991 = vmatmul.mubr.f32.vlgmr.msra.gmra.mrb[128].mxu1 %v3632_v56  ;;  %v3518_v25 = vpop.xlane.xlu0 %3517  ;;  %v3635_v9 = vmul.f32 %v10515_v22, %v12955_v61  ;;  %v3634_v57 = vmul.f32 %v10515_v22, %v12953_v26  ;;  %v1981_v26 = vmax.f32 %v13378_v60, %v13382_v33  ;;  %v16909_v56 = vld [vmem:[#allocation93_spill] sm:$0xff]  ;;  %v16911_v22 = vld [vmem:[#allocation94_spill] sm:$0xff] }
 0x4df   : > { %10520 = vrcp.f32 %v3518_v25  ;;  %10141 = vmatpush3.bf16.msra.mxu1 %v13159_v41  ;;  %v13401_v43 = vadd.f32 -1e+30, %v16909_v56  ;;  %v13405_v35 = vadd.f32 %v16911_v22, %v16910_v7  ;;  %v1984_v56 = vmax.f32 %v13389_v37, %v13393_v46 }
 0x4e0   : > { %3995 = vmatprep.mubr.f32.mxu1 %v3635_v9  ;;  %10143 = vmatprep.subr.bf16.mxu1 %v10142_v4  ;;  %v16912_v9 = vld [vmem:[#allocation95_spill] sm:$0xff] }
 0x4e1   : > { %v10517_v61 = vpop.eup %10516  ;;  %1979 = vmax.xlane.f32.xlu1 %v1978_v39  ;;  %1976 = vmax.xlane.f32.xlu0 %v1975_v38  ;;  %v13410_v14 = vadd.f32 -1e+30, %v16912_v9  ;;  %v16913_v38 = vld [vmem:[#allocation138_spill] sm:$0xff]  ;;  %v16914_v39 = vld [vmem:[#allocation96_spill] sm:$0xff]  ;;  %v16915_v9 = vld [vmem:[#allocation97_spill] sm:$0xff] }
 0x4e2   : > { %3996 = vmatmul.mubr.f32.gmra.mrb[130].mxu1 %v3634_v57  ;;  %v3521_v25 = vpop.xlane.xlu0 %3520  ;;  %v3637_v11 = vmul.f32 %v10517_v61, %v12963_v42  ;;  %v3636_v41 = vmul.f32 %v10517_v61, %v12961_v2  ;;  %v13414_v36 = vadd.f32 %v16914_v39, %v16913_v38  ;;  %v1987_v57 = vmax.f32 %v13401_v43, %v13405_v35  ;;  %v16917_v38 = vld [vmem:[#allocation98_spill] sm:$0xff] }
 0x4e3   : > { %10522 = vrcp.f32 %v3521_v25  ;;  %10145 = vmatpush3.bf16.msra.mxu1 %v10142_v4  ;;  %v13423_v39 = vadd.f32 -1e+30, %v16915_v9  ;;  %v16916_v25 = vld [vmem:[#allocation141_spill] sm:$0xff] }
 0x4e4   : > { %4000 = vmatprep.mubr.f32.mxu1 %v3637_v11  ;;  %v13427_v7 = vadd.f32 %v16917_v38, %v16916_v25  ;;  %v1990_v4 = vmax.f32 %v13410_v14, %v13414_v36  ;;  %v16920_v38 = vld [vmem:[#allocation100_spill] sm:$0xff] }
 0x4e5   : > { %v10519_v22 = vpop.eup %10518  ;;  %1985 = vmax.xlane.f32.xlu1 %v1984_v56  ;;  %1982 = vmax.xlane.f32.xlu0 %v1981_v26 }
 0x4e6   : > { %4001 = vmatmul.mubr.f32.gmra.mrb[132].mxu1 %v3636_v41  ;;  %v3524_v42 = vpop.xlane.xlu0 %3523  ;;  %v3639_v2 = vmul.f32 %v10519_v22, %v12971_v53  ;;  %v3638_v61 = vmul.f32 %v10519_v22, %v12969_v52  ;;  %v16918_v41 = vld [vmem:[#allocation99_spill] sm:$0xff]  ;;  %v16919_v22 = vld [vmem:[#allocation144_spill] sm:$0xff] }
 0x4e7   : > { %10524 = vrcp.f32 %v3524_v42  ;;  %v13434_v56 = vadd.f32 -1e+30, %v16918_v41  ;;  %v13438_v9 = vadd.f32 %v16920_v38, %v16919_v22  ;;  %v1993_v42 = vmax.f32 %v13423_v39, %v13427_v7  ;;  %v16923_v41 = vld [vmem:[#allocation102_spill] sm:$0xff]  ;;  %v16926_v22 = vld [vmem:[#allocation104_spill] sm:$0xff] }
 0x4e8   : > { %4005 = vmatprep.mubr.f32.mxu1 %v3639_v2 }
 0x4e9   : > { %v10521_v26 = vpop.eup %10520  ;;  %1991 = vmax.xlane.f32.xlu1 %v1990_v4  ;;  %1988 = vmax.xlane.f32.xlu0 %v1987_v57 }
 0x4ea   : > { %4006 = vmatmul.mubr.f32.gmra.mrb[134].mxu1 %v3638_v61  ;;  %v3527_v53 = vpop.xlane.xlu0 %3526  ;;  %v3641_v11 = vmul.f32 %v10521_v26, %v12979_v54  ;;  %v3640_v52 = vmul.f32 %v10521_v26, %v12977_v44  ;;  %v16921_v61 = vld [vmem:[#allocation101_spill] sm:$0xff]  ;;  %v16922_v26 = vld [vmem:[#allocation147_spill] sm:$0xff] }
 0x4eb   : > { %10526 = vrcp.f32 %v3527_v53  ;;  %v13445_v4 = vadd.f32 -1e+30, %v16921_v61  ;;  %v13449_v38 = vadd.f32 %v16923_v41, %v16922_v26  ;;  %v1996_v53 = vmax.f32 %v13434_v56, %v13438_v9  ;;  %v16925_v61 = vld [vmem:[#allocation150_spill] sm:$0xff] }
 0x4ec   : > { %4010 = vmatprep.mubr.f32.mxu1 %v3641_v11  ;;  %v13460_v41 = vadd.f32 %v16926_v22, %v16925_v61  ;;  %v16929_v26 = vld [vmem:[#allocation106_spill] sm:$0xff]  ;;  %v16932_v61 = vld [vmem:[#allocation108_spill] sm:$0xff] }
 0x4ed   : > { %v10523_v2 = vpop.eup %10522  ;;  %1994 = vmax.xlane.f32.xlu1 %v1993_v42  ;;  %v16924_v42 = vld [vmem:[#allocation103_spill] sm:$0xff] }
 0x4ee   : > { %4011 = vmatmul.mubr.f32.gmra.mrb[136].mxu1 %v3640_v52  ;;  %v3530_v57 = vpop.xlane.xlu0 %3529  ;;  %v3643_v54 = vmul.f32 %v10523_v2, %v12987_v19  ;;  %v3642_v44 = vmul.f32 %v10523_v2, %v12985_v8  ;;  %v13456_v2 = vadd.f32 -1e+30, %v16924_v42  ;;  %v16928_v42 = vld [vmem:[#allocation151_spill] sm:$0xff] }
 0x4ef   : > { %10528 = vrcp.f32 %v3530_v57  ;;  %v1999_v57 = vmax.f32 %v13445_v4, %v13449_v38  ;;  %v13471_v22 = vadd.f32 %v16929_v26, %v16928_v42  ;;  %v16935_v42 = vld [vmem:[#allocation110_spill] sm:$0xff] }
 0x4f0   : > { %4015 = vmatprep.mubr.f32.mxu1 %v3643_v54 }
 0x4f1   : > { %v10525_v11 = vpop.eup %10524  ;;  %1997 = vmax.xlane.f32.xlu1 %v1996_v53  ;;  %v16927_v53 = vld [vmem:[#allocation105_spill] sm:$0xff] }
 0x4f2   : > { %4016 = vmatmul.mubr.f32.gmra.mrb[138].mxu1 %v3642_v44  ;;  %v3533_v52 = vpop.xlane.xlu0 %3532  ;;  %v3645_v19 = vmul.f32 %v10525_v11, %v12995_v3  ;;  %v3644_v8 = vmul.f32 %v10525_v11, %v12993_v21  ;;  %v13467_v11 = vadd.f32 -1e+30, %v16927_v53  ;;  %v16931_v53 = vld [vmem:[#allocation152_spill] sm:$0xff] }
 0x4f3   : > { %10530 = vrcp.f32 %v3533_v52  ;;  %v2002_v52 = vmax.f32 %v13456_v2, %v13460_v41  ;;  %v13482_v26 = vadd.f32 %v16932_v61, %v16931_v53  ;;  %v16938_v53 = vld [vmem:[#allocation112_spill] sm:$0xff] }
 0x4f4   : > { %4020 = vmatprep.mubr.f32.mxu1 %v3645_v19 }
 0x4f5   : > { %v10527_v54 = vpop.eup %10526  ;;  %2000 = vmax.xlane.f32.xlu1 %v1999_v57  ;;  %v16930_v57 = vld [vmem:[#allocation107_spill] sm:$0xff] }
 0x4f6   : > { %4021 = vmatmul.mubr.f32.gmra.mrb[140].mxu1 %v3644_v8  ;;  %v3536_v44 = vpop.xlane.xlu1 %3535  ;;  %v3647_v3 = vmul.f32 %v10527_v54, %v13003_v10  ;;  %v3646_v21 = vmul.f32 %v10527_v54, %v13001_v55  ;;  %v13478_v54 = vadd.f32 -1e+30, %v16930_v57  ;;  %v16934_v57 = vld [vmem:[#allocation153_spill] sm:$0xff] }
 0x4f7   : > { %10532 = vrcp.f32 %v3536_v44  ;;  %v2005_v44 = vmax.f32 %v13467_v11, %v13471_v22  ;;  %v13493_v61 = vadd.f32 %v16935_v42, %v16934_v57  ;;  %v16941_v57 = vld [vmem:[#allocation114_spill] sm:$0xff] }
 0x4f8   : > { %4025 = vmatprep.mubr.f32.mxu1 %v3647_v3 }
 0x4f9   : > { %v10529_v19 = vpop.eup %10528  ;;  %2003 = vmax.xlane.f32.xlu1 %v2002_v52  ;;  %v16933_v52 = vld [vmem:[#allocation109_spill] sm:$0xff] }
 0x4fa   : > { %4026 = vmatmul.mubr.f32.gmra.mrb[142].mxu1 %v3646_v21  ;;  %v3539_v8 = vpop.xlane.xlu0 %3538  ;;  %v3649_v10 = vmul.f32 %v10529_v19, %v13011_v15  ;;  %v3648_v55 = vmul.f32 %v10529_v19, %v13009_v34  ;;  %v13489_v19 = vadd.f32 -1e+30, %v16933_v52  ;;  %v16937_v52 = vld [vmem:[#allocation155_spill] sm:$0xff] }
 0x4fb   : > { %10534 = vrcp.f32 %v3539_v8  ;;  %v2008_v8 = vmax.f32 %v13478_v54, %v13482_v26  ;;  %v13504_v42 = vadd.f32 %v16938_v53, %v16937_v52  ;;  %v16997_v52 = vmov 0.0|0.0  }
 0x4fc   : > { %4030 = vmatprep.mubr.f32.mxu1 %v3649_v10 }
 0x4fd   : > { %v10531_v3 = vpop.eup %10530  ;;  %2006 = vmax.xlane.f32.xlu1 %v2005_v44  ;;  %v16936_v44 = vld [vmem:[#allocation111_spill] sm:$0xff] }
 0x4fe   : > { %4031 = vmatmul.mubr.f32.gmra.mrb[144].mxu1 %v3648_v55  ;;  %v3542_v21 = vpop.xlane.xlu1 %3541  ;;  %v3651_v15 = vmul.f32 %v10531_v3, %v13019_v32  ;;  %v3650_v34 = vmul.f32 %v10531_v3, %v13017_v30  ;;  %v13500_v3 = vadd.f32 -1e+30, %v16936_v44  ;;  %v16940_v44 = vld [vmem:[#allocation158_spill] sm:$0xff] }
 0x4ff   : > { %10536 = vrcp.f32 %v3542_v21  ;;  %v2011_v21 = vmax.f32 %v13489_v19, %v13493_v61  ;;  %v13515_v53 = vadd.f32 %v16941_v57, %v16940_v44 }
 0x500   : > { %4035 = vmatprep.mubr.f32.mxu1 %v3651_v15 }
 0x501   : > { %v10533_v10 = vpop.eup %10532  ;;  %2009 = vmax.xlane.f32.xlu1 %v2008_v8  ;;  %v16939_v8 = vld [vmem:[#allocation113_spill] sm:$0xff] }
 0x502   : > { %4036 = vmatmul.mubr.f32.gmra.mrb[146].mxu1 %v3650_v34  ;;  %v3545_v55 = vpop.xlane.xlu0 %3544  ;;  %v3653_v32 = vmul.f32 %v10533_v10, %v13027_v29  ;;  %v3652_v30 = vmul.f32 %v10533_v10, %v13025_v27  ;;  %v13511_v10 = vadd.f32 -1e+30, %v16939_v8 }
 0x503   : > { %10538 = vrcp.f32 %v3545_v55  ;;  %v2014_v55 = vmax.f32 %v13500_v3, %v13504_v42 }
 0x504   : > { %4040 = vmatprep.mubr.f32.mxu1 %v3653_v32 }
 0x505   : > { %v10535_v15 = vpop.eup %10534  ;;  %2012 = vmax.xlane.f32.xlu1 %v2011_v21  ;;  %v2017_v21 = vmax.f32 %v13511_v10, %v13515_v53 }
 0x506   : > { %4041 = vmatmul.mubr.f32.gmra.mrb[148].mxu1 %v3652_v30  ;;  %v3548_v34 = vpop.xlane.xlu1 %3547  ;;  %v3655_v29 = vmul.f32 %v10535_v15, %v13035_v20  ;;  %v3654_v27 = vmul.f32 %v10535_v15, %v13033_v18 }
 0x507   : > { %10540 = vrcp.f32 %v3548_v34 }
 0x508   : > { %4045 = vmatprep.mubr.f32.mxu1 %v3655_v29 }
 0x509   : > { %v10537_v32 = vpop.eup %10536  ;;  %2015 = vmax.xlane.f32.xlu1 %v2014_v55 }
 0x50a   : > { %4046 = vmatmul.mubr.f32.gmra.mrb[150].mxu1 %v3654_v27  ;;  %v3551_v30 = vpop.xlane.xlu0 %3550  ;;  %v3657_v20 = vmul.f32 %v10537_v32, %v13043_v12  ;;  %v3656_v18 = vmul.f32 %v10537_v32, %v13041_v45 }
 0x50b   : > { %10542 = vrcp.f32 %v3551_v30 }
 0x50c   : > { %4050 = vmatprep.mubr.f32.mxu1 %v3657_v20  ;;  %v8405_v20 = vld [vmem:[%s16234_s4 + $0x48] sm:$0xff] }
 0x50d   : > { %v10539_v57 = vpop.eup %10538  ;;  %2018 = vmax.xlane.f32.xlu1 %v2017_v21 }
 0x50e   : > { %4051 = vmatmul.mubr.f32.gmra.mrb[152].mxu1 %v3656_v18  ;;  %v3554_v15 = vpop.xlane.xlu1 %3553  ;;  %v3659_v34 = vmul.f32 %v10539_v57, %v13051_v24  ;;  %v3658_v29 = vmul.f32 %v10539_v57, %v13049_v40  ;;  %v8404_v40 = vld [vmem:[%s16234_s4 + $0x40] sm:$0xff] }
 0x50f   : > { %10544 = vrcp.f32 %v3554_v15 }
 0x510   : > { %4055 = vmatprep.mubr.f32.mxu1 %v3659_v34 }
 0x511   : > { %v10541_v27 = vpop.eup %10540 }
 0x512   : > { %4056 = vmatmul.mubr.f32.gmra.mrb[154].mxu1 %v3658_v29  ;;  %v3557_v12 = vpop.xlane.xlu0 %3556  ;;  %v3661_v45 = vmul.f32 %v10541_v27, %v13059_v58  ;;  %v3660_v8 = vmul.f32 %v10541_v27, %v13057_v1  ;;  %v13535_v58 = vpack.c.bf16 %v8405_v20, %v8404_v40 }
 0x513   : > { %10546 = vrcp.f32 %v3557_v12 }
 0x514   : > { %4060 = vmatprep.mubr.f32.mxu1 %v3661_v45  ;;  %10195 = vmatprep.subr.bf16.mxu1 %v13535_v58 }
 0x515   : > { %v10543_v55 = vpop.eup %10542 }
 0x516   : > { %4061 = vmatmul.mubr.f32.gmra.mrb[156].mxu1 %v3660_v8  ;;  %v3560_v32 = vpop.xlane.xlu1 %3559  ;;  %v3663_v30 = vmul.f32 %v10543_v55, %v13067_v16  ;;  %v3662_v24 = vmul.f32 %v10543_v55, %v13065_v13  ;;  %v16942_v8 = vld [vmem:[#allocation139_spill] sm:$0xff] }
 0x517   : > { %10548 = vrcp.f32 %v3560_v32  ;;  %v16943_v32 = vld [vmem:[#allocation137_spill] sm:$0xff] }
 0x518   : > { %4065 = vmatprep.mubr.f32.mxu1 %v3663_v30 }
 0x519   : > { %v10545_v1 = vpop.eup %10544 }
 0x51a   : > { %4066 = vmatmul.mubr.f32.gmra.mrb[158].mxu1 %v3662_v24  ;;  %v3563_v18 = vpop.xlane.xlu0 %3562  ;;  %v3665_v16 = vmul.f32 %v10545_v1, %v13075_v47  ;;  %v3664_v13 = vmul.f32 %v10545_v1, %v13073_v51  ;;  %v16944_v1 = vld [vmem:[#allocation140_spill] sm:$0xff] }
 0x51b   : > { %10550 = vrcp.f32 %v3563_v18 }
 0x51c   : > { %4070 = vmatprep.mubr.f32.mxu1 %v3665_v16 }
 0x51d   : > { %v10547_v21 = vpop.eup %10546 }
 0x51e   : > { %4071 = vmatmul.mubr.f32.gmra.mrb[160].mxu1 %v3664_v13  ;;  %v3566_v57 = vpop.xlane.xlu1 %3565  ;;  %v3667_v15 = vmul.f32 %v10547_v21, %v13083_v49  ;;  %v3666_v34 = vmul.f32 %v10547_v21, %v13081_v31  ;;  %v16945_v21 = vld [vmem:[#allocation143_spill] sm:$0xff] }
 0x51f   : > { %10552 = vrcp.f32 %v3566_v57 }
 0x520   : > { %4075 = vmatprep.mubr.f32.mxu1 %v3667_v15  ;;  %v16946_v15 = vld [vmem:[#allocation142_spill] sm:$0xff] }
 0x521   : > { %v10549_v29 = vpop.eup %10548 }
 0x522   : > { %4076 = vmatmul.mubr.f32.gmra.mrb[162].mxu1 %v3666_v34  ;;  %v3569_v27 = vpop.xlane.xlu0 %3568  ;;  %v3669_v12 = vmul.f32 %v10549_v29, %v13091_v63  ;;  %v3668_v47 = vmul.f32 %v10549_v29, %v13089_v0  ;;  %v16947_v29 = vld [vmem:[#allocation146_spill] sm:$0xff] }
 0x523   : > { %10554 = vrcp.f32 %v3569_v27 }
 0x524   : > { %4080 = vmatprep.mubr.f32.mxu1 %v3669_v12  ;;  %v16948_v12 = vld [vmem:[#allocation145_spill] sm:$0xff] }
 0x525   : > { %v10551_v51 = vpop.eup %10550 }
 0x526   : > { %4081 = vmatmul.mubr.f32.gmra.mrb[164].mxu1 %v3668_v47  ;;  %v3572_v45 = vpop.xlane.xlu1 %3571  ;;  %v3671_v55 = vmul.f32 %v10551_v51, %v16942_v8  ;;  %v3670_v49 = vmul.f32 %v10551_v51, %v16943_v32 }
 0x527   : > { %10556 = vrcp.f32 %v3572_v45  ;;  %v16949_v45 = vld [vmem:[#allocation149_spill] sm:$0xff] }
 0x528   : > { %4085 = vmatprep.mubr.f32.mxu1 %v3671_v55  ;;  %v16950_v55 = vld [vmem:[#allocation148_spill] sm:$0xff] }
 0x529   : > { %v10553_v31 = vpop.eup %10552 }
 0x52a   : > { %4086 = vmatmul.mubr.f32.gmra.mrb[166].mxu1 %v3670_v49  ;;  %v3575_v30 = vpop.xlane.xlu0 %3574  ;;  %v3673_v24 = vmul.f32 %v10553_v31, %v13107_v50  ;;  %v3672_v63 = vmul.f32 %v10553_v31, %v13105_v28 }
 0x52b   : > { %10558 = vrcp.f32 %v3575_v30  ;;  %v16951_v30 = vld [vmem:[#allocation161_spill] sm:$0xff] }
 0x52c   : > { %4090 = vmatprep.mubr.f32.mxu1 %v3673_v24 }
 0x52d   : > { %v10555_v0 = vpop.eup %10554 }
 0x52e   : > { %4091 = vmatmul.mubr.f32.gmra.mrb[168].mxu1 %v3672_v63  ;;  %v3578_v40 = vpop.xlane.xlu1 %3577  ;;  %v3675_v20 = vmul.f32 %v10555_v0, %v13115_v17  ;;  %v3674_v18 = vmul.f32 %v10555_v0, %v16944_v1  ;;  %v16952_v63 = vld [vmem:[#allocation160_spill] sm:$0xff]  ;;  %v16953_v1 = vld [vmem:[#allocation162_spill] sm:$0xff] }
 0x52f   : > { %10560 = vrcp.f32 %v3578_v40 }
 0x530   : > { %4095 = vmatprep.mubr.f32.mxu1 %v3675_v20 }
 0x531   : > { %v10557_v16 = vpop.eup %10556 }
 0x532   : > { %4096 = vmatmul.mubr.f32.gmra.mrb[170].mxu1 %v3674_v18  ;;  %v3581_v13 = vpop.xlane.xlu0 %3580  ;;  %v3677_v57 = vmul.f32 %v10557_v16, %v16945_v21  ;;  %v3676_v50 = vmul.f32 %v10557_v16, %v16946_v15  ;;  %v16954_v16 = vld [vmem:[#allocation154_spill] sm:$0xff]  ;;  %v16955_v15 = vld [vmem:[#allocation157_spill] sm:$0xff] }
 0x533   : > { %10562 = vrcp.f32 %v3581_v13 }
 0x534   : > { %4100 = vmatprep.mubr.f32.mxu1 %v3677_v57 }
 0x535   : > { %v10559_v28 = vpop.eup %10558 }
 0x536   : > { %4101 = vmatmul.mubr.f32.gmra.mrb[172].mxu1 %v3676_v50  ;;  %v3584_v34 = vpop.xlane.xlu1 %3583  ;;  %v3679_v27 = vmul.f32 %v10559_v28, %v16947_v29  ;;  %v3678_v17 = vmul.f32 %v10559_v28, %v16948_v12  ;;  %v16956_v28 = vld [vmem:[#allocation156_spill] sm:$0xff] }
 0x537   : > { %10564 = vrcp.f32 %v3584_v34 }
 0x538   : > { %4105 = vmatprep.mubr.f32.mxu1 %v3679_v27 }
 0x539   : > { %v10561_v47 = vpop.eup %10560 }
 0x53a   : > { %4106 = vmatmul.mubr.f32.gmra.mrb[174].mxu1 %v3678_v17  ;;  %v3587_v51 = vpop.xlane.xlu0 %3586  ;;  %v3681_v8 = vmul.f32 %v10561_v47, %v16949_v45  ;;  %v3680_v32 = vmul.f32 %v10561_v47, %v16950_v55  ;;  %v16957_v17 = vld [vmem:[#allocation163_spill] sm:$0xff] }
 0x53b   : > { %10566 = vrcp.f32 %v3587_v51  ;;  %v16958_v51 = vld [vmem:[#allocation159_spill] sm:$0xff] }
 0x53c   : > { %4110 = vmatprep.mubr.f32.mxu1 %v3681_v8  ;;  %v16959_v8 = vld [vmem:[#allocation51_spill] sm:$0xff] }
 0x53d   : > { %v10563_v49 = vpop.eup %10562 }
 0x53e   : > { %4111 = vmatmul.mubr.f32.gmra.mrb[176].mxu1 %v3680_v32  ;;  %v3590_v31 = vpop.xlane.xlu1 %3589  ;;  %v3683_v24 = vmul.f32 %v10563_v49, %v16951_v30  ;;  %v3682_v0 = vmul.f32 %v10563_v49, %v16952_v63  ;;  %v16960_v32 = vld [vmem:[#allocation52_spill] sm:$0xff] }
 0x53f   : > { %10568 = vrcp.f32 %v3590_v31 }
 0x540   : > { %4115 = vmatprep.mubr.f32.mxu1 %v3683_v24 }
 0x541   : > { %v10565_v40 = vpop.eup %10564 }
 0x542   : > { %4116 = vmatmul.mubr.f32.gmra.mrb[178].mxu1 %v3682_v0  ;;  %v3593_v20 = vpop.xlane.xlu0 %3592  ;;  %v3685_v18 = vmul.f32 %v10565_v40, %v16953_v1  ;;  %v3684_v13 = vmul.f32 %v10565_v40, %v16954_v16  ;;  %v16961_v40 = vld [vmem:[#allocation165_spill] sm:$0xff]  ;;  %v16962_v1 = vld [vmem:[#allocation164_spill] sm:$0xff] }
 0x543   : > { %10570 = vrcp.f32 %v3593_v20  ;;  %v16963_v16 = vld [vmem:[#allocation53_spill] sm:$0xff] }
 0x544   : > { %4120 = vmatprep.mubr.f32.mxu1 %v3685_v18 }
 0x545   : > { %v10567_v21 = vpop.eup %10566 }
 0x546   : > { %4121 = vmatmul.mubr.f32.gmra.mrb[180].mxu1 %v3684_v13  ;;  %v3596_v57 = vpop.xlane.xlu1 %3595  ;;  %v3687_v50 = vmul.f32 %v10567_v21, %v16955_v15  ;;  %v3686_v34 = vmul.f32 %v10567_v21, %v16956_v28  ;;  %v16964_v21 = vld [vmem:[#allocation55_spill] sm:$0xff]  ;;  %v16965_v15 = vld [vmem:[#allocation54_spill] sm:$0xff] }
 0x547   : > { %10572 = vrcp.f32 %v3596_v57 }
 0x548   : > { %4125 = vmatprep.mubr.f32.mxu1 %v3687_v50 }
 0x549   : > { %v10569_v29 = vpop.eup %10568 }
 0x54a   : > { %4126 = vmatmul.mubr.f32.gmra.mrb[182].mxu1 %v3686_v34  ;;  %v1926_v27 = vpop.xlane.xlu1 %1925  ;;  %v3599_v12 = vpop.xlane.xlu0 %3598  ;;  %v3689_v47 = vmul.f32 %v10569_v29, %v16957_v17  ;;  %v3688_v45 = vmul.f32 %v10569_v29, %v16958_v51  ;;  %v16966_v34 = vld [vmem:[#allocation56_spill] sm:$0xff]  ;;  %v16967_v51 = vld [vmem:[#allocation167_spill] sm:$0xff] }
 0x54b   : > { %v2020_v55 = vsub.f32 %v16959_v8, %v1926_v27  ;;  %v2021_v49 = vsub.f32 %v16960_v32, %v1926_v27  ;;  %10574 = vrcp.f32 %v3599_v12  ;;  %v16968_v8 = vld [vmem:[#allocation166_spill] sm:$0xff] }
 0x54c   : > { %4130 = vmatprep.mubr.f32.mxu1 %v3689_v47 }
 0x54d   : > { %v10571_v31 = vpop.eup %10570  ;;  %v2084_v30 = vmul.f32 1.442695, %v2020_v55  ;;  %v2086_v24 = vmul.f32 1.442695, %v2021_v49  ;;  %v16969_v49 = vld [vmem:[#allocation57_spill] sm:$0xff] }
 0x54e   : > { %4131 = vmatmul.mubr.f32.gmra.mrb[184].mxu1 %v3688_v45  ;;  %v1932_v63 = vpop.xlane.xlu1 %1931  ;;  %v1929_v0 = vpop.xlane.xlu0 %1928  ;;  %v3691_v20 = vmul.f32 %v10571_v31, %v16961_v40  ;;  %v3690_v18 = vmul.f32 %v10571_v31, %v16962_v1  ;;  %v16971_v1 = vld [vmem:[#allocation169_spill] sm:$0xff] }
 0x54f   : > { %10576 = vpow2.f32 %v2084_v30  ;;  %v2022_v13 = vsub.f32 %v16963_v16, %v1929_v0  ;;  %v2024_v57 = vsub.f32 %v16964_v21, %v1932_v63  ;;  %v2023_v50 = vsub.f32 %v16965_v15, %v1929_v0  ;;  %v16970_v0 = vld [vmem:[#allocation58_spill] sm:$0xff]  ;;  %v16972_v16 = vld [vmem:[#allocation168_spill] sm:$0xff]  ;;  %v16973_v21 = vld [vmem:[#allocation59_spill] sm:$0xff] }
 0x550   : > { %10578 = vpow2.f32 %v2086_v24  ;;  %4135 = vmatprep.mubr.f32.mxu1 %v3691_v20  ;;  %v2025_v29 = vsub.f32 %v16966_v34, %v1932_v63  ;;  %v8406_v34 = vld [vmem:[%s16234_s4 + $0x50] sm:$0xff] }
 0x551   : > { %v10573_v28 = vpop.eup %10572  ;;  %v2088_v27 = vmul.f32 1.442695, %v2022_v13  ;;  %v2090_v12 = vmul.f32 1.442695, %v2023_v50  ;;  %v2092_v32 = vmul.f32 1.442695, %v2024_v57 }
 0x552   : > { %4136 = vmatmul.mubr.f32.gmra.mrb[186].mxu1 %v3690_v18  ;;  %v1938_v17 = vpop.xlane.xlu1 %1937  ;;  %v1935_v47 = vpop.xlane.xlu0 %1934  ;;  %v3693_v45 = vmul.f32 %v10573_v28, %v16967_v51  ;;  %v3692_v55 = vmul.f32 %v10573_v28, %v16968_v8  ;;  %v2094_v24 = vmul.f32 1.442695, %v2025_v29  ;;  %v16974_v57 = vld [vmem:[#allocation60_spill] sm:$0xff]  ;;  %v8407_v29 = vld [vmem:[%s16234_s4 + $0x58] sm:$0xff] }
 0x553   : > { %v2026_v31 = vsub.f32 %v16969_v49, %v1935_v47  ;;  %10580 = vpow2.f32 %v2088_v27  ;;  %v2027_v40 = vsub.f32 %v16970_v0, %v1935_v47  ;;  %v2028_v15 = vsub.f32 %v16973_v21, %v1938_v17  ;;  %v16976_v47 = vld [vmem:[#allocation63_spill] sm:$0xff]  ;;  %v16978_v8 = vld [vmem:[#allocation61_spill] sm:$0xff] }
 0x554   : > { %4140 = vmatprep.mubr.f32.mxu1 %v3693_v45  ;;  %10582 = vpow2.f32 %v2090_v12  ;;  %v2029_v50 = vsub.f32 %v16974_v57, %v1938_v17  ;;  %v16982_v57 = vld [vmem:[#allocation3_spill] sm:$0xff] }
 0x555   : > { %v10575_v30 = vpop.eup %10574  ;;  %10584 = vpow2.f32 %v2092_v32  ;;  %v2096_v28 = vmul.f32 1.442695, %v2026_v31  ;;  %v2098_v12 = vmul.f32 1.442695, %v2027_v40  ;;  %v2100_v49 = vmul.f32 1.442695, %v2028_v15 }
 0x556   : > { %4141 = vmatmul.mubr.f32.gmra.mrb[188].mxu1 %v3692_v55  ;;  %v1944_v63 = vpop.xlane.xlu1 %1943  ;;  %v1941_v20 = vpop.xlane.xlu0 %1940  ;;  %v3695_v18 = vmul.f32 %v10575_v30, %v16971_v1  ;;  %v3694_v13 = vmul.f32 %v10575_v30, %v16972_v16  ;;  %10586 = vpow2.f32 %v2094_v24  ;;  %v16979_v31 = vld [vmem:[#allocation2_spill] sm:$0xff]  ;;  %v10198_v30 = vpack.c.bf16 %v8407_v29, %v8406_v34  ;;  %v16981_v16 = vld [vmem:[#allocation64_spill] sm:$0xff] }
 0x557   : > { %v2032_v51 = vsub.f32 %v16976_v47, %v1944_v63  ;;  %v2030_v17 = vsub.f32 %v16978_v8, %v1941_v20  ;;  %v2102_v0 = vmul.f32 1.442695, %v2029_v50  ;;  %10588 = vpow2.f32 %v2096_v28  ;;  %v16980_v24 = vld [vmem:[#allocation62_spill] sm:$0xff]  ;;  %v16984_v50 = vld [vmem:[#allocation71_spill] sm:$0xff]  ;;  %v16985_v28 = vld [vmem:[#allocation72_spill] sm:$0xff] }
 0x558   : > { %4145 = vmatprep.mubr.f32.mxu1 %v3695_v18  ;;  %v2031_v40 = vsub.f32 %v16980_v24, %v1941_v20  ;;  %10590 = vpow2.f32 %v2098_v12  ;;  %v16986_v8 = vld [vmem:[#allocation4_spill] sm:$0xff] }
 0x559   : > { %v13586_v27 = vpop.eup %10576  ;;  %v2108_v18 = vmul.f32 1.442695, %v2032_v51  ;;  %v2104_v21 = vmul.f32 1.442695, %v2030_v17  ;;  %10592 = vpow2.f32 %v2100_v49  ;;  %v16988_v51 = vld [vmem:[#allocation67_spill] sm:$0xff] }
 0x55a   : > { %16975 = vst [vmem:[#allocation83_spill] sm:$0xff] %v13586_v27  ;;  %v13589_v45 = vpop.eup %10578  ;;  %4146 = vmatmul.mubr.f32.gmra.mrb[190].mxu1 %v3694_v13  ;;  %v13592_v55 = vpop.xlane.xlu1 %1949  ;;  %v2033_v13 = vsub.f32 %v16981_v16, %v1944_v63  ;;  %10594 = vpow2.f32 %v2102_v0  ;;  %v2106_v12 = vmul.f32 1.442695, %v2031_v40 }
 0x55b   : > { %16977 = vst [vmem:[#allocation84_spill] sm:$0xff] %v13589_v45  ;;  %v13594_v32 = vpop.xlane.xlu0 %1946  ;;  %9638 = vmatprep.mubr.msk.f32.mxu1 %vm1249_vm0, %v16979_v31  ;;  %v2212_v1 = vadd.f32 %v13589_v45, %v13586_v27  ;;  %10596 = vpow2.f32 %v2108_v18  ;;  %v2036_v17 = vsub.f32 %v16988_v51, %v13592_v55  ;;  %v16994_v51 = vld [vmem:[#allocation76_spill] sm:$0xff]  ;;  %v17000_v27 = vld [vmem:[#allocation7_spill] sm:$0xff] }
 0x55c   : > { %v2110_v16 = vmul.f32 1.442695, %v2033_v13  ;;  %10598 = vpow2.f32 %v2104_v21  ;;  %v16995_v21 = vld [vmem:[#allocation6_spill] sm:$0xff] }
 0x55d   : > { %2213 = vadd.xlane.f32.xlu0 %v2212_v1  ;;  %v13606_v34 = vpop.eup %10580  ;;  %v2116_v25 = vmul.f32 1.442695, %v2036_v17 }
 0x55e   : > { %9639 = vmatmul.mubr.msk.f32.vlgmr.msra.gmra.mrb[192].mxu1 %vm1249_vm0, %v16982_v57  ;;  %v1956_v15 = vpop.xlane.xlu1 %1955  ;;  %16983 = vst [vmem:[#allocation85_spill] sm:$0xff] %v13606_v34  ;;  %v13613_v63 = vpop.eup %10582 }
 0x55f   : > { %v13604_v47 = vpop.xlane.xlu0 %1952  ;;  %v2040_v20 = vsub.f32 %v16984_v50, %v1956_v15  ;;  %v2041_v29 = vsub.f32 %v16985_v28, %v1956_v15  ;;  %9641 = vmatprep.mubr.msk.f32.mxu1 %vm1249_vm0, %v16986_v8  ;;  %10197 = vmatpush3.bf16.msra.mxu1 %v13535_v58  ;;  %16987 = vst [vmem:[#allocation86_spill] sm:$0xff] %v13613_v63  ;;  %v13617_v1 = vpop.eup %10584  ;;  %v16990_v15 = vld [vmem:[#allocation65_spill] sm:$0xff] }
 0x560   : > { %10199 = vmatprep.subr.bf16.mxu1 %v10198_v30  ;;  %16989 = vst [vmem:[#allocation87_spill] sm:$0xff] %v13617_v1  ;;  %v2034_v50 = vsub.f32 %v16990_v15, %v13594_v32  ;;  %v2215_v58 = vadd.f32 %v13613_v63, %v13606_v34  ;;  %v16991_v28 = vld [vmem:[#allocation5_spill] sm:$0xff]  ;;  %v13627_v18 = vpop.eup %10586  ;;  %v16996_v15 = vld [vmem:[#allocation66_spill] sm:$0xff] }
 0x561   : > { %v2124_v24 = vmul.f32 1.442695, %v2040_v20  ;;  %v2126_v49 = vmul.f32 1.442695, %v2041_v29  ;;  %16992 = vst [vmem:[#allocation88_spill] sm:$0xff] %v13627_v18  ;;  %v16993_v20 = vld [vmem:[#allocation75_spill] sm:$0xff]  ;;  %v2035_v44 = vsub.f32 %v16996_v15, %v13594_v32 }
 0x562   : > { %9642 = vmatmul.mubr.msk.f32.gmra.mrb[194].mxu1 %vm1249_vm0, %v16991_v28  ;;  %v1962_v0 = vpop.xlane.xlu1 %1961  ;;  %2216 = vadd.xlane.f32.xlu0 %v2215_v58  ;;  %v17003_v58 = vld [vmem:[#allocation80_spill] sm:$0xff]  ;;  %v17006_v15 = vld [vmem:[#allocation69_spill] sm:$0xff] }
 0x563   : > { %v13625_v40 = vpop.xlane.xlu0 %1958  ;;  %10600 = vpow2.f32 %v2124_v24  ;;  %v2044_v29 = vsub.f32 %v16993_v20, %v1962_v0  ;;  %v2045_v13 = vsub.f32 %v16994_v51, %v1962_v0  ;;  %9644 = vmatprep.mubr.msk.f32.mxu1 %vm1249_vm0, %v16995_v21  ;;  %10201 = vmatpush3.bf16.msra.mxu1 %v10198_v30  ;;  %v13636_v24 = vpop.eup %10588  ;;  %v16999_v0 = vld [vmem:[#allocation68_spill] sm:$0xff]  ;;  %v2112_v51 = vmul.f32 1.442695, %v2034_v50 }
 0x564   : > { %10602 = vpow2.f32 %v2126_v49  ;;  %10202 = vmatprep.subr.bf16.mxu1 %v16997_v52  ;;  %16998 = vst [vmem:[#allocation89_spill] sm:$0xff] %v13636_v24  ;;  %v2037_v20 = vsub.f32 %v16999_v0, %v13592_v55  ;;  %v2218_v30 = vadd.f32 %v13627_v18, %v13617_v1  ;;  %v13644_v49 = vpop.eup %10590  ;;  %v2114_v55 = vmul.f32 1.442695, %v2035_v44 }
 0x565   : > { %10604 = vpow2.f32 %v2106_v12  ;;  %v2132_v34 = vmul.f32 1.442695, %v2044_v29  ;;  %v2134_v63 = vmul.f32 1.442695, %v2045_v13  ;;  %17001 = vst [vmem:[#allocation90_spill] sm:$0xff] %v13644_v49  ;;  %v17002_v12 = vld [vmem:[#allocation79_spill] sm:$0xff]  ;;  %v13652_v50 = vpop.eup %10592  ;;  %v2038_v0 = vsub.f32 %v17006_v15, %v13604_v47 }
 0x566   : > { %10606 = vpow2.f32 %v2110_v16  ;;  %9645 = vmatmul.mubr.msk.f32.gmra.mrb[196].mxu1 %vm1249_vm0, %v17000_v27  ;;  %v1968_v32 = vpop.xlane.xlu1 %1967  ;;  %v17004_v13 = vld [vmem:[#allocation8_spill] sm:$0xff]  ;;  %2219 = vadd.xlane.f32.xlu0 %v2218_v30  ;;  %17005 = vst [vmem:[#allocation91_spill] sm:$0xff] %v13652_v50  ;;  %v13656_v1 = vpop.eup %10594  ;;  %v2221_v44 = vadd.f32 %v13644_v49, %v13636_v24  ;;  %v17011_v15 = vld [vmem:[#allocation10_spill] sm:$0xff] }
 0x567   : > { %10608 = vpow2.f32 %v2132_v34  ;;  %v2048_v17 = vsub.f32 %v17002_v12, %v1968_v32  ;;  %v2049_v29 = vsub.f32 %v17003_v58, %v1968_v32  ;;  %9647 = vmatprep.mubr.msk.f32.mxu1 %vm1249_vm0, %v17004_v13  ;;  %v13650_v16 = vpop.xlane.xlu0 %1964  ;;  %17007 = vst [vmem:[#allocation92_spill] sm:$0xff] %v13656_v1  ;;  %v2118_v12 = vmul.f32 1.442695, %v2037_v20  ;;  %v17008_v32 = vld [vmem:[#allocation70_spill] sm:$0xff] }
 0x568   : > { %10610 = vpow2.f32 %v2134_v63  ;;  %v2039_v58 = vsub.f32 %v17008_v32, %v13604_v47  ;;  %v17009_v63 = vld [vmem:[#allocation9_spill] sm:$0xff]  ;;  %v2224_v18 = vadd.f32 %v13656_v1, %v13652_v50  ;;  %v17021_v50 = vld [vmem:[#allocation74_spill] sm:$0xff] }
 0x569   : > { %10612 = vpow2.f32 %v2116_v25  ;;  %v2140_v52 = vmul.f32 1.442695, %v2048_v17  ;;  %v2142_v34 = vmul.f32 1.442695, %v2049_v29  ;;  %v13664_v25 = vpop.eup %10596 }
 0x56a   : > { %10614 = vpow2.f32 %v2112_v51  ;;  %9648 = vmatmul.mubr.msk.f32.gmra.mrb[198].mxu1 %vm1249_vm0, %v17009_v63  ;;  %v1974_v30 = vpop.xlane.xlu1 %1973  ;;  %17010 = vst [vmem:[#allocation93_spill] sm:$0xff] %v13664_v25  ;;  %v13670_v20 = vpop.eup %10598  ;;  %2222 = vadd.xlane.f32.xlu0 %v2221_v44  ;;  %v2120_v51 = vmul.f32 1.442695, %v2038_v0 }
 0x56b   : > { %10616 = vpow2.f32 %v2140_v52  ;;  %v2052_v17 = vsub.f32 %v13343_v59, %v1974_v30  ;;  %v2053_v29 = vsub.f32 %v13347_v48, %v1974_v30  ;;  %9650 = vmatprep.mubr.msk.f32.mxu1 %vm1249_vm0, %v17011_v15  ;;  %17012 = vst [vmem:[#allocation94_spill] sm:$0xff] %v13670_v20  ;;  %v13674_v49 = vpop.xlane.xlu0 %1970  ;;  %v2122_v59 = vmul.f32 1.442695, %v2039_v58  ;;  %v17015_v48 = vld [vmem:[#allocation73_spill] sm:$0xff] }
 0x56c   : > { %10618 = vpow2.f32 %v2142_v34  ;;  %v2042_v30 = vsub.f32 %v17015_v48, %v13625_v40  ;;  %v17016_v34 = vld [vmem:[#allocation11_spill] sm:$0xff] }
 0x56d   : > { %v13672_v47 = vpop.eup %10600  ;;  %10620 = vpow2.f32 %v2114_v55  ;;  %v2148_v32 = vmul.f32 1.442695, %v2052_v17  ;;  %v2150_v24 = vmul.f32 1.442695, %v2053_v29  ;;  %v17018_v29 = vld [vmem:[#allocation12_spill] sm:$0xff] }
 0x56e   : > { %17013 = vst [vmem:[#allocation95_spill] sm:$0xff] %v13672_v47  ;;  %v13676_v52 = vpop.eup %10602  ;;  %10622 = vpow2.f32 %v2118_v12  ;;  %9651 = vmatmul.mubr.msk.f32.gmra.mrb[200].mxu1 %vm1249_vm0, %v17016_v34  ;;  %v1980_v44 = vpop.xlane.xlu1 %1979  ;;  %2225 = vadd.xlane.f32.xlu0 %v2224_v18 }
 0x56f   : > { %17014 = vst [vmem:[#allocation96_spill] sm:$0xff] %v13676_v52  ;;  %v13684_v55 = vpop.eup %10604  ;;  %10624 = vpow2.f32 %v2148_v32  ;;  %v2056_v0 = vsub.f32 %v13369_v6, %v1980_v44  ;;  %v2057_v17 = vsub.f32 %v13373_v62, %v1980_v44  ;;  %9653 = vmatprep.mubr.msk.f32.mxu1 %vm1249_vm0, %v17018_v29  ;;  %v2242_v58 = vadd.f32 %v13676_v52, %v13672_v47  ;;  %v17023_v44 = vld [vmem:[#allocation77_spill] sm:$0xff] }
 0x570   : > { %17017 = vst [vmem:[#allocation97_spill] sm:$0xff] %v13684_v55  ;;  %v13690_v12 = vpop.eup %10606  ;;  %10626 = vpow2.f32 %v2150_v24  ;;  %v2043_v32 = vsub.f32 %v17021_v50, %v13625_v40  ;;  %v2128_v62 = vmul.f32 1.442695, %v2042_v30  ;;  %v2046_v29 = vsub.f32 %v17023_v44, %v13650_v16  ;;  %v17024_v24 = vld [vmem:[#allocation13_spill] sm:$0xff]  ;;  %v13708_v40 = vpop.xlane.xlu0 %1976  ;;  %v17026_v30 = vld [vmem:[#allocation14_spill] sm:$0xff] }
 0x571   : > { %17019 = vst [vmem:[#allocation98_spill] sm:$0xff] %v13690_v12  ;;  %v13694_v48 = vpop.eup %10608  ;;  %10628 = vpow2.f32 %v2120_v51  ;;  %v2156_v1 = vmul.f32 1.442695, %v2056_v0  ;;  %v2158_v6 = vmul.f32 1.442695, %v2057_v17  ;;  %v2227_v18 = vadd.f32 %v13684_v55, %v13670_v20  ;;  %2243 = vadd.xlane.f32.xlu1 %v2242_v58 }
 0x572   : > { %17020 = vst [vmem:[#allocation99_spill] sm:$0xff] %v13694_v48  ;;  %v13698_v45 = vpop.eup %10610  ;;  %10630 = vpow2.f32 %v2122_v59  ;;  %9654 = vmatmul.mubr.msk.f32.gmra.mrb[202].mxu1 %vm1249_vm0, %v17024_v24  ;;  %v1986_v51 = vpop.xlane.xlu1 %1985  ;;  %v2130_v44 = vmul.f32 1.442695, %v2043_v32  ;;  %v17031_v32 = vld [vmem:[#allocation81_spill] sm:$0xff] }
 0x573   : > { %17022 = vst [vmem:[#allocation100_spill] sm:$0xff] %v13698_v45  ;;  %v13706_v47 = vpop.eup %10612  ;;  %10632 = vpow2.f32 %v2156_v1  ;;  %v2060_v50 = vsub.f32 %v13389_v37, %v1986_v51  ;;  %v2061_v59 = vsub.f32 %v13393_v46, %v1986_v51  ;;  %9656 = vmatprep.mubr.msk.f32.mxu1 %vm1249_vm0, %v17026_v30  ;;  %2228 = vadd.xlane.f32.xlu0 %v2227_v18  ;;  %v17028_v1 = vld [vmem:[#allocation78_spill] sm:$0xff]  ;;  %v2136_v46 = vmul.f32 1.442695, %v2046_v29 }
 0x574   : > { %17025 = vst [vmem:[#allocation101_spill] sm:$0xff] %v13706_v47  ;;  %v13714_v0 = vpop.eup %10614  ;;  %10634 = vpow2.f32 %v2158_v6  ;;  %v2248_v17 = vadd.f32 %v13698_v45, %v13694_v48  ;;  %v2047_v52 = vsub.f32 %v17028_v1, %v13650_v16  ;;  %v2230_v51 = vadd.f32 %v13690_v12, %v13664_v25  ;;  %v17030_v6 = vld [vmem:[#allocation15_spill] sm:$0xff] }
 0x575   : > { %v13718_v58 = vpop.eup %10616  ;;  %v2164_v20 = vmul.f32 1.442695, %v2060_v50  ;;  %v2166_v37 = vmul.f32 1.442695, %v2061_v59  ;;  %10636 = vpow2.f32 %v2128_v62  ;;  %v2050_v45 = vsub.f32 %v17031_v32, %v13674_v49  ;;  %v17032_v62 = vld [vmem:[#allocation16_spill] sm:$0xff]  ;;  %v17033_v59 = vld [vmem:[#allocation82_spill] sm:$0xff] }
 0x576   : > { %17027 = vst [vmem:[#allocation102_spill] sm:$0xff] %v13718_v58  ;;  %v13722_v55 = vpop.eup %10618  ;;  %2249 = vadd.xlane.f32.xlu1 %v2248_v17  ;;  %9657 = vmatmul.mubr.msk.f32.gmra.mrb[204].mxu1 %vm1249_vm0, %v17030_v6  ;;  %v1992_v18 = vpop.xlane.xlu1 %1991  ;;  %v2051_v17 = vsub.f32 %v17033_v59, %v13674_v49  ;;  %v2054_v12 = vsub.f32 %v13360_v23, %v13708_v40 }
 0x577   : > { %17029 = vst [vmem:[#allocation103_spill] sm:$0xff] %v13722_v55  ;;  %v13728_v48 = vpop.eup %10620  ;;  %10638 = vpow2.f32 %v2164_v20  ;;  %v2064_v16 = vsub.f32 %v13410_v14, %v1992_v18  ;;  %v2065_v50 = vsub.f32 %v13414_v36, %v1992_v18  ;;  %9659 = vmatprep.mubr.msk.f32.mxu1 %vm1249_vm0, %v17032_v62  ;;  %2231 = vadd.xlane.f32.xlu0 %v2230_v51  ;;  %v2138_v20 = vmul.f32 1.442695, %v2047_v52  ;;  %v1983_v14 = vpop.xlane.xlu0 %1982 }
 0x578   : > { %v13736_v29 = vpop.eup %10622  ;;  %10640 = vpow2.f32 %v2166_v37  ;;  %v2254_v1 = vadd.f32 %v13722_v55, %v13718_v58  ;;  %v2233_v49 = vadd.f32 %v13728_v48, %v13714_v0  ;;  %v17036_v37 = vld [vmem:[#allocation17_spill] sm:$0xff]  ;;  %v2144_v52 = vmul.f32 1.442695, %v2050_v45  ;;  %v17041_v55 = vld [vmem:[#allocation18_spill] sm:$0xff] }
 0x579   : > { %v13742_v25 = vpop.eup %10624  ;;  %10642 = vpow2.f32 %v2130_v44  ;;  %v2172_v32 = vmul.f32 1.442695, %v2064_v16  ;;  %v2174_v36 = vmul.f32 1.442695, %v2065_v50  ;;  %v17038_v16 = vld [vmem:[#allocation19_spill] sm:$0xff] }
 0x57a   : > { %17034 = vst [vmem:[#allocation104_spill] sm:$0xff] %v13742_v25  ;;  %v13744_v18 = vpop.eup %10626  ;;  %10644 = vpow2.f32 %v2136_v46  ;;  %2255 = vadd.xlane.f32.xlu1 %v2254_v1  ;;  %9660 = vmatmul.mubr.msk.f32.gmra.mrb[206].mxu1 %vm1249_vm0, %v17036_v37  ;;  %v13752_v51 = vpop.xlane.xlu1 %1994  ;;  %v2146_v50 = vmul.f32 1.442695, %v2051_v17  ;;  %v2055_v1 = vsub.f32 %v13364_v5, %v13708_v40  ;;  %v2152_v45 = vmul.f32 1.442695, %v2054_v12 }
 0x57b   : > { %17035 = vst [vmem:[#allocation105_spill] sm:$0xff] %v13744_v18  ;;  %v13754_v44 = vpop.eup %10628  ;;  %10646 = vpow2.f32 %v2172_v32  ;;  %9662 = vmatprep.mubr.msk.f32.mxu1 %vm1249_vm0, %v17038_v16  ;;  %v2260_v46 = vadd.f32 %v13744_v18, %v13742_v25  ;;  %2234 = vadd.xlane.f32.xlu0 %v2233_v49  ;;  %v2236_v32 = vadd.f32 %v13736_v29, %v13706_v47  ;;  %v1989_v17 = vpop.xlane.xlu0 %1988  ;;  %v17042_v49 = vld [vmem:[#allocation24_spill] sm:$0xff] }
 0x57c   : > { %17037 = vst [vmem:[#allocation106_spill] sm:$0xff] %v13754_v44  ;;  %v13760_v23 = vpop.eup %10630  ;;  %10648 = vpow2.f32 %v2174_v36  ;;  %v2058_v40 = vsub.f32 %v13378_v60, %v1983_v14  ;;  %v2059_v18 = vsub.f32 %v13382_v33, %v1983_v14  ;;  %v17046_v33 = vld [vmem:[#allocation27_spill] sm:$0xff] }
 0x57d   : > { %v13762_v59 = vpop.eup %10632  ;;  %10650 = vpow2.f32 %v2138_v20 }
 0x57e   : > { %17039 = vst [vmem:[#allocation107_spill] sm:$0xff] %v13762_v59  ;;  %v13766_v58 = vpop.eup %10634  ;;  %2261 = vadd.xlane.f32.xlu1 %v2260_v46  ;;  %9663 = vmatmul.mubr.msk.f32.gmra.mrb[208].mxu1 %vm1249_vm0, %v17041_v55  ;;  %v1998_v25 = vpop.xlane.xlu1 %1997  ;;  %10652 = vpow2.f32 %v2144_v52  ;;  %v2154_v52 = vmul.f32 1.442695, %v2055_v1 }
 0x57f   : > { %17040 = vst [vmem:[#allocation108_spill] sm:$0xff] %v13766_v58  ;;  %v2068_v36 = vsub.f32 %v13434_v56, %v1998_v25  ;;  %v2069_v20 = vsub.f32 %v13438_v9, %v1998_v25  ;;  %9665 = vmatprep.mubr.msk.f32.mxu1 %vm1249_vm0, %v17042_v49  ;;  %v2266_v5 = vadd.f32 %v13766_v58, %v13762_v59  ;;  %v13778_v12 = vpop.eup %10636  ;;  %10654 = vpow2.f32 %v2146_v50  ;;  %v17045_v50 = vld [vmem:[#allocation22_spill] sm:$0xff] }
 0x580   : > { %2237 = vadd.xlane.f32.xlu0 %v2236_v32  ;;  %10656 = vpow2.f32 %v2152_v45  ;;  %v2062_v25 = vsub.f32 %v13401_v43, %v1989_v17  ;;  %v2239_v59 = vadd.f32 %v13760_v23, %v13754_v44  ;;  %v2160_v43 = vmul.f32 1.442695, %v2058_v40  ;;  %v17049_v44 = vld [vmem:[#allocation26_spill] sm:$0xff] }
 0x581   : > { %v13781_v46 = vpop.eup %10638  ;;  %v2180_v56 = vmul.f32 1.442695, %v2068_v36  ;;  %v2182_v47 = vmul.f32 1.442695, %v2069_v20  ;;  %v2162_v36 = vmul.f32 1.442695, %v2059_v18  ;;  %v2063_v20 = vsub.f32 %v13405_v35, %v1989_v17 }
 0x582   : > { %17043 = vst [vmem:[#allocation109_spill] sm:$0xff] %v13781_v46  ;;  %v13784_v9 = vpop.eup %10640  ;;  %2267 = vadd.xlane.f32.xlu1 %v2266_v5  ;;  %9666 = vmatmul.mubr.msk.f32.gmra.mrb[210].mxu1 %vm1249_vm0, %v17045_v50  ;;  %v13791_v60 = vpop.xlane.xlu1 %2000 }
 0x583   : > { %17044 = vst [vmem:[#allocation110_spill] sm:$0xff] %v13784_v9  ;;  %v13793_v32 = vpop.eup %10642  ;;  %10658 = vpow2.f32 %v2180_v56  ;;  %9668 = vmatprep.mubr.msk.f32.mxu1 %vm1249_vm0, %v17046_v33  ;;  %v2272_v14 = vadd.f32 %v13784_v9, %v13781_v46  ;;  %v2168_v56 = vmul.f32 1.442695, %v2062_v25 }
 0x584   : > { %v13799_v1 = vpop.eup %10644  ;;  %10660 = vpow2.f32 %v2182_v47  ;;  %2240 = vadd.xlane.f32.xlu0 %v2239_v59  ;;  %v2245_v58 = vadd.f32 %v13793_v32, %v13778_v12  ;;  %v2066_v47 = vsub.f32 %v13423_v39, %v13752_v51  ;;  %v17050_v59 = vld [vmem:[#allocation29_spill] sm:$0xff] }
 0x585   : > { %v13801_v45 = vpop.eup %10646  ;;  %10662 = vpow2.f32 %v2154_v52  ;;  %v2067_v52 = vsub.f32 %v13427_v7, %v13752_v51  ;;  %v17053_v51 = vld [vmem:[#allocation32_spill] sm:$0xff] }
 0x586   : > { %17047 = vst [vmem:[#allocation111_spill] sm:$0xff] %v13801_v45  ;;  %v13804_v5 = vpop.eup %10648  ;;  %2273 = vadd.xlane.f32.xlu1 %v2272_v14  ;;  %9669 = vmatmul.mubr.msk.f32.gmra.mrb[212].mxu1 %vm1249_vm0, %v17049_v44  ;;  %v2004_v46 = vpop.xlane.xlu1 %2003  ;;  %10664 = vpow2.f32 %v2160_v43  ;;  %v2170_v14 = vmul.f32 1.442695, %v2063_v20  ;;  %v17052_v43 = vld [vmem:[#allocation31_spill] sm:$0xff] }
 0x587   : > { %17048 = vst [vmem:[#allocation112_spill] sm:$0xff] %v13804_v5  ;;  %v13810_v40 = vpop.eup %10650  ;;  %v2072_v18 = vsub.f32 %v13456_v2, %v2004_v46  ;;  %v2073_v35 = vsub.f32 %v13460_v41, %v2004_v46  ;;  %9671 = vmatprep.mubr.msk.f32.mxu1 %vm1249_vm0, %v17050_v59  ;;  %v2278_v17 = vadd.f32 %v13804_v5, %v13801_v45  ;;  %10666 = vpow2.f32 %v2162_v36 }
 0x588   : > { %2246 = vadd.xlane.f32.xlu0 %v2245_v58  ;;  %v13822_v25 = vpop.eup %10652  ;;  %10668 = vpow2.f32 %v2168_v56  ;;  %v2070_v41 = vsub.f32 %v13445_v4, %v13791_v60  ;;  %v2251_v46 = vadd.f32 %v13810_v40, %v13799_v1  ;;  %v2176_v58 = vmul.f32 1.442695, %v2066_v47 }
 0x589   : > { %17051 = vst [vmem:[#allocation113_spill] sm:$0xff] %v13822_v25  ;;  %v2188_v39 = vmul.f32 1.442695, %v2072_v18  ;;  %v2190_v9 = vmul.f32 1.442695, %v2073_v35  ;;  %v13824_v2 = vpop.eup %10654  ;;  %v2071_v4 = vsub.f32 %v13449_v38, %v13791_v60 }
 0x58a   : > { %2279 = vadd.xlane.f32.xlu1 %v2278_v17  ;;  %9672 = vmatmul.mubr.msk.f32.gmra.mrb[214].mxu1 %vm1249_vm0, %v17052_v43  ;;  %v2007_v7 = vpop.xlane.xlu1 %2006  ;;  %v13834_v36 = vpop.eup %10656  ;;  %v2178_v20 = vmul.f32 1.442695, %v2067_v52  ;;  %v2184_v35 = vmul.f32 1.442695, %v2070_v41  ;;  %v2257_v47 = vadd.f32 %v13824_v2, %v13822_v25  ;;  %v17056_v17 = vld [vmem:[#allocation33_spill] sm:$0xff] }
 0x58b   : > { %10670 = vpow2.f32 %v2188_v39  ;;  %9674 = vmatprep.mubr.msk.f32.mxu1 %vm1249_vm0, %v17053_v51  ;;  %v2074_v60 = vsub.f32 %v13467_v11, %v2007_v7  ;;  %v2186_v41 = vmul.f32 1.442695, %v2071_v4  ;;  %v17061_v4 = vld [vmem:[#allocation38_spill] sm:$0xff] }
 0x58c   : > { %10672 = vpow2.f32 %v2190_v9  ;;  %2252 = vadd.xlane.f32.xlu0 %v2251_v46  ;;  %v2075_v46 = vsub.f32 %v13471_v22, %v2007_v7 }
 0x58d   : > { %v13836_v56 = vpop.eup %10658  ;;  %10674 = vpow2.f32 %v2170_v14  ;;  %v17057_v14 = vld [vmem:[#allocation35_spill] sm:$0xff]  ;;  %v2192_v7 = vmul.f32 1.442695, %v2074_v60 }
 0x58e   : > { %17054 = vst [vmem:[#allocation114_spill] sm:$0xff] %v13836_v56  ;;  %v13840_v18 = vpop.eup %10660  ;;  %9675 = vmatmul.mubr.msk.f32.gmra.mrb[216].mxu1 %vm1249_vm0, %v17056_v17  ;;  %v2010_v39 = vpop.xlane.xlu1 %2009  ;;  %10676 = vpow2.f32 %v2176_v58 }
 0x58f   : > { %17055 = vst [vmem:[#allocation139_spill] sm:$0xff] %v13840_v18  ;;  %v13846_v45 = vpop.eup %10662  ;;  %v2076_v9 = vsub.f32 %v13478_v54, %v2010_v39  ;;  %v2077_v52 = vsub.f32 %v13482_v26, %v2010_v39  ;;  %9677 = vmatprep.mubr.msk.f32.mxu1 %vm1249_vm0, %v17057_v14  ;;  %v2284_v38 = vadd.f32 %v13840_v18, %v13836_v56  ;;  %10678 = vpow2.f32 %v2178_v20  ;;  %v17059_v26 = vld [vmem:[#allocation37_spill] sm:$0xff] }
 0x590   : > { %2258 = vadd.xlane.f32.xlu0 %v2257_v47  ;;  %v13856_v58 = vpop.eup %10664  ;;  %10680 = vpow2.f32 %v2184_v35  ;;  %v2263_v54 = vadd.f32 %v13846_v45, %v13834_v36  ;;  %v2194_v47 = vmul.f32 1.442695, %v2075_v46 }
 0x591   : > { %v2196_v5 = vmul.f32 1.442695, %v2076_v9  ;;  %v2198_v25 = vmul.f32 1.442695, %v2077_v52  ;;  %2285 = vadd.xlane.f32.xlu1 %v2284_v38  ;;  %17058 = vst [vmem:[#allocation137_spill] sm:$0xff] %v13856_v58  ;;  %v13862_v20 = vpop.eup %10666 }
 0x592   : > { %9678 = vmatmul.mubr.msk.f32.gmra.mrb[218].mxu1 %vm1249_vm0, %v17059_v26  ;;  %v2013_v39 = vpop.xlane.xlu1 %2012  ;;  %17060 = vst [vmem:[#allocation140_spill] sm:$0xff] %v13862_v20  ;;  %v13867_v22 = vpop.eup %10668 }
 0x593   : > { %10682 = vpow2.f32 %v2196_v5  ;;  %v2078_v11 = vsub.f32 %v13489_v19, %v2013_v39  ;;  %9680 = vmatprep.mubr.msk.f32.mxu1 %vm1249_vm0, %v17061_v4  ;;  %v2079_v9 = vsub.f32 %v13493_v61, %v2013_v39  ;;  %v2269_v19 = vadd.f32 %v13862_v20, %v13856_v58  ;;  %v17062_v5 = vld [vmem:[#allocation39_spill] sm:$0xff] }
 0x594   : > { %10684 = vpow2.f32 %v2198_v25  ;;  %2264 = vadd.xlane.f32.xlu0 %v2263_v54  ;;  %v17063_v25 = vld [vmem:[#allocation41_spill] sm:$0xff]  ;;  %v17064_v20 = vld [vmem:[#allocation43_spill] sm:$0xff] }
 0x595   : > { %v13869_v35 = vpop.eup %10670  ;;  %10686 = vpow2.f32 %v2186_v41  ;;  %v2200_v38 = vmul.f32 1.442695, %v2078_v11  ;;  %v2202_v54 = vmul.f32 1.442695, %v2079_v9 }
 0x596   : > { %v13872_v52 = vpop.eup %10672  ;;  %9681 = vmatmul.mubr.msk.f32.gmra.mrb[220].mxu1 %vm1249_vm0, %v17062_v5  ;;  %v2016_v56 = vpop.xlane.xlu1 %2015  ;;  %10688 = vpow2.f32 %v2192_v7 }
 0x597   : > { %v13878_v18 = vpop.eup %10674  ;;  %9683 = vmatprep.mubr.msk.f32.mxu1 %vm1249_vm0, %v17063_v25  ;;  %v2080_v60 = vsub.f32 %v13500_v3, %v2016_v56  ;;  %v2081_v41 = vsub.f32 %v13504_v42, %v2016_v56  ;;  %v2290_v61 = vadd.f32 %v13872_v52, %v13869_v35  ;;  %10690 = vpow2.f32 %v2194_v47 }
 0x598   : > { %2270 = vadd.xlane.f32.xlu0 %v2269_v19  ;;  %v13886_v46 = vpop.eup %10676  ;;  %10692 = vpow2.f32 %v2200_v38  ;;  %v2275_v3 = vadd.f32 %v13878_v18, %v13867_v22 }
 0x599   : > { %v2204_v39 = vmul.f32 1.442695, %v2080_v60  ;;  %v2206_v11 = vmul.f32 1.442695, %v2081_v41  ;;  %2291 = vadd.xlane.f32.xlu1 %v2290_v61  ;;  %v13888_v58 = vpop.eup %10678 }
 0x59a   : > { %9684 = vmatmul.mubr.msk.f32.gmra.mrb[222].mxu1 %vm1249_vm0, %v17064_v20  ;;  %v2019_v42 = vpop.xlane.xlu1 %2018  ;;  %v13898_v47 = vpop.eup %10680  ;;  %v2281_v41 = vadd.f32 %v13888_v58, %v13886_v46 }
 0x59b   : > { %10694 = vpow2.f32 %v2204_v39  ;;  %9694 = vmatprep.mubr.msk.f32.mxu1 %vm1249_vm0, %v16979_v31  ;;  %v2082_v56 = vsub.f32 %v13511_v10, %v2019_v42  ;;  %v2083_v7 = vsub.f32 %v13515_v53, %v2019_v42 }
 0x59c   : > { %10696 = vpow2.f32 %v2206_v11  ;;  %2276 = vadd.xlane.f32.xlu0 %v2275_v3 }
 0x59d   : > { %v13900_v9 = vpop.eup %10682  ;;  %10698 = vpow2.f32 %v2202_v54  ;;  %v2208_v38 = vmul.f32 1.442695, %v2082_v56  ;;  %v2210_v19 = vmul.f32 1.442695, %v2083_v7 }
 0x59e   : > { %v13902_v60 = vpop.eup %10684  ;;  %9695 = vmatmul.mubr.msk.f32.vlgmr.msra.gmra.mrb[224].mxu1 %vm1249_vm0, %v16982_v57 }
 0x59f   : > { %v13908_v10 = vpop.eup %10686  ;;  %10700 = vpow2.f32 %v2208_v38  ;;  %9697 = vmatprep.mubr.msk.f32.mxu1 %vm1249_vm0, %v16986_v8  ;;  %v2296_v53 = vadd.f32 %v13902_v60, %v13900_v9 }
 0x5a0   : > { %10702 = vpow2.f32 %v2210_v19  ;;  %2282 = vadd.xlane.f32.xlu0 %v2281_v41  ;;  %v13914_v61 = vpop.eup %10688  ;;  %v2287_v54 = vadd.f32 %v13908_v10, %v13898_v47 }
 0x5a1   : > { %2297 = vadd.xlane.f32.xlu1 %v2296_v53  ;;  %v13920_v39 = vpop.eup %10690 }
 0x5a2   : > { %9698 = vmatmul.mubr.msk.f32.gmra.mrb[226].mxu1 %vm1249_vm0, %v16991_v28  ;;  %v13924_v11 = vpop.eup %10692  ;;  %v2293_v56 = vadd.f32 %v13920_v39, %v13914_v61 }
 0x5a3   : > { %9700 = vmatprep.mubr.msk.f32.mxu1 %vm1249_vm0, %v16995_v21 }
 0x5a4   : > { %2288 = vadd.xlane.f32.xlu0 %v2287_v54 }
 0x5a5   : > { %v13926_v3 = vpop.eup %10694 }
 0x5a6   : > { %v13928_v42 = vpop.eup %10696  ;;  %9701 = vmatmul.mubr.msk.f32.gmra.mrb[228].mxu1 %vm1249_vm0, %v17000_v27 }
 0x5a7   : > { %v13934_v7 = vpop.eup %10698  ;;  %9703 = vmatprep.mubr.msk.f32.mxu1 %vm1249_vm0, %v17004_v13  ;;  %v2302_v38 = vadd.f32 %v13928_v42, %v13926_v3 }
 0x5a8   : > { %2294 = vadd.xlane.f32.xlu0 %v2293_v56  ;;  %v2299_v53 = vadd.f32 %v13934_v7, %v13924_v11  ;;  %v17065_v56 = vld [vmem:[#allocation12_spill] sm:$0xff] }
 0x5a9   : > { %v13940_v19 = vpop.eup %10700  ;;  %2303 = vadd.xlane.f32.xlu1 %v2302_v38 }
 0x5aa   : > { %v13942_v41 = vpop.eup %10702  ;;  %9704 = vmatmul.mubr.msk.f32.gmra.mrb[230].mxu1 %vm1249_vm0, %v17009_v63  ;;  %v17073_v63 = vld [vmem:[#allocation83_spill] sm:$0xff] }
 0x5ab   : > { %9706 = vmatprep.mubr.msk.f32.mxu1 %vm1249_vm0, %v17011_v15  ;;  %v2305_v54 = vadd.f32 %v13942_v41, %v13940_v19 }
 0x5ac   : > { %2300 = vadd.xlane.f32.xlu0 %v2299_v53 }
 0x5ae   : > { %9707 = vmatmul.mubr.msk.f32.gmra.mrb[232].mxu1 %vm1249_vm0, %v17016_v34 }
 0x5af   : > { %9709 = vmatprep.mubr.msk.f32.mxu1 %vm1249_vm0, %v17065_v56 }
 0x5b0   : > { %2306 = vadd.xlane.f32.xlu0 %v2305_v54 }
 0x5b1   : > { %v13956_v38 = vpop.f32.mrb[128].mxu1 }
 0x5b2   : > { %v3994_v13 = vpop.f32.mrb[129].mxu1  ;;  %9710 = vmatmul.mubr.msk.f32.gmra.mrb[234].mxu1 %vm1249_vm0, %v17024_v24 }
 0x5b3   : > { %9712 = vmatprep.mubr.msk.f32.mxu1 %vm1249_vm0, %v17026_v30 }
 0x5b5   : > { %v13962_v53 = vpop.f32.mrb[130].mxu1 }
 0x5b6   : > { %v3999_v15 = vpop.f32.mrb[131].mxu1  ;;  %9713 = vmatmul.mubr.msk.f32.gmra.mrb[236].mxu1 %vm1249_vm0, %v17030_v6 }
 0x5b7   : > { %9715 = vmatprep.mubr.msk.f32.mxu1 %vm1249_vm0, %v17032_v62 }
 0x5b9   : > { %v13968_v56 = vpop.f32.mrb[132].mxu1 }
 0x5ba   : > { %v4004_v54 = vpop.f32.mrb[133].mxu1  ;;  %9716 = vmatmul.mubr.msk.f32.gmra.mrb[238].mxu1 %vm1249_vm0, %v17036_v37 }
 0x5bb   : > { %9718 = vmatprep.mubr.msk.f32.mxu1 %vm1249_vm0, %v17038_v16 }
 0x5bd   : > { %v13974_v13 = vpop.f32.mrb[134].mxu1 }
 0x5be   : > { %v4009_v30 = vpop.f32.mrb[135].mxu1  ;;  %9719 = vmatmul.mubr.msk.f32.gmra.mrb[240].mxu1 %vm1249_vm0, %v17041_v55 }
 0x5bf   : > { %9721 = vmatprep.mubr.msk.f32.mxu1 %vm1249_vm0, %v17042_v49 }
 0x5c1   : > { %v13980_v15 = vpop.f32.mrb[136].mxu1 }
 0x5c2   : > { %v4014_v62 = vpop.f32.mrb[137].mxu1  ;;  %9722 = vmatmul.mubr.msk.f32.gmra.mrb[242].mxu1 %vm1249_vm0, %v17045_v50 }
 0x5c3   : > { %9724 = vmatprep.mubr.msk.f32.mxu1 %vm1249_vm0, %v17046_v33 }
 0x5c5   : > { %v13986_v54 = vpop.f32.mrb[138].mxu1 }
 0x5c6   : > { %v4019_v16 = vpop.f32.mrb[139].mxu1  ;;  %9725 = vmatmul.mubr.msk.f32.gmra.mrb[244].mxu1 %vm1249_vm0, %v17049_v44 }
 0x5c7   : > { %9727 = vmatprep.mubr.msk.f32.mxu1 %vm1249_vm0, %v17050_v59 }
 0x5c9   : > { %v13992_v30 = vpop.f32.mrb[140].mxu1 }
 0x5ca   : > { %v4024_v49 = vpop.f32.mrb[141].mxu1  ;;  %9728 = vmatmul.mubr.msk.f32.gmra.mrb[246].mxu1 %vm1249_vm0, %v17052_v43 }
 0x5cb   : > { %9730 = vmatprep.mubr.msk.f32.mxu1 %vm1249_vm0, %v17053_v51 }
 0x5cd   : > { %v13998_v62 = vpop.f32.mrb[142].mxu1 }
 0x5ce   : > { %v4029_v33 = vpop.f32.mrb[143].mxu1  ;;  %9731 = vmatmul.mubr.msk.f32.gmra.mrb[248].mxu1 %vm1249_vm0, %v17056_v17 }
 0x5cf   : > { %9733 = vmatprep.mubr.msk.f32.mxu1 %vm1249_vm0, %v17057_v14 }
 0x5d1   : > { %v14004_v16 = vpop.f32.mrb[144].mxu1 }
 0x5d2   : > { %v4034_v59 = vpop.f32.mrb[145].mxu1  ;;  %9734 = vmatmul.mubr.msk.f32.gmra.mrb[250].mxu1 %vm1249_vm0, %v17059_v26 }
 0x5d3   : > { %9736 = vmatprep.mubr.msk.f32.mxu1 %vm1249_vm0, %v17061_v4 }
 0x5d5   : > { %v14010_v49 = vpop.f32.mrb[146].mxu1 }
 0x5d6   : > { %v4039_v51 = vpop.f32.mrb[147].mxu1  ;;  %9737 = vmatmul.mubr.msk.f32.gmra.mrb[252].mxu1 %vm1249_vm0, %v17062_v5 }
 0x5d7   : > { %9739 = vmatprep.mubr.msk.f32.mxu1 %vm1249_vm0, %v17063_v25 }
 0x5d9   : > { %v14016_v33 = vpop.f32.mrb[148].mxu1 }
 0x5da   : > { %v4044_v14 = vpop.f32.mrb[149].mxu1  ;;  %9740 = vmatmul.mubr.msk.f32.gmra.mrb[254].mxu1 %vm1249_vm0, %v17064_v20 }
 0x5dd   : > { %v14020_v59 = vpop.f32.mrb[150].mxu1 }
 0x5de   : > { %v4049_v26 = vpop.f32.mrb[151].mxu1 }
 0x5e1   : > { %v14022_v17 = vpop.f32.mrb[152].mxu1 }
 0x5e2   : > { %17066 = vst [vmem:[#allocation143_spill] sm:$0xff] %v14022_v17  ;;  %v4054_v4 = vpop.f32.mrb[153].mxu1 }
 0x5e5   : > { %v14024_v43 = vpop.f32.mrb[154].mxu1 }
 0x5e6   : > { %17067 = vst [vmem:[#allocation142_spill] sm:$0xff] %v14024_v43  ;;  %v4059_v51 = vpop.f32.mrb[155].mxu1  ;;  %v17083_v43 = vld [vmem:[#allocation87_spill] sm:$0xff] }
 0x5e7   : > { %v17072_v51 = vld [vmem:[#allocation84_spill] sm:$0xff] }
 0x5e9   : > { %v14026_v44 = vpop.f32.mrb[156].mxu1 }
 0x5ea   : > { %17068 = vst [vmem:[#allocation146_spill] sm:$0xff] %v14026_v44  ;;  %v4064_v5 = vpop.f32.mrb[157].mxu1  ;;  %v2214_v50 = vpop.xlane.xlu0 %2213 }
 0x5eb   : > { %10704 = vrcp.f32 %v2214_v50 }
 0x5ed   : > { %v14028_v25 = vpop.f32.mrb[158].mxu1 }
 0x5ee   : > { %17069 = vst [vmem:[#allocation145_spill] sm:$0xff] %v14028_v25  ;;  %v4069_v14 = vpop.f32.mrb[159].mxu1 }
 0x5ef   : > { %v2217_v55 = vpop.xlane.xlu0 %2216 }
 0x5f0   : > { %10706 = vrcp.f32 %v2217_v55 }
 0x5f1   : > { %v14030_v37 = vpop.f32.mrb[160].mxu1 }
 0x5f2   : > { %17070 = vst [vmem:[#allocation149_spill] sm:$0xff] %v14030_v37  ;;  %v4074_v20 = vpop.f32.mrb[161].mxu1  ;;  %v17075_v37 = vld [vmem:[#allocation23_spill] sm:$0xff] }
 0x5f3   : > { %v2220_v26 = vpop.xlane.xlu0 %2219 }
 0x5f4   : > { %10708 = vrcp.f32 %v2220_v26  ;;  %v17078_v26 = vld [vmem:[#allocation86_spill] sm:$0xff] }
 0x5f5   : > { %v14032_v6 = vpop.f32.mrb[162].mxu1  ;;  %v10705_v4 = vpop.eup %10704 }
 0x5f6   : > { %17071 = vst [vmem:[#allocation148_spill] sm:$0xff] %v14032_v6  ;;  %v4079_v24 = vpop.f32.mrb[163].mxu1  ;;  %v2341_v34 = vmul.f32 %v10705_v4, %v17072_v51  ;;  %v2340_v5 = vmul.f32 %v10705_v4, %v17073_v63  ;;  %v17077_v6 = vld [vmem:[#allocation25_spill] sm:$0xff] }
 0x5f7   : > { %v2223_v44 = vpop.xlane.xlu0 %2222 }
 0x5f8   : > { %4215 = vmatprep.mubr.f32.mxu0 %v2341_v34  ;;  %10710 = vrcp.f32 %v2223_v44  ;;  %v17080_v34 = vld [vmem:[#allocation85_spill] sm:$0xff] }
 0x5f9   : > { %v14036_v50 = vpop.f32.mrb[164].mxu1  ;;  %4216 = vmatmul.mubr.f32.vlgmr.msra.gmra.mrb[160].mxu0 %v2340_v5 }
 0x5fa   : > { %17074 = vst [vmem:[#allocation161_spill] sm:$0xff] %v14036_v50  ;;  %v4084_v14 = vpop.f32.mrb[165].mxu1  ;;  %10151 = vmatpush3.bf16.xpose.msk.msra.mxu0 %vm11527_vm3, %v17075_v37  ;;  %v10707_v20 = vpop.eup %10706  ;;  %v17081_v50 = vld [vmem:[#allocation88_spill] sm:$0xff] }
 0x5fb   : > { %10154 = vmatprep.subr.msk.bf16.mxu0 %vm11527_vm3, %v17077_v6  ;;  %v2226_v24 = vpop.xlane.xlu0 %2225  ;;  %v2343_v51 = vmul.f32 %v10707_v20, %v17078_v26  ;;  %v2342_v4 = vmul.f32 %v10707_v20, %v17080_v34  ;;  %v17084_v26 = vld [vmem:[#allocation28_spill] sm:$0xff]  ;;  %v17086_v34 = vld [vmem:[#allocation90_spill] sm:$0xff] }
 0x5fc   : > { %10712 = vrcp.f32 %v2226_v24  ;;  %v17085_v24 = vld [vmem:[#allocation30_spill] sm:$0xff] }
 0x5fd   : > { %v14045_v63 = vpop.f32.mrb[166].mxu1  ;;  %4220 = vmatprep.mubr.f32.mxu0 %v2343_v51 }
 0x5fe   : > { %17079 = vst [vmem:[#allocation160_spill] sm:$0xff] %v14045_v63  ;;  %v4089_v44 = vpop.f32.mrb[167].mxu1  ;;  %v10709_v5 = vpop.eup %10708  ;;  %4221 = vmatmul.mubr.f32.gmra.mrb[162].mxu0 %v2342_v4  ;;  %v17091_v63 = vld [vmem:[#allocation91_spill] sm:$0xff] }
 0x5ff   : > { %v2345_v25 = vmul.f32 %v10709_v5, %v17081_v50  ;;  %v2344_v21 = vmul.f32 %v10709_v5, %v17083_v43  ;;  %v17088_v44 = vld [vmem:[#allocation89_spill] sm:$0xff] }
 0x600   : > { %v2229_v14 = vpop.xlane.xlu0 %2228 }
 0x601   : > { %v14049_v27 = vpop.f32.mrb[168].mxu1  ;;  %10714 = vrcp.f32 %v2229_v14  ;;  %4225 = vmatprep.mubr.f32.mxu0 %v2345_v25  ;;  %v17089_v14 = vld [vmem:[#allocation92_spill] sm:$0xff] }
 0x602   : > { %17082 = vst [vmem:[#allocation162_spill] sm:$0xff] %v14049_v27  ;;  %v4094_v28 = vpop.f32.mrb[169].mxu1  ;;  %10157 = vmatpush3.bf16.xpose.msk.msra.mxu0 %vm11527_vm3, %v17084_v26  ;;  %v10711_v20 = vpop.eup %10710 }
 0x603   : > { %4226 = vmatmul.mubr.f32.gmra.mrb[164].mxu0 %v2344_v21  ;;  %10160 = vmatprep.subr.msk.bf16.mxu0 %vm11527_vm3, %v17085_v24  ;;  %v2347_v50 = vmul.f32 %v10711_v20, %v17086_v34  ;;  %v2346_v43 = vmul.f32 %v10711_v20, %v17088_v44  ;;  %v17092_v34 = vld [vmem:[#allocation34_spill] sm:$0xff]  ;;  %v17094_v44 = vld [vmem:[#allocation97_spill] sm:$0xff] }
 0x604   : > { %v2232_v51 = vpop.xlane.xlu0 %2231 }
 0x605   : > { %v14059_v4 = vpop.f32.mrb[170].mxu1  ;;  %10716 = vrcp.f32 %v2232_v51  ;;  %4230 = vmatprep.mubr.f32.mxu0 %v2347_v50  ;;  %v17093_v51 = vld [vmem:[#allocation36_spill] sm:$0xff] }
 0x606   : > { %17087 = vst [vmem:[#allocation154_spill] sm:$0xff] %v14059_v4  ;;  %v4099_v28 = vpop.f32.mrb[171].mxu1  ;;  %v10713_v25 = vpop.eup %10712 }
 0x607   : > { %4231 = vmatmul.mubr.f32.gmra.mrb[166].mxu0 %v2346_v43  ;;  %v2349_v27 = vmul.f32 %v10713_v25, %v17089_v14  ;;  %v2348_v26 = vmul.f32 %v10713_v25, %v17091_v63  ;;  %v17096_v14 = vld [vmem:[#allocation94_spill] sm:$0xff]  ;;  %v2244_v25 = vpop.xlane.xlu1 %2243 }
 0x608   : > { %v2235_v5 = vpop.xlane.xlu0 %2234 }
 0x609   : > { %v14063_v21 = vpop.f32.mrb[172].mxu1  ;;  %10718 = vrcp.f32 %v2235_v5  ;;  %4235 = vmatprep.mubr.f32.mxu0 %v2349_v27 }
 0x60a   : > { %17090 = vst [vmem:[#allocation157_spill] sm:$0xff] %v14063_v21  ;;  %v4104_v24 = vpop.f32.mrb[173].mxu1  ;;  %10163 = vmatpush3.bf16.xpose.msk.msra.mxu0 %vm11527_vm3, %v17092_v34 }
 0x60b   : > { %v10715_v20 = vpop.eup %10714  ;;  %4236 = vmatmul.mubr.f32.gmra.mrb[168].mxu0 %v2348_v26  ;;  %10166 = vmatprep.subr.msk.bf16.mxu0 %vm11527_vm3, %v17093_v51  ;;  %v17097_v26 = vld [vmem:[#allocation98_spill] sm:$0xff]  ;;  %v17099_v51 = vld [vmem:[#allocation93_spill] sm:$0xff] }
 0x60c   : > { %v2351_v43 = vmul.f32 %v10715_v20, %v17094_v44  ;;  %v2350_v63 = vmul.f32 %v10715_v20, %v17096_v14 }
 0x60d   : > { %v2238_v50 = vpop.xlane.xlu0 %2237  ;;  %v14073_v28 = vpop.f32.mrb[174].mxu1 }
 0x60e   : > { %17095 = vst [vmem:[#allocation156_spill] sm:$0xff] %v14073_v28  ;;  %10720 = vrcp.f32 %v2238_v50  ;;  %v4109_v27 = vpop.f32.mrb[175].mxu1  ;;  %4240 = vmatprep.mubr.f32.mxu0 %v2351_v43  ;;  %v17100_v28 = vld [vmem:[#allocation40_spill] sm:$0xff]  ;;  %v17101_v50 = vld [vmem:[#allocation42_spill] sm:$0xff] }
 0x60f   : > { %v10717_v24 = vpop.eup %10716  ;;  %4241 = vmatmul.mubr.f32.gmra.mrb[170].mxu0 %v2350_v63  ;;  %10722 = vrcp.f32 %v2244_v25 }
 0x610   : > { %v2353_v21 = vmul.f32 %v10717_v24, %v17097_v26  ;;  %v2352_v34 = vmul.f32 %v10717_v24, %v17099_v51 }
 0x611   : > { %v2241_v5 = vpop.xlane.xlu0 %2240  ;;  %v14077_v4 = vpop.f32.mrb[176].mxu1 }
 0x612   : > { %17098 = vst [vmem:[#allocation163_spill] sm:$0xff] %v14077_v4  ;;  %10724 = vrcp.f32 %v2241_v5  ;;  %v4114_v44 = vpop.f32.mrb[177].mxu1  ;;  %4245 = vmatprep.mubr.f32.mxu0 %v2353_v21  ;;  %10169 = vmatpush3.bf16.xpose.msk.msra.mxu0 %vm11527_vm3, %v17100_v28  ;;  %v2250_v21 = vpop.xlane.xlu1 %2249  ;;  %v17104_v5 = vld [vmem:[#allocation101_spill] sm:$0xff] }
 0x613   : > { %v10719_v20 = vpop.eup %10718  ;;  %4246 = vmatmul.mubr.f32.gmra.mrb[172].mxu0 %v2352_v34  ;;  %10172 = vmatprep.subr.msk.bf16.mxu0 %vm11527_vm3, %v17101_v50  ;;  %v17131_v50 = vld [vmem:[#allocation110_spill] sm:$0xff] }
 0x614   : > { %v2355_v14 = vmul.f32 %v10719_v20, %v13728_v48  ;;  %v2354_v51 = vmul.f32 %v10719_v20, %v13714_v0  ;;  %v17106_v20 = vld [vmem:[#allocation45_spill] sm:$0xff] }
 0x615   : > { %v2247_v43 = vpop.xlane.xlu0 %2246  ;;  %v14087_v63 = vpop.f32.mrb[178].mxu1 }
 0x616   : > { %17102 = vst [vmem:[#allocation159_spill] sm:$0xff] %v14087_v63  ;;  %10726 = vrcp.f32 %v2247_v43  ;;  %v4119_v25 = vpop.f32.mrb[179].mxu1  ;;  %4250 = vmatprep.mubr.f32.mxu0 %v2355_v14  ;;  %v17105_v63 = vld [vmem:[#allocation44_spill] sm:$0xff]  ;;  %v17108_v14 = vld [vmem:[#allocation106_spill] sm:$0xff] }
 0x617   : > { %4251 = vmatmul.mubr.f32.gmra.mrb[174].mxu0 %v2354_v51  ;;  %10728 = vrcp.f32 %v2250_v21  ;;  %v2256_v21 = vpop.xlane.xlu1 %2255 }
 0x618   : > { %v10721_v27 = vpop.eup %10720 }
 0x619   : > { %v2357_v24 = vmul.f32 %v10721_v27, %v13736_v29  ;;  %v14091_v34 = vpop.f32.mrb[180].mxu1  ;;  %v2356_v26 = vmul.f32 %v10721_v27, %v17104_v5  ;;  %v10723_v4 = vpop.eup %10722  ;;  %v17109_v27 = vld [vmem:[#allocation96_spill] sm:$0xff] }
 0x61a   : > { %17103 = vst [vmem:[#allocation51_spill] sm:$0xff] %v14091_v34  ;;  %v4124_v44 = vpop.f32.mrb[181].mxu1  ;;  %v2253_v48 = vpop.xlane.xlu0 %2252  ;;  %10175 = vmatpush3.bf16.xpose.msk.msra.mxu0 %vm11527_vm3, %v17105_v63  ;;  %v17112_v63 = vld [vmem:[#allocation46_spill] sm:$0xff] }
 0x61b   : > { %4255 = vmatprep.mubr.f32.mxu0 %v2357_v24  ;;  %10178 = vmatprep.subr.msk.bf16.mxu0 %vm11527_vm3, %v17106_v20  ;;  %10730 = vrcp.f32 %v2253_v48  ;;  %v2361_v24 = vmul.f32 %v10723_v4, %v17109_v27  ;;  %v17111_v44 = vld [vmem:[#allocation95_spill] sm:$0xff] }
 0x61c   : > { %v10725_v0 = vpop.eup %10724  ;;  %4256 = vmatmul.mubr.f32.gmra.mrb[176].mxu0 %v2356_v26  ;;  %10732 = vrcp.f32 %v2256_v21  ;;  %v2360_v34 = vmul.f32 %v10723_v4, %v17111_v44 }
 0x61d   : > { %v2359_v29 = vmul.f32 %v10725_v0, %v13760_v23  ;;  %v14101_v43 = vpop.f32.mrb[182].mxu1  ;;  %v2358_v51 = vmul.f32 %v10725_v0, %v17108_v14 }
 0x61e   : > { %17107 = vst [vmem:[#allocation52_spill] sm:$0xff] %v14101_v43  ;;  %v4129_v25 = vpop.f32.mrb[183].mxu1  ;;  %v2259_v23 = vpop.xlane.xlu0 %2258 }
 0x61f   : > { %4260 = vmatprep.mubr.f32.mxu0 %v2359_v29  ;;  %v17113_v29 = vld [vmem:[#allocation47_spill] sm:$0xff]  ;;  %10734 = vrcp.f32 %v2259_v23  ;;  %v17115_v25 = vld [vmem:[#allocation100_spill] sm:$0xff]  ;;  %v17119_v23 = vld [vmem:[#allocation49_spill] sm:$0xff] }
 0x620   : > { %v10727_v5 = vpop.eup %10726  ;;  %4261 = vmatmul.mubr.f32.gmra.mrb[178].mxu0 %v2358_v51  ;;  %v2262_v51 = vpop.xlane.xlu1 %2261 }
 0x621   : > { %4265 = vmatprep.mubr.f32.mxu0 %v2361_v24  ;;  %v14105_v26 = vpop.f32.mrb[184].mxu1  ;;  %v2363_v48 = vmul.f32 %v10727_v5, %v13793_v32  ;;  %v10729_v0 = vpop.eup %10728  ;;  %v2362_v4 = vmul.f32 %v10727_v5, %v13778_v12  ;;  %10736 = vrcp.f32 %v2262_v51 }
 0x622   : > { %17110 = vst [vmem:[#allocation165_spill] sm:$0xff] %v14105_v26  ;;  %v4134_v20 = vpop.f32.mrb[185].mxu1  ;;  %10181 = vmatpush3.bf16.xpose.msk.msra.mxu0 %vm11527_vm3, %v17112_v63  ;;  %v2365_v21 = vmul.f32 %v10729_v0, %v17115_v25  ;;  %v2265_v26 = vpop.xlane.xlu0 %2264 }
 0x623   : > { %10184 = vmatprep.subr.msk.bf16.mxu0 %vm11527_vm3, %v17113_v29  ;;  %10738 = vrcp.f32 %v2265_v26  ;;  %v17123_v26 = vld [vmem:[#allocation50_spill] sm:$0xff]  ;;  %v17129_v29 = vld [vmem:[#allocation140_spill] sm:$0xff] }
 0x624   : > { %4266 = vmatmul.mubr.f32.gmra.mrb[180].mxu0 %v2360_v34  ;;  %v17117_v34 = vld [vmem:[#allocation99_spill] sm:$0xff]  ;;  %v2268_v25 = vpop.xlane.xlu1 %2267 }
 0x625   : > { %4270 = vmatprep.mubr.f32.mxu0 %v2363_v48  ;;  %v14115_v14 = vpop.f32.mrb[186].mxu1  ;;  %v10731_v27 = vpop.eup %10730  ;;  %v2364_v24 = vmul.f32 %v10729_v0, %v17117_v34  ;;  %v17118_v48 = vld [vmem:[#allocation48_spill] sm:$0xff]  ;;  %v8440_v0 = vld [vmem:[%s16233_s3 + $0x60] sm:$0xff]  ;;  %10740 = vrcp.f32 %v2268_v25 }
 0x626   : > { %17114 = vst [vmem:[#allocation164_spill] sm:$0xff] %v14115_v14  ;;  %v4139_v20 = vpop.f32.mrb[187].mxu1  ;;  %v2367_v12 = vmul.f32 %v10731_v27, %v13810_v40  ;;  %v10733_v5 = vpop.eup %10732  ;;  %v2366_v40 = vmul.f32 %v10731_v27, %v13799_v1 }
 0x627   : > { %v8441_v20 = vld [vmem:[%s16233_s3 + $0x68] sm:$0xff]  ;;  %v2271_v43 = vpop.xlane.xlu0 %2270 }
 0x628   : > { %4271 = vmatmul.mubr.f32.gmra.mrb[182].mxu0 %v2362_v4  ;;  %10742 = vrcp.f32 %v2271_v43 }
 0x629   : > { %4275 = vmatprep.mubr.f32.mxu0 %v2365_v21  ;;  %v14119_v32 = vpop.f32.mrb[188].mxu1  ;;  %v17121_v21 = vld [vmem:[#allocation103_spill] sm:$0xff] }
 0x62a   : > { %17116 = vst [vmem:[#allocation53_spill] sm:$0xff] %v14119_v32  ;;  %v4144_v44 = vpop.f32.mrb[189].mxu1  ;;  %10187 = vmatpush3.bf16.xpose.msk.msra.mxu0 %vm11527_vm3, %v17118_v48  ;;  %v2369_v34 = vmul.f32 %v10733_v5, %v17121_v21 }
 0x62b   : > { %10190 = vmatprep.subr.msk.bf16.mxu0 %vm11527_vm3, %v17119_v23  ;;  %v14139_v44 = vpack.c.bf16 %v8441_v20, %v8440_v0  ;;  %v17124_v20 = vld [vmem:[#allocation113_spill] sm:$0xff] }
 0x62c   : > { %4276 = vmatmul.mubr.f32.gmra.mrb[184].mxu0 %v2364_v24  ;;  %v10735_v24 = vpop.eup %10734 }
 0x62d   : > { %4280 = vmatprep.mubr.f32.mxu0 %v2367_v12  ;;  %v14129_v4 = vpop.f32.mrb[190].mxu1  ;;  %v2371_v1 = vmul.f32 %v10735_v24, %v13824_v2  ;;  %v10737_v27 = vpop.eup %10736  ;;  %v17126_v2 = vld [vmem:[#allocation104_spill] sm:$0xff] }
 0x62e   : > { %17120 = vst [vmem:[#allocation55_spill] sm:$0xff] %v14129_v4  ;;  %v4149_v51 = vpop.f32.mrb[191].mxu1  ;;  %v17122_v4 = vld [vmem:[#allocation102_spill] sm:$0xff]  ;;  %v10739_v21 = vpop.eup %10738 }
 0x62f   : > { %v2368_v32 = vmul.f32 %v10733_v5, %v17122_v4  ;;  %v2274_v4 = vpop.xlane.xlu1 %2273  ;;  %v17125_v51 = vld [vmem:[#allocation105_spill] sm:$0xff]  ;;  %v2375_v43 = vmul.f32 %v10739_v21, %v13846_v45  ;;  %v10741_v23 = vpop.eup %10740  ;;  %v17128_v45 = vld [vmem:[#allocation107_spill] sm:$0xff] }
 0x630   : > { %4281 = vmatmul.mubr.f32.gmra.mrb[186].mxu0 %v2366_v40  ;;  %v2370_v40 = vmul.f32 %v10735_v24, %v17124_v20  ;;  %v2373_v25 = vmul.f32 %v10737_v27, %v17125_v51  ;;  %10744 = vrcp.f32 %v2274_v4  ;;  %v2374_v20 = vmul.f32 %v10739_v21, %v13834_v36  ;;  %v17130_v21 = vld [vmem:[#allocation137_spill] sm:$0xff] }
 0x631   : > { %4285 = vmatprep.mubr.f32.mxu0 %v2369_v34  ;;  %v14141_v12 = vpop.f32.mrb[192].mxu1 }
 0x632   : > { %v14144_v14 = vpop.f32.mrb[193].mxu1  ;;  %10193 = vmatpush3.bf16.xpose.msk.msra.mxu0 %vm11527_vm3, %v17123_v26  ;;  %v10743_v48 = vpop.eup %10742 }
 0x633   : > { %10251 = vmatprep.subr.bf16.mxu0 %v14139_v44  ;;  %v2280_v51 = vpop.xlane.xlu1 %2279 }
 0x634   : > { %4286 = vmatmul.mubr.f32.gmra.mrb[188].mxu0 %v2368_v32  ;;  %v2372_v32 = vmul.f32 %v10737_v27, %v17126_v2  ;;  %v2376_v2 = vmul.f32 %v10741_v23, %v17128_v45 }
 0x635   : > { %4290 = vmatprep.mubr.f32.mxu0 %v2371_v1  ;;  %v14151_v0 = vpop.f32.mrb[194].mxu1  ;;  %v2277_v1 = vpop.xlane.xlu0 %2276 }
 0x636   : > { %v14154_v5 = vpop.f32.mrb[195].mxu1  ;;  %10746 = vrcp.f32 %v2277_v1  ;;  %v2379_v1 = vmul.f32 %v10743_v48, %v17129_v29  ;;  %v17132_v29 = vld [vmem:[#allocation109_spill] sm:$0xff] }
 0x637   : > { %10748 = vrcp.f32 %v2280_v51 }
 0x638   : > { %4291 = vmatmul.mubr.f32.gmra.mrb[190].mxu0 %v2370_v40 }
 0x639   : > { %4295 = vmatprep.mubr.f32.mxu0 %v2373_v25  ;;  %v14157_v34 = vpop.f32.mrb[196].mxu1  ;;  %v17127_v25 = vld [vmem:[#allocation108_spill] sm:$0xff] }
 0x63a   : > { %v14160_v26 = vpop.f32.mrb[197].mxu1  ;;  %v2377_v4 = vmul.f32 %v10741_v23, %v17127_v25  ;;  %v10745_v63 = vpop.eup %10744  ;;  %v2378_v25 = vmul.f32 %v10743_v48, %v17130_v21 }
 0x63b   : > { %v2381_v51 = vmul.f32 %v10745_v63, %v17131_v50  ;;  %v2380_v45 = vmul.f32 %v10745_v63, %v17132_v29 }
 0x63c   : > { %4296 = vmatmul.mubr.f32.gmra.mrb[192].mxu0 %v2372_v32 }
 0x63d   : > { %4300 = vmatprep.mubr.f32.mxu0 %v2375_v43  ;;  %v14163_v24 = vpop.f32.mrb[198].mxu1  ;;  %v2283_v43 = vpop.xlane.xlu0 %2282 }
 0x63e   : > { %v14166_v40 = vpop.f32.mrb[199].mxu1  ;;  %10750 = vrcp.f32 %v2283_v43 }
 0x640   : > { %4301 = vmatmul.mubr.f32.gmra.mrb[194].mxu0 %v2374_v20  ;;  %v10747_v28 = vpop.eup %10746 }
 0x641   : > { %4305 = vmatprep.mubr.f32.mxu0 %v2377_v4  ;;  %v14169_v27 = vpop.f32.mrb[200].mxu1  ;;  %v2286_v4 = vpop.xlane.xlu1 %2285  ;;  %v2383_v43 = vmul.f32 %v10747_v28, %v13878_v18  ;;  %v2382_v50 = vmul.f32 %v10747_v28, %v13867_v22  ;;  %v17134_v18 = vld [vmem:[#allocation111_spill] sm:$0xff] }
 0x642   : > { %v14172_v32 = vpop.f32.mrb[201].mxu1  ;;  %10752 = vrcp.f32 %v2286_v4  ;;  %v10749_v17 = vpop.eup %10748 }
 0x643   : > { %v2384_v29 = vmul.f32 %v10749_v17, %v17134_v18 }
 0x644   : > { %4306 = vmatmul.mubr.f32.gmra.mrb[196].mxu0 %v2376_v2 }
 0x645   : > { %4310 = vmatprep.mubr.f32.mxu0 %v2379_v1  ;;  %v14175_v36 = vpop.f32.mrb[202].mxu1  ;;  %v2289_v1 = vpop.xlane.xlu0 %2288 }
 0x646   : > { %v14178_v20 = vpop.f32.mrb[203].mxu1  ;;  %10754 = vrcp.f32 %v2289_v1 }
 0x648   : > { %4311 = vmatmul.mubr.f32.gmra.mrb[198].mxu0 %v2378_v25  ;;  %v2292_v25 = vpop.xlane.xlu1 %2291  ;;  %v10751_v6 = vpop.eup %10750 }
 0x649   : > { %4315 = vmatprep.mubr.f32.mxu0 %v2381_v51  ;;  %v14181_v23 = vpop.f32.mrb[204].mxu1  ;;  %v17133_v51 = vld [vmem:[#allocation112_spill] sm:$0xff]  ;;  %10756 = vrcp.f32 %v2292_v25  ;;  %v2387_v1 = vmul.f32 %v10751_v6, %v13888_v58  ;;  %v2386_v28 = vmul.f32 %v10751_v6, %v13886_v46  ;;  %v17136_v58 = vld [vmem:[#allocation114_spill] sm:$0xff] }
 0x64a   : > { %v14184_v2 = vpop.f32.mrb[205].mxu1  ;;  %v2385_v4 = vmul.f32 %v10749_v17, %v17133_v51 }
 0x64c   : > { %4316 = vmatmul.mubr.f32.gmra.mrb[200].mxu0 %v2380_v45  ;;  %v10753_v8 = vpop.eup %10752  ;;  %v2298_v51 = vpop.xlane.xlu1 %2297 }
 0x64d   : > { %4320 = vmatprep.mubr.f32.mxu0 %v2383_v43  ;;  %v14187_v48 = vpop.f32.mrb[206].mxu1  ;;  %v2295_v43 = vpop.xlane.xlu0 %2294  ;;  %v2388_v18 = vmul.f32 %v10753_v8, %v17136_v58 }
 0x64e   : > { %v14190_v21 = vpop.f32.mrb[207].mxu1  ;;  %10758 = vrcp.f32 %v2295_v43 }
 0x64f   : > { %10760 = vrcp.f32 %v2298_v51 }
 0x650   : > { %4321 = vmatmul.mubr.f32.gmra.mrb[202].mxu0 %v2382_v50  ;;  %v10755_v37 = vpop.eup %10754 }
 0x651   : > { %4325 = vmatprep.mubr.f32.mxu0 %v2385_v4  ;;  %v14193_v63 = vpop.f32.mrb[208].mxu1  ;;  %v17135_v4 = vld [vmem:[#allocation139_spill] sm:$0xff]  ;;  %v2391_v43 = vmul.f32 %v10755_v37, %v13908_v10  ;;  %v2390_v46 = vmul.f32 %v10755_v37, %v13898_v47 }
 0x652   : > { %v14196_v45 = vpop.f32.mrb[209].mxu1  ;;  %v2389_v25 = vmul.f32 %v10753_v8, %v17135_v4  ;;  %v2304_v4 = vpop.xlane.xlu1 %2303 }
 0x653   : > { %v10757_v57 = vpop.eup %10756 }
 0x654   : > { %4326 = vmatmul.mubr.f32.gmra.mrb[204].mxu0 %v2384_v29  ;;  %v2393_v51 = vmul.f32 %v10757_v57, %v13872_v52  ;;  %v2392_v10 = vmul.f32 %v10757_v57, %v13869_v35 }
 0x655   : > { %4330 = vmatprep.mubr.f32.mxu0 %v2387_v1  ;;  %v14199_v22 = vpop.f32.mrb[210].mxu1  ;;  %v2301_v1 = vpop.xlane.xlu0 %2300 }
 0x656   : > { %v14202_v50 = vpop.f32.mrb[211].mxu1  ;;  %10762 = vrcp.f32 %v2301_v1 }
 0x657   : > { %10764 = vrcp.f32 %v2304_v4 }
 0x658   : > { %4331 = vmatmul.mubr.f32.gmra.mrb[206].mxu0 %v2386_v28 }
 0x659   : > { %4335 = vmatprep.mubr.f32.mxu0 %v2389_v25  ;;  %v14205_v17 = vpop.f32.mrb[212].mxu1  ;;  %v10759_v25 = vpop.eup %10758 }
 0x65a   : > { %v14208_v29 = vpop.f32.mrb[213].mxu1  ;;  %v2395_v1 = vmul.f32 %v10759_v25, %v13920_v39  ;;  %v2394_v52 = vmul.f32 %v10759_v25, %v13914_v61 }
 0x65c   : > { %4336 = vmatmul.mubr.f32.gmra.mrb[208].mxu0 %v2388_v18  ;;  %v2307_v18 = vpop.xlane.xlu0 %2306 }
 0x65d   : > { %4340 = vmatprep.mubr.f32.mxu0 %v2391_v43  ;;  %v14211_v6 = vpop.f32.mrb[214].mxu1  ;;  %v10761_v43 = vpop.eup %10760  ;;  %10766 = vrcp.f32 %v2307_v18 }
 0x65e   : > { %v14214_v28 = vpop.f32.mrb[215].mxu1  ;;  %v2396_v35 = vmul.f32 %v10761_v43, %v13900_v9 }
 0x660   : > { %4341 = vmatmul.mubr.f32.gmra.mrb[210].mxu0 %v2390_v46  ;;  %v2397_v46 = vmul.f32 %v10761_v43, %v13902_v60  ;;  %v10763_v4 = vpop.eup %10762 }
 0x661   : > { %4345 = vmatprep.mubr.f32.mxu0 %v2393_v51  ;;  %v14217_v8 = vpop.f32.mrb[216].mxu1  ;;  %v2399_v51 = vmul.f32 %v10763_v4, %v13934_v7  ;;  %v2398_v61 = vmul.f32 %v10763_v4, %v13924_v11 }
 0x662   : > { %v14220_v58 = vpop.f32.mrb[217].mxu1 }
 0x664   : > { %4346 = vmatmul.mubr.f32.gmra.mrb[212].mxu0 %v2392_v10  ;;  %v10765_v10 = vpop.eup %10764 }
 0x665   : > { %4350 = vmatprep.mubr.f32.mxu0 %v2395_v1  ;;  %v14223_v37 = vpop.f32.mrb[218].mxu1  ;;  %v2401_v60 = vmul.f32 %v10765_v10, %v13928_v42  ;;  %v2400_v9 = vmul.f32 %v10765_v10, %v13926_v3  ;;  %v8443_v3 = vld [vmem:[%s16233_s3 + $0x78] sm:$0xff] }
 0x666   : > { %v14226_v47 = vpop.f32.mrb[219].mxu1 }
 0x667   : > { %v10767_v1 = vpop.eup %10766 }
 0x668   : > { %4351 = vmatmul.mubr.f32.gmra.mrb[214].mxu0 %v2394_v52  ;;  %v2403_v7 = vmul.f32 %v10767_v1, %v13942_v41  ;;  %v2402_v11 = vmul.f32 %v10767_v1, %v13940_v19 }
 0x669   : > { %4355 = vmatprep.mubr.f32.mxu0 %v2397_v46  ;;  %v14229_v57 = vpop.f32.mrb[220].mxu1 }
 0x66a   : > { %v14232_v39 = vpop.f32.mrb[221].mxu1 }
 0x66c   : > { %4356 = vmatmul.mubr.f32.gmra.mrb[216].mxu0 %v2396_v35 }
 0x66d   : > { %4360 = vmatprep.mubr.f32.mxu0 %v2399_v51  ;;  %v14235_v18 = vpop.f32.mrb[222].mxu1  ;;  %v17137_v51 = vmov 0.0|0.0  }
 0x66e   : > { %v14238_v25 = vpop.f32.mrb[223].mxu1 }
 0x670   : > { %4361 = vmatmul.mubr.f32.gmra.mrb[218].mxu0 %v2398_v61  ;;  %v8442_v61 = vld [vmem:[%s16233_s3 + $0x70] sm:$0xff] }
 0x671   : > { %4365 = vmatprep.mubr.f32.mxu0 %v2401_v60  ;;  %v9696_v52 = vpop.f32.mrb[224].mxu1  ;;  %v10254_v19 = vpack.c.bf16 %v8443_v3, %v8442_v61 }
 0x672   : > { %v5510_v43 = vpop.f32.mrb[225].mxu1 }
 0x673   : > { %v10203_v46 = vpack.c.bf16 %v9696_v52, %v5510_v43  ;;  %v17138_v43 = vld [vmem:[#allocation21_spill] sm:$0xff] }
 0x674   : > { %4366 = vmatmul.mubr.f32.gmra.mrb[220].mxu0 %v2400_v9 }
 0x675   : > { %4370 = vmatprep.mubr.f32.mxu0 %v2403_v7  ;;  %v9699_v35 = vpop.f32.mrb[226].mxu1  ;;  %10204 = vmatpush1.bf16.msra.mxu1 %v10203_v46 }
 0x676   : > { %v5520_v4 = vpop.f32.mrb[227].mxu1  ;;  %10205 = vmatprep.subr.bf16.mxu1 %v17137_v51 }
 0x677   : > { %v10206_v42 = vpack.c.bf16 %v9699_v35, %v5520_v4 }
 0x678   : > { %4371 = vmatmul.mubr.f32.gmra.mrb[222].mxu0 %v2402_v11 }
 0x679   : > { %9050 = vmatprep.mubr.msk.f32.mxu0 %vm1249_vm0, %v14144_v14  ;;  %v9702_v41 = vpop.f32.mrb[228].mxu1  ;;  %10207 = vmatpush1.bf16.msra.mxu1 %v10206_v42 }
 0x67a   : > { %v5530_v10 = vpop.f32.mrb[229].mxu1  ;;  %10208 = vmatprep.subr.bf16.mxu1 %v17137_v51 }
 0x67b   : > { %v10209_v60 = vpack.c.bf16 %v9702_v41, %v5530_v10 }
 0x67c   : > { %9051 = vmatmul.mubr.msk.f32.vlgmr.msra.gmra.mrb[224].mxu0 %vm1249_vm0, %v14144_v14 }
 0x67d   : > { %10253 = vmatpush3.bf16.msra.mxu0 %v14139_v44  ;;  %9052 = vmatprep.mubr.msk.f32.mxu0 %vm1249_vm0, %v14141_v12  ;;  %v9705_v1 = vpop.f32.mrb[230].mxu1 }
 0x67e   : > { %10255 = vmatprep.subr.bf16.mxu0 %v10254_v19  ;;  %10210 = vmatpush1.bf16.msra.mxu1 %v10209_v60  ;;  %v5540_v52 = vpop.f32.mrb[231].mxu1 }
 0x67f   : > { %v10212_v9 = vpack.c.bf16 %v9705_v1, %v5540_v52  ;;  %10211 = vmatprep.subr.bf16.mxu1 %v17137_v51 }
 0x680   : > { %9053 = vmatmul.mubr.msk.f32.gmra.mrb[226].mxu0 %vm1249_vm0, %v14141_v12 }
 0x681   : > { %10257 = vmatpush3.bf16.msra.mxu0 %v10254_v19  ;;  %9054 = vmatprep.mubr.msk.f32.mxu0 %vm1249_vm0, %v14154_v5  ;;  %v9708_v14 = vpop.f32.mrb[232].mxu1 }
 0x682   : > { %10260 = vmatprep.subr.msk.bf16.mxu0 %vm11527_vm3, %v17138_v43  ;;  %10213 = vmatpush1.bf16.msra.mxu1 %v10212_v9  ;;  %v5550_v44 = vpop.f32.mrb[233].mxu1 }
 0x683   : > { %v10215_v7 = vpack.c.bf16 %v9708_v14, %v5550_v44  ;;  %10214 = vmatprep.subr.bf16.mxu1 %v17137_v51 }
 0x684   : > { %9055 = vmatmul.mubr.msk.f32.gmra.mrb[228].mxu0 %vm1249_vm0, %v14154_v5 }
 0x685   : > { %9056 = vmatprep.mubr.msk.f32.mxu0 %vm1249_vm0, %v14151_v0  ;;  %v9711_v12 = vpop.f32.mrb[234].mxu1 }
 0x686   : > { %10216 = vmatpush1.bf16.msra.mxu1 %v10215_v7  ;;  %v5560_v46 = vpop.f32.mrb[235].mxu1 }
 0x687   : > { %v10218_v35 = vpack.c.bf16 %v9711_v12, %v5560_v46  ;;  %10217 = vmatprep.subr.bf16.mxu1 %v17137_v51 }
 0x688   : > { %9057 = vmatmul.mubr.msk.f32.gmra.mrb[230].mxu0 %vm1249_vm0, %v14151_v0 }
 0x689   : > { %9058 = vmatprep.mubr.msk.f32.mxu0 %vm1249_vm0, %v14160_v26  ;;  %v9714_v11 = vpop.f32.mrb[236].mxu1 }
 0x68a   : > { %10219 = vmatpush1.bf16.msra.mxu1 %v10218_v35  ;;  %v5570_v4 = vpop.f32.mrb[237].mxu1 }
 0x68b   : > { %v10221_v42 = vpack.c.bf16 %v9714_v11, %v5570_v4  ;;  %10220 = vmatprep.subr.bf16.mxu1 %v17137_v51 }
 0x68c   : > { %9059 = vmatmul.mubr.msk.f32.gmra.mrb[232].mxu0 %vm1249_vm0, %v14160_v26 }
 0x68d   : > { %9060 = vmatprep.mubr.msk.f32.mxu0 %vm1249_vm0, %v14157_v34  ;;  %v9717_v5 = vpop.f32.mrb[238].mxu1 }
 0x68e   : > { %10222 = vmatpush1.bf16.msra.mxu1 %v10221_v42  ;;  %v5580_v61 = vpop.f32.mrb[239].mxu1 }
 0x68f   : > { %v10224_v3 = vpack.c.bf16 %v9717_v5, %v5580_v61  ;;  %10223 = vmatprep.subr.bf16.mxu1 %v17137_v51 }
 0x690   : > { %9061 = vmatmul.mubr.msk.f32.gmra.mrb[234].mxu0 %vm1249_vm0, %v14157_v34 }
 0x691   : > { %9062 = vmatprep.mubr.msk.f32.mxu0 %vm1249_vm0, %v14166_v40  ;;  %v9720_v0 = vpop.f32.mrb[240].mxu1 }
 0x692   : > { %10225 = vmatpush1.bf16.msra.mxu1 %v10224_v3  ;;  %v5590_v41 = vpop.f32.mrb[241].mxu1 }
 0x693   : > { %v10227_v10 = vpack.c.bf16 %v9720_v0, %v5590_v41  ;;  %10226 = vmatprep.subr.bf16.mxu1 %v17137_v51 }
 0x694   : > { %9063 = vmatmul.mubr.msk.f32.gmra.mrb[236].mxu0 %vm1249_vm0, %v14166_v40 }
 0x695   : > { %9064 = vmatprep.mubr.msk.f32.mxu0 %vm1249_vm0, %v14163_v24  ;;  %v9723_v26 = vpop.f32.mrb[242].mxu1 }
 0x696   : > { %10228 = vmatpush1.bf16.msra.mxu1 %v10227_v10  ;;  %v5600_v19 = vpop.f32.mrb[243].mxu1 }
 0x697   : > { %v10230_v60 = vpack.c.bf16 %v9723_v26, %v5600_v19  ;;  %10229 = vmatprep.subr.bf16.mxu1 %v17137_v51  ;;  %v17152_v26 = vld [vmem:[#allocation23_spill] sm:$0xff]  ;;  %v17154_v19 = vld [vmem:[#allocation25_spill] sm:$0xff] }
 0x698   : > { %9065 = vmatmul.mubr.msk.f32.gmra.mrb[238].mxu0 %vm1249_vm0, %v14163_v24 }
 0x699   : > { %9066 = vmatprep.mubr.msk.f32.mxu0 %vm1249_vm0, %v14172_v32  ;;  %v9726_v34 = vpop.f32.mrb[244].mxu1 }
 0x69a   : > { %10231 = vmatpush1.bf16.msra.mxu1 %v10230_v60  ;;  %v5610_v1 = vpop.f32.mrb[245].mxu1  ;;  %v17155_v60 = vld [vmem:[#allocation143_spill] sm:$0xff] }
 0x69b   : > { %v10233_v52 = vpack.c.bf16 %v9726_v34, %v5610_v1  ;;  %10232 = vmatprep.subr.bf16.mxu1 %v17137_v51  ;;  %v17157_v1 = vld [vmem:[#allocation5_spill] sm:$0xff] }
 0x69c   : > { %9067 = vmatmul.mubr.msk.f32.gmra.mrb[240].mxu0 %vm1249_vm0, %v14172_v32 }
 0x69d   : > { %9068 = vmatprep.mubr.msk.f32.mxu0 %vm1249_vm0, %v14169_v27  ;;  %v9729_v40 = vpop.f32.mrb[246].mxu1 }
 0x69e   : > { %10234 = vmatpush1.bf16.msra.mxu1 %v10233_v52  ;;  %v5620_v9 = vpop.f32.mrb[247].mxu1  ;;  %v17158_v52 = vld [vmem:[#allocation6_spill] sm:$0xff] }
 0x69f   : > { %v10236_v14 = vpack.c.bf16 %v9729_v40, %v5620_v9  ;;  %10235 = vmatprep.subr.bf16.mxu1 %v17137_v51  ;;  %v17159_v9 = vld [vmem:[#allocation142_spill] sm:$0xff] }
 0x6a0   : > { %9069 = vmatmul.mubr.msk.f32.gmra.mrb[242].mxu0 %vm1249_vm0, %v14169_v27 }
 0x6a1   : > { %9070 = vmatprep.mubr.msk.f32.mxu0 %vm1249_vm0, %v14178_v20  ;;  %v9732_v24 = vpop.f32.mrb[248].mxu1 }
 0x6a2   : > { %10237 = vmatpush1.bf16.msra.mxu1 %v10236_v14  ;;  %v5630_v43 = vpop.f32.mrb[249].mxu1 }
 0x6a3   : > { %v10239_v44 = vpack.c.bf16 %v9732_v24, %v5630_v43  ;;  %10238 = vmatprep.subr.bf16.mxu1 %v17137_v51  ;;  %v17161_v43 = vld [vmem:[#allocation7_spill] sm:$0xff] }
 0x6a4   : > { %9071 = vmatmul.mubr.msk.f32.gmra.mrb[244].mxu0 %vm1249_vm0, %v14178_v20 }
 0x6a5   : > { %9072 = vmatprep.mubr.msk.f32.mxu0 %vm1249_vm0, %v14175_v36  ;;  %v9735_v32 = vpop.f32.mrb[250].mxu1 }
 0x6a6   : > { %10240 = vmatpush1.bf16.msra.mxu1 %v10239_v44  ;;  %v5640_v7 = vpop.f32.mrb[251].mxu1  ;;  %v17162_v44 = vld [vmem:[#allocation28_spill] sm:$0xff] }
 0x6a7   : > { %v10242_v12 = vpack.c.bf16 %v9735_v32, %v5640_v7  ;;  %10241 = vmatprep.subr.bf16.mxu1 %v17137_v51  ;;  %v17163_v32 = vld [vmem:[#allocation8_spill] sm:$0xff]  ;;  %v17164_v7 = vld [vmem:[#allocation30_spill] sm:$0xff] }
 0x6a8   : > { %9073 = vmatmul.mubr.msk.f32.gmra.mrb[246].mxu0 %vm1249_vm0, %v14175_v36 }
 0x6a9   : > { %9074 = vmatprep.mubr.msk.f32.mxu0 %vm1249_vm0, %v14184_v2  ;;  %v9738_v27 = vpop.f32.mrb[252].mxu1 }
 0x6aa   : > { %10243 = vmatpush1.bf16.msra.mxu1 %v10242_v12  ;;  %v5650_v46 = vpop.f32.mrb[253].mxu1 }
 0x6ab   : > { %v10245_v35 = vpack.c.bf16 %v9738_v27, %v5650_v46  ;;  %10244 = vmatprep.subr.bf16.mxu1 %v17137_v51  ;;  %v17165_v27 = vld [vmem:[#allocation146_spill] sm:$0xff] }
 0x6ac   : > { %9075 = vmatmul.mubr.msk.f32.gmra.mrb[248].mxu0 %vm1249_vm0, %v14184_v2 }
 0x6ad   : > { %9076 = vmatprep.mubr.msk.f32.mxu0 %vm1249_vm0, %v14181_v23  ;;  %v9741_v20 = vpop.f32.mrb[254].mxu1 }
 0x6ae   : > { %10246 = vmatpush1.bf16.msra.mxu1 %v10245_v35  ;;  %v5660_v11 = vpop.f32.mrb[255].mxu1 }
 0x6af   : > { %v10248_v4 = vpack.c.bf16 %v9741_v20, %v5660_v11  ;;  %10247 = vmatprep.subr.bf16.mxu1 %v17137_v51  ;;  %v17167_v20 = vld [vmem:[#allocation9_spill] sm:$0xff]  ;;  %v17168_v11 = vld [vmem:[#allocation10_spill] sm:$0xff] }
 0x6b0   : > { %9077 = vmatmul.mubr.msk.f32.gmra.mrb[250].mxu0 %vm1249_vm0, %v14181_v23 }
 0x6b1   : > { %9078 = vmatprep.mubr.msk.f32.mxu0 %vm1249_vm0, %v14190_v21 }
 0x6b2   : > { %10249 = vmatpush1.bf16.msra.mxu1 %v10248_v4 }
 0x6b4   : > { %9079 = vmatmul.mubr.msk.f32.gmra.mrb[252].mxu0 %vm1249_vm0, %v14190_v21 }
 0x6b5   : > { %9080 = vmatprep.mubr.msk.f32.mxu0 %vm1249_vm0, %v14187_v48 }
 0x6b8   : > { %9081 = vmatmul.mubr.msk.f32.gmra.mrb[254].mxu0 %vm1249_vm0, %v14187_v48 }
 0x6b9   : > { %9082 = vmatprep.mubr.msk.f32.mxu0 %vm1249_vm0, %v14196_v45 }
 0x6bc   : > { %9083 = vmatmul.mubr.msk.f32.gmra.mrb[0].mxu0 %vm1249_vm0, %v14196_v45 }
 0x6bd   : > { %9084 = vmatprep.mubr.msk.f32.mxu0 %vm1249_vm0, %v14193_v63 }
 0x6c0   : > { %9085 = vmatmul.mubr.msk.f32.gmra.mrb[2].mxu0 %vm1249_vm0, %v14193_v63 }
 0x6c1   : > { %9086 = vmatprep.mubr.msk.f32.mxu0 %vm1249_vm0, %v14202_v50 }
 0x6c4   : > { %9087 = vmatmul.mubr.msk.f32.gmra.mrb[4].mxu0 %vm1249_vm0, %v14202_v50 }
 0x6c5   : > { %9088 = vmatprep.mubr.msk.f32.mxu0 %vm1249_vm0, %v14199_v22 }
 0x6c8   : > { %9089 = vmatmul.mubr.msk.f32.gmra.mrb[6].mxu0 %vm1249_vm0, %v14199_v22 }
 0x6c9   : > { %9090 = vmatprep.mubr.msk.f32.mxu0 %vm1249_vm0, %v14208_v29 }
 0x6cc   : > { %9091 = vmatmul.mubr.msk.f32.gmra.mrb[8].mxu0 %vm1249_vm0, %v14208_v29  ;;  %v4217_v36 = vpop.f32.mrb[160].mxu0 }
 0x6cd   : > { %9092 = vmatprep.mubr.msk.f32.mxu0 %vm1249_vm0, %v14205_v17  ;;  %v14356_v23 = vadd.f32 %v4217_v36, %v13956_v38  ;;  %v4219_v2 = vpop.f32.mrb[161].mxu0  ;;  %v17169_v36 = vld [vmem:[#allocation145_spill] sm:$0xff] }
 0x6cf   : > { %17139 = vst [vmem:[#allocation54_spill] sm:$0xff] %v14356_v23 }
 0x6d0   : > { %9093 = vmatmul.mubr.msk.f32.gmra.mrb[10].mxu0 %vm1249_vm0, %v14205_v17 }
 0x6d1   : > { %9094 = vmatprep.mubr.msk.f32.mxu0 %vm1249_vm0, %v14214_v28  ;;  %v4222_v48 = vpop.f32.mrb[162].mxu0 }
 0x6d2   : > { %v14363_v21 = vadd.f32 %v4222_v48, %v13962_v53  ;;  %v4224_v63 = vpop.f32.mrb[163].mxu0 }
 0x6d3   : > { %v17171_v63 = vld [vmem:[#allocation11_spill] sm:$0xff] }
 0x6d4   : > { %17140 = vst [vmem:[#allocation56_spill] sm:$0xff] %v14363_v21  ;;  %9095 = vmatmul.mubr.msk.f32.gmra.mrb[12].mxu0 %vm1249_vm0, %v14214_v28 }
 0x6d5   : > { %9096 = vmatprep.mubr.msk.f32.mxu0 %vm1249_vm0, %v14211_v6 }
 0x6d6   : > { %v4227_v38 = vpop.f32.mrb[164].mxu0 }
 0x6d7   : > { %v14370_v45 = vadd.f32 %v4227_v38, %v13968_v56  ;;  %v4229_v22 = vpop.f32.mrb[165].mxu0  ;;  %v17172_v38 = vld [vmem:[#allocation34_spill] sm:$0xff] }
 0x6d8   : > { %9097 = vmatmul.mubr.msk.f32.gmra.mrb[14].mxu0 %vm1249_vm0, %v14211_v6  ;;  %v17173_v22 = vld [vmem:[#allocation12_spill] sm:$0xff] }
 0x6d9   : > { %17141 = vst [vmem:[#allocation167_spill] sm:$0xff] %v14370_v45  ;;  %9098 = vmatprep.mubr.msk.f32.mxu0 %vm1249_vm0, %v14220_v58  ;;  %v17244_v45 = vld [vmem:[#allocation122_spill] sm:$0xff] }
 0x6da   : > { %v4232_v53 = vpop.f32.mrb[166].mxu0 }
 0x6db   : > { %v14377_v50 = vadd.f32 %v4232_v53, %v13974_v13  ;;  %v4234_v17 = vpop.f32.mrb[167].mxu0  ;;  %v17174_v53 = vld [vmem:[#allocation36_spill] sm:$0xff] }
 0x6dc   : > { %9099 = vmatmul.mubr.msk.f32.gmra.mrb[16].mxu0 %vm1249_vm0, %v14220_v58 }
 0x6dd   : > { %17142 = vst [vmem:[#allocation166_spill] sm:$0xff] %v14377_v50  ;;  %9100 = vmatprep.mubr.msk.f32.mxu0 %vm1249_vm0, %v14217_v8 }
 0x6de   : > { %v4237_v56 = vpop.f32.mrb[168].mxu0 }
 0x6df   : > { %v14384_v29 = vadd.f32 %v4237_v56, %v13980_v15  ;;  %v4239_v28 = vpop.f32.mrb[169].mxu0  ;;  %v17175_v56 = vld [vmem:[#allocation149_spill] sm:$0xff] }
 0x6e0   : > { %9101 = vmatmul.mubr.msk.f32.gmra.mrb[18].mxu0 %vm1249_vm0, %v14217_v8 }
 0x6e1   : > { %17143 = vst [vmem:[#allocation57_spill] sm:$0xff] %v14384_v29  ;;  %9102 = vmatprep.mubr.msk.f32.mxu0 %vm1249_vm0, %v14226_v47 }
 0x6e2   : > { %v4242_v13 = vpop.f32.mrb[170].mxu0 }
 0x6e3   : > { %v14391_v6 = vadd.f32 %v4242_v13, %v13986_v54  ;;  %v4244_v42 = vpop.f32.mrb[171].mxu0 }
 0x6e4   : > { %9103 = vmatmul.mubr.msk.f32.gmra.mrb[20].mxu0 %vm1249_vm0, %v14226_v47  ;;  %v17177_v42 = vld [vmem:[#allocation13_spill] sm:$0xff] }
 0x6e5   : > { %17144 = vst [vmem:[#allocation58_spill] sm:$0xff] %v14391_v6  ;;  %9104 = vmatprep.mubr.msk.f32.mxu0 %vm1249_vm0, %v14223_v37  ;;  %v17243_v6 = vld [vmem:[#allocation121_spill] sm:$0xff] }
 0x6e6   : > { %v4247_v15 = vpop.f32.mrb[172].mxu0 }
 0x6e7   : > { %v14398_v58 = vadd.f32 %v4247_v15, %v13992_v30  ;;  %v4249_v5 = vpop.f32.mrb[173].mxu0  ;;  %v17178_v15 = vld [vmem:[#allocation14_spill] sm:$0xff] }
 0x6e8   : > { %9105 = vmatmul.mubr.msk.f32.gmra.mrb[22].mxu0 %vm1249_vm0, %v14223_v37 }
 0x6e9   : > { %17145 = vst [vmem:[#allocation169_spill] sm:$0xff] %v14398_v58  ;;  %9106 = vmatprep.mubr.msk.f32.mxu0 %vm1249_vm0, %v14232_v39 }
 0x6ea   : > { %v4252_v54 = vpop.f32.mrb[174].mxu0 }
 0x6eb   : > { %v14405_v8 = vadd.f32 %v4252_v54, %v13998_v62  ;;  %v4254_v61 = vpop.f32.mrb[175].mxu0  ;;  %v17179_v54 = vld [vmem:[#allocation148_spill] sm:$0xff] }
 0x6ec   : > { %9107 = vmatmul.mubr.msk.f32.gmra.mrb[24].mxu0 %vm1249_vm0, %v14232_v39 }
 0x6ed   : > { %17146 = vst [vmem:[#allocation168_spill] sm:$0xff] %v14405_v8  ;;  %9108 = vmatprep.mubr.msk.f32.mxu0 %vm1249_vm0, %v14229_v57 }
 0x6ef   : > { %v4257_v30 = vpop.f32.mrb[176].mxu0 }
 0x6f0   : > { %v14412_v47 = vadd.f32 %v4257_v30, %v14004_v16  ;;  %v4259_v3 = vpop.f32.mrb[177].mxu0  ;;  %9109 = vmatmul.mubr.msk.f32.gmra.mrb[26].mxu0 %vm1249_vm0, %v14229_v57 }
 0x6f1   : > { %9110 = vmatprep.mubr.msk.f32.mxu0 %vm1249_vm0, %v14238_v25  ;;  %v17181_v3 = vld [vmem:[#allocation15_spill] sm:$0xff] }
 0x6f2   : > { %17147 = vst [vmem:[#allocation59_spill] sm:$0xff] %v14412_v47  ;;  %v17242_v47 = vld [vmem:[#allocation120_spill] sm:$0xff] }
 0x6f3   : > { %v4262_v62 = vpop.f32.mrb[178].mxu0 }
 0x6f4   : > { %v14419_v37 = vadd.f32 %v4262_v62, %v14010_v49  ;;  %v4264_v0 = vpop.f32.mrb[179].mxu0  ;;  %9111 = vmatmul.mubr.msk.f32.gmra.mrb[28].mxu0 %vm1249_vm0, %v14238_v25  ;;  %v17151_v25 = vld [vmem:[#allocation3_spill] sm:$0xff]  ;;  %v17182_v62 = vld [vmem:[#allocation40_spill] sm:$0xff] }
 0x6f5   : > { %9112 = vmatprep.mubr.msk.f32.mxu0 %vm1249_vm0, %v14235_v18  ;;  %v17183_v0 = vld [vmem:[#allocation16_spill] sm:$0xff] }
 0x6f6   : > { %17148 = vst [vmem:[#allocation60_spill] sm:$0xff] %v14419_v37 }
 0x6f7   : > { %v4267_v16 = vpop.f32.mrb[180].mxu0 }
 0x6f8   : > { %v14426_v39 = vadd.f32 %v4267_v16, %v14016_v33  ;;  %v4269_v41 = vpop.f32.mrb[181].mxu0  ;;  %9113 = vmatmul.mubr.msk.f32.gmra.mrb[30].mxu0 %vm1249_vm0, %v14235_v18  ;;  %v17153_v33 = vld [vmem:[#allocation4_spill] sm:$0xff]  ;;  %v17184_v16 = vld [vmem:[#allocation42_spill] sm:$0xff] }
 0x6f9   : > { %9750 = vmatprep.mubr.msk.f32.mxu0 %vm1249_vm0, %v16979_v31  ;;  %v17255_v31 = vld [vmem:[#allocation133_spill] sm:$0xff] }
 0x6fa   : > { %17149 = vst [vmem:[#allocation63_spill] sm:$0xff] %v14426_v39 }
 0x6fb   : > { %v4272_v49 = vpop.f32.mrb[182].mxu0 }
 0x6fc   : > { %v14433_v57 = vadd.f32 %v4272_v49, %v14020_v59  ;;  %v4274_v10 = vpop.f32.mrb[183].mxu0  ;;  %9751 = vmatmul.mubr.msk.f32.vlgmr.msra.gmra.mrb[32].mxu0 %vm1249_vm0, %v17151_v25  ;;  %v17185_v49 = vld [vmem:[#allocation161_spill] sm:$0xff] }
 0x6fd   : > { %10263 = vmatpush3.bf16.xpose.msk.msra.mxu0 %vm11527_vm3, %v17152_v26  ;;  %9753 = vmatprep.mubr.msk.f32.mxu0 %vm1249_vm0, %v17153_v33 }
 0x6fe   : > { %17150 = vst [vmem:[#allocation61_spill] sm:$0xff] %v14433_v57  ;;  %10266 = vmatprep.subr.msk.bf16.mxu0 %vm11527_vm3, %v17154_v19  ;;  %v17187_v19 = vld [vmem:[#allocation17_spill] sm:$0xff]  ;;  %v17241_v57 = vld [vmem:[#allocation119_spill] sm:$0xff] }
 0x6ff   : > { %v4277_v18 = vpop.f32.mrb[184].mxu0 }
 0x700   : > { %v14446_v34 = vadd.f32 %v4277_v18, %v17155_v60  ;;  %v4279_v59 = vpop.f32.mrb[185].mxu0  ;;  %9754 = vmatmul.mubr.msk.f32.gmra.mrb[34].mxu0 %vm1249_vm0, %v17157_v1  ;;  %v17188_v18 = vld [vmem:[#allocation19_spill] sm:$0xff]  ;;  %v17254_v1 = vld [vmem:[#allocation132_spill] sm:$0xff] }
 0x701   : > { %9756 = vmatprep.mubr.msk.f32.mxu0 %vm1249_vm0, %v17158_v52  ;;  %v17189_v59 = vld [vmem:[#allocation160_spill] sm:$0xff] }
 0x702   : > { %17156 = vst [vmem:[#allocation62_spill] sm:$0xff] %v14446_v34 }
 0x703   : > { %v4282_v40 = vpop.f32.mrb[186].mxu0 }
 0x704   : > { %v14453_v14 = vadd.f32 %v4282_v40, %v17159_v9  ;;  %v4284_v24 = vpop.f32.mrb[187].mxu0  ;;  %9757 = vmatmul.mubr.msk.f32.gmra.mrb[36].mxu0 %vm1249_vm0, %v17161_v43 }
 0x705   : > { %10269 = vmatpush3.bf16.xpose.msk.msra.mxu0 %vm11527_vm3, %v17162_v44  ;;  %9759 = vmatprep.mubr.msk.f32.mxu0 %vm1249_vm0, %v17163_v32  ;;  %v17191_v24 = vld [vmem:[#allocation18_spill] sm:$0xff]  ;;  %v17192_v44 = vld [vmem:[#allocation44_spill] sm:$0xff]  ;;  %v17253_v32 = vld [vmem:[#allocation131_spill] sm:$0xff] }
 0x706   : > { %17160 = vst [vmem:[#allocation64_spill] sm:$0xff] %v14453_v14  ;;  %10272 = vmatprep.subr.msk.bf16.mxu0 %vm11527_vm3, %v17164_v7  ;;  %v17193_v7 = vld [vmem:[#allocation24_spill] sm:$0xff]  ;;  %v17235_v14 = vld [vmem:[#allocation55_spill] sm:$0xff] }
 0x707   : > { %v4287_v12 = vpop.f32.mrb[188].mxu0 }
 0x708   : > { %v14466_v46 = vadd.f32 %v4287_v12, %v17165_v27  ;;  %v4289_v35 = vpop.f32.mrb[189].mxu0  ;;  %9760 = vmatmul.mubr.msk.f32.gmra.mrb[38].mxu0 %vm1249_vm0, %v17167_v20  ;;  %v17194_v12 = vld [vmem:[#allocation45_spill] sm:$0xff] }
 0x709   : > { %9762 = vmatprep.mubr.msk.f32.mxu0 %vm1249_vm0, %v17168_v11  ;;  %v17195_v35 = vld [vmem:[#allocation162_spill] sm:$0xff] }
 0x70a   : > { %17166 = vst [vmem:[#allocation71_spill] sm:$0xff] %v14466_v46 }
 0x70b   : > { %v4292_v4 = vpop.f32.mrb[190].mxu0 }
 0x70c   : > { %v14473_v2 = vadd.f32 %v4292_v4, %v17169_v36  ;;  %v4294_v48 = vpop.f32.mrb[191].mxu0  ;;  %9763 = vmatmul.mubr.msk.f32.gmra.mrb[40].mxu0 %vm1249_vm0, %v17171_v63 }
 0x70d   : > { %10275 = vmatpush3.bf16.xpose.msk.msra.mxu0 %vm11527_vm3, %v17172_v38  ;;  %9765 = vmatprep.mubr.msk.f32.mxu0 %vm1249_vm0, %v17173_v22  ;;  %v17197_v48 = vld [vmem:[#allocation22_spill] sm:$0xff]  ;;  %v17198_v38 = vld [vmem:[#allocation27_spill] sm:$0xff] }
 0x70e   : > { %17170 = vst [vmem:[#allocation72_spill] sm:$0xff] %v14473_v2  ;;  %10278 = vmatprep.subr.msk.bf16.mxu0 %vm11527_vm3, %v17174_v53  ;;  %v17252_v22 = vld [vmem:[#allocation130_spill] sm:$0xff] }
 0x70f   : > { %v4297_v17 = vpop.f32.mrb[192].mxu0 }
 0x710   : > { %v14486_v28 = vadd.f32 %v4297_v17, %v17175_v56  ;;  %v4299_v13 = vpop.f32.mrb[193].mxu0  ;;  %9766 = vmatmul.mubr.msk.f32.gmra.mrb[42].mxu0 %vm1249_vm0, %v17177_v42  ;;  %v17199_v17 = vld [vmem:[#allocation154_spill] sm:$0xff] }
 0x711   : > { %9768 = vmatprep.mubr.msk.f32.mxu0 %vm1249_vm0, %v17178_v15 }
 0x712   : > { %17176 = vst [vmem:[#allocation67_spill] sm:$0xff] %v14486_v28 }
 0x713   : > { %v4302_v5 = vpop.f32.mrb[194].mxu0 }
 0x714   : > { %v14493_v61 = vadd.f32 %v4302_v5, %v17179_v54  ;;  %v4304_v30 = vpop.f32.mrb[195].mxu0  ;;  %9769 = vmatmul.mubr.msk.f32.gmra.mrb[44].mxu0 %vm1249_vm0, %v17181_v3  ;;  %v17201_v5 = vld [vmem:[#allocation26_spill] sm:$0xff]  ;;  %v17251_v3 = vld [vmem:[#allocation129_spill] sm:$0xff] }
 0x715   : > { %10281 = vmatpush3.bf16.xpose.msk.msra.mxu0 %vm11527_vm3, %v17182_v62  ;;  %9771 = vmatprep.mubr.msk.f32.mxu0 %vm1249_vm0, %v17183_v0  ;;  %v17202_v54 = vld [vmem:[#allocation46_spill] sm:$0xff]  ;;  %v17203_v30 = vld [vmem:[#allocation29_spill] sm:$0xff]  ;;  %v17204_v62 = vld [vmem:[#allocation47_spill] sm:$0xff] }
 0x716   : > { %17180 = vst [vmem:[#allocation65_spill] sm:$0xff] %v14493_v61  ;;  %10284 = vmatprep.subr.msk.bf16.mxu0 %vm11527_vm3, %v17184_v16  ;;  %v17231_v61 = vld [vmem:[#allocation164_spill] sm:$0xff] }
 0x717   : > { %v4307_v41 = vpop.f32.mrb[196].mxu0 }
 0x718   : > { %v14506_v10 = vadd.f32 %v4307_v41, %v17185_v49  ;;  %v4309_v26 = vpop.f32.mrb[197].mxu0  ;;  %9772 = vmatmul.mubr.msk.f32.gmra.mrb[46].mxu0 %vm1249_vm0, %v17187_v19  ;;  %v17205_v41 = vld [vmem:[#allocation157_spill] sm:$0xff] }
 0x719   : > { %9774 = vmatprep.mubr.msk.f32.mxu0 %vm1249_vm0, %v17188_v18  ;;  %v17250_v18 = vld [vmem:[#allocation128_spill] sm:$0xff] }
 0x71a   : > { %17186 = vst [vmem:[#allocation75_spill] sm:$0xff] %v14506_v10 }
 0x71b   : > { %v4312_v60 = vpop.f32.mrb[198].mxu0 }
 0x71c   : > { %v14513_v40 = vadd.f32 %v4312_v60, %v17189_v59  ;;  %v4314_v9 = vpop.f32.mrb[199].mxu0  ;;  %9775 = vmatmul.mubr.msk.f32.gmra.mrb[48].mxu0 %vm1249_vm0, %v17191_v24  ;;  %v17207_v60 = vld [vmem:[#allocation31_spill] sm:$0xff]  ;;  %v17208_v59 = vld [vmem:[#allocation32_spill] sm:$0xff] }
 0x71d   : > { %10287 = vmatpush3.bf16.xpose.msk.msra.mxu0 %vm11527_vm3, %v17192_v44  ;;  %9777 = vmatprep.mubr.msk.f32.mxu0 %vm1249_vm0, %v17193_v7  ;;  %v17209_v44 = vld [vmem:[#allocation156_spill] sm:$0xff] }
 0x71e   : > { %17190 = vst [vmem:[#allocation76_spill] sm:$0xff] %v14513_v40  ;;  %10290 = vmatprep.subr.msk.bf16.mxu0 %vm11527_vm3, %v17194_v12  ;;  %v17229_v40 = vld [vmem:[#allocation165_spill] sm:$0xff] }
 0x71f   : > { %v4317_v27 = vpop.f32.mrb[200].mxu0 }
 0x720   : > { %v14526_v4 = vadd.f32 %v4317_v27, %v17195_v35  ;;  %v4319_v36 = vpop.f32.mrb[201].mxu0  ;;  %9778 = vmatmul.mubr.msk.f32.gmra.mrb[50].mxu0 %vm1249_vm0, %v17197_v48  ;;  %v17211_v35 = vld [vmem:[#allocation33_spill] sm:$0xff]  ;;  %v17249_v48 = vld [vmem:[#allocation127_spill] sm:$0xff] }
 0x721   : > { %9780 = vmatprep.mubr.msk.f32.mxu0 %vm1249_vm0, %v17198_v38  ;;  %v17212_v36 = vld [vmem:[#allocation48_spill] sm:$0xff] }
 0x722   : > { %17196 = vst [vmem:[#allocation66_spill] sm:$0xff] %v14526_v4 }
 0x723   : > { %v4322_v53 = vpop.f32.mrb[202].mxu0 }
 0x724   : > { %v14533_v56 = vadd.f32 %v4322_v53, %v17199_v17  ;;  %v4324_v13 = vpop.f32.mrb[203].mxu0  ;;  %9781 = vmatmul.mubr.msk.f32.gmra.mrb[52].mxu0 %vm1249_vm0, %v17201_v5  ;;  %v17213_v53 = vld [vmem:[#allocation35_spill] sm:$0xff]  ;;  %v17214_v17 = vld [vmem:[#allocation49_spill] sm:$0xff] }
 0x725   : > { %10293 = vmatpush3.bf16.xpose.msk.msra.mxu0 %vm11527_vm3, %v17202_v54  ;;  %9783 = vmatprep.mubr.msk.f32.mxu0 %vm1249_vm0, %v17203_v30  ;;  %v17215_v54 = vld [vmem:[#allocation163_spill] sm:$0xff]  ;;  %v17248_v30 = vld [vmem:[#allocation126_spill] sm:$0xff] }
 0x726   : > { %17200 = vst [vmem:[#allocation68_spill] sm:$0xff] %v14533_v56  ;;  %10296 = vmatprep.subr.msk.bf16.mxu0 %vm11527_vm3, %v17204_v62  ;;  %v17226_v56 = vld [vmem:[#allocation43_spill] sm:$0xff] }
 0x727   : > { %v4327_v16 = vpop.f32.mrb[204].mxu0 }
 0x728   : > { %v14546_v49 = vadd.f32 %v4327_v16, %v17205_v41  ;;  %v4329_v26 = vpop.f32.mrb[205].mxu0  ;;  %9784 = vmatmul.mubr.msk.f32.gmra.mrb[54].mxu0 %vm1249_vm0, %v17207_v60  ;;  %v17217_v41 = vld [vmem:[#allocation37_spill] sm:$0xff] }
 0x729   : > { %9786 = vmatprep.mubr.msk.f32.mxu0 %vm1249_vm0, %v17208_v59  ;;  %v17218_v26 = vld [vmem:[#allocation38_spill] sm:$0xff] }
 0x72a   : > { %17206 = vst [vmem:[#allocation79_spill] sm:$0xff] %v14546_v49 }
 0x72b   : > { %v4332_v9 = vpop.f32.mrb[206].mxu0 }
 0x72c   : > { %v14553_v12 = vadd.f32 %v4332_v9, %v17209_v44  ;;  %v4334_v27 = vpop.f32.mrb[207].mxu0  ;;  %9787 = vmatmul.mubr.msk.f32.gmra.mrb[56].mxu0 %vm1249_vm0, %v17211_v35  ;;  %v17219_v44 = vld [vmem:[#allocation159_spill] sm:$0xff]  ;;  %v17247_v35 = vld [vmem:[#allocation125_spill] sm:$0xff] }
 0x72d   : > { %10299 = vmatpush3.bf16.xpose.msk.msra.mxu0 %vm11527_vm3, %v17212_v36  ;;  %9789 = vmatprep.mubr.msk.f32.mxu0 %vm1249_vm0, %v17213_v53 }
 0x72e   : > { %17210 = vst [vmem:[#allocation80_spill] sm:$0xff] %v14553_v12  ;;  %10302 = vmatprep.subr.msk.bf16.mxu0 %vm11527_vm3, %v17214_v17  ;;  %v17221_v12 = vld [vmem:[#allocation39_spill] sm:$0xff]  ;;  %v17222_v17 = vld [vmem:[#allocation50_spill] sm:$0xff] }
 0x72f   : > { %v4337_v13 = vpop.f32.mrb[208].mxu0 }
 0x730   : > { %v14566_v62 = vadd.f32 %v4337_v13, %v17215_v54  ;;  %v4339_v16 = vpop.f32.mrb[209].mxu0  ;;  %9790 = vmatmul.mubr.msk.f32.gmra.mrb[58].mxu0 %vm1249_vm0, %v17217_v41  ;;  %v17223_v13 = vld [vmem:[#allocation41_spill] sm:$0xff] }
 0x731   : > { %9792 = vmatprep.mubr.msk.f32.mxu0 %vm1249_vm0, %v17218_v26  ;;  %v17224_v16 = vld [vmem:[#allocation51_spill] sm:$0xff]  ;;  %v17246_v26 = vld [vmem:[#allocation124_spill] sm:$0xff] }
 0x732   : > { %17216 = vst [vmem:[#allocation69_spill] sm:$0xff] %v14566_v62 }
 0x733   : > { %v4342_v9 = vpop.f32.mrb[210].mxu0 }
 0x734   : > { %v14573_v27 = vadd.f32 %v4342_v9, %v17219_v44  ;;  %v4344_v36 = vpop.f32.mrb[211].mxu0  ;;  %9793 = vmatmul.mubr.msk.f32.gmra.mrb[60].mxu0 %vm1249_vm0, %v17221_v12  ;;  %v17227_v44 = vld [vmem:[#allocation52_spill] sm:$0xff] }
 0x735   : > { %10305 = vmatpush3.bf16.xpose.msk.msra.mxu0 %vm11527_vm3, %v17222_v17  ;;  %9795 = vmatprep.mubr.msk.f32.mxu0 %vm1249_vm0, %v17223_v13 }
 0x736   : > { %17220 = vst [vmem:[#allocation70_spill] sm:$0xff] %v14573_v27 }
 0x737   : > { %v4347_v54 = vpop.f32.mrb[212].mxu0 }
 0x738   : > { %v14583_v62 = vadd.f32 %v4347_v54, %v17224_v16  ;;  %v4349_v49 = vpop.f32.mrb[213].mxu0  ;;  %9796 = vmatmul.mubr.msk.f32.gmra.mrb[62].mxu0 %vm1249_vm0, %v17226_v56  ;;  %v17245_v56 = vld [vmem:[#allocation123_spill] sm:$0xff] }
 0x739   : > { %v17233_v49 = vld [vmem:[#allocation53_spill] sm:$0xff] }
 0x73a   : > { %17225 = vst [vmem:[#allocation73_spill] sm:$0xff] %v14583_v62 }
 0x73b   : > { %v4352_v9 = vpop.f32.mrb[214].mxu0 }
 0x73c   : > { %v14588_v36 = vadd.f32 %v4352_v9, %v17227_v44  ;;  %v4354_v27 = vpop.f32.mrb[215].mxu0 }
 0x73e   : > { %17228 = vst [vmem:[#allocation74_spill] sm:$0xff] %v14588_v36  ;;  %v17237_v36 = vld [vmem:[#allocation115_spill] sm:$0xff] }
 0x73f   : > { %v4357_v4 = vpop.f32.mrb[216].mxu0 }
 0x740   : > { %v14591_v55 = vadd.f32 %v4357_v4, %v17229_v40  ;;  %v4359_v17 = vpop.f32.mrb[217].mxu0 }
 0x742   : > { %17230 = vst [vmem:[#allocation77_spill] sm:$0xff] %v14591_v55 }
 0x743   : > { %v4362_v10 = vpop.f32.mrb[218].mxu0 }
 0x744   : > { %v14594_v28 = vadd.f32 %v4362_v10, %v17231_v61  ;;  %v4364_v54 = vpop.f32.mrb[219].mxu0 }
 0x745   : > { %v17238_v54 = vld [vmem:[#allocation116_spill] sm:$0xff] }
 0x746   : > { %17232 = vst [vmem:[#allocation78_spill] sm:$0xff] %v14594_v28  ;;  %v17240_v28 = vld [vmem:[#allocation118_spill] sm:$0xff] }
 0x747   : > { %v4367_v16 = vpop.f32.mrb[220].mxu0 }
 0x748   : > { %v14597_v62 = vadd.f32 %v4367_v16, %v17233_v49  ;;  %v4369_v2 = vpop.f32.mrb[221].mxu0 }
 0x74a   : > { %17234 = vst [vmem:[#allocation81_spill] sm:$0xff] %v14597_v62 }
 0x74b   : > { %v4372_v46 = vpop.f32.mrb[222].mxu0 }
 0x74c   : > { %v14600_v9 = vadd.f32 %v4372_v46, %v17235_v14  ;;  %v4374_v27 = vpop.f32.mrb[223].mxu0 }
 0x74d   : > { %v17239_v27 = vld [vmem:[#allocation117_spill] sm:$0xff] }
 0x74e   : > { %17236 = vst [vmem:[#allocation82_spill] sm:$0xff] %v14600_v9 }
 0x74f   : > { %v4768_v44 = vpop.f32.mrb[224].mxu0 }
 0x750   : > { %v14603_v40 = vadd.f32 %v4768_v44, %v17237_v36  ;;  %v4770_v4 = vpop.f32.mrb[225].mxu0 }
 0x751   : > { %v14605_v17 = vadd.f32 -1e+30, %v4770_v4 }
 0x753   : > { %v4959_v61 = vmax.f32 %v14603_v40, %v14605_v17  ;;  %v4774_v10 = vpop.f32.mrb[226].mxu0 }
 0x754   : > { %v14610_v16 = vadd.f32 %v4774_v10, %v17238_v54  ;;  %v4776_v2 = vpop.f32.mrb[227].mxu0 }
 0x755   : > { %v14612_v49 = vadd.f32 -1e+30, %v4776_v2  ;;  %4960 = vmax.xlane.f32.xlu1 %v4959_v61 }
 0x757   : > { %v4962_v14 = vmax.f32 %v14610_v16, %v14612_v49  ;;  %v4780_v46 = vpop.f32.mrb[228].mxu0 }
 0x758   : > { %v14617_v44 = vadd.f32 %v4780_v46, %v17239_v27  ;;  %v4782_v4 = vpop.f32.mrb[229].mxu0 }
 0x759   : > { %v14619_v9 = vadd.f32 -1e+30, %v4782_v4  ;;  %4963 = vmax.xlane.f32.xlu0 %v4962_v14 }
 0x75b   : > { %v4965_v62 = vmax.f32 %v14617_v44, %v14619_v9  ;;  %v4786_v10 = vpop.f32.mrb[230].mxu0 }
 0x75c   : > { %v14624_v55 = vadd.f32 %v4786_v10, %v17240_v28  ;;  %v4788_v2 = vpop.f32.mrb[231].mxu0 }
 0x75d   : > { %v14626_v61 = vadd.f32 -1e+30, %v4788_v2  ;;  %4966 = vmax.xlane.f32.xlu1 %v4965_v62 }
 0x75f   : > { %v4968_v34 = vmax.f32 %v14624_v55, %v14626_v61  ;;  %v4792_v46 = vpop.f32.mrb[232].mxu0 }
 0x760   : > { %v14631_v39 = vadd.f32 %v4792_v46, %v17241_v57  ;;  %v4794_v4 = vpop.f32.mrb[233].mxu0 }
 0x761   : > { %v14633_v14 = vadd.f32 -1e+30, %v4794_v4  ;;  %4969 = vmax.xlane.f32.xlu0 %v4968_v34 }
 0x763   : > { %v4971_v37 = vmax.f32 %v14631_v39, %v14633_v14  ;;  %v4798_v10 = vpop.f32.mrb[234].mxu0 }
 0x764   : > { %v14638_v8 = vadd.f32 %v4798_v10, %v17242_v47  ;;  %v4800_v2 = vpop.f32.mrb[235].mxu0 }
 0x765   : > { %v14640_v62 = vadd.f32 -1e+30, %v4800_v2  ;;  %4972 = vmax.xlane.f32.xlu1 %v4971_v37 }
 0x767   : > { %v4974_v58 = vmax.f32 %v14638_v8, %v14640_v62  ;;  %v4804_v46 = vpop.f32.mrb[236].mxu0 }
 0x768   : > { %v14645_v29 = vadd.f32 %v4804_v46, %v17243_v6  ;;  %v4806_v4 = vpop.f32.mrb[237].mxu0 }
 0x769   : > { %v14647_v34 = vadd.f32 -1e+30, %v4806_v4  ;;  %4975 = vmax.xlane.f32.xlu0 %v4974_v58 }
 0x76b   : > { %v4977_v50 = vmax.f32 %v14645_v29, %v14647_v34  ;;  %v4810_v10 = vpop.f32.mrb[238].mxu0 }
 0x76c   : > { %v14652_v21 = vadd.f32 %v4810_v10, %v17244_v45  ;;  %v4812_v2 = vpop.f32.mrb[239].mxu0 }
 0x76d   : > { %v14654_v37 = vadd.f32 -1e+30, %v4812_v2  ;;  %4978 = vmax.xlane.f32.xlu1 %v4977_v50 }
 0x76f   : > { %v4980_v23 = vmax.f32 %v14652_v21, %v14654_v37  ;;  %v4816_v46 = vpop.f32.mrb[240].mxu0 }
 0x770   : > { %v14659_v13 = vadd.f32 %v4816_v46, %v17245_v56  ;;  %v4818_v4 = vpop.f32.mrb[241].mxu0 }
 0x771   : > { %v14661_v58 = vadd.f32 -1e+30, %v4818_v4  ;;  %4981 = vmax.xlane.f32.xlu0 %v4980_v23 }
 0x773   : > { %v4983_v12 = vmax.f32 %v14659_v13, %v14661_v58  ;;  %v4822_v10 = vpop.f32.mrb[242].mxu0 }
 0x774   : > { %v14666_v41 = vadd.f32 %v4822_v10, %v17246_v26  ;;  %v4824_v2 = vpop.f32.mrb[243].mxu0 }
 0x775   : > { %v14668_v50 = vadd.f32 -1e+30, %v4824_v2  ;;  %4984 = vmax.xlane.f32.xlu1 %v4983_v12 }
 0x777   : > { %v4986_v53 = vmax.f32 %v14666_v41, %v14668_v50  ;;  %v4828_v46 = vpop.f32.mrb[244].mxu0 }
 0x778   : > { %v14673_v59 = vadd.f32 %v4828_v46, %v17247_v35  ;;  %v4830_v4 = vpop.f32.mrb[245].mxu0 }
 0x779   : > { %v14675_v23 = vadd.f32 -1e+30, %v4830_v4  ;;  %4987 = vmax.xlane.f32.xlu0 %v4986_v53 }
 0x77b   : > { %v4989_v60 = vmax.f32 %v14673_v59, %v14675_v23  ;;  %v4834_v10 = vpop.f32.mrb[246].mxu0 }
 0x77c   : > { %v14680_v5 = vadd.f32 %v4834_v10, %v17248_v30  ;;  %v4836_v2 = vpop.f32.mrb[247].mxu0 }
 0x77d   : > { %v14682_v12 = vadd.f32 -1e+30, %v4836_v2  ;;  %4990 = vmax.xlane.f32.xlu1 %v4989_v60 }
 0x77f   : > { %v4992_v38 = vmax.f32 %v14680_v5, %v14682_v12  ;;  %v4840_v46 = vpop.f32.mrb[248].mxu0 }
 0x780   : > { %v14687_v7 = vadd.f32 %v4840_v46, %v17249_v48  ;;  %v4842_v4 = vpop.f32.mrb[249].mxu0 }
 0x781   : > { %v14689_v53 = vadd.f32 -1e+30, %v4842_v4  ;;  %4993 = vmax.xlane.f32.xlu0 %v4992_v38 }
 0x783   : > { %v4995_v24 = vmax.f32 %v14687_v7, %v14689_v53  ;;  %v4846_v10 = vpop.f32.mrb[250].mxu0 }
 0x784   : > { %v14694_v19 = vadd.f32 %v4846_v10, %v17250_v18  ;;  %v4848_v2 = vpop.f32.mrb[251].mxu0 }
 0x785   : > { %v14696_v60 = vadd.f32 -1e+30, %v4848_v2  ;;  %4996 = vmax.xlane.f32.xlu1 %v4995_v24 }
 0x787   : > { %v4998_v0 = vmax.f32 %v14694_v19, %v14696_v60  ;;  %v4852_v46 = vpop.f32.mrb[252].mxu0 }
 0x788   : > { %v14701_v15 = vadd.f32 %v4852_v46, %v17251_v3  ;;  %v4854_v4 = vpop.f32.mrb[253].mxu0 }
 0x789   : > { %v14703_v38 = vadd.f32 -1e+30, %v4854_v4  ;;  %4999 = vmax.xlane.f32.xlu0 %v4998_v0 }
 0x78b   : > { %v5001_v42 = vmax.f32 %v14701_v15, %v14703_v38  ;;  %v4858_v10 = vpop.f32.mrb[254].mxu0 }
 0x78c   : > { %v14708_v63 = vadd.f32 %v4858_v10, %v17252_v22  ;;  %v4860_v2 = vpop.f32.mrb[255].mxu0 }
 0x78d   : > { %v14710_v24 = vadd.f32 -1e+30, %v4860_v2  ;;  %5002 = vmax.xlane.f32.xlu1 %v5001_v42 }
 0x78f   : > { %v5004_v11 = vmax.f32 %v14708_v63, %v14710_v24  ;;  %v4864_v46 = vpop.f32.mrb[0].mxu0 }
 0x790   : > { %v14714_v20 = vadd.f32 -1e+30, %v4864_v46  ;;  %v4866_v4 = vpop.f32.mrb[1].mxu0 }
 0x791   : > { %v14717_v0 = vadd.f32 %v4866_v4, %v17253_v32  ;;  %5005 = vmax.xlane.f32.xlu0 %v5004_v11 }
 0x793   : > { %v5007_v43 = vmax.f32 %v14714_v20, %v14717_v0  ;;  %v4870_v10 = vpop.f32.mrb[2].mxu0 }
 0x794   : > { %v14721_v52 = vadd.f32 -1e+30, %v4870_v10  ;;  %v4872_v2 = vpop.f32.mrb[3].mxu0 }
 0x795   : > { %v14724_v42 = vadd.f32 %v4872_v2, %v17254_v1  ;;  %5008 = vmax.xlane.f32.xlu1 %v5007_v43  ;;  %v17256_v1 = vld [vmem:[#allocation134_spill] sm:$0xff] }
 0x797   : > { %v5010_v46 = vmax.f32 %v14721_v52, %v14724_v42  ;;  %v4876_v33 = vpop.f32.mrb[4].mxu0 }
 0x798   : > { %v14728_v25 = vadd.f32 -1e+30, %v4876_v33  ;;  %v4878_v4 = vpop.f32.mrb[5].mxu0 }
 0x799   : > { %v14731_v11 = vadd.f32 %v4878_v4, %v17255_v31  ;;  %5011 = vmax.xlane.f32.xlu0 %v5010_v46  ;;  %v17257_v31 = vld [vmem:[#allocation135_spill] sm:$0xff] }
 0x79b   : > { %v5013_v10 = vmax.f32 %v14728_v25, %v14731_v11  ;;  %v4882_v32 = vpop.f32.mrb[6].mxu0 }
 0x79c   : > { %v14735_v22 = vadd.f32 -1e+30, %v4882_v32  ;;  %v4884_v2 = vpop.f32.mrb[7].mxu0 }
 0x79d   : > { %v14738_v43 = vadd.f32 %v4884_v2, %v17256_v1  ;;  %5014 = vmax.xlane.f32.xlu1 %v5013_v10  ;;  %v17258_v1 = vld [vmem:[#allocation136_spill] sm:$0xff] }
 0x79f   : > { %v5016_v33 = vmax.f32 %v14735_v22, %v14738_v43  ;;  %v4888_v3 = vpop.f32.mrb[8].mxu0 }
 0x7a0   : > { %v14742_v18 = vadd.f32 -1e+30, %v4888_v3  ;;  %v4890_v4 = vpop.f32.mrb[9].mxu0 }
 0x7a1   : > { %v14745_v46 = vadd.f32 %v4890_v4, %v17257_v31  ;;  %5017 = vmax.xlane.f32.xlu0 %v5016_v33  ;;  %v17259_v31 = vld [vmem:[#allocation138_spill] sm:$0xff] }
 0x7a3   : > { %v5019_v32 = vmax.f32 %v14742_v18, %v14745_v46  ;;  %v4894_v48 = vpop.f32.mrb[10].mxu0 }
 0x7a4   : > { %v14749_v30 = vadd.f32 -1e+30, %v4894_v48  ;;  %v4896_v2 = vpop.f32.mrb[11].mxu0 }
 0x7a5   : > { %v14752_v10 = vadd.f32 %v4896_v2, %v17258_v1  ;;  %5020 = vmax.xlane.f32.xlu1 %v5019_v32  ;;  %v17260_v1 = vld [vmem:[#allocation141_spill] sm:$0xff] }
 0x7a7   : > { %v5022_v3 = vmax.f32 %v14749_v30, %v14752_v10  ;;  %v4900_v35 = vpop.f32.mrb[12].mxu0 }
 0x7a8   : > { %v14756_v26 = vadd.f32 -1e+30, %v4900_v35  ;;  %v4902_v4 = vpop.f32.mrb[13].mxu0 }
 0x7a9   : > { %v14759_v33 = vadd.f32 %v4902_v4, %v17259_v31  ;;  %5023 = vmax.xlane.f32.xlu0 %v5022_v3  ;;  %v17262_v31 = vld [vmem:[#allocation144_spill] sm:$0xff] }
 0x7ab   : > { %v5025_v48 = vmax.f32 %v14756_v26, %v14759_v33  ;;  %v4906_v56 = vpop.f32.mrb[14].mxu0 }
 0x7ac   : > { %v14763_v45 = vadd.f32 -1e+30, %v4906_v56  ;;  %v4908_v2 = vpop.f32.mrb[15].mxu0 }
 0x7ad   : > { %v14766_v32 = vadd.f32 %v4908_v2, %v17260_v1  ;;  %5026 = vmax.xlane.f32.xlu1 %v5025_v48  ;;  %v17265_v1 = vld [vmem:[#allocation147_spill] sm:$0xff] }
 0x7af   : > { %v5028_v35 = vmax.f32 %v14763_v45, %v14766_v32  ;;  %v4912_v6 = vpop.f32.mrb[16].mxu0 }
 0x7b0   : > { %v14770_v47 = vadd.f32 -1e+30, %v4912_v6  ;;  %v4914_v4 = vpop.f32.mrb[17].mxu0 }
 0x7b1   : > { %v14773_v3 = vadd.f32 %v4914_v4, %v17262_v31  ;;  %5029 = vmax.xlane.f32.xlu1 %v5028_v35  ;;  %v17268_v31 = vld [vmem:[#allocation150_spill] sm:$0xff] }
 0x7b2   : > { %17261 = vst [vmem:[#allocation84_spill] sm:$0xff] %v14770_v47 }
 0x7b3   : > { %17263 = vst [vmem:[#allocation83_spill] sm:$0xff] %v14773_v3  ;;  %v5031_v56 = vmax.f32 %v14770_v47, %v14773_v3  ;;  %v4918_v57 = vpop.f32.mrb[18].mxu0 }
 0x7b4   : > { %v14777_v28 = vadd.f32 -1e+30, %v4918_v57  ;;  %v4920_v2 = vpop.f32.mrb[19].mxu0 }
 0x7b5   : > { %v14780_v48 = vadd.f32 %v4920_v2, %v17265_v1  ;;  %5032 = vmax.xlane.f32.xlu1 %v5031_v56  ;;  %v17271_v1 = vld [vmem:[#allocation151_spill] sm:$0xff] }
 0x7b6   : > { %17264 = vst [vmem:[#allocation20_spill] sm:$0xff] %v14777_v28 }
 0x7b7   : > { %17266 = vst [vmem:[#allocation86_spill] sm:$0xff] %v14780_v48  ;;  %v5034_v6 = vmax.f32 %v14777_v28, %v14780_v48  ;;  %v4924_v27 = vpop.f32.mrb[20].mxu0 }
 0x7b8   : > { %v14784_v54 = vadd.f32 -1e+30, %v4924_v27  ;;  %v4926_v4 = vpop.f32.mrb[21].mxu0 }
 0x7b9   : > { %v14787_v35 = vadd.f32 %v4926_v4, %v17268_v31  ;;  %5035 = vmax.xlane.f32.xlu1 %v5034_v6  ;;  %v17274_v31 = vld [vmem:[#allocation152_spill] sm:$0xff] }
 0x7ba   : > { %17267 = vst [vmem:[#allocation85_spill] sm:$0xff] %v14784_v54 }
 0x7bb   : > { %17269 = vst [vmem:[#allocation88_spill] sm:$0xff] %v14787_v35  ;;  %v5037_v57 = vmax.f32 %v14784_v54, %v14787_v35  ;;  %v4930_v36 = vpop.f32.mrb[22].mxu0 }
 0x7bc   : > { %v14791_v51 = vadd.f32 -1e+30, %v4930_v36  ;;  %v4932_v2 = vpop.f32.mrb[23].mxu0 }
 0x7bd   : > { %v14794_v56 = vadd.f32 %v4932_v2, %v17271_v1  ;;  %5038 = vmax.xlane.f32.xlu1 %v5037_v57  ;;  %v17277_v1 = vld [vmem:[#allocation153_spill] sm:$0xff] }
 0x7be   : > { %17270 = vst [vmem:[#allocation87_spill] sm:$0xff] %v14791_v51 }
 0x7bf   : > { %17272 = vst [vmem:[#allocation90_spill] sm:$0xff] %v14794_v56  ;;  %v5040_v27 = vmax.f32 %v14791_v51, %v14794_v56  ;;  %v4936_v48 = vpop.f32.mrb[24].mxu0 }
 0x7c0   : > { %v14798_v28 = vadd.f32 -1e+30, %v4936_v48  ;;  %v4938_v4 = vpop.f32.mrb[25].mxu0 }
 0x7c1   : > { %v14801_v6 = vadd.f32 %v4938_v4, %v17274_v31  ;;  %5041 = vmax.xlane.f32.xlu1 %v5040_v27  ;;  %v17280_v31 = vld [vmem:[#allocation155_spill] sm:$0xff] }
 0x7c2   : > { %17273 = vst [vmem:[#allocation89_spill] sm:$0xff] %v14798_v28 }
 0x7c3   : > { %17275 = vst [vmem:[#allocation92_spill] sm:$0xff] %v14801_v6  ;;  %v5043_v36 = vmax.f32 %v14798_v28, %v14801_v6  ;;  %v4942_v35 = vpop.f32.mrb[26].mxu0 }
 0x7c4   : > { %v14805_v54 = vadd.f32 -1e+30, %v4942_v35  ;;  %v4944_v2 = vpop.f32.mrb[27].mxu0 }
 0x7c5   : > { %v14808_v57 = vadd.f32 %v4944_v2, %v17277_v1  ;;  %5044 = vmax.xlane.f32.xlu1 %v5043_v36  ;;  %v17283_v1 = vld [vmem:[#allocation158_spill] sm:$0xff] }
 0x7c6   : > { %17276 = vst [vmem:[#allocation91_spill] sm:$0xff] %v14805_v54 }
 0x7c7   : > { %17278 = vst [vmem:[#allocation97_spill] sm:$0xff] %v14808_v57  ;;  %v5046_v48 = vmax.f32 %v14805_v54, %v14808_v57  ;;  %v4948_v56 = vpop.f32.mrb[28].mxu0 }
 0x7c8   : > { %v14812_v51 = vadd.f32 -1e+30, %v4948_v56  ;;  %v4950_v4 = vpop.f32.mrb[29].mxu0 }
 0x7c9   : > { %v14815_v27 = vadd.f32 %v4950_v4, %v17280_v31  ;;  %5047 = vmax.xlane.f32.xlu1 %v5046_v48 }
 0x7ca   : > { %17279 = vst [vmem:[#allocation94_spill] sm:$0xff] %v14812_v51 }
 0x7cb   : > { %17281 = vst [vmem:[#allocation98_spill] sm:$0xff] %v14815_v27  ;;  %v5049_v35 = vmax.f32 %v14812_v51, %v14815_v27  ;;  %v4954_v6 = vpop.f32.mrb[30].mxu0 }
 0x7cc   : > { %v14819_v28 = vadd.f32 -1e+30, %v4954_v6  ;;  %v4956_v2 = vpop.f32.mrb[31].mxu0 }
 0x7cd   : > { %v14822_v36 = vadd.f32 %v4956_v2, %v17283_v1  ;;  %5050 = vmax.xlane.f32.xlu1 %v5049_v35 }
 0x7ce   : > { %17282 = vst [vmem:[#allocation93_spill] sm:$0xff] %v14819_v28 }
 0x7cf   : > { %17284 = vst [vmem:[#allocation101_spill] sm:$0xff] %v14822_v36  ;;  %v5052_v56 = vmax.f32 %v14819_v28, %v14822_v36  ;;  %v9752_v57 = vpop.f32.mrb[32].mxu0 }
 0x7d0   : > { %v5997_v54 = vpop.f32.mrb[33].mxu0 }
 0x7d1   : > { %9218 = vmatprep.mubr.msk.f32.mxu0 %vm1249_vm0, %v5997_v54  ;;  %5053 = vmax.xlane.f32.xlu1 %v5052_v56 }
 0x7d2   : > { %9219 = vmatmul.mubr.msk.f32.vlgmr.msra.gmra.mrb[64].mxu0 %vm1249_vm0, %v5997_v54 }
 0x7d3   : > { %v9755_v48 = vpop.f32.mrb[34].mxu0  ;;  %9220 = vmatprep.mubr.msk.f32.mxu0 %vm1249_vm0, %v9752_v57 }
 0x7d4   : > { %v6007_v6 = vpop.f32.mrb[35].mxu0 }
 0x7d6   : > { %9221 = vmatmul.mubr.msk.f32.gmra.mrb[66].mxu0 %vm1249_vm0, %v9752_v57 }
 0x7d7   : > { %v9758_v4 = vpop.f32.mrb[36].mxu0  ;;  %9222 = vmatprep.mubr.msk.f32.mxu0 %vm1249_vm0, %v6007_v6 }
 0x7d8   : > { %v6017_v35 = vpop.f32.mrb[37].mxu0 }
 0x7da   : > { %9223 = vmatmul.mubr.msk.f32.gmra.mrb[68].mxu0 %vm1249_vm0, %v6007_v6 }
 0x7db   : > { %v9761_v2 = vpop.f32.mrb[38].mxu0  ;;  %9224 = vmatprep.mubr.msk.f32.mxu0 %vm1249_vm0, %v9755_v48 }
 0x7dc   : > { %v6027_v1 = vpop.f32.mrb[39].mxu0 }
 0x7de   : > { %9225 = vmatmul.mubr.msk.f32.gmra.mrb[70].mxu0 %vm1249_vm0, %v9755_v48 }
 0x7df   : > { %v9764_v56 = vpop.f32.mrb[40].mxu0  ;;  %9226 = vmatprep.mubr.msk.f32.mxu0 %vm1249_vm0, %v6017_v35 }
 0x7e0   : > { %v6037_v54 = vpop.f32.mrb[41].mxu0 }
 0x7e2   : > { %9227 = vmatmul.mubr.msk.f32.gmra.mrb[72].mxu0 %vm1249_vm0, %v6017_v35  ;;  %v4961_v31 = vpop.xlane.xlu1 %4960 }
 0x7e3   : > { %v5055_v57 = vsub.f32 %v14603_v40, %v4961_v31  ;;  %v5056_v36 = vsub.f32 %v14605_v17, %v4961_v31  ;;  %v14838_v28 = vpop.f32.mrb[42].mxu0  ;;  %9228 = vmatprep.mubr.msk.f32.mxu0 %vm1249_vm0, %v9758_v4 }
 0x7e4   : > { %v14841_v6 = vpop.f32.mrb[43].mxu0 }
 0x7e5   : > { %v5119_v27 = vmul.f32 1.442695, %v5055_v57  ;;  %v5121_v51 = vmul.f32 1.442695, %v5056_v36 }
 0x7e6   : > { %9229 = vmatmul.mubr.msk.f32.gmra.mrb[74].mxu0 %vm1249_vm0, %v9758_v4  ;;  %v4964_v48 = vpop.xlane.xlu0 %4963 }
 0x7e7   : > { %10768 = vpow2.f32 %v5119_v27  ;;  %v5057_v3 = vsub.f32 %v14610_v16, %v4964_v48  ;;  %v5058_v35 = vsub.f32 %v14612_v49, %v4964_v48  ;;  %v14846_v47 = vpop.f32.mrb[44].mxu0  ;;  %9230 = vmatprep.mubr.msk.f32.mxu0 %vm1249_vm0, %v6027_v1 }
 0x7e8   : > { %10770 = vpow2.f32 %v5121_v51  ;;  %v14849_v31 = vpop.f32.mrb[45].mxu0 }
 0x7e9   : > { %v5123_v40 = vmul.f32 1.442695, %v5057_v3  ;;  %v5125_v17 = vmul.f32 1.442695, %v5058_v35 }
 0x7ea   : > { %9231 = vmatmul.mubr.msk.f32.gmra.mrb[76].mxu0 %vm1249_vm0, %v6027_v1  ;;  %v4967_v36 = vpop.xlane.xlu1 %4966 }
 0x7eb   : > { %10772 = vpow2.f32 %v5123_v40  ;;  %v5059_v4 = vsub.f32 %v14617_v44, %v4967_v36  ;;  %v5060_v27 = vsub.f32 %v14619_v9, %v4967_v36  ;;  %v14854_v16 = vpop.f32.mrb[46].mxu0  ;;  %9232 = vmatprep.mubr.msk.f32.mxu0 %vm1249_vm0, %v9761_v2 }
 0x7ec   : > { %10774 = vpow2.f32 %v5125_v17  ;;  %v14857_v49 = vpop.f32.mrb[47].mxu0 }
 0x7ed   : > { %v5127_v51 = vmul.f32 1.442695, %v5059_v4  ;;  %v5129_v57 = vmul.f32 1.442695, %v5060_v27 }
 0x7ee   : > { %9233 = vmatmul.mubr.msk.f32.gmra.mrb[78].mxu0 %vm1249_vm0, %v9761_v2  ;;  %v4970_v3 = vpop.xlane.xlu0 %4969 }
 0x7ef   : > { %10776 = vpow2.f32 %v5127_v51  ;;  %v5061_v1 = vsub.f32 %v14624_v55, %v4970_v3  ;;  %v5062_v48 = vsub.f32 %v14626_v61, %v4970_v3  ;;  %v14862_v44 = vpop.f32.mrb[48].mxu0  ;;  %9234 = vmatprep.mubr.msk.f32.mxu0 %vm1249_vm0, %v6037_v54 }
 0x7f0   : > { %10778 = vpow2.f32 %v5129_v57  ;;  %v14865_v9 = vpop.f32.mrb[49].mxu0 }
 0x7f1   : > { %v14867_v35 = vpop.eup %10768  ;;  %v5131_v40 = vmul.f32 1.442695, %v5061_v1  ;;  %v5133_v17 = vmul.f32 1.442695, %v5062_v48 }
 0x7f2   : > { %v14869_v36 = vpop.eup %10770  ;;  %9235 = vmatmul.mubr.msk.f32.gmra.mrb[80].mxu0 %vm1249_vm0, %v6037_v54  ;;  %v4973_v2 = vpop.xlane.xlu1 %4972 }
 0x7f3   : > { %10780 = vpow2.f32 %v5131_v40  ;;  %v5063_v55 = vsub.f32 %v14631_v39, %v4973_v2  ;;  %v5064_v61 = vsub.f32 %v14633_v14, %v4973_v2  ;;  %v14874_v4 = vpop.f32.mrb[50].mxu0  ;;  %9236 = vmatprep.mubr.msk.f32.mxu0 %vm1249_vm0, %v9764_v56  ;;  %v5247_v27 = vadd.f32 %v14869_v36, %v14867_v35 }
 0x7f4   : > { %10782 = vpow2.f32 %v5133_v17  ;;  %v14879_v51 = vpop.f32.mrb[51].mxu0 }
 0x7f5   : > { %v14881_v57 = vpop.eup %10772  ;;  %v5135_v3 = vmul.f32 1.442695, %v5063_v55  ;;  %v5137_v54 = vmul.f32 1.442695, %v5064_v61  ;;  %5248 = vadd.xlane.f32.xlu0 %v5247_v27 }
 0x7f6   : > { %v14883_v1 = vpop.eup %10774  ;;  %9237 = vmatmul.mubr.msk.f32.gmra.mrb[82].mxu0 %vm1249_vm0, %v9764_v56  ;;  %v4976_v39 = vpop.xlane.xlu0 %4975 }
 0x7f7   : > { %10784 = vpow2.f32 %v5135_v3  ;;  %v5065_v14 = vsub.f32 %v14638_v8, %v4976_v39  ;;  %v5066_v48 = vsub.f32 %v14640_v62, %v4976_v39  ;;  %v14888_v40 = vpop.f32.mrb[52].mxu0  ;;  %9238 = vmatprep.mubr.msk.f32.mxu0 %vm1249_vm0, %v14841_v6  ;;  %v5250_v17 = vadd.f32 %v14883_v1, %v14881_v57 }
 0x7f8   : > { %10786 = vpow2.f32 %v5137_v54  ;;  %v14894_v2 = vpop.f32.mrb[53].mxu0 }
 0x7f9   : > { %v14896_v55 = vpop.eup %10776  ;;  %v5139_v56 = vmul.f32 1.442695, %v5065_v14  ;;  %v5141_v61 = vmul.f32 1.442695, %v5066_v48  ;;  %5251 = vadd.xlane.f32.xlu0 %v5250_v17 }
 0x7fa   : > { %17285 = vst [vmem:[#allocation106_spill] sm:$0xff] %v14896_v55  ;;  %v14898_v27 = vpop.eup %10778  ;;  %9239 = vmatmul.mubr.msk.f32.gmra.mrb[84].mxu0 %vm1249_vm0, %v14841_v6  ;;  %v4979_v8 = vpop.xlane.xlu1 %4978 }
 0x7fb   : > { %10788 = vpow2.f32 %v5139_v56  ;;  %v5067_v62 = vsub.f32 %v14645_v29, %v4979_v8  ;;  %v5068_v3 = vsub.f32 %v14647_v34, %v4979_v8  ;;  %v14904_v39 = vpop.f32.mrb[54].mxu0  ;;  %9240 = vmatprep.mubr.msk.f32.mxu0 %vm1249_vm0, %v14838_v28  ;;  %v5253_v54 = vadd.f32 %v14898_v27, %v14896_v55 }
 0x7fc   : > { %10790 = vpow2.f32 %v5141_v61  ;;  %v14910_v14 = vpop.f32.mrb[55].mxu0 }
 0x7fd   : > { %v14912_v48 = vpop.eup %10780  ;;  %v5143_v6 = vmul.f32 1.442695, %v5067_v62  ;;  %v5145_v17 = vmul.f32 1.442695, %v5068_v3  ;;  %5254 = vadd.xlane.f32.xlu0 %v5253_v54 }
 0x7fe   : > { %17286 = vst [vmem:[#allocation96_spill] sm:$0xff] %v14912_v48  ;;  %v14914_v56 = vpop.eup %10782  ;;  %9241 = vmatmul.mubr.msk.f32.gmra.mrb[86].mxu0 %vm1249_vm0, %v14838_v28  ;;  %v4982_v29 = vpop.xlane.xlu0 %4981 }
 0x7ff   : > { %10792 = vpow2.f32 %v5143_v6  ;;  %v5069_v34 = vsub.f32 %v14652_v21, %v4982_v29  ;;  %v5070_v8 = vsub.f32 %v14654_v37, %v4982_v29  ;;  %v14920_v55 = vpop.f32.mrb[56].mxu0  ;;  %9242 = vmatprep.mubr.msk.f32.mxu0 %vm1249_vm0, %v14849_v31  ;;  %v5256_v61 = vadd.f32 %v14914_v56, %v14912_v48 }
 0x800   : > { %10794 = vpow2.f32 %v5145_v17  ;;  %v14926_v62 = vpop.f32.mrb[57].mxu0 }
 0x801   : > { %v14928_v3 = vpop.eup %10784  ;;  %v5147_v28 = vmul.f32 1.442695, %v5069_v34  ;;  %v5149_v54 = vmul.f32 1.442695, %v5070_v8  ;;  %5257 = vadd.xlane.f32.xlu0 %v5256_v61 }
 0x802   : > { %v14930_v6 = vpop.eup %10786  ;;  %9243 = vmatmul.mubr.msk.f32.gmra.mrb[88].mxu0 %vm1249_vm0, %v14849_v31  ;;  %v4985_v21 = vpop.xlane.xlu1 %4984 }
 0x803   : > { %17287 = vst [vmem:[#allocation95_spill] sm:$0xff] %v14930_v6  ;;  %10796 = vpow2.f32 %v5147_v28  ;;  %v5071_v37 = vsub.f32 %v14659_v13, %v4985_v21  ;;  %v5072_v29 = vsub.f32 %v14661_v58, %v4985_v21  ;;  %v14936_v48 = vpop.f32.mrb[58].mxu0  ;;  %9244 = vmatprep.mubr.msk.f32.mxu0 %vm1249_vm0, %v14846_v47  ;;  %v5259_v17 = vadd.f32 %v14930_v6, %v14928_v3 }
 0x804   : > { %10798 = vpow2.f32 %v5149_v54  ;;  %v14942_v34 = vpop.f32.mrb[59].mxu0 }
 0x805   : > { %v14944_v8 = vpop.eup %10788  ;;  %v5151_v31 = vmul.f32 1.442695, %v5071_v37  ;;  %v5153_v61 = vmul.f32 1.442695, %v5072_v29  ;;  %5260 = vadd.xlane.f32.xlu0 %v5259_v17 }
 0x806   : > { %v14946_v28 = vpop.eup %10790  ;;  %9245 = vmatmul.mubr.msk.f32.gmra.mrb[90].mxu0 %vm1249_vm0, %v14846_v47  ;;  %v4988_v13 = vpop.xlane.xlu0 %4987 }
 0x807   : > { %17288 = vst [vmem:[#allocation100_spill] sm:$0xff] %v14946_v28  ;;  %10800 = vpow2.f32 %v5151_v31  ;;  %v5073_v58 = vsub.f32 %v14666_v41, %v4988_v13  ;;  %v5074_v21 = vsub.f32 %v14668_v50, %v4988_v13  ;;  %v14952_v6 = vpop.f32.mrb[60].mxu0  ;;  %9246 = vmatprep.mubr.msk.f32.mxu0 %vm1249_vm0, %v14857_v49  ;;  %v5262_v54 = vadd.f32 %v14946_v28, %v14944_v8 }
 0x808   : > { %10802 = vpow2.f32 %v5153_v61  ;;  %v14958_v37 = vpop.f32.mrb[61].mxu0 }
 0x809   : > { %v14960_v29 = vpop.eup %10792  ;;  %v5155_v47 = vmul.f32 1.442695, %v5073_v58  ;;  %v5157_v17 = vmul.f32 1.442695, %v5074_v21  ;;  %5263 = vadd.xlane.f32.xlu0 %v5262_v54 }
 0x80a   : > { %v14962_v31 = vpop.eup %10794  ;;  %9247 = vmatmul.mubr.msk.f32.gmra.mrb[92].mxu0 %vm1249_vm0, %v14857_v49  ;;  %v4991_v41 = vpop.xlane.xlu1 %4990 }
 0x80b   : > { %10804 = vpow2.f32 %v5155_v47  ;;  %v5075_v50 = vsub.f32 %v14673_v59, %v4991_v41  ;;  %v5076_v13 = vsub.f32 %v14675_v23, %v4991_v41  ;;  %v14968_v28 = vpop.f32.mrb[62].mxu0  ;;  %9248 = vmatprep.mubr.msk.f32.mxu0 %vm1249_vm0, %v14854_v16  ;;  %v5265_v61 = vadd.f32 %v14962_v31, %v14960_v29 }
 0x80c   : > { %10806 = vpow2.f32 %v5157_v17  ;;  %v14974_v58 = vpop.f32.mrb[63].mxu0 }
 0x80d   : > { %v14976_v21 = vpop.eup %10796  ;;  %v5159_v49 = vmul.f32 1.442695, %v5075_v50  ;;  %v5161_v54 = vmul.f32 1.442695, %v5076_v13  ;;  %5266 = vadd.xlane.f32.xlu0 %v5265_v61 }
 0x80e   : > { %v14978_v47 = vpop.eup %10798  ;;  %9249 = vmatmul.mubr.msk.f32.gmra.mrb[94].mxu0 %vm1249_vm0, %v14854_v16  ;;  %v4994_v59 = vpop.xlane.xlu0 %4993  ;;  %v8540_v16 = vld [vmem:[%s16234_s4 + $0x60] sm:$0xff] }
 0x80f   : > { %17289 = vst [vmem:[#allocation99_spill] sm:$0xff] %v14978_v47  ;;  %10808 = vpow2.f32 %v5159_v49  ;;  %v5077_v23 = vsub.f32 %v14680_v5, %v4994_v59  ;;  %v5078_v41 = vsub.f32 %v14682_v12, %v4994_v59  ;;  %9250 = vmatprep.mubr.msk.f32.mxu0 %vm1249_vm0, %v14865_v9  ;;  %v5268_v17 = vadd.f32 %v14978_v47, %v14976_v21  ;;  %v8541_v5 = vld [vmem:[%s16234_s4 + $0x68] sm:$0xff] }
 0x810   : > { %10810 = vpow2.f32 %v5161_v54  ;;  %v15000_v54 = vpack.c.bf16 %v8541_v5, %v8540_v16 }
 0x811   : > { %v14988_v50 = vpop.eup %10800  ;;  %v5163_v13 = vmul.f32 1.442695, %v5077_v23  ;;  %v5165_v61 = vmul.f32 1.442695, %v5078_v41  ;;  %5269 = vadd.xlane.f32.xlu0 %v5268_v17 }
 0x812   : > { %v14996_v12 = vpop.eup %10802  ;;  %9251 = vmatmul.mubr.msk.f32.gmra.mrb[96].mxu0 %vm1249_vm0, %v14865_v9  ;;  %v4997_v49 = vpop.xlane.xlu1 %4996  ;;  %10307 = vmatprep.subr.bf16.mxu1 %v15000_v54 }
 0x813   : > { %10812 = vpow2.f32 %v5163_v13  ;;  %v5079_v59 = vsub.f32 %v14687_v7, %v4997_v49  ;;  %v5080_v23 = vsub.f32 %v14689_v53, %v4997_v49  ;;  %9252 = vmatprep.mubr.msk.f32.mxu0 %vm1249_vm0, %v14862_v44  ;;  %v5271_v41 = vadd.f32 %v14996_v12, %v14988_v50 }
 0x814   : > { %10814 = vpow2.f32 %v5165_v61 }
 0x815   : > { %v15009_v17 = vpop.eup %10804  ;;  %v5167_v9 = vmul.f32 1.442695, %v5079_v59  ;;  %v5169_v47 = vmul.f32 1.442695, %v5080_v23  ;;  %5272 = vadd.xlane.f32.xlu0 %v5271_v41 }
 0x816   : > { %v15011_v16 = vpop.eup %10806  ;;  %9253 = vmatmul.mubr.msk.f32.gmra.mrb[98].mxu0 %vm1249_vm0, %v14862_v44  ;;  %v5000_v7 = vpop.xlane.xlu0 %4999 }
 0x817   : > { %10816 = vpow2.f32 %v5167_v9  ;;  %v5081_v53 = vsub.f32 %v14694_v19, %v5000_v7  ;;  %v5082_v13 = vsub.f32 %v14696_v60, %v5000_v7  ;;  %9254 = vmatprep.mubr.msk.f32.mxu0 %vm1249_vm0, %v14879_v51  ;;  %v5274_v61 = vadd.f32 %v15011_v16, %v15009_v17 }
 0x818   : > { %10818 = vpow2.f32 %v5169_v47 }
 0x819   : > { %v15021_v5 = vpop.eup %10808  ;;  %v5171_v49 = vmul.f32 1.442695, %v5081_v53  ;;  %v5173_v59 = vmul.f32 1.442695, %v5082_v13  ;;  %5275 = vadd.xlane.f32.xlu0 %v5274_v61 }
 0x81a   : > { %v15023_v23 = vpop.eup %10810  ;;  %9255 = vmatmul.mubr.msk.f32.gmra.mrb[100].mxu0 %vm1249_vm0, %v14879_v51  ;;  %v5003_v19 = vpop.xlane.xlu1 %5002 }
 0x81b   : > { %10820 = vpow2.f32 %v5171_v49  ;;  %v5083_v60 = vsub.f32 %v14701_v15, %v5003_v19  ;;  %v5084_v44 = vsub.f32 %v14703_v38, %v5003_v19  ;;  %9256 = vmatprep.mubr.msk.f32.mxu0 %vm1249_vm0, %v14874_v4  ;;  %v5277_v47 = vadd.f32 %v15023_v23, %v15021_v5 }
 0x81c   : > { %10822 = vpow2.f32 %v5173_v59 }
 0x81d   : > { %v15033_v41 = vpop.eup %10812  ;;  %v5175_v9 = vmul.f32 1.442695, %v5083_v60  ;;  %v5177_v7 = vmul.f32 1.442695, %v5084_v44  ;;  %5278 = vadd.xlane.f32.xlu1 %v5277_v47 }
 0x81e   : > { %v15035_v53 = vpop.eup %10814  ;;  %9257 = vmatmul.mubr.msk.f32.gmra.mrb[102].mxu0 %vm1249_vm0, %v14874_v4  ;;  %v5006_v15 = vpop.xlane.xlu0 %5005 }
 0x81f   : > { %10824 = vpow2.f32 %v5175_v9  ;;  %v5085_v38 = vsub.f32 %v14708_v63, %v5006_v15  ;;  %v5086_v51 = vsub.f32 %v14710_v24, %v5006_v15  ;;  %9258 = vmatprep.mubr.msk.f32.mxu0 %vm1249_vm0, %v14894_v2  ;;  %v5280_v13 = vadd.f32 %v15035_v53, %v15033_v41 }
 0x820   : > { %10826 = vpow2.f32 %v5177_v7 }
 0x821   : > { %v15045_v61 = vpop.eup %10816  ;;  %v5179_v49 = vmul.f32 1.442695, %v5085_v38  ;;  %v5181_v59 = vmul.f32 1.442695, %v5086_v51  ;;  %5281 = vadd.xlane.f32.xlu0 %v5280_v13 }
 0x822   : > { %v15047_v19 = vpop.eup %10818  ;;  %9259 = vmatmul.mubr.msk.f32.gmra.mrb[104].mxu0 %vm1249_vm0, %v14894_v2  ;;  %v5009_v63 = vpop.xlane.xlu1 %5008 }
 0x823   : > { %10828 = vpow2.f32 %v5179_v49  ;;  %v5087_v24 = vsub.f32 %v14714_v20, %v5009_v63  ;;  %v5088_v4 = vsub.f32 %v14717_v0, %v5009_v63  ;;  %9260 = vmatprep.mubr.msk.f32.mxu0 %vm1249_vm0, %v14888_v40  ;;  %v5283_v60 = vadd.f32 %v15047_v19, %v15045_v61 }
 0x824   : > { %10830 = vpow2.f32 %v5181_v59 }
 0x825   : > { %v15057_v44 = vpop.eup %10820  ;;  %v5183_v47 = vmul.f32 1.442695, %v5087_v24  ;;  %v5185_v9 = vmul.f32 1.442695, %v5088_v4  ;;  %5284 = vadd.xlane.f32.xlu1 %v5283_v60 }
 0x826   : > { %v15059_v7 = vpop.eup %10822  ;;  %9261 = vmatmul.mubr.msk.f32.gmra.mrb[106].mxu0 %vm1249_vm0, %v14888_v40  ;;  %v5012_v20 = vpop.xlane.xlu0 %5011 }
 0x827   : > { %10832 = vpow2.f32 %v5183_v47  ;;  %v5089_v0 = vsub.f32 %v14721_v52, %v5012_v20  ;;  %v5090_v2 = vsub.f32 %v14724_v42, %v5012_v20  ;;  %9262 = vmatprep.mubr.msk.f32.mxu0 %vm1249_vm0, %v14910_v14  ;;  %v5286_v15 = vadd.f32 %v15059_v7, %v15057_v44 }
 0x828   : > { %10834 = vpow2.f32 %v5185_v9 }
 0x829   : > { %v15069_v38 = vpop.eup %10824  ;;  %v5187_v51 = vmul.f32 1.442695, %v5089_v0  ;;  %v5189_v13 = vmul.f32 1.442695, %v5090_v2  ;;  %5287 = vadd.xlane.f32.xlu0 %v5286_v15 }
 0x82a   : > { %v15071_v49 = vpop.eup %10826  ;;  %9263 = vmatmul.mubr.msk.f32.gmra.mrb[108].mxu0 %vm1249_vm0, %v14910_v14  ;;  %v5015_v52 = vpop.xlane.xlu1 %5014 }
 0x82b   : > { %10836 = vpow2.f32 %v5187_v51  ;;  %v5091_v42 = vsub.f32 %v14728_v25, %v5015_v52  ;;  %v5092_v40 = vsub.f32 %v14731_v11, %v5015_v52  ;;  %9264 = vmatprep.mubr.msk.f32.mxu0 %vm1249_vm0, %v14904_v39  ;;  %v5289_v59 = vadd.f32 %v15071_v49, %v15069_v38 }
 0x82c   : > { %10838 = vpow2.f32 %v5189_v13 }
 0x82d   : > { %v15081_v63 = vpop.eup %10828  ;;  %v5191_v24 = vmul.f32 1.442695, %v5091_v42  ;;  %v5193_v4 = vmul.f32 1.442695, %v5092_v40  ;;  %5290 = vadd.xlane.f32.xlu1 %v5289_v59 }
 0x82e   : > { %v15083_v60 = vpop.eup %10830  ;;  %9265 = vmatmul.mubr.msk.f32.gmra.mrb[110].mxu0 %vm1249_vm0, %v14904_v39  ;;  %v5018_v25 = vpop.xlane.xlu0 %5017 }
 0x82f   : > { %10840 = vpow2.f32 %v5191_v24  ;;  %v5093_v11 = vsub.f32 %v14735_v22, %v5018_v25  ;;  %v5094_v14 = vsub.f32 %v14738_v43, %v5018_v25  ;;  %9266 = vmatprep.mubr.msk.f32.mxu0 %vm1249_vm0, %v14926_v62  ;;  %v5292_v47 = vadd.f32 %v15083_v60, %v15081_v63 }
 0x830   : > { %10842 = vpow2.f32 %v5193_v4 }
 0x831   : > { %v15093_v9 = vpop.eup %10832  ;;  %v5195_v20 = vmul.f32 1.442695, %v5093_v11  ;;  %v5197_v0 = vmul.f32 1.442695, %v5094_v14  ;;  %5293 = vadd.xlane.f32.xlu0 %v5292_v47 }
 0x832   : > { %v15095_v2 = vpop.eup %10834  ;;  %9267 = vmatmul.mubr.msk.f32.gmra.mrb[112].mxu0 %vm1249_vm0, %v14926_v62  ;;  %v5021_v22 = vpop.xlane.xlu1 %5020 }
 0x833   : > { %10844 = vpow2.f32 %v5195_v20  ;;  %v5095_v43 = vsub.f32 %v14742_v18, %v5021_v22  ;;  %v5096_v39 = vsub.f32 %v14745_v46, %v5021_v22  ;;  %9268 = vmatprep.mubr.msk.f32.mxu0 %vm1249_vm0, %v14920_v55  ;;  %v5295_v15 = vadd.f32 %v15095_v2, %v15093_v9 }
 0x834   : > { %10846 = vpow2.f32 %v5197_v0 }
 0x835   : > { %v15105_v51 = vpop.eup %10836  ;;  %v5199_v13 = vmul.f32 1.442695, %v5095_v43  ;;  %v5201_v52 = vmul.f32 1.442695, %v5096_v39  ;;  %5296 = vadd.xlane.f32.xlu1 %v5295_v15 }
 0x836   : > { %v15107_v42 = vpop.eup %10838  ;;  %9269 = vmatmul.mubr.msk.f32.gmra.mrb[114].mxu0 %vm1249_vm0, %v14920_v55  ;;  %v5024_v18 = vpop.xlane.xlu0 %5023 }
 0x837   : > { %10848 = vpow2.f32 %v5199_v13  ;;  %v5097_v46 = vsub.f32 %v14749_v30, %v5024_v18  ;;  %v5098_v62 = vsub.f32 %v14752_v10, %v5024_v18  ;;  %9270 = vmatprep.mubr.msk.f32.mxu0 %vm1249_vm0, %v14942_v34  ;;  %v5298_v40 = vadd.f32 %v15107_v42, %v15105_v51 }
 0x838   : > { %10850 = vpow2.f32 %v5201_v52  ;;  %v17291_v52 = vld [vmem:[#allocation83_spill] sm:$0xff] }
 0x839   : > { %v15117_v59 = vpop.eup %10840  ;;  %v5203_v24 = vmul.f32 1.442695, %v5097_v46  ;;  %v5205_v4 = vmul.f32 1.442695, %v5098_v62  ;;  %5299 = vadd.xlane.f32.xlu0 %v5298_v40 }
 0x83a   : > { %v15119_v25 = vpop.eup %10842  ;;  %9271 = vmatmul.mubr.msk.f32.gmra.mrb[116].mxu0 %vm1249_vm0, %v14942_v34  ;;  %v5027_v30 = vpop.xlane.xlu1 %5026 }
 0x83b   : > { %10852 = vpow2.f32 %v5203_v24  ;;  %v5099_v10 = vsub.f32 %v14756_v26, %v5027_v30  ;;  %v5100_v55 = vsub.f32 %v14759_v33, %v5027_v30  ;;  %9272 = vmatprep.mubr.msk.f32.mxu0 %vm1249_vm0, %v14936_v48  ;;  %v5301_v11 = vadd.f32 %v15119_v25, %v15117_v59  ;;  %v17292_v30 = vld [vmem:[#allocation20_spill] sm:$0xff] }
 0x83c   : > { %10854 = vpow2.f32 %v5205_v4 }
 0x83d   : > { %v15129_v14 = vpop.eup %10844  ;;  %v5207_v47 = vmul.f32 1.442695, %v5099_v10  ;;  %v5209_v20 = vmul.f32 1.442695, %v5100_v55  ;;  %5302 = vadd.xlane.f32.xlu1 %v5301_v11  ;;  %v17293_v55 = vld [vmem:[#allocation86_spill] sm:$0xff] }
 0x83e   : > { %v15131_v0 = vpop.eup %10846  ;;  %9273 = vmatmul.mubr.msk.f32.gmra.mrb[118].mxu0 %vm1249_vm0, %v14936_v48  ;;  %v5030_v26 = vpop.xlane.xlu1 %5029 }
 0x83f   : > { %10856 = vpow2.f32 %v5207_v47  ;;  %v5101_v33 = vsub.f32 %v14763_v45, %v5030_v26  ;;  %v5102_v34 = vsub.f32 %v14766_v32, %v5030_v26  ;;  %9274 = vmatprep.mubr.msk.f32.mxu0 %vm1249_vm0, %v14958_v37  ;;  %v5304_v22 = vadd.f32 %v15131_v0, %v15129_v14  ;;  %v17290_v32 = vld [vmem:[#allocation84_spill] sm:$0xff] }
 0x840   : > { %10858 = vpow2.f32 %v5209_v20 }
 0x841   : > { %v15141_v43 = vpop.eup %10848  ;;  %v5211_v39 = vmul.f32 1.442695, %v5101_v33  ;;  %v5213_v15 = vmul.f32 1.442695, %v5102_v34  ;;  %5305 = vadd.xlane.f32.xlu0 %v5304_v22  ;;  %v17294_v22 = vld [vmem:[#allocation85_spill] sm:$0xff] }
 0x842   : > { %v15143_v13 = vpop.eup %10850  ;;  %9275 = vmatmul.mubr.msk.f32.gmra.mrb[120].mxu0 %vm1249_vm0, %v14958_v37  ;;  %v5033_v45 = vpop.xlane.xlu1 %5032 }
 0x843   : > { %10860 = vpow2.f32 %v5211_v39  ;;  %v5103_v48 = vsub.f32 %v17290_v32, %v5033_v45  ;;  %v5104_v18 = vsub.f32 %v17291_v52, %v5033_v45  ;;  %9276 = vmatprep.mubr.msk.f32.mxu0 %vm1249_vm0, %v14952_v6  ;;  %v5307_v46 = vadd.f32 %v15143_v13, %v15141_v43 }
 0x844   : > { %10862 = vpow2.f32 %v5213_v15  ;;  %v17295_v15 = vld [vmem:[#allocation88_spill] sm:$0xff] }
 0x845   : > { %v15153_v62 = vpop.eup %10852  ;;  %v5215_v40 = vmul.f32 1.442695, %v5103_v48  ;;  %v5217_v24 = vmul.f32 1.442695, %v5104_v18  ;;  %5308 = vadd.xlane.f32.xlu1 %v5307_v46 }
 0x846   : > { %v15155_v4 = vpop.eup %10854  ;;  %9277 = vmatmul.mubr.msk.f32.gmra.mrb[122].mxu0 %vm1249_vm0, %v14952_v6  ;;  %v5036_v37 = vpop.xlane.xlu1 %5035 }
 0x847   : > { %10864 = vpow2.f32 %v5215_v40  ;;  %v5105_v10 = vsub.f32 %v17292_v30, %v5036_v37  ;;  %v5106_v11 = vsub.f32 %v17293_v55, %v5036_v37  ;;  %9278 = vmatprep.mubr.msk.f32.mxu0 %vm1249_vm0, %v14974_v58  ;;  %v5310_v47 = vadd.f32 %v15155_v4, %v15153_v62  ;;  %v17296_v40 = vld [vmem:[#allocation87_spill] sm:$0xff]  ;;  %v17297_v37 = vld [vmem:[#allocation90_spill] sm:$0xff] }
 0x848   : > { %10866 = vpow2.f32 %v5217_v24 }
 0x849   : > { %v15165_v20 = vpop.eup %10856  ;;  %v5219_v26 = vmul.f32 1.442695, %v5105_v10  ;;  %v5221_v33 = vmul.f32 1.442695, %v5106_v11  ;;  %5311 = vadd.xlane.f32.xlu0 %v5310_v47 }
 0x84a   : > { %v15167_v34 = vpop.eup %10858  ;;  %9279 = vmatmul.mubr.msk.f32.gmra.mrb[124].mxu0 %vm1249_vm0, %v14974_v58  ;;  %v5039_v6 = vpop.xlane.xlu1 %5038 }
 0x84b   : > { %10868 = vpow2.f32 %v5219_v26  ;;  %v5107_v39 = vsub.f32 %v17294_v22, %v5039_v6  ;;  %v5108_v45 = vsub.f32 %v17295_v15, %v5039_v6  ;;  %9280 = vmatprep.mubr.msk.f32.mxu0 %vm1249_vm0, %v14968_v28  ;;  %v5313_v32 = vadd.f32 %v15167_v34, %v15165_v20  ;;  %v17299_v22 = vld [vmem:[#allocation92_spill] sm:$0xff] }
 0x84c   : > { %10870 = vpow2.f32 %v5221_v33 }
 0x84d   : > { %v15177_v48 = vpop.eup %10860  ;;  %v5223_v52 = vmul.f32 1.442695, %v5107_v39  ;;  %v5225_v18 = vmul.f32 1.442695, %v5108_v45  ;;  %5314 = vadd.xlane.f32.xlu1 %v5313_v32 }
 0x84e   : > { %v15179_v46 = vpop.eup %10862  ;;  %9281 = vmatmul.mubr.msk.f32.gmra.mrb[126].mxu0 %vm1249_vm0, %v14968_v28  ;;  %v5042_v58 = vpop.xlane.xlu1 %5041  ;;  %v17298_v28 = vld [vmem:[#allocation89_spill] sm:$0xff] }
 0x84f   : > { %10872 = vpow2.f32 %v5223_v52  ;;  %v5109_v24 = vsub.f32 %v17296_v40, %v5042_v58  ;;  %v5110_v30 = vsub.f32 %v17297_v37, %v5042_v58  ;;  %v5316_v10 = vadd.f32 %v15179_v46, %v15177_v48  ;;  %v17302_v40 = vld [vmem:[#allocation91_spill] sm:$0xff]  ;;  %v17303_v37 = vld [vmem:[#allocation97_spill] sm:$0xff] }
 0x850   : > { %10874 = vpow2.f32 %v5225_v18 }
 0x851   : > { %v15187_v55 = vpop.eup %10864  ;;  %v5227_v11 = vmul.f32 1.442695, %v5109_v24  ;;  %v5229_v47 = vmul.f32 1.442695, %v5110_v30  ;;  %5317 = vadd.xlane.f32.xlu0 %v5316_v10 }
 0x852   : > { %v15189_v26 = vpop.eup %10866  ;;  %v5045_v33 = vpop.xlane.xlu1 %5044 }
 0x853   : > { %10876 = vpow2.f32 %v5227_v11  ;;  %v5111_v6 = vsub.f32 %v17298_v28, %v5045_v33  ;;  %v5112_v39 = vsub.f32 %v17299_v22, %v5045_v33  ;;  %v5319_v15 = vadd.f32 %v15189_v26, %v15187_v55  ;;  %v17304_v22 = vld [vmem:[#allocation94_spill] sm:$0xff] }
 0x854   : > { %10878 = vpow2.f32 %v5229_v47 }
 0x855   : > { %v15195_v45 = vpop.eup %10868  ;;  %v5231_v32 = vmul.f32 1.442695, %v5111_v6  ;;  %v5233_v52 = vmul.f32 1.442695, %v5112_v39  ;;  %5320 = vadd.xlane.f32.xlu1 %v5319_v15  ;;  %v17305_v15 = vld [vmem:[#allocation98_spill] sm:$0xff] }
 0x856   : > { %17300 = vst [vmem:[#allocation103_spill] sm:$0xff] %v15195_v45  ;;  %v15197_v18 = vpop.eup %10870  ;;  %v5048_v58 = vpop.xlane.xlu1 %5047 }
 0x857   : > { %17301 = vst [vmem:[#allocation102_spill] sm:$0xff] %v15197_v18  ;;  %10880 = vpow2.f32 %v5231_v32  ;;  %v5113_v24 = vsub.f32 %v17302_v40, %v5048_v58  ;;  %v5114_v30 = vsub.f32 %v17303_v37, %v5048_v58  ;;  %v5322_v10 = vadd.f32 %v15197_v18, %v15195_v45 }
 0x858   : > { %10882 = vpow2.f32 %v5233_v52 }
 0x859   : > { %v15203_v11 = vpop.eup %10872  ;;  %v5235_v47 = vmul.f32 1.442695, %v5113_v24  ;;  %v5237_v33 = vmul.f32 1.442695, %v5114_v30  ;;  %5323 = vadd.xlane.f32.xlu0 %v5322_v10  ;;  %v17306_v10 = vld [vmem:[#allocation93_spill] sm:$0xff] }
 0x85a   : > { %v15205_v28 = vpop.eup %10874  ;;  %v5051_v6 = vpop.xlane.xlu1 %5050 }
 0x85b   : > { %10884 = vpow2.f32 %v5235_v47  ;;  %v5115_v39 = vsub.f32 %v17304_v22, %v5051_v6  ;;  %v5116_v32 = vsub.f32 %v17305_v15, %v5051_v6  ;;  %v5325_v58 = vadd.f32 %v15205_v28, %v15203_v11  ;;  %v17307_v47 = vld [vmem:[#allocation101_spill] sm:$0xff] }
 0x85c   : > { %10886 = vpow2.f32 %v5237_v33 }
 0x85d   : > { %v15211_v40 = vpop.eup %10876  ;;  %v5239_v52 = vmul.f32 1.442695, %v5115_v39  ;;  %v5241_v37 = vmul.f32 1.442695, %v5116_v32  ;;  %5326 = vadd.xlane.f32.xlu1 %v5325_v58 }
 0x85e   : > { %v15213_v24 = vpop.eup %10878  ;;  %v5054_v30 = vpop.xlane.xlu1 %5053 }
 0x85f   : > { %10888 = vpow2.f32 %v5239_v52  ;;  %v5117_v18 = vsub.f32 %v17306_v10, %v5054_v30  ;;  %v5118_v45 = vsub.f32 %v17307_v47, %v5054_v30  ;;  %v5328_v6 = vadd.f32 %v15213_v24, %v15211_v40 }
 0x860   : > { %10890 = vpow2.f32 %v5241_v37 }
 0x861   : > { %v15219_v22 = vpop.eup %10880  ;;  %v5243_v33 = vmul.f32 1.442695, %v5117_v18  ;;  %v5245_v15 = vmul.f32 1.442695, %v5118_v45  ;;  %5329 = vadd.xlane.f32.xlu0 %v5328_v6 }
 0x862   : > { %v15221_v39 = vpop.eup %10882 }
 0x863   : > { %10892 = vpow2.f32 %v5243_v33  ;;  %v5331_v32 = vadd.f32 %v15221_v39, %v15219_v22 }
 0x864   : > { %10894 = vpow2.f32 %v5245_v15 }
 0x865   : > { %v15225_v58 = vpop.eup %10884  ;;  %5332 = vadd.xlane.f32.xlu1 %v5331_v32 }
 0x866   : > { %17308 = vst [vmem:[#allocation113_spill] sm:$0xff] %v15225_v58  ;;  %v15227_v52 = vpop.eup %10886 }
 0x867   : > { %17309 = vst [vmem:[#allocation105_spill] sm:$0xff] %v15227_v52  ;;  %v5334_v37 = vadd.f32 %v15227_v52, %v15225_v58 }
 0x869   : > { %v15231_v30 = vpop.eup %10888  ;;  %5335 = vadd.xlane.f32.xlu0 %v5334_v37  ;;  %v8542_v37 = vld [vmem:[%s16234_s4 + $0x70] sm:$0xff] }
 0x86a   : > { %17310 = vst [vmem:[#allocation104_spill] sm:$0xff] %v15231_v30  ;;  %v15233_v45 = vpop.eup %10890 }
 0x86b   : > { %17311 = vst [vmem:[#allocation108_spill] sm:$0xff] %v15233_v45  ;;  %v5337_v18 = vadd.f32 %v15233_v45, %v15231_v30 }
 0x86d   : > { %v15237_v10 = vpop.eup %10892  ;;  %5338 = vadd.xlane.f32.xlu1 %v5337_v18  ;;  %v8543_v18 = vld [vmem:[%s16234_s4 + $0x78] sm:$0xff] }
 0x86e   : > { %17312 = vst [vmem:[#allocation107_spill] sm:$0xff] %v15237_v10  ;;  %v15239_v47 = vpop.eup %10894 }
 0x86f   : > { %17313 = vst [vmem:[#allocation140_spill] sm:$0xff] %v15239_v47  ;;  %v5340_v6 = vadd.f32 %v15239_v47, %v15237_v10 }
 0x871   : > { %5341 = vadd.xlane.f32.xlu0 %v5340_v6 }
 0x882   : > { %v5249_v33 = vpop.xlane.xlu0 %5248 }
 0x883   : > { %10896 = vrcp.f32 %v5249_v33  ;;  %v10310_v33 = vpack.c.bf16 %v8543_v18, %v8542_v37  ;;  %v17316_v37 = vld [vmem:[#allocation96_spill] sm:$0xff] }
 0x886   : > { %v5252_v15 = vpop.xlane.xlu0 %5251 }
 0x887   : > { %10898 = vrcp.f32 %v5252_v15 }
 0x88a   : > { %v5255_v32 = vpop.xlane.xlu0 %5254 }
 0x88b   : > { %10900 = vrcp.f32 %v5255_v32 }
 0x88d   : > { %v10897_v45 = vpop.eup %10896 }
 0x88e   : > { %v5375_v30 = vmul.f32 %v10897_v45, %v14867_v35  ;;  %v5258_v52 = vpop.xlane.xlu0 %5257  ;;  %v5376_v6 = vmul.f32 %v10897_v45, %v14869_v36 }
 0x88f   : > { %10902 = vrcp.f32 %v5258_v52  ;;  %v17314_v52 = vld [vmem:[#allocation106_spill] sm:$0xff] }
 0x890   : > { %5733 = vmatprep.mubr.f32.mxu1 %v5376_v6 }
 0x891   : > { %v10899_v15 = vpop.eup %10898  ;;  %5734 = vmatmul.mubr.f32.vlgmr.msra.gmra.mrb[0].mxu1 %v5375_v30  ;;  %v17315_v30 = vmov 0.0|0.0  }
 0x892   : > { %10309 = vmatpush3.bf16.msra.mxu1 %v15000_v54  ;;  %v5261_v32 = vpop.xlane.xlu0 %5260  ;;  %v5378_v47 = vmul.f32 %v10899_v15, %v14883_v1  ;;  %v5377_v10 = vmul.f32 %v10899_v15, %v14881_v57 }
 0x893   : > { %10904 = vrcp.f32 %v5261_v32  ;;  %10311 = vmatprep.subr.bf16.mxu1 %v10310_v33 }
 0x894   : > { %5738 = vmatprep.mubr.f32.mxu1 %v5378_v47 }
 0x895   : > { %v10901_v58 = vpop.eup %10900  ;;  %5739 = vmatmul.mubr.f32.gmra.mrb[2].mxu1 %v5377_v10 }
 0x896   : > { %v5264_v35 = vpop.xlane.xlu0 %5263  ;;  %v5380_v36 = vmul.f32 %v10901_v58, %v14898_v27  ;;  %v5379_v45 = vmul.f32 %v10901_v58, %v17314_v52  ;;  %10313 = vmatpush3.bf16.msra.mxu1 %v10310_v33  ;;  %v17317_v58 = vld [vmem:[#allocation95_spill] sm:$0xff] }
 0x897   : > { %10906 = vrcp.f32 %v5264_v35  ;;  %10314 = vmatprep.subr.bf16.mxu1 %v17315_v30  ;;  %v17318_v35 = vld [vmem:[#allocation100_spill] sm:$0xff] }
 0x898   : > { %5743 = vmatprep.mubr.f32.mxu1 %v5380_v36 }
 0x899   : > { %v10903_v54 = vpop.eup %10902  ;;  %5744 = vmatmul.mubr.f32.gmra.mrb[4].mxu1 %v5379_v45 }
 0x89a   : > { %v5267_v1 = vpop.xlane.xlu0 %5266  ;;  %v5382_v57 = vmul.f32 %v10903_v54, %v14914_v56  ;;  %v5381_v18 = vmul.f32 %v10903_v54, %v17316_v37 }
 0x89b   : > { %10908 = vrcp.f32 %v5267_v1 }
 0x89c   : > { %5748 = vmatprep.mubr.f32.mxu1 %v5382_v57 }
 0x89d   : > { %v10905_v10 = vpop.eup %10904  ;;  %5749 = vmatmul.mubr.f32.gmra.mrb[6].mxu1 %v5381_v18 }
 0x89e   : > { %v5383_v27 = vmul.f32 %v10905_v10, %v14928_v3  ;;  %v5270_v47 = vpop.xlane.xlu0 %5269  ;;  %v5384_v6 = vmul.f32 %v10905_v10, %v17317_v58  ;;  %v17319_v3 = vld [vmem:[#allocation115_spill] sm:$0xff] }
 0x89f   : > { %10910 = vrcp.f32 %v5270_v47 }
 0x8a0   : > { %5753 = vmatprep.mubr.f32.mxu1 %v5384_v6 }
 0x8a1   : > { %v10907_v33 = vpop.eup %10906  ;;  %5754 = vmatmul.mubr.f32.gmra.mrb[8].mxu1 %v5383_v27 }
 0x8a2   : > { %v5385_v15 = vmul.f32 %v10907_v33, %v14944_v8  ;;  %v5273_v32 = vpop.xlane.xlu0 %5272  ;;  %v5386_v56 = vmul.f32 %v10907_v33, %v17318_v35 }
 0x8a3   : > { %10912 = vrcp.f32 %v5273_v32 }
 0x8a4   : > { %5758 = vmatprep.mubr.f32.mxu1 %v5386_v56 }
 0x8a5   : > { %v10909_v36 = vpop.eup %10908  ;;  %5759 = vmatmul.mubr.f32.gmra.mrb[10].mxu1 %v5385_v15  ;;  %v6318_v52 = vpop.f32.mrb[64].mxu0  ;;  %v17321_v15 = vld [vmem:[#allocation99_spill] sm:$0xff] }
 0x8a6   : > { %v5387_v45 = vmul.f32 %v10909_v36, %v14960_v29  ;;  %v15265_v54 = vadd.f32 %v6318_v52, %v17319_v3  ;;  %v5276_v1 = vpop.xlane.xlu0 %5275  ;;  %v6320_v57 = vpop.f32.mrb[65].mxu0  ;;  %v5388_v37 = vmul.f32 %v10909_v36, %v14962_v31  ;;  %v17320_v29 = vld [vmem:[#allocation116_spill] sm:$0xff]  ;;  %v17322_v52 = vld [vmem:[#allocation117_spill] sm:$0xff] }
 0x8a7   : > { %10914 = vrcp.f32 %v5276_v1  ;;  %v15268_v18 = vadd.f32 -1e+30, %v6320_v57 }
 0x8a8   : > { %5763 = vmatprep.mubr.f32.mxu1 %v5388_v37 }
 0x8a9   : > { %v10911_v8 = vpop.eup %10910  ;;  %v6509_v10 = vmax.f32 %v15265_v54, %v15268_v18  ;;  %5764 = vmatmul.mubr.f32.gmra.mrb[12].mxu1 %v5387_v45  ;;  %v6324_v27 = vpop.f32.mrb[66].mxu0 }
 0x8aa   : > { %v5389_v47 = vmul.f32 %v10911_v8, %v14976_v21  ;;  %v15274_v58 = vadd.f32 %v6324_v27, %v17320_v29  ;;  %v5279_v6 = vpop.xlane.xlu1 %5278  ;;  %v6326_v33 = vpop.f32.mrb[67].mxu0  ;;  %v5390_v32 = vmul.f32 %v10911_v8, %v17321_v15 }
 0x8ab   : > { %10916 = vrcp.f32 %v5279_v6  ;;  %v15277_v31 = vadd.f32 -1e+30, %v6326_v33  ;;  %6510 = vmax.xlane.f32.xlu1 %v6509_v10 }
 0x8ac   : > { %5768 = vmatprep.mubr.f32.mxu1 %v5390_v32 }
 0x8ad   : > { %v10913_v35 = vpop.eup %10912  ;;  %v6512_v56 = vmax.f32 %v15274_v58, %v15277_v31  ;;  %5769 = vmatmul.mubr.f32.gmra.mrb[14].mxu1 %v5389_v47  ;;  %v6330_v36 = vpop.f32.mrb[68].mxu0  ;;  %v17323_v47 = vld [vmem:[#allocation118_spill] sm:$0xff] }
 0x8ae   : > { %v5391_v21 = vmul.f32 %v10913_v35, %v14988_v50  ;;  %v15283_v45 = vadd.f32 %v6330_v36, %v17322_v52  ;;  %v5282_v3 = vpop.xlane.xlu0 %5281  ;;  %v6332_v1 = vpop.f32.mrb[69].mxu0  ;;  %v5392_v57 = vmul.f32 %v10913_v35, %v14996_v12  ;;  %v17324_v36 = vld [vmem:[#allocation119_spill] sm:$0xff] }
 0x8af   : > { %10918 = vrcp.f32 %v5282_v3  ;;  %v15286_v37 = vadd.f32 -1e+30, %v6332_v1  ;;  %6513 = vmax.xlane.f32.xlu0 %v6512_v56 }
 0x8b0   : > { %5773 = vmatprep.mubr.f32.mxu1 %v5392_v57 }
 0x8b1   : > { %v10915_v8 = vpop.eup %10914  ;;  %v6515_v10 = vmax.f32 %v15283_v45, %v15286_v37  ;;  %5774 = vmatmul.mubr.f32.gmra.mrb[16].mxu1 %v5391_v21  ;;  %v6336_v27 = vpop.f32.mrb[70].mxu0 }
 0x8b2   : > { %v5393_v50 = vmul.f32 %v10915_v8, %v15009_v17  ;;  %v15292_v29 = vadd.f32 %v6336_v27, %v17323_v47  ;;  %v5285_v6 = vpop.xlane.xlu1 %5284  ;;  %v6338_v33 = vpop.f32.mrb[71].mxu0  ;;  %v5394_v12 = vmul.f32 %v10915_v8, %v15011_v16  ;;  %v17325_v27 = vld [vmem:[#allocation120_spill] sm:$0xff] }
 0x8b3   : > { %10920 = vrcp.f32 %v5285_v6  ;;  %v15295_v15 = vadd.f32 -1e+30, %v6338_v33  ;;  %6516 = vmax.xlane.f32.xlu1 %v6515_v10 }
 0x8b4   : > { %5778 = vmatprep.mubr.f32.mxu1 %v5394_v12 }
 0x8b5   : > { %v10917_v32 = vpop.eup %10916  ;;  %v6518_v35 = vmax.f32 %v15292_v29, %v15295_v15  ;;  %5779 = vmatmul.mubr.f32.gmra.mrb[18].mxu1 %v5393_v50  ;;  %v6342_v56 = vpop.f32.mrb[72].mxu0 }
 0x8b6   : > { %v5395_v17 = vmul.f32 %v10917_v32, %v15021_v5  ;;  %v15301_v21 = vadd.f32 %v6342_v56, %v17324_v36  ;;  %v5288_v52 = vpop.xlane.xlu0 %5287  ;;  %v6344_v3 = vpop.f32.mrb[73].mxu0  ;;  %v5396_v16 = vmul.f32 %v10917_v32, %v15023_v23  ;;  %v17326_v56 = vld [vmem:[#allocation121_spill] sm:$0xff] }
 0x8b7   : > { %10922 = vrcp.f32 %v5288_v52  ;;  %v15304_v1 = vadd.f32 -1e+30, %v6344_v3  ;;  %6519 = vmax.xlane.f32.xlu0 %v6518_v35 }
 0x8b8   : > { %5783 = vmatprep.mubr.f32.mxu1 %v5396_v16 }
 0x8b9   : > { %v10919_v57 = vpop.eup %10918  ;;  %v6521_v8 = vmax.f32 %v15301_v21, %v15304_v1  ;;  %5784 = vmatmul.mubr.f32.gmra.mrb[20].mxu1 %v5395_v17  ;;  %v6348_v10 = vpop.f32.mrb[74].mxu0 }
 0x8ba   : > { %v5397_v5 = vmul.f32 %v10919_v57, %v15033_v41  ;;  %v15310_v50 = vadd.f32 %v6348_v10, %v17325_v27  ;;  %v5291_v47 = vpop.xlane.xlu1 %5290  ;;  %v6350_v6 = vpop.f32.mrb[75].mxu0  ;;  %v5398_v23 = vmul.f32 %v10919_v57, %v15035_v53  ;;  %v17327_v10 = vld [vmem:[#allocation122_spill] sm:$0xff] }
 0x8bb   : > { %10924 = vrcp.f32 %v5291_v47  ;;  %v15313_v33 = vadd.f32 -1e+30, %v6350_v6  ;;  %6522 = vmax.xlane.f32.xlu1 %v6521_v8 }
 0x8bc   : > { %5788 = vmatprep.mubr.f32.mxu1 %v5398_v23 }
 0x8bd   : > { %v10921_v12 = vpop.eup %10920  ;;  %v6524_v32 = vmax.f32 %v15310_v50, %v15313_v33  ;;  %5789 = vmatmul.mubr.f32.gmra.mrb[22].mxu1 %v5397_v5  ;;  %v6354_v35 = vpop.f32.mrb[76].mxu0 }
 0x8be   : > { %v5399_v41 = vmul.f32 %v10921_v12, %v15045_v61  ;;  %v15319_v17 = vadd.f32 %v6354_v35, %v17326_v56  ;;  %v5294_v36 = vpop.xlane.xlu0 %5293  ;;  %v6356_v52 = vpop.f32.mrb[77].mxu0  ;;  %v5400_v53 = vmul.f32 %v10921_v12, %v15047_v19  ;;  %v17328_v35 = vld [vmem:[#allocation123_spill] sm:$0xff] }
 0x8bf   : > { %10926 = vrcp.f32 %v5294_v36  ;;  %v15322_v3 = vadd.f32 -1e+30, %v6356_v52  ;;  %6525 = vmax.xlane.f32.xlu0 %v6524_v32 }
 0x8c0   : > { %5793 = vmatprep.mubr.f32.mxu1 %v5400_v53 }
 0x8c1   : > { %v10923_v16 = vpop.eup %10922  ;;  %v6527_v57 = vmax.f32 %v15319_v17, %v15322_v3  ;;  %5794 = vmatmul.mubr.f32.gmra.mrb[24].mxu1 %v5399_v41  ;;  %v6360_v8 = vpop.f32.mrb[78].mxu0 }
 0x8c2   : > { %v5401_v61 = vmul.f32 %v10923_v16, %v15057_v44  ;;  %v15328_v5 = vadd.f32 %v6360_v8, %v17327_v10  ;;  %v5297_v27 = vpop.xlane.xlu1 %5296  ;;  %v6362_v47 = vpop.f32.mrb[79].mxu0  ;;  %v5402_v19 = vmul.f32 %v10923_v16, %v15059_v7  ;;  %v17329_v8 = vld [vmem:[#allocation124_spill] sm:$0xff] }
 0x8c3   : > { %10928 = vrcp.f32 %v5297_v27  ;;  %v15331_v6 = vadd.f32 -1e+30, %v6362_v47  ;;  %6528 = vmax.xlane.f32.xlu1 %v6527_v57 }
 0x8c4   : > { %5798 = vmatprep.mubr.f32.mxu1 %v5402_v19 }
 0x8c5   : > { %v10925_v23 = vpop.eup %10924  ;;  %v6530_v12 = vmax.f32 %v15328_v5, %v15331_v6  ;;  %5799 = vmatmul.mubr.f32.gmra.mrb[26].mxu1 %v5401_v61  ;;  %v6366_v32 = vpop.f32.mrb[80].mxu0 }
 0x8c6   : > { %v5403_v44 = vmul.f32 %v10925_v23, %v15069_v38  ;;  %v15337_v41 = vadd.f32 %v6366_v32, %v17328_v35  ;;  %v5300_v56 = vpop.xlane.xlu0 %5299  ;;  %v6368_v36 = vpop.f32.mrb[81].mxu0  ;;  %v5404_v7 = vmul.f32 %v10925_v23, %v15071_v49  ;;  %v17330_v32 = vld [vmem:[#allocation125_spill] sm:$0xff] }
 0x8c7   : > { %10930 = vrcp.f32 %v5300_v56  ;;  %v15340_v52 = vadd.f32 -1e+30, %v6368_v36  ;;  %6531 = vmax.xlane.f32.xlu0 %v6530_v12 }
 0x8c8   : > { %5803 = vmatprep.mubr.f32.mxu1 %v5404_v7 }
 0x8c9   : > { %v10927_v53 = vpop.eup %10926  ;;  %v6533_v16 = vmax.f32 %v15337_v41, %v15340_v52  ;;  %5804 = vmatmul.mubr.f32.gmra.mrb[28].mxu1 %v5403_v44  ;;  %v6372_v57 = vpop.f32.mrb[82].mxu0 }
 0x8ca   : > { %v5405_v38 = vmul.f32 %v10927_v53, %v15081_v63  ;;  %v15346_v61 = vadd.f32 %v6372_v57, %v17329_v8  ;;  %v5303_v10 = vpop.xlane.xlu1 %5302  ;;  %v6374_v27 = vpop.f32.mrb[83].mxu0  ;;  %v5406_v49 = vmul.f32 %v10927_v53, %v15083_v60  ;;  %v17331_v57 = vld [vmem:[#allocation126_spill] sm:$0xff] }
 0x8cb   : > { %10932 = vrcp.f32 %v5303_v10  ;;  %v15349_v47 = vadd.f32 -1e+30, %v6374_v27  ;;  %6534 = vmax.xlane.f32.xlu1 %v6533_v16 }
 0x8cc   : > { %5808 = vmatprep.mubr.f32.mxu1 %v5406_v49 }
 0x8cd   : > { %v10929_v19 = vpop.eup %10928  ;;  %v6536_v23 = vmax.f32 %v15346_v61, %v15349_v47  ;;  %5809 = vmatmul.mubr.f32.gmra.mrb[30].mxu1 %v5405_v38  ;;  %v6378_v12 = vpop.f32.mrb[84].mxu0 }
 0x8ce   : > { %v5407_v63 = vmul.f32 %v10929_v19, %v15093_v9  ;;  %v15355_v44 = vadd.f32 %v6378_v12, %v17330_v32  ;;  %v5306_v35 = vpop.xlane.xlu0 %5305  ;;  %v6380_v56 = vpop.f32.mrb[85].mxu0  ;;  %v5408_v60 = vmul.f32 %v10929_v19, %v15095_v2  ;;  %v17332_v12 = vld [vmem:[#allocation127_spill] sm:$0xff] }
 0x8cf   : > { %10934 = vrcp.f32 %v5306_v35  ;;  %v15358_v36 = vadd.f32 -1e+30, %v6380_v56  ;;  %6537 = vmax.xlane.f32.xlu0 %v6536_v23 }
 0x8d0   : > { %5813 = vmatprep.mubr.f32.mxu1 %v5408_v60 }
 0x8d1   : > { %v10931_v7 = vpop.eup %10930  ;;  %v6539_v53 = vmax.f32 %v15355_v44, %v15358_v36  ;;  %5814 = vmatmul.mubr.f32.gmra.mrb[32].mxu1 %v5407_v63  ;;  %v6384_v16 = vpop.f32.mrb[86].mxu0 }
 0x8d2   : > { %v5409_v9 = vmul.f32 %v10931_v7, %v15105_v51  ;;  %v15364_v38 = vadd.f32 %v6384_v16, %v17331_v57  ;;  %v5309_v8 = vpop.xlane.xlu1 %5308  ;;  %v6386_v10 = vpop.f32.mrb[87].mxu0  ;;  %v5410_v2 = vmul.f32 %v10931_v7, %v15107_v42  ;;  %v17333_v16 = vld [vmem:[#allocation128_spill] sm:$0xff] }
 0x8d3   : > { %10936 = vrcp.f32 %v5309_v8  ;;  %v15367_v27 = vadd.f32 -1e+30, %v6386_v10  ;;  %6540 = vmax.xlane.f32.xlu1 %v6539_v53 }
 0x8d4   : > { %5818 = vmatprep.mubr.f32.mxu1 %v5410_v2 }
 0x8d5   : > { %v10933_v49 = vpop.eup %10932  ;;  %v6542_v19 = vmax.f32 %v15364_v38, %v15367_v27  ;;  %5819 = vmatmul.mubr.f32.gmra.mrb[34].mxu1 %v5409_v9  ;;  %v6390_v23 = vpop.f32.mrb[88].mxu0 }
 0x8d6   : > { %v5411_v51 = vmul.f32 %v10933_v49, %v15117_v59  ;;  %v15373_v63 = vadd.f32 %v6390_v23, %v17332_v12  ;;  %v5312_v32 = vpop.xlane.xlu0 %5311  ;;  %v6392_v35 = vpop.f32.mrb[89].mxu0  ;;  %v5412_v42 = vmul.f32 %v10933_v49, %v15119_v25  ;;  %v17334_v23 = vld [vmem:[#allocation129_spill] sm:$0xff] }
 0x8d7   : > { %10938 = vrcp.f32 %v5312_v32  ;;  %v15376_v56 = vadd.f32 -1e+30, %v6392_v35  ;;  %6543 = vmax.xlane.f32.xlu0 %v6542_v19 }
 0x8d8   : > { %5823 = vmatprep.mubr.f32.mxu1 %v5412_v42 }
 0x8d9   : > { %v10935_v60 = vpop.eup %10934  ;;  %v6545_v7 = vmax.f32 %v15373_v63, %v15376_v56  ;;  %5824 = vmatmul.mubr.f32.gmra.mrb[36].mxu1 %v5411_v51  ;;  %v6396_v53 = vpop.f32.mrb[90].mxu0 }
 0x8da   : > { %v5413_v59 = vmul.f32 %v10935_v60, %v15129_v14  ;;  %v15382_v9 = vadd.f32 %v6396_v53, %v17333_v16  ;;  %v5315_v57 = vpop.xlane.xlu1 %5314  ;;  %v6398_v8 = vpop.f32.mrb[91].mxu0  ;;  %v5414_v25 = vmul.f32 %v10935_v60, %v15131_v0  ;;  %v17335_v53 = vld [vmem:[#allocation130_spill] sm:$0xff] }
 0x8db   : > { %10940 = vrcp.f32 %v5315_v57  ;;  %v15385_v10 = vadd.f32 -1e+30, %v6398_v8  ;;  %6546 = vmax.xlane.f32.xlu1 %v6545_v7 }
 0x8dc   : > { %5828 = vmatprep.mubr.f32.mxu1 %v5414_v25 }
 0x8dd   : > { %v10937_v2 = vpop.eup %10936  ;;  %v6548_v49 = vmax.f32 %v15382_v9, %v15385_v10  ;;  %5829 = vmatmul.mubr.f32.gmra.mrb[38].mxu1 %v5413_v59  ;;  %v6402_v19 = vpop.f32.mrb[92].mxu0 }
 0x8de   : > { %v5415_v14 = vmul.f32 %v10937_v2, %v15141_v43  ;;  %v15391_v51 = vadd.f32 %v6402_v19, %v17334_v23  ;;  %v5318_v12 = vpop.xlane.xlu0 %5317  ;;  %v6404_v32 = vpop.f32.mrb[93].mxu0  ;;  %v5416_v0 = vmul.f32 %v10937_v2, %v15143_v13 }
 0x8df   : > { %10942 = vrcp.f32 %v5318_v12  ;;  %v15394_v35 = vadd.f32 -1e+30, %v6404_v32  ;;  %6549 = vmax.xlane.f32.xlu0 %v6548_v49 }
 0x8e0   : > { %5833 = vmatprep.mubr.f32.mxu1 %v5416_v0 }
 0x8e1   : > { %v10939_v42 = vpop.eup %10938  ;;  %v6551_v60 = vmax.f32 %v15391_v51, %v15394_v35  ;;  %5834 = vmatmul.mubr.f32.gmra.mrb[40].mxu1 %v5415_v14  ;;  %v6408_v7 = vpop.f32.mrb[94].mxu0 }
 0x8e2   : > { %v5417_v43 = vmul.f32 %v10939_v42, %v15153_v62  ;;  %v15400_v59 = vadd.f32 %v6408_v7, %v17335_v53  ;;  %v5321_v16 = vpop.xlane.xlu1 %5320  ;;  %v6410_v57 = vpop.f32.mrb[95].mxu0  ;;  %v5418_v13 = vmul.f32 %v10939_v42, %v15155_v4  ;;  %v17336_v4 = vld [vmem:[#allocation131_spill] sm:$0xff] }
 0x8e3   : > { %10944 = vrcp.f32 %v5321_v16  ;;  %v15403_v8 = vadd.f32 -1e+30, %v6410_v57  ;;  %6552 = vmax.xlane.f32.xlu1 %v6551_v60  ;;  %v17337_v16 = vld [vmem:[#allocation132_spill] sm:$0xff] }
 0x8e4   : > { %5838 = vmatprep.mubr.f32.mxu1 %v5418_v13 }
 0x8e5   : > { %v10941_v25 = vpop.eup %10940  ;;  %v6554_v2 = vmax.f32 %v15400_v59, %v15403_v8  ;;  %5839 = vmatmul.mubr.f32.gmra.mrb[42].mxu1 %v5417_v43  ;;  %v6414_v49 = vpop.f32.mrb[96].mxu0 }
 0x8e6   : > { %v5419_v62 = vmul.f32 %v10941_v25, %v15165_v20  ;;  %v15408_v19 = vadd.f32 -1e+30, %v6414_v49  ;;  %v5324_v14 = vpop.xlane.xlu0 %5323  ;;  %v6416_v23 = vpop.f32.mrb[97].mxu0  ;;  %v5420_v12 = vmul.f32 %v10941_v25, %v15167_v34 }
 0x8e7   : > { %10946 = vrcp.f32 %v5324_v14  ;;  %v15412_v32 = vadd.f32 %v6416_v23, %v17336_v4  ;;  %6555 = vmax.xlane.f32.xlu0 %v6554_v2  ;;  %v17338_v23 = vld [vmem:[#allocation133_spill] sm:$0xff] }
 0x8e8   : > { %5843 = vmatprep.mubr.f32.mxu1 %v5420_v12 }
 0x8e9   : > { %v10943_v0 = vpop.eup %10942  ;;  %v6557_v42 = vmax.f32 %v15408_v19, %v15412_v32  ;;  %5844 = vmatmul.mubr.f32.gmra.mrb[44].mxu1 %v5419_v62  ;;  %v6420_v60 = vpop.f32.mrb[98].mxu0 }
 0x8ea   : > { %v5421_v20 = vmul.f32 %v10943_v0, %v15177_v48  ;;  %v15417_v7 = vadd.f32 -1e+30, %v6420_v60  ;;  %v5327_v43 = vpop.xlane.xlu1 %5326  ;;  %v6422_v53 = vpop.f32.mrb[99].mxu0  ;;  %v5422_v34 = vmul.f32 %v10943_v0, %v15179_v46  ;;  %v17339_v60 = vld [vmem:[#allocation103_spill] sm:$0xff] }
 0x8eb   : > { %10948 = vrcp.f32 %v5327_v43  ;;  %v15421_v57 = vadd.f32 %v6422_v53, %v17337_v16  ;;  %6558 = vmax.xlane.f32.xlu1 %v6557_v42  ;;  %v17341_v16 = vld [vmem:[#allocation134_spill] sm:$0xff] }
 0x8ec   : > { %5848 = vmatprep.mubr.f32.mxu1 %v5422_v34  ;;  %v17340_v34 = vld [vmem:[#allocation102_spill] sm:$0xff] }
 0x8ed   : > { %v10945_v13 = vpop.eup %10944  ;;  %v6560_v25 = vmax.f32 %v15417_v7, %v15421_v57  ;;  %5849 = vmatmul.mubr.f32.gmra.mrb[46].mxu1 %v5421_v20  ;;  %v6426_v2 = vpop.f32.mrb[100].mxu0 }
 0x8ee   : > { %v5423_v48 = vmul.f32 %v10945_v13, %v15187_v55  ;;  %v15426_v49 = vadd.f32 -1e+30, %v6426_v2  ;;  %v5330_v62 = vpop.xlane.xlu0 %5329  ;;  %v6428_v14 = vpop.f32.mrb[101].mxu0  ;;  %v5424_v46 = vmul.f32 %v10945_v13, %v15189_v26 }
 0x8ef   : > { %10950 = vrcp.f32 %v5330_v62  ;;  %v15430_v12 = vadd.f32 %v6428_v14, %v17338_v23  ;;  %6561 = vmax.xlane.f32.xlu0 %v6560_v25 }
 0x8f0   : > { %5853 = vmatprep.mubr.f32.mxu1 %v5424_v46 }
 0x8f1   : > { %v10947_v4 = vpop.eup %10946  ;;  %v6563_v0 = vmax.f32 %v15426_v49, %v15430_v12  ;;  %5854 = vmatmul.mubr.f32.gmra.mrb[48].mxu1 %v5423_v48  ;;  %v6432_v42 = vpop.f32.mrb[102].mxu0 }
 0x8f2   : > { %v5425_v55 = vmul.f32 %v10947_v4, %v17339_v60  ;;  %v15435_v20 = vadd.f32 -1e+30, %v6432_v42  ;;  %v5333_v43 = vpop.xlane.xlu1 %5332  ;;  %v6434_v53 = vpop.f32.mrb[103].mxu0  ;;  %v5426_v26 = vmul.f32 %v10947_v4, %v17340_v34  ;;  %v17342_v42 = vld [vmem:[#allocation135_spill] sm:$0xff] }
 0x8f3   : > { %10952 = vrcp.f32 %v5333_v43  ;;  %v15439_v13 = vadd.f32 %v6434_v53, %v17341_v16  ;;  %6564 = vmax.xlane.f32.xlu1 %v6563_v0  ;;  %v17343_v16 = vld [vmem:[#allocation136_spill] sm:$0xff] }
 0x8f4   : > { %5858 = vmatprep.mubr.f32.mxu1 %v5426_v26 }
 0x8f5   : > { %v10949_v25 = vpop.eup %10948  ;;  %v6566_v2 = vmax.f32 %v15435_v20, %v15439_v13  ;;  %5859 = vmatmul.mubr.f32.gmra.mrb[50].mxu1 %v5425_v55  ;;  %v6438_v48 = vpop.f32.mrb[104].mxu0 }
 0x8f6   : > { %v5427_v62 = vmul.f32 %v10949_v25, %v15203_v11  ;;  %v15444_v14 = vadd.f32 -1e+30, %v6438_v48  ;;  %v5336_v46 = vpop.xlane.xlu0 %5335  ;;  %v6440_v23 = vpop.f32.mrb[105].mxu0  ;;  %v5428_v4 = vmul.f32 %v10949_v25, %v15205_v28 }
 0x8f7   : > { %10954 = vrcp.f32 %v5336_v46  ;;  %v15448_v60 = vadd.f32 %v6440_v23, %v17342_v42  ;;  %6567 = vmax.xlane.f32.xlu0 %v6566_v2  ;;  %v17344_v42 = vld [vmem:[#allocation138_spill] sm:$0xff] }
 0x8f8   : > { %5863 = vmatprep.mubr.f32.mxu1 %v5428_v4 }
 0x8f9   : > { %v10951_v0 = vpop.eup %10950  ;;  %v6569_v43 = vmax.f32 %v15444_v14, %v15448_v60  ;;  %5864 = vmatmul.mubr.f32.gmra.mrb[52].mxu1 %v5427_v62  ;;  %v6444_v55 = vpop.f32.mrb[106].mxu0 }
 0x8fa   : > { %v5429_v11 = vmul.f32 %v10951_v0, %v15211_v40  ;;  %v15453_v53 = vadd.f32 -1e+30, %v6444_v55  ;;  %v5339_v34 = vpop.xlane.xlu1 %5338  ;;  %v6446_v26 = vpop.f32.mrb[107].mxu0  ;;  %v5430_v28 = vmul.f32 %v10951_v0, %v15213_v24 }
 0x8fb   : > { %10956 = vrcp.f32 %v5339_v34  ;;  %v15457_v25 = vadd.f32 %v6446_v26, %v17343_v16  ;;  %6570 = vmax.xlane.f32.xlu1 %v6569_v43  ;;  %v17346_v34 = vld [vmem:[#allocation113_spill] sm:$0xff] }
 0x8fc   : > { %5868 = vmatprep.mubr.f32.mxu1 %v5430_v28  ;;  %v17348_v16 = vld [vmem:[#allocation105_spill] sm:$0xff] }
 0x8fd   : > { %v10953_v2 = vpop.eup %10952  ;;  %v6572_v48 = vmax.f32 %v15453_v53, %v15457_v25  ;;  %5869 = vmatmul.mubr.f32.gmra.mrb[54].mxu1 %v5429_v11  ;;  %v6450_v62 = vpop.f32.mrb[108].mxu0 }
 0x8fe   : > { %v5431_v40 = vmul.f32 %v10953_v2, %v15219_v22  ;;  %v15462_v46 = vadd.f32 -1e+30, %v6450_v62  ;;  %v5342_v23 = vpop.xlane.xlu0 %5341  ;;  %v6452_v4 = vpop.f32.mrb[109].mxu0  ;;  %v5432_v24 = vmul.f32 %v10953_v2, %v15221_v39  ;;  %v17349_v39 = vld [vmem:[#allocation141_spill] sm:$0xff] }
 0x8ff   : > { %10958 = vrcp.f32 %v5342_v23  ;;  %v15466_v0 = vadd.f32 %v6452_v4, %v17344_v42  ;;  %6573 = vmax.xlane.f32.xlu0 %v6572_v48 }
 0x900   : > { %5873 = vmatprep.mubr.f32.mxu1 %v5432_v24 }
 0x901   : > { %17345 = vst [vmem:[#allocation137_spill] sm:$0xff] %v15466_v0  ;;  %v10955_v43 = vpop.eup %10954  ;;  %v6575_v55 = vmax.f32 %v15462_v46, %v15466_v0  ;;  %5874 = vmatmul.mubr.f32.gmra.mrb[56].mxu1 %v5431_v40  ;;  %v6456_v11 = vpop.f32.mrb[110].mxu0  ;;  %v17351_v40 = vld [vmem:[#allocation104_spill] sm:$0xff] }
 0x902   : > { %v5433_v22 = vmul.f32 %v10955_v43, %v17346_v34  ;;  %v15471_v26 = vadd.f32 -1e+30, %v6456_v11  ;;  %v6458_v28 = vpop.f32.mrb[111].mxu0  ;;  %v5434_v62 = vmul.f32 %v10955_v43, %v17348_v16  ;;  %v17352_v34 = vld [vmem:[#allocation108_spill] sm:$0xff] }
 0x903   : > { %v15475_v2 = vadd.f32 %v6458_v28, %v17349_v39  ;;  %6576 = vmax.xlane.f32.xlu1 %v6575_v55  ;;  %v17353_v0 = vld [vmem:[#allocation144_spill] sm:$0xff] }
 0x904   : > { %17347 = vst [vmem:[#allocation110_spill] sm:$0xff] %v15471_v26  ;;  %5878 = vmatprep.mubr.f32.mxu1 %v5434_v62 }
 0x905   : > { %17350 = vst [vmem:[#allocation109_spill] sm:$0xff] %v15475_v2  ;;  %v10957_v48 = vpop.eup %10956  ;;  %v6578_v23 = vmax.f32 %v15471_v26, %v15475_v2  ;;  %5879 = vmatmul.mubr.f32.gmra.mrb[58].mxu1 %v5433_v22  ;;  %v6462_v4 = vpop.f32.mrb[112].mxu0  ;;  %v17354_v22 = vld [vmem:[#allocation107_spill] sm:$0xff] }
 0x906   : > { %v5435_v24 = vmul.f32 %v10957_v48, %v17351_v40  ;;  %v15480_v42 = vadd.f32 -1e+30, %v6462_v4  ;;  %v6464_v11 = vpop.f32.mrb[113].mxu0  ;;  %v5436_v30 = vmul.f32 %v10957_v48, %v17352_v34  ;;  %v17355_v40 = vld [vmem:[#allocation140_spill] sm:$0xff]  ;;  %v17356_v26 = vld [vmem:[#allocation147_spill] sm:$0xff]  ;;  %v17358_v34 = vld [vmem:[#allocation150_spill] sm:$0xff] }
 0x907   : > { %v15484_v43 = vadd.f32 %v6464_v11, %v17353_v0  ;;  %6579 = vmax.xlane.f32.xlu1 %v6578_v23 }
 0x908   : > { %5883 = vmatprep.mubr.f32.mxu1 %v5436_v30 }
 0x909   : > { %v10959_v55 = vpop.eup %10958  ;;  %v6581_v28 = vmax.f32 %v15480_v42, %v15484_v43  ;;  %5884 = vmatmul.mubr.f32.gmra.mrb[60].mxu1 %v5435_v24  ;;  %v6468_v16 = vpop.f32.mrb[114].mxu0  ;;  %v17357_v24 = vld [vmem:[#allocation2_spill] sm:$0xff] }
 0x90a   : > { %v5437_v62 = vmul.f32 %v10959_v55, %v17354_v22  ;;  %v15489_v39 = vadd.f32 -1e+30, %v6468_v16  ;;  %v6470_v4 = vpop.f32.mrb[115].mxu0  ;;  %v5438_v2 = vmul.f32 %v10959_v55, %v17355_v40  ;;  %v17359_v55 = vld [vmem:[#allocation3_spill] sm:$0xff]  ;;  %v17361_v22 = vld [vmem:[#allocation4_spill] sm:$0xff] }
 0x90b   : > { %v15493_v48 = vadd.f32 %v6470_v4, %v17356_v26  ;;  %6582 = vmax.xlane.f32.xlu1 %v6581_v28  ;;  %v17362_v4 = vld [vmem:[#allocation151_spill] sm:$0xff] }
 0x90c   : > { %5888 = vmatprep.mubr.f32.mxu1 %v5438_v2 }
 0x90d   : > { %v6584_v30 = vmax.f32 %v15489_v39, %v15493_v48  ;;  %5889 = vmatmul.mubr.f32.gmra.mrb[62].mxu1 %v5437_v62  ;;  %v6474_v0 = vpop.f32.mrb[116].mxu0 }
 0x90e   : > { %v15497_v23 = vadd.f32 -1e+30, %v6474_v0  ;;  %9806 = vmatprep.mubr.msk.f32.mxu1 %vm1249_vm0, %v17357_v24  ;;  %v6476_v11 = vpop.f32.mrb[117].mxu0  ;;  %v17364_v0 = vld [vmem:[#allocation5_spill] sm:$0xff] }
 0x90f   : > { %v15502_v16 = vadd.f32 %v6476_v11, %v17358_v34  ;;  %6585 = vmax.xlane.f32.xlu1 %v6584_v30  ;;  %v17366_v34 = vld [vmem:[#allocation6_spill] sm:$0xff] }
 0x911   : > { %v6587_v26 = vmax.f32 %v15497_v23, %v15502_v16  ;;  %9807 = vmatmul.mubr.msk.f32.vlgmr.msra.gmra.mrb[64].mxu1 %vm1249_vm0, %v17359_v55  ;;  %v6480_v2 = vpop.f32.mrb[118].mxu0 }
 0x912   : > { %v15508_v28 = vadd.f32 -1e+30, %v6480_v2  ;;  %9809 = vmatprep.mubr.msk.f32.mxu1 %vm1249_vm0, %v17361_v22  ;;  %v6482_v62 = vpop.f32.mrb[119].mxu0  ;;  %v17367_v2 = vld [vmem:[#allocation152_spill] sm:$0xff] }
 0x913   : > { %v15513_v40 = vadd.f32 %v6482_v62, %v17362_v4  ;;  %6588 = vmax.xlane.f32.xlu1 %v6587_v26  ;;  %v17369_v62 = vld [vmem:[#allocation7_spill] sm:$0xff] }
 0x914   : > { %17360 = vst [vmem:[#allocation112_spill] sm:$0xff] %v15508_v28 }
 0x915   : > { %17363 = vst [vmem:[#allocation111_spill] sm:$0xff] %v15513_v40  ;;  %v6590_v30 = vmax.f32 %v15508_v28, %v15513_v40  ;;  %9810 = vmatmul.mubr.msk.f32.gmra.mrb[66].mxu1 %vm1249_vm0, %v17364_v0  ;;  %v6486_v24 = vpop.f32.mrb[120].mxu0  ;;  %v17371_v0 = vld [vmem:[#allocation8_spill] sm:$0xff]  ;;  %v17372_v28 = vld [vmem:[#allocation153_spill] sm:$0xff] }
 0x916   : > { %v15519_v11 = vadd.f32 -1e+30, %v6486_v24  ;;  %9812 = vmatprep.mubr.msk.f32.mxu1 %vm1249_vm0, %v17366_v34  ;;  %v6488_v55 = vpop.f32.mrb[121].mxu0 }
 0x917   : > { %v15524_v22 = vadd.f32 %v6488_v55, %v17367_v2  ;;  %6591 = vmax.xlane.f32.xlu1 %v6590_v30  ;;  %v17374_v55 = vld [vmem:[#allocation9_spill] sm:$0xff] }
 0x918   : > { %17365 = vst [vmem:[#allocation139_spill] sm:$0xff] %v15519_v11 }
 0x919   : > { %17368 = vst [vmem:[#allocation114_spill] sm:$0xff] %v15524_v22  ;;  %v6593_v26 = vmax.f32 %v15519_v11, %v15524_v22  ;;  %9813 = vmatmul.mubr.msk.f32.gmra.mrb[68].mxu1 %vm1249_vm0, %v17369_v62  ;;  %v6492_v4 = vpop.f32.mrb[122].mxu0  ;;  %v17375_v62 = vld [vmem:[#allocation10_spill] sm:$0xff]  ;;  %v17376_v11 = vld [vmem:[#allocation155_spill] sm:$0xff] }
 0x91a   : > { %v15530_v40 = vadd.f32 -1e+30, %v6492_v4  ;;  %9815 = vmatprep.mubr.msk.f32.mxu1 %vm1249_vm0, %v17371_v0  ;;  %v6494_v24 = vpop.f32.mrb[123].mxu0 }
 0x91b   : > { %v15535_v34 = vadd.f32 %v6494_v24, %v17372_v28  ;;  %6594 = vmax.xlane.f32.xlu1 %v6593_v26  ;;  %v17377_v26 = vld [vmem:[#allocation11_spill] sm:$0xff] }
 0x91c   : > { %17370 = vst [vmem:[#allocation21_spill] sm:$0xff] %v15530_v40 }
 0x91d   : > { %17373 = vst [vmem:[#allocation23_spill] sm:$0xff] %v15535_v34  ;;  %v6596_v30 = vmax.f32 %v15530_v40, %v15535_v34  ;;  %9816 = vmatmul.mubr.msk.f32.gmra.mrb[70].mxu1 %vm1249_vm0, %v17374_v55  ;;  %v6498_v2 = vpop.f32.mrb[124].mxu0  ;;  %v17379_v55 = vld [vmem:[#allocation12_spill] sm:$0xff]  ;;  %v17380_v40 = vld [vmem:[#allocation158_spill] sm:$0xff] }
 0x91e   : > { %v15541_v22 = vadd.f32 -1e+30, %v6498_v2  ;;  %9818 = vmatprep.mubr.msk.f32.mxu1 %vm1249_vm0, %v17375_v62  ;;  %v6500_v4 = vpop.f32.mrb[125].mxu0 }
 0x91f   : > { %v15546_v0 = vadd.f32 %v6500_v4, %v17376_v11  ;;  %6597 = vmax.xlane.f32.xlu1 %v6596_v30  ;;  %v17382_v30 = vld [vmem:[#allocation13_spill] sm:$0xff]  ;;  %v17383_v4 = vld [vmem:[#allocation14_spill] sm:$0xff] }
 0x921   : > { %v6599_v28 = vmax.f32 %v15541_v22, %v15546_v0  ;;  %9819 = vmatmul.mubr.msk.f32.gmra.mrb[72].mxu1 %vm1249_vm0, %v17377_v26  ;;  %v6504_v24 = vpop.f32.mrb[126].mxu0  ;;  %v17384_v26 = vld [vmem:[#allocation15_spill] sm:$0xff] }
 0x922   : > { %v15552_v34 = vadd.f32 -1e+30, %v6504_v24  ;;  %9821 = vmatprep.mubr.msk.f32.mxu1 %vm1249_vm0, %v17379_v55  ;;  %v6506_v2 = vpop.f32.mrb[127].mxu0  ;;  %v17385_v24 = vld [vmem:[#allocation16_spill] sm:$0xff]  ;;  %v17386_v55 = vld [vmem:[#allocation17_spill] sm:$0xff] }
 0x923   : > { %v15557_v62 = vadd.f32 %v6506_v2, %v17380_v40  ;;  %6600 = vmax.xlane.f32.xlu1 %v6599_v28  ;;  %v17387_v40 = vld [vmem:[#allocation19_spill] sm:$0xff]  ;;  %v17388_v28 = vld [vmem:[#allocation18_spill] sm:$0xff]  ;;  %v17389_v2 = vld [vmem:[#allocation24_spill] sm:$0xff] }
 0x924   : > { %17378 = vst [vmem:[#allocation25_spill] sm:$0xff] %v15552_v34 }
 0x925   : > { %17381 = vst [vmem:[#allocation143_spill] sm:$0xff] %v15557_v62  ;;  %v6602_v11 = vmax.f32 %v15552_v34, %v15557_v62  ;;  %9822 = vmatmul.mubr.msk.f32.gmra.mrb[74].mxu1 %vm1249_vm0, %v17382_v30  ;;  %v17390_v30 = vld [vmem:[#allocation22_spill] sm:$0xff] }
 0x926   : > { %9824 = vmatprep.mubr.msk.f32.mxu1 %vm1249_vm0, %v17383_v4 }
 0x927   : > { %6603 = vmax.xlane.f32.xlu1 %v6602_v11  ;;  %v17391_v11 = vld [vmem:[#allocation27_spill] sm:$0xff] }
 0x929   : > { %9825 = vmatmul.mubr.msk.f32.gmra.mrb[76].mxu1 %vm1249_vm0, %v17384_v26  ;;  %v17392_v26 = vld [vmem:[#allocation26_spill] sm:$0xff] }
 0x92a   : > { %9827 = vmatprep.mubr.msk.f32.mxu1 %vm1249_vm0, %v17385_v24 }
 0x92d   : > { %9828 = vmatmul.mubr.msk.f32.gmra.mrb[78].mxu1 %vm1249_vm0, %v17386_v55 }
 0x92e   : > { %9830 = vmatprep.mubr.msk.f32.mxu1 %vm1249_vm0, %v17387_v40  ;;  %v17393_v40 = vld [vmem:[#allocation29_spill] sm:$0xff] }
 0x931   : > { %9831 = vmatmul.mubr.msk.f32.gmra.mrb[80].mxu1 %vm1249_vm0, %v17388_v28 }
 0x932   : > { %9833 = vmatprep.mubr.msk.f32.mxu1 %vm1249_vm0, %v17389_v2 }
 0x935   : > { %9834 = vmatmul.mubr.msk.f32.gmra.mrb[82].mxu1 %vm1249_vm0, %v17390_v30 }
 0x936   : > { %9836 = vmatprep.mubr.msk.f32.mxu1 %vm1249_vm0, %v17391_v11  ;;  %v17394_v11 = vld [vmem:[#allocation31_spill] sm:$0xff] }
 0x938   : > { %v6511_v4 = vpop.xlane.xlu1 %6510 }
 0x939   : > { %9837 = vmatmul.mubr.msk.f32.gmra.mrb[84].mxu1 %vm1249_vm0, %v17392_v26  ;;  %v6605_v24 = vsub.f32 %v15265_v54, %v6511_v4  ;;  %v6606_v55 = vsub.f32 %v15268_v18, %v6511_v4  ;;  %v17395_v26 = vld [vmem:[#allocation32_spill] sm:$0xff] }
 0x93a   : > { %9839 = vmatprep.mubr.msk.f32.mxu1 %vm1249_vm0, %v17393_v40  ;;  %v17396_v40 = vld [vmem:[#allocation33_spill] sm:$0xff] }
 0x93b   : > { %v6669_v28 = vmul.f32 1.442695, %v6605_v24  ;;  %v6671_v62 = vmul.f32 1.442695, %v6606_v55 }
 0x93c   : > { %v6514_v2 = vpop.xlane.xlu0 %6513 }
 0x93d   : > { %10960 = vpow2.f32 %v6669_v28  ;;  %v6607_v30 = vsub.f32 %v15274_v58, %v6514_v2  ;;  %v6608_v34 = vsub.f32 %v15277_v31, %v6514_v2  ;;  %9840 = vmatmul.mubr.msk.f32.gmra.mrb[86].mxu1 %vm1249_vm0, %v17394_v11  ;;  %v17397_v31 = vld [vmem:[#allocation35_spill] sm:$0xff]  ;;  %v17399_v11 = vld [vmem:[#allocation38_spill] sm:$0xff] }
 0x93e   : > { %10962 = vpow2.f32 %v6671_v62  ;;  %9842 = vmatprep.mubr.msk.f32.mxu1 %vm1249_vm0, %v17395_v26 }
 0x93f   : > { %v6673_v54 = vmul.f32 1.442695, %v6607_v30  ;;  %v6675_v18 = vmul.f32 1.442695, %v6608_v34  ;;  %v17398_v30 = vld [vmem:[#allocation37_spill] sm:$0xff] }
 0x940   : > { %v6517_v4 = vpop.xlane.xlu1 %6516 }
 0x941   : > { %10964 = vpow2.f32 %v6673_v54  ;;  %9843 = vmatmul.mubr.msk.f32.gmra.mrb[88].mxu1 %vm1249_vm0, %v17396_v40  ;;  %v6609_v24 = vsub.f32 %v15283_v45, %v6517_v4  ;;  %v6610_v58 = vsub.f32 %v15286_v37, %v6517_v4  ;;  %v17400_v4 = vld [vmem:[#allocation39_spill] sm:$0xff] }
 0x942   : > { %10966 = vpow2.f32 %v6675_v18  ;;  %9845 = vmatprep.mubr.msk.f32.mxu1 %vm1249_vm0, %v17397_v31 }
 0x943   : > { %v6677_v55 = vmul.f32 1.442695, %v6609_v24  ;;  %v6679_v62 = vmul.f32 1.442695, %v6610_v58  ;;  %v17401_v24 = vld [vmem:[#allocation41_spill] sm:$0xff] }
 0x944   : > { %v6520_v28 = vpop.xlane.xlu0 %6519 }
 0x945   : > { %10968 = vpow2.f32 %v6677_v55  ;;  %v6611_v2 = vsub.f32 %v15292_v29, %v6520_v28  ;;  %v6612_v34 = vsub.f32 %v15295_v15, %v6520_v28  ;;  %9846 = vmatmul.mubr.msk.f32.gmra.mrb[90].mxu1 %vm1249_vm0, %v17398_v30 }
 0x946   : > { %10970 = vpow2.f32 %v6679_v62  ;;  %9848 = vmatprep.mubr.msk.f32.mxu1 %vm1249_vm0, %v17399_v11 }
 0x947   : > { %v15605_v45 = vpop.eup %10960  ;;  %v6681_v37 = vmul.f32 1.442695, %v6611_v2  ;;  %v6683_v26 = vmul.f32 1.442695, %v6612_v34  ;;  %v17402_v2 = vld [vmem:[#allocation43_spill] sm:$0xff] }
 0x948   : > { %v15607_v54 = vpop.eup %10962  ;;  %v6523_v18 = vpop.xlane.xlu1 %6522 }
 0x949   : > { %10972 = vpow2.f32 %v6681_v37  ;;  %9849 = vmatmul.mubr.msk.f32.gmra.mrb[92].mxu1 %vm1249_vm0, %v17400_v4  ;;  %v6613_v29 = vsub.f32 %v15301_v21, %v6523_v18  ;;  %v6614_v15 = vsub.f32 %v15304_v1, %v6523_v18  ;;  %v6797_v40 = vadd.f32 %v15607_v54, %v15605_v45 }
 0x94a   : > { %10974 = vpow2.f32 %v6683_v26  ;;  %9851 = vmatprep.mubr.msk.f32.mxu1 %vm1249_vm0, %v17401_v24 }
 0x94b   : > { %v15617_v58 = vpop.eup %10964  ;;  %v6685_v31 = vmul.f32 1.442695, %v6613_v29  ;;  %v6687_v55 = vmul.f32 1.442695, %v6614_v15  ;;  %6798 = vadd.xlane.f32.xlu0 %v6797_v40 }
 0x94c   : > { %v15619_v62 = vpop.eup %10966  ;;  %v6526_v28 = vpop.xlane.xlu0 %6525 }
 0x94d   : > { %10976 = vpow2.f32 %v6685_v31  ;;  %v6615_v21 = vsub.f32 %v15310_v50, %v6526_v28  ;;  %v6616_v1 = vsub.f32 %v15313_v33, %v6526_v28  ;;  %9852 = vmatmul.mubr.msk.f32.gmra.mrb[94].mxu1 %vm1249_vm0, %v17402_v2  ;;  %v6800_v34 = vadd.f32 %v15619_v62, %v15617_v58 }
 0x94e   : > { %10978 = vpow2.f32 %v6687_v55 }
 0x94f   : > { %v15627_v30 = vpop.eup %10968  ;;  %v6689_v11 = vmul.f32 1.442695, %v6615_v21  ;;  %v6691_v37 = vmul.f32 1.442695, %v6616_v1  ;;  %6801 = vadd.xlane.f32.xlu0 %v6800_v34 }
 0x950   : > { %v15629_v26 = vpop.eup %10970  ;;  %v6529_v18 = vpop.xlane.xlu1 %6528 }
 0x951   : > { %10980 = vpow2.f32 %v6689_v11  ;;  %v6617_v50 = vsub.f32 %v15319_v17, %v6529_v18  ;;  %v6618_v33 = vsub.f32 %v15322_v3, %v6529_v18  ;;  %v6803_v4 = vadd.f32 %v15629_v26, %v15627_v30 }
 0x952   : > { %10982 = vpow2.f32 %v6691_v37 }
 0x953   : > { %v15635_v29 = vpop.eup %10972  ;;  %v6693_v15 = vmul.f32 1.442695, %v6617_v50  ;;  %v6695_v40 = vmul.f32 1.442695, %v6618_v33  ;;  %6804 = vadd.xlane.f32.xlu0 %v6803_v4 }
 0x954   : > { %v15637_v24 = vpop.eup %10974  ;;  %v6532_v31 = vpop.xlane.xlu0 %6531 }
 0x955   : > { %10984 = vpow2.f32 %v6693_v15  ;;  %v6619_v55 = vsub.f32 %v15328_v5, %v6532_v31  ;;  %v6620_v28 = vsub.f32 %v15331_v6, %v6532_v31  ;;  %v6806_v17 = vadd.f32 %v15637_v24, %v15635_v29 }
 0x956   : > { %10986 = vpow2.f32 %v6695_v40 }
 0x957   : > { %v15643_v3 = vpop.eup %10976  ;;  %v6697_v21 = vmul.f32 1.442695, %v6619_v55  ;;  %v6699_v1 = vmul.f32 1.442695, %v6620_v28  ;;  %6807 = vadd.xlane.f32.xlu0 %v6806_v17 }
 0x958   : > { %v15645_v2 = vpop.eup %10978  ;;  %v6535_v34 = vpop.xlane.xlu1 %6534 }
 0x959   : > { %10988 = vpow2.f32 %v6697_v21  ;;  %v6621_v11 = vsub.f32 %v15337_v41, %v6535_v34  ;;  %v6622_v37 = vsub.f32 %v15340_v52, %v6535_v34  ;;  %v6809_v5 = vadd.f32 %v15645_v2, %v15643_v3 }
 0x95a   : > { %10990 = vpow2.f32 %v6699_v1 }
 0x95b   : > { %v15651_v6 = vpop.eup %10980  ;;  %v6701_v18 = vmul.f32 1.442695, %v6621_v11  ;;  %v6703_v50 = vmul.f32 1.442695, %v6622_v37  ;;  %6810 = vadd.xlane.f32.xlu0 %v6809_v5 }
 0x95c   : > { %v15653_v33 = vpop.eup %10982  ;;  %v6538_v4 = vpop.xlane.xlu0 %6537 }
 0x95d   : > { %10992 = vpow2.f32 %v6701_v18  ;;  %v6623_v15 = vsub.f32 %v15346_v61, %v6538_v4  ;;  %v6624_v40 = vsub.f32 %v15349_v47, %v6538_v4  ;;  %v6812_v41 = vadd.f32 %v15653_v33, %v15651_v6 }
 0x95e   : > { %10994 = vpow2.f32 %v6703_v50  ;;  %v17403_v50 = vld [vmem:[#allocation54_spill] sm:$0xff] }
 0x95f   : > { %v15659_v52 = vpop.eup %10984  ;;  %v6705_v31 = vmul.f32 1.442695, %v6623_v15  ;;  %v6707_v55 = vmul.f32 1.442695, %v6624_v40  ;;  %6813 = vadd.xlane.f32.xlu0 %v6812_v41 }
 0x960   : > { %v15661_v28 = vpop.eup %10986  ;;  %v6541_v17 = vpop.xlane.xlu1 %6540 }
 0x961   : > { %10996 = vpow2.f32 %v6705_v31  ;;  %v6625_v21 = vsub.f32 %v15355_v44, %v6541_v17  ;;  %v6626_v1 = vsub.f32 %v15358_v36, %v6541_v17  ;;  %v6815_v61 = vadd.f32 %v15661_v28, %v15659_v52 }
 0x962   : > { %10998 = vpow2.f32 %v6707_v55 }
 0x963   : > { %v15667_v47 = vpop.eup %10988  ;;  %v6709_v34 = vmul.f32 1.442695, %v6625_v21  ;;  %v6711_v11 = vmul.f32 1.442695, %v6626_v1  ;;  %6816 = vadd.xlane.f32.xlu0 %v6815_v61  ;;  %v17405_v61 = vld [vmem:[#allocation56_spill] sm:$0xff] }
 0x964   : > { %v15669_v37 = vpop.eup %10990  ;;  %v5735_v5 = vpop.f32.mrb[0].mxu1 }
 0x965   : > { %v6544_v18 = vpop.xlane.xlu0 %6543  ;;  %11000 = vpow2.f32 %v6709_v34  ;;  %v15672_v4 = vadd.f32 %v5735_v5, %v17403_v50  ;;  %v5737_v44 = vpop.f32.mrb[1].mxu1  ;;  %v6818_v40 = vadd.f32 %v15669_v37, %v15667_v47 }
 0x966   : > { %v6627_v36 = vsub.f32 %v15364_v38, %v6544_v18  ;;  %v6628_v15 = vsub.f32 %v15367_v27, %v6544_v18  ;;  %11002 = vpow2.f32 %v6711_v11 }
 0x967   : > { %17404 = vst [vmem:[#allocation142_spill] sm:$0xff] %v15672_v4  ;;  %v15678_v41 = vpop.eup %10992  ;;  %6819 = vadd.xlane.f32.xlu0 %v6818_v40 }
 0x968   : > { %v6713_v31 = vmul.f32 1.442695, %v6627_v36  ;;  %v6715_v55 = vmul.f32 1.442695, %v6628_v15  ;;  %v15680_v17 = vpop.eup %10994  ;;  %v5740_v21 = vpop.f32.mrb[2].mxu1 }
 0x969   : > { %v6547_v1 = vpop.xlane.xlu1 %6546  ;;  %v15683_v34 = vadd.f32 %v5740_v21, %v17405_v61  ;;  %v5742_v38 = vpop.f32.mrb[3].mxu1  ;;  %v6821_v5 = vadd.f32 %v15680_v17, %v15678_v41 }
 0x96a   : > { %11004 = vpow2.f32 %v6713_v31  ;;  %v6629_v27 = vsub.f32 %v15373_v63, %v6547_v1  ;;  %v6630_v11 = vsub.f32 %v15376_v56, %v6547_v1  ;;  %v17407_v31 = vld [vmem:[#allocation167_spill] sm:$0xff] }
 0x96b   : > { %17406 = vst [vmem:[#allocation28_spill] sm:$0xff] %v15683_v34  ;;  %11006 = vpow2.f32 %v6715_v55  ;;  %v15689_v18 = vpop.eup %10996  ;;  %6822 = vadd.xlane.f32.xlu0 %v6821_v5 }
 0x96c   : > { %v6717_v50 = vmul.f32 1.442695, %v6629_v27  ;;  %v6719_v44 = vmul.f32 1.442695, %v6630_v11  ;;  %v15691_v36 = vpop.eup %10998  ;;  %v5745_v15 = vpop.f32.mrb[4].mxu1 }
 0x96d   : > { %v6550_v40 = vpop.xlane.xlu0 %6549  ;;  %v15694_v21 = vadd.f32 %v5745_v15, %v17407_v31  ;;  %v5747_v63 = vpop.f32.mrb[5].mxu1  ;;  %v6824_v1 = vadd.f32 %v15691_v36, %v15689_v18  ;;  %v17409_v15 = vld [vmem:[#allocation166_spill] sm:$0xff] }
 0x96e   : > { %11008 = vpow2.f32 %v6717_v50  ;;  %v6631_v56 = vsub.f32 %v15382_v9, %v6550_v40  ;;  %v6632_v55 = vsub.f32 %v15385_v10, %v6550_v40 }
 0x96f   : > { %17408 = vst [vmem:[#allocation30_spill] sm:$0xff] %v15694_v21  ;;  %11010 = vpow2.f32 %v6719_v44  ;;  %v15700_v61 = vpop.eup %11000  ;;  %6825 = vadd.xlane.f32.xlu0 %v6824_v1 }
 0x970   : > { %v6721_v38 = vmul.f32 1.442695, %v6631_v56  ;;  %v6723_v27 = vmul.f32 1.442695, %v6632_v55  ;;  %v15702_v11 = vpop.eup %11002  ;;  %v5750_v5 = vpop.f32.mrb[6].mxu1 }
 0x971   : > { %v6553_v50 = vpop.xlane.xlu1 %6552  ;;  %v15705_v31 = vadd.f32 %v5750_v5, %v17409_v15  ;;  %v5752_v9 = vpop.f32.mrb[7].mxu1  ;;  %v6827_v40 = vadd.f32 %v15702_v11, %v15700_v61  ;;  %v17411_v5 = vld [vmem:[#allocation57_spill] sm:$0xff] }
 0x972   : > { %11012 = vpow2.f32 %v6721_v38  ;;  %v6633_v10 = vsub.f32 %v15391_v51, %v6553_v50  ;;  %v6634_v44 = vsub.f32 %v15394_v35, %v6553_v50 }
 0x973   : > { %17410 = vst [vmem:[#allocation146_spill] sm:$0xff] %v15705_v31  ;;  %11014 = vpow2.f32 %v6723_v27  ;;  %6828 = vadd.xlane.f32.xlu1 %v6827_v40 }
 0x974   : > { %v15711_v63 = vpop.eup %11004  ;;  %v6725_v56 = vmul.f32 1.442695, %v6633_v10  ;;  %v6727_v55 = vmul.f32 1.442695, %v6634_v44  ;;  %v5755_v38 = vpop.f32.mrb[8].mxu1 }
 0x975   : > { %v15713_v1 = vpop.eup %11006  ;;  %v6556_v21 = vpop.xlane.xlu0 %6555  ;;  %v15716_v15 = vadd.f32 %v5755_v38, %v17411_v5  ;;  %v17413_v38 = vld [vmem:[#allocation58_spill] sm:$0xff] }
 0x976   : > { %11016 = vpow2.f32 %v6725_v56  ;;  %v5757_v51 = vpop.f32.mrb[9].mxu1  ;;  %v6635_v35 = vsub.f32 %v15400_v59, %v6556_v21  ;;  %v6636_v27 = vsub.f32 %v15403_v8, %v6556_v21  ;;  %v6830_v50 = vadd.f32 %v15713_v1, %v15711_v63 }
 0x977   : > { %17412 = vst [vmem:[#allocation145_spill] sm:$0xff] %v15716_v15  ;;  %11018 = vpow2.f32 %v6727_v55 }
 0x978   : > { %v15722_v9 = vpop.eup %11008  ;;  %v6729_v10 = vmul.f32 1.442695, %v6635_v35  ;;  %v6731_v44 = vmul.f32 1.442695, %v6636_v27  ;;  %6831 = vadd.xlane.f32.xlu0 %v6830_v50  ;;  %v5760_v56 = vpop.f32.mrb[10].mxu1 }
 0x979   : > { %v15724_v40 = vpop.eup %11010  ;;  %v6559_v31 = vpop.xlane.xlu1 %6558  ;;  %v15727_v5 = vadd.f32 %v5760_v56, %v17413_v38  ;;  %v17415_v56 = vld [vmem:[#allocation169_spill] sm:$0xff] }
 0x97a   : > { %11020 = vpow2.f32 %v6729_v10  ;;  %v5762_v59 = vpop.f32.mrb[11].mxu1  ;;  %v6637_v8 = vsub.f32 %v15408_v19, %v6559_v31  ;;  %v6638_v21 = vsub.f32 %v15412_v32, %v6559_v31  ;;  %v6833_v55 = vadd.f32 %v15724_v40, %v15722_v9 }
 0x97b   : > { %17414 = vst [vmem:[#allocation34_spill] sm:$0xff] %v15727_v5  ;;  %11022 = vpow2.f32 %v6731_v44 }
 0x97c   : > { %v15733_v51 = vpop.eup %11012  ;;  %v6733_v35 = vmul.f32 1.442695, %v6637_v8  ;;  %v6735_v27 = vmul.f32 1.442695, %v6638_v21  ;;  %6834 = vadd.xlane.f32.xlu1 %v6833_v55  ;;  %v5765_v10 = vpop.f32.mrb[12].mxu1 }
 0x97d   : > { %v15735_v50 = vpop.eup %11014  ;;  %v6562_v15 = vpop.xlane.xlu0 %6561  ;;  %v15738_v38 = vadd.f32 %v5765_v10, %v17415_v56  ;;  %v17417_v10 = vld [vmem:[#allocation168_spill] sm:$0xff] }
 0x97e   : > { %11024 = vpow2.f32 %v6733_v35  ;;  %v5767_v19 = vpop.f32.mrb[13].mxu1  ;;  %v6639_v32 = vsub.f32 %v15417_v7, %v6562_v15  ;;  %v6640_v31 = vsub.f32 %v15421_v57, %v6562_v15  ;;  %v6836_v44 = vadd.f32 %v15735_v50, %v15733_v51 }
 0x97f   : > { %17416 = vst [vmem:[#allocation36_spill] sm:$0xff] %v15738_v38  ;;  %11026 = vpow2.f32 %v6735_v27 }
 0x980   : > { %v15744_v59 = vpop.eup %11016  ;;  %v6737_v8 = vmul.f32 1.442695, %v6639_v32  ;;  %v6739_v21 = vmul.f32 1.442695, %v6640_v31  ;;  %6837 = vadd.xlane.f32.xlu0 %v6836_v44  ;;  %v5770_v35 = vpop.f32.mrb[14].mxu1 }
 0x981   : > { %v15746_v55 = vpop.eup %11018  ;;  %v6565_v5 = vpop.xlane.xlu1 %6564  ;;  %v15749_v56 = vadd.f32 %v5770_v35, %v17417_v10  ;;  %v17419_v35 = vld [vmem:[#allocation59_spill] sm:$0xff] }
 0x982   : > { %11028 = vpow2.f32 %v6737_v8  ;;  %v5772_v7 = vpop.f32.mrb[15].mxu1  ;;  %v6641_v57 = vsub.f32 %v15426_v49, %v6565_v5  ;;  %v6642_v15 = vsub.f32 %v15430_v12, %v6565_v5  ;;  %v6839_v27 = vadd.f32 %v15746_v55, %v15744_v59 }
 0x983   : > { %17418 = vst [vmem:[#allocation149_spill] sm:$0xff] %v15749_v56  ;;  %11030 = vpow2.f32 %v6739_v21 }
 0x984   : > { %v15755_v19 = vpop.eup %11020  ;;  %v6741_v32 = vmul.f32 1.442695, %v6641_v57  ;;  %v6743_v31 = vmul.f32 1.442695, %v6642_v15  ;;  %6840 = vadd.xlane.f32.xlu1 %v6839_v27  ;;  %v5775_v8 = vpop.f32.mrb[16].mxu1 }
 0x985   : > { %v15757_v44 = vpop.eup %11022  ;;  %v6568_v38 = vpop.xlane.xlu0 %6567  ;;  %v15760_v10 = vadd.f32 %v5775_v8, %v17419_v35  ;;  %v17421_v8 = vld [vmem:[#allocation60_spill] sm:$0xff] }
 0x986   : > { %11032 = vpow2.f32 %v6741_v32  ;;  %v5777_v49 = vpop.f32.mrb[17].mxu1  ;;  %v6643_v12 = vsub.f32 %v15435_v20, %v6568_v38  ;;  %v6644_v5 = vsub.f32 %v15439_v13, %v6568_v38  ;;  %v6842_v21 = vadd.f32 %v15757_v44, %v15755_v19 }
 0x987   : > { %17420 = vst [vmem:[#allocation148_spill] sm:$0xff] %v15760_v10  ;;  %11034 = vpow2.f32 %v6743_v31 }
 0x988   : > { %v15766_v7 = vpop.eup %11024  ;;  %v6745_v57 = vmul.f32 1.442695, %v6643_v12  ;;  %v6747_v15 = vmul.f32 1.442695, %v6644_v5  ;;  %6843 = vadd.xlane.f32.xlu0 %v6842_v21  ;;  %v5780_v32 = vpop.f32.mrb[18].mxu1 }
 0x989   : > { %v15768_v27 = vpop.eup %11026  ;;  %v6571_v56 = vpop.xlane.xlu1 %6570  ;;  %v15771_v35 = vadd.f32 %v5780_v32, %v17421_v8  ;;  %v17423_v32 = vld [vmem:[#allocation63_spill] sm:$0xff] }
 0x98a   : > { %11036 = vpow2.f32 %v6745_v57  ;;  %v5782_v20 = vpop.f32.mrb[19].mxu1  ;;  %v6645_v13 = vsub.f32 %v15444_v14, %v6571_v56  ;;  %v6646_v38 = vsub.f32 %v15448_v60, %v6571_v56  ;;  %v6845_v31 = vadd.f32 %v15768_v27, %v15766_v7 }
 0x98b   : > { %17422 = vst [vmem:[#allocation40_spill] sm:$0xff] %v15771_v35  ;;  %11038 = vpow2.f32 %v6747_v15 }
 0x98c   : > { %v15777_v49 = vpop.eup %11028  ;;  %v6749_v12 = vmul.f32 1.442695, %v6645_v13  ;;  %v6751_v5 = vmul.f32 1.442695, %v6646_v38  ;;  %6846 = vadd.xlane.f32.xlu1 %v6845_v31  ;;  %v5785_v57 = vpop.f32.mrb[20].mxu1 }
 0x98d   : > { %v15779_v21 = vpop.eup %11030  ;;  %v6574_v10 = vpop.xlane.xlu0 %6573  ;;  %v15782_v8 = vadd.f32 %v5785_v57, %v17423_v32  ;;  %v17426_v57 = vld [vmem:[#allocation61_spill] sm:$0xff] }
 0x98e   : > { %11040 = vpow2.f32 %v6749_v12  ;;  %v6647_v14 = vsub.f32 %v15453_v53, %v6574_v10  ;;  %v6648_v60 = vsub.f32 %v15457_v25, %v6574_v10  ;;  %v5787_v56 = vpop.f32.mrb[21].mxu1  ;;  %v6848_v15 = vadd.f32 %v15779_v21, %v15777_v49  ;;  %v17428_v10 = vld [vmem:[#allocation137_spill] sm:$0xff] }
 0x98f   : > { %17424 = vst [vmem:[#allocation42_spill] sm:$0xff] %v15782_v8  ;;  %11042 = vpow2.f32 %v6751_v5 }
 0x990   : > { %v15788_v20 = vpop.eup %11032  ;;  %v6753_v13 = vmul.f32 1.442695, %v6647_v14  ;;  %v6755_v38 = vmul.f32 1.442695, %v6648_v60  ;;  %6849 = vadd.xlane.f32.xlu0 %v6848_v15  ;;  %v5790_v12 = vpop.f32.mrb[22].mxu1 }
 0x991   : > { %17425 = vst [vmem:[#allocation161_spill] sm:$0xff] %v15788_v20  ;;  %v15790_v31 = vpop.eup %11034  ;;  %v6577_v35 = vpop.xlane.xlu1 %6576  ;;  %v15793_v32 = vadd.f32 %v5790_v12, %v17426_v57  ;;  %v17429_v12 = vld [vmem:[#allocation62_spill] sm:$0xff] }
 0x992   : > { %11044 = vpow2.f32 %v6753_v13  ;;  %v5792_v53 = vpop.f32.mrb[23].mxu1  ;;  %v6649_v25 = vsub.f32 %v15462_v46, %v6577_v35  ;;  %v6650_v5 = vsub.f32 %v17428_v10, %v6577_v35  ;;  %v6851_v56 = vadd.f32 %v15790_v31, %v15788_v20 }
 0x993   : > { %17427 = vst [vmem:[#allocation160_spill] sm:$0xff] %v15793_v32  ;;  %11046 = vpow2.f32 %v6755_v38  ;;  %v17431_v53 = vld [vmem:[#allocation110_spill] sm:$0xff]  ;;  %v17432_v38 = vld [vmem:[#allocation109_spill] sm:$0xff] }
 0x994   : > { %v15799_v14 = vpop.eup %11036  ;;  %v6757_v60 = vmul.f32 1.442695, %v6649_v25  ;;  %v6759_v8 = vmul.f32 1.442695, %v6650_v5  ;;  %6852 = vadd.xlane.f32.xlu1 %v6851_v56  ;;  %v5795_v13 = vpop.f32.mrb[24].mxu1 }
 0x995   : > { %v15801_v15 = vpop.eup %11038  ;;  %v6580_v34 = vpop.xlane.xlu1 %6579  ;;  %v15804_v57 = vadd.f32 %v5795_v13, %v17429_v12  ;;  %v17433_v13 = vld [vmem:[#allocation64_spill] sm:$0xff] }
 0x996   : > { %11048 = vpow2.f32 %v6757_v60  ;;  %v5797_v46 = vpop.f32.mrb[25].mxu1  ;;  %v6651_v35 = vsub.f32 %v17431_v53, %v6580_v34  ;;  %v6652_v10 = vsub.f32 %v17432_v38, %v6580_v34  ;;  %v6854_v32 = vadd.f32 %v15801_v15, %v15799_v14 }
 0x997   : > { %17430 = vst [vmem:[#allocation44_spill] sm:$0xff] %v15804_v57  ;;  %11050 = vpow2.f32 %v6759_v8 }
 0x998   : > { %v15810_v25 = vpop.eup %11040  ;;  %v6761_v5 = vmul.f32 1.442695, %v6651_v35  ;;  %v6763_v4 = vmul.f32 1.442695, %v6652_v10  ;;  %6855 = vadd.xlane.f32.xlu0 %v6854_v32  ;;  %v5800_v60 = vpop.f32.mrb[26].mxu1 }
 0x999   : > { %v15812_v56 = vpop.eup %11042  ;;  %v6583_v20 = vpop.xlane.xlu1 %6582  ;;  %v15815_v12 = vadd.f32 %v5800_v60, %v17433_v13  ;;  %v17435_v60 = vld [vmem:[#allocation71_spill] sm:$0xff] }
 0x99a   : > { %11052 = vpow2.f32 %v6761_v5  ;;  %v5802_v46 = vpop.f32.mrb[27].mxu1  ;;  %v6653_v34 = vsub.f32 %v15480_v42, %v6583_v20  ;;  %v6654_v8 = vsub.f32 %v15484_v43, %v6583_v20  ;;  %v6857_v53 = vadd.f32 %v15812_v56, %v15810_v25 }
 0x99b   : > { %17434 = vst [vmem:[#allocation45_spill] sm:$0xff] %v15815_v12  ;;  %11054 = vpow2.f32 %v6763_v4 }
 0x99c   : > { %v15821_v35 = vpop.eup %11044  ;;  %v6765_v38 = vmul.f32 1.442695, %v6653_v34  ;;  %v6767_v10 = vmul.f32 1.442695, %v6654_v8  ;;  %6858 = vadd.xlane.f32.xlu1 %v6857_v53  ;;  %v5805_v5 = vpop.f32.mrb[28].mxu1 }
 0x99d   : > { %v15823_v32 = vpop.eup %11046  ;;  %v6586_v57 = vpop.xlane.xlu1 %6585  ;;  %v15826_v13 = vadd.f32 %v5805_v5, %v17435_v60  ;;  %v17439_v5 = vld [vmem:[#allocation72_spill] sm:$0xff] }
 0x99e   : > { %11056 = vpow2.f32 %v6765_v38  ;;  %v5807_v42 = vpop.f32.mrb[29].mxu1  ;;  %v6655_v43 = vsub.f32 %v15489_v39, %v6586_v57  ;;  %v6656_v4 = vsub.f32 %v15493_v48, %v6586_v57  ;;  %v6860_v20 = vadd.f32 %v15823_v32, %v15821_v35 }
 0x99f   : > { %17436 = vst [vmem:[#allocation162_spill] sm:$0xff] %v15826_v13  ;;  %11058 = vpow2.f32 %v6767_v10 }
 0x9a0   : > { %v15832_v46 = vpop.eup %11048  ;;  %v6769_v34 = vmul.f32 1.442695, %v6655_v43  ;;  %v6771_v8 = vmul.f32 1.442695, %v6656_v4  ;;  %6861 = vadd.xlane.f32.xlu0 %v6860_v20  ;;  %v5810_v38 = vpop.f32.mrb[30].mxu1 }
 0x9a1   : > { %17437 = vst [vmem:[#allocation154_spill] sm:$0xff] %v15832_v46  ;;  %v15834_v53 = vpop.eup %11050  ;;  %v6589_v12 = vpop.xlane.xlu1 %6588  ;;  %v15837_v60 = vadd.f32 %v5810_v38, %v17439_v5  ;;  %v17443_v38 = vld [vmem:[#allocation67_spill] sm:$0xff] }
 0x9a2   : > { %17438 = vst [vmem:[#allocation46_spill] sm:$0xff] %v15834_v53  ;;  %11060 = vpow2.f32 %v6769_v34  ;;  %v5812_v39 = vpop.f32.mrb[31].mxu1  ;;  %v6657_v48 = vsub.f32 %v15497_v23, %v6589_v12  ;;  %v6658_v57 = vsub.f32 %v15502_v16, %v6589_v12  ;;  %v6863_v10 = vadd.f32 %v15834_v53, %v15832_v46  ;;  %v17446_v12 = vld [vmem:[#allocation111_spill] sm:$0xff] }
 0x9a3   : > { %17440 = vst [vmem:[#allocation47_spill] sm:$0xff] %v15837_v60  ;;  %11062 = vpow2.f32 %v6771_v8  ;;  %v17445_v39 = vld [vmem:[#allocation112_spill] sm:$0xff] }
 0x9a4   : > { %v15843_v42 = vpop.eup %11052  ;;  %v6773_v43 = vmul.f32 1.442695, %v6657_v48  ;;  %v6775_v4 = vmul.f32 1.442695, %v6658_v57  ;;  %6864 = vadd.xlane.f32.xlu1 %v6863_v10  ;;  %v5815_v34 = vpop.f32.mrb[32].mxu1 }
 0x9a5   : > { %17441 = vst [vmem:[#allocation157_spill] sm:$0xff] %v15843_v42  ;;  %v15845_v20 = vpop.eup %11054  ;;  %v6592_v13 = vpop.xlane.xlu1 %6591  ;;  %v15848_v5 = vadd.f32 %v5815_v34, %v17443_v38  ;;  %v17449_v34 = vld [vmem:[#allocation65_spill] sm:$0xff] }
 0x9a6   : > { %17442 = vst [vmem:[#allocation156_spill] sm:$0xff] %v15845_v20  ;;  %11064 = vpow2.f32 %v6773_v43  ;;  %v5817_v23 = vpop.f32.mrb[33].mxu1  ;;  %v6659_v16 = vsub.f32 %v17445_v39, %v6592_v13  ;;  %v6660_v8 = vsub.f32 %v17446_v12, %v6592_v13  ;;  %v6866_v60 = vadd.f32 %v15845_v20, %v15843_v42  ;;  %v17451_v39 = vld [vmem:[#allocation139_spill] sm:$0xff] }
 0x9a7   : > { %17444 = vst [vmem:[#allocation48_spill] sm:$0xff] %v15848_v5  ;;  %11066 = vpow2.f32 %v6775_v4  ;;  %v17452_v4 = vld [vmem:[#allocation114_spill] sm:$0xff] }
 0x9a8   : > { %v15854_v48 = vpop.eup %11056  ;;  %v6777_v57 = vmul.f32 1.442695, %v6659_v16  ;;  %v6779_v46 = vmul.f32 1.442695, %v6660_v8  ;;  %6867 = vadd.xlane.f32.xlu0 %v6866_v60  ;;  %v5820_v43 = vpop.f32.mrb[34].mxu1 }
 0x9a9   : > { %17447 = vst [vmem:[#allocation49_spill] sm:$0xff] %v15854_v48  ;;  %v15856_v10 = vpop.eup %11058  ;;  %v6595_v53 = vpop.xlane.xlu1 %6594  ;;  %v15859_v38 = vadd.f32 %v5820_v43, %v17449_v34  ;;  %v17453_v43 = vld [vmem:[#allocation75_spill] sm:$0xff] }
 0x9aa   : > { %17448 = vst [vmem:[#allocation163_spill] sm:$0xff] %v15856_v10  ;;  %11068 = vpow2.f32 %v6777_v57  ;;  %v5822_v23 = vpop.f32.mrb[35].mxu1  ;;  %v6661_v13 = vsub.f32 %v17451_v39, %v6595_v53  ;;  %v6662_v12 = vsub.f32 %v17452_v4, %v6595_v53  ;;  %v6869_v5 = vadd.f32 %v15856_v10, %v15854_v48  ;;  %v17455_v39 = vld [vmem:[#allocation21_spill] sm:$0xff] }
 0x9ab   : > { %17450 = vst [vmem:[#allocation159_spill] sm:$0xff] %v15859_v38  ;;  %11070 = vpow2.f32 %v6779_v46  ;;  %v17456_v46 = vld [vmem:[#allocation23_spill] sm:$0xff] }
 0x9ac   : > { %v15865_v16 = vpop.eup %11060  ;;  %v6781_v8 = vmul.f32 1.442695, %v6661_v13  ;;  %v6783_v42 = vmul.f32 1.442695, %v6662_v12  ;;  %6870 = vadd.xlane.f32.xlu1 %v6869_v5  ;;  %v5825_v57 = vpop.f32.mrb[36].mxu1 }
 0x9ad   : > { %v15867_v60 = vpop.eup %11062  ;;  %v6598_v20 = vpop.xlane.xlu1 %6597  ;;  %v15870_v34 = vadd.f32 %v5825_v57, %v17453_v43  ;;  %v17458_v57 = vld [vmem:[#allocation76_spill] sm:$0xff] }
 0x9ae   : > { %11072 = vpow2.f32 %v6781_v8  ;;  %v5827_v23 = vpop.f32.mrb[37].mxu1  ;;  %v6663_v53 = vsub.f32 %v17455_v39, %v6598_v20  ;;  %v6664_v4 = vsub.f32 %v17456_v46, %v6598_v20  ;;  %v6872_v38 = vadd.f32 %v15867_v60, %v15865_v16 }
 0x9af   : > { %17454 = vst [vmem:[#allocation50_spill] sm:$0xff] %v15870_v34  ;;  %11074 = vpow2.f32 %v6783_v42 }
 0x9b0   : > { %v15876_v13 = vpop.eup %11064  ;;  %v6785_v12 = vmul.f32 1.442695, %v6663_v53  ;;  %v6787_v48 = vmul.f32 1.442695, %v6664_v4  ;;  %6873 = vadd.xlane.f32.xlu0 %v6872_v38  ;;  %v5830_v8 = vpop.f32.mrb[38].mxu1 }
 0x9b1   : > { %17457 = vst [vmem:[#allocation51_spill] sm:$0xff] %v15876_v13  ;;  %v15878_v5 = vpop.eup %11066  ;;  %v6601_v10 = vpop.xlane.xlu1 %6600  ;;  %v15881_v43 = vadd.f32 %v5830_v8, %v17458_v57  ;;  %v17462_v8 = vld [vmem:[#allocation66_spill] sm:$0xff] }
 0x9b2   : > { %11076 = vpow2.f32 %v6785_v12  ;;  %v5832_v23 = vpop.f32.mrb[39].mxu1  ;;  %v6665_v20 = vsub.f32 %v15541_v22, %v6601_v10  ;;  %v6666_v42 = vsub.f32 %v15546_v0, %v6601_v10  ;;  %v6875_v39 = vadd.f32 %v15878_v5, %v15876_v13 }
 0x9b3   : > { %17459 = vst [vmem:[#allocation52_spill] sm:$0xff] %v15881_v43  ;;  %11078 = vpow2.f32 %v6787_v48  ;;  %v17464_v23 = vld [vmem:[#allocation25_spill] sm:$0xff]  ;;  %v17465_v48 = vld [vmem:[#allocation143_spill] sm:$0xff] }
 0x9b4   : > { %v15887_v53 = vpop.eup %11068  ;;  %v6789_v46 = vmul.f32 1.442695, %v6665_v20  ;;  %v6791_v4 = vmul.f32 1.442695, %v6666_v42  ;;  %6876 = vadd.xlane.f32.xlu1 %v6875_v39  ;;  %v5835_v12 = vpop.f32.mrb[40].mxu1 }
 0x9b5   : > { %17460 = vst [vmem:[#allocation165_spill] sm:$0xff] %v15887_v53  ;;  %v15889_v38 = vpop.eup %11070  ;;  %v6604_v34 = vpop.xlane.xlu1 %6603  ;;  %v15892_v57 = vadd.f32 %v5835_v12, %v17462_v8  ;;  %v17468_v12 = vld [vmem:[#allocation68_spill] sm:$0xff] }
 0x9b6   : > { %17461 = vst [vmem:[#allocation164_spill] sm:$0xff] %v15889_v38  ;;  %11080 = vpow2.f32 %v6789_v46  ;;  %v5837_v22 = vpop.f32.mrb[41].mxu1  ;;  %v6667_v0 = vsub.f32 %v17464_v23, %v6604_v34  ;;  %v6668_v10 = vsub.f32 %v17465_v48, %v6604_v34  ;;  %v6878_v43 = vadd.f32 %v15889_v38, %v15887_v53  ;;  %v17472_v48 = vld [vmem:[#allocation79_spill] sm:$0xff]  ;;  %v17485_v53 = vld [vmem:[#allocation74_spill] sm:$0xff] }
 0x9b7   : > { %17463 = vst [vmem:[#allocation53_spill] sm:$0xff] %v15892_v57  ;;  %11082 = vpow2.f32 %v6791_v4 }
 0x9b8   : > { %v15898_v20 = vpop.eup %11072  ;;  %v6793_v42 = vmul.f32 1.442695, %v6667_v0  ;;  %v6795_v13 = vmul.f32 1.442695, %v6668_v10  ;;  %6879 = vadd.xlane.f32.xlu0 %v6878_v43  ;;  %v5840_v46 = vpop.f32.mrb[42].mxu1 }
 0x9b9   : > { %17466 = vst [vmem:[#allocation55_spill] sm:$0xff] %v15898_v20  ;;  %v15900_v39 = vpop.eup %11074  ;;  %v15903_v8 = vadd.f32 %v5840_v46, %v17468_v12  ;;  %v5842_v22 = vpop.f32.mrb[43].mxu1 }
 0x9ba   : > { %17467 = vst [vmem:[#allocation84_spill] sm:$0xff] %v15900_v39  ;;  %11084 = vpow2.f32 %v6793_v42  ;;  %v6881_v34 = vadd.f32 %v15900_v39, %v15898_v20 }
 0x9bb   : > { %17469 = vst [vmem:[#allocation83_spill] sm:$0xff] %v15903_v8  ;;  %11086 = vpow2.f32 %v6795_v13  ;;  %v17476_v13 = vld [vmem:[#allocation80_spill] sm:$0xff] }
 0x9bc   : > { %v15907_v4 = vpop.eup %11076  ;;  %6882 = vadd.xlane.f32.xlu1 %v6881_v34  ;;  %v5845_v0 = vpop.f32.mrb[44].mxu1 }
 0x9bd   : > { %17470 = vst [vmem:[#allocation20_spill] sm:$0xff] %v15907_v4  ;;  %v15909_v23 = vpop.eup %11078  ;;  %v15912_v10 = vadd.f32 %v5845_v0, %v17472_v48  ;;  %v5847_v43 = vpop.f32.mrb[45].mxu1 }
 0x9be   : > { %17471 = vst [vmem:[#allocation86_spill] sm:$0xff] %v15909_v23  ;;  %v6884_v42 = vadd.f32 %v15909_v23, %v15907_v4  ;;  %v17480_v43 = vld [vmem:[#allocation69_spill] sm:$0xff] }
 0x9bf   : > { %17473 = vst [vmem:[#allocation85_spill] sm:$0xff] %v15912_v10 }
 0x9c0   : > { %v15916_v46 = vpop.eup %11080  ;;  %6885 = vadd.xlane.f32.xlu0 %v6884_v42  ;;  %v5850_v22 = vpop.f32.mrb[46].mxu1 }
 0x9c1   : > { %17474 = vst [vmem:[#allocation88_spill] sm:$0xff] %v15916_v46  ;;  %v15918_v12 = vpop.eup %11082  ;;  %v15921_v8 = vadd.f32 %v5850_v22, %v17476_v13  ;;  %v5852_v34 = vpop.f32.mrb[47].mxu1  ;;  %v17482_v13 = vld [vmem:[#allocation70_spill] sm:$0xff] }
 0x9c2   : > { %17475 = vst [vmem:[#allocation87_spill] sm:$0xff] %v15918_v12  ;;  %v6887_v57 = vadd.f32 %v15918_v12, %v15916_v46  ;;  %v17483_v12 = vld [vmem:[#allocation73_spill] sm:$0xff] }
 0x9c3   : > { %17477 = vst [vmem:[#allocation90_spill] sm:$0xff] %v15921_v8 }
 0x9c4   : > { %v15925_v20 = vpop.eup %11084  ;;  %6888 = vadd.xlane.f32.xlu1 %v6887_v57  ;;  %v5855_v48 = vpop.f32.mrb[48].mxu1 }
 0x9c5   : > { %17478 = vst [vmem:[#allocation89_spill] sm:$0xff] %v15925_v20  ;;  %v15927_v0 = vpop.eup %11086  ;;  %v15930_v10 = vadd.f32 %v5855_v48, %v17480_v43  ;;  %v5857_v42 = vpop.f32.mrb[49].mxu1 }
 0x9c6   : > { %17479 = vst [vmem:[#allocation92_spill] sm:$0xff] %v15927_v0  ;;  %v6890_v4 = vadd.f32 %v15927_v0, %v15925_v20  ;;  %v17487_v42 = vld [vmem:[#allocation77_spill] sm:$0xff] }
 0x9c7   : > { %17481 = vst [vmem:[#allocation91_spill] sm:$0xff] %v15930_v10 }
 0x9c8   : > { %6891 = vadd.xlane.f32.xlu0 %v6890_v4  ;;  %v5860_v22 = vpop.f32.mrb[50].mxu1 }
 0x9c9   : > { %v15935_v34 = vadd.f32 %v5860_v22, %v17482_v13  ;;  %v5862_v8 = vpop.f32.mrb[51].mxu1  ;;  %v17488_v22 = vld [vmem:[#allocation78_spill] sm:$0xff] }
 0x9cc   : > { %v5865_v46 = vpop.f32.mrb[52].mxu1 }
 0x9cd   : > { %v15938_v23 = vadd.f32 %v5865_v46, %v17483_v12  ;;  %v5867_v57 = vpop.f32.mrb[53].mxu1  ;;  %v17490_v12 = vld [vmem:[#allocation81_spill] sm:$0xff] }
 0x9cf   : > { %17484 = vst [vmem:[#allocation97_spill] sm:$0xff] %v15938_v23 }
 0x9d0   : > { %v5870_v39 = vpop.f32.mrb[54].mxu1 }
 0x9d1   : > { %v15941_v38 = vadd.f32 %v5870_v39, %v17485_v53  ;;  %v5872_v48 = vpop.f32.mrb[55].mxu1  ;;  %v17492_v39 = vld [vmem:[#allocation82_spill] sm:$0xff] }
 0x9d3   : > { %17486 = vst [vmem:[#allocation94_spill] sm:$0xff] %v15941_v38 }
 0x9d4   : > { %v5875_v43 = vpop.f32.mrb[56].mxu1 }
 0x9d5   : > { %v15944_v10 = vadd.f32 %v5875_v43, %v17487_v42  ;;  %v5877_v4 = vpop.f32.mrb[57].mxu1 }
 0x9d8   : > { %v5880_v20 = vpop.f32.mrb[58].mxu1  ;;  %v6799_v0 = vpop.xlane.xlu0 %6798 }
 0x9d9   : > { %v15947_v13 = vadd.f32 %v5880_v20, %v17488_v22  ;;  %11088 = vrcp.f32 %v6799_v0  ;;  %v5882_v8 = vpop.f32.mrb[59].mxu1 }
 0x9db   : > { %17489 = vst [vmem:[#allocation98_spill] sm:$0xff] %v15947_v13 }
 0x9dc   : > { %v5885_v46 = vpop.f32.mrb[60].mxu1 }
 0x9dd   : > { %v15950_v57 = vadd.f32 %v5885_v46, %v17490_v12  ;;  %v5887_v23 = vpop.f32.mrb[61].mxu1  ;;  %v17494_v46 = vmov 0.0|0.0  }
 0x9df   : > { %17491 = vst [vmem:[#allocation93_spill] sm:$0xff] %v15950_v57 }
 0x9e0   : > { %v5890_v53 = vpop.f32.mrb[62].mxu1 }
 0x9e1   : > { %v15953_v48 = vadd.f32 %v5890_v53, %v17492_v39  ;;  %v5892_v38 = vpop.f32.mrb[63].mxu1 }
 0x9e3   : > { %17493 = vst [vmem:[#allocation101_spill] sm:$0xff] %v15953_v48  ;;  %v15955_v43 = vpop.eup %11088 }
 0x9e4   : > { %v9808_v42 = vpop.f32.mrb[64].mxu1  ;;  %v6926_v4 = vmul.f32 %v15955_v43, %v15607_v54 }
 0x9e5   : > { %v7060_v20 = vpop.f32.mrb[65].mxu1 }
 0x9e6   : > { %v10315_v22 = vpack.c.bf16 %v9808_v42, %v7060_v20  ;;  %7283 = vmatprep.mubr.f32.mxu1 %v6926_v4 }
 0x9e8   : > { %v9811_v0 = vpop.f32.mrb[66].mxu1  ;;  %10316 = vmatpush1.bf16.msra.mxu1 %v10315_v22 }
 0x9e9   : > { %v7070_v8 = vpop.f32.mrb[67].mxu1  ;;  %10317 = vmatprep.subr.bf16.mxu1 %v17494_v46 }
 0x9ea   : > { %v10318_v23 = vpack.c.bf16 %v9811_v0, %v7070_v8 }
 0x9ec   : > { %v9814_v12 = vpop.f32.mrb[68].mxu1  ;;  %10319 = vmatpush1.bf16.msra.mxu1 %v10318_v23 }
 0x9ed   : > { %v7080_v53 = vpop.f32.mrb[69].mxu1  ;;  %10320 = vmatprep.subr.bf16.mxu1 %v17494_v46 }
 0x9ee   : > { %v10321_v38 = vpack.c.bf16 %v9814_v12, %v7080_v53 }
 0x9f0   : > { %v9817_v39 = vpop.f32.mrb[70].mxu1  ;;  %10322 = vmatpush1.bf16.msra.mxu1 %v10321_v38 }
 0x9f1   : > { %v7090_v48 = vpop.f32.mrb[71].mxu1  ;;  %10323 = vmatprep.subr.bf16.mxu1 %v17494_v46 }
 0x9f2   : > { %v10324_v54 = vpack.c.bf16 %v9817_v39, %v7090_v48 }
 0x9f4   : > { %v9820_v42 = vpop.f32.mrb[72].mxu1  ;;  %10325 = vmatpush1.bf16.msra.mxu1 %v10324_v54 }
 0x9f5   : > { %v7100_v4 = vpop.f32.mrb[73].mxu1  ;;  %10326 = vmatprep.subr.bf16.mxu1 %v17494_v46 }
 0x9f6   : > { %v10327_v20 = vpack.c.bf16 %v9820_v42, %v7100_v4  ;;  %v6802_v4 = vpop.xlane.xlu0 %6801 }
 0x9f7   : > { %11090 = vrcp.f32 %v6802_v4 }
 0x9f8   : > { %v9823_v22 = vpop.f32.mrb[74].mxu1  ;;  %10328 = vmatpush1.bf16.msra.mxu1 %v10327_v20 }
 0x9f9   : > { %v7110_v0 = vpop.f32.mrb[75].mxu1  ;;  %10329 = vmatprep.subr.bf16.mxu1 %v17494_v46 }
 0x9fa   : > { %v10330_v8 = vpack.c.bf16 %v9823_v22, %v7110_v0 }
 0x9fc   : > { %v9826_v23 = vpop.f32.mrb[76].mxu1  ;;  %10331 = vmatpush1.bf16.msra.mxu1 %v10330_v8 }
 0x9fd   : > { %v7120_v12 = vpop.f32.mrb[77].mxu1  ;;  %10332 = vmatprep.subr.bf16.mxu1 %v17494_v46 }
 0x9fe   : > { %v10333_v53 = vpack.c.bf16 %v9826_v23, %v7120_v12  ;;  %v6805_v23 = vpop.xlane.xlu0 %6804 }
 0x9ff   : > { %11092 = vrcp.f32 %v6805_v23  ;;  %v7548_v23 = vld [vmem:[%s16236_s6 + $0x8] sm:$0xff] }
 0xa00   : > { %v9829_v38 = vpop.f32.mrb[78].mxu1  ;;  %10334 = vmatpush1.bf16.msra.mxu1 %v10333_v53 }
 0xa01   : > { %v7130_v48 = vpop.f32.mrb[79].mxu1  ;;  %10335 = vmatprep.subr.bf16.mxu1 %v17494_v46  ;;  %v11091_v4 = vpop.eup %11090 }
 0xa02   : > { %v10336_v39 = vpack.c.bf16 %v9829_v38, %v7130_v48  ;;  %v6808_v57 = vpop.xlane.xlu0 %6807 }
 0xa03   : > { %11094 = vrcp.f32 %v6808_v57  ;;  %v6928_v57 = vmul.f32 %v11091_v4, %v15619_v62 }
 0xa04   : > { %v9832_v54 = vpop.f32.mrb[80].mxu1  ;;  %10337 = vmatpush1.bf16.msra.mxu1 %v10336_v39 }
 0xa05   : > { %v7140_v42 = vpop.f32.mrb[81].mxu1  ;;  %10338 = vmatprep.subr.bf16.mxu1 %v17494_v46 }
 0xa06   : > { %v10339_v20 = vpack.c.bf16 %v9832_v54, %v7140_v42 }
 0xa08   : > { %v9835_v22 = vpop.f32.mrb[82].mxu1  ;;  %10340 = vmatpush1.bf16.msra.mxu1 %v10339_v20 }
 0xa09   : > { %v7150_v0 = vpop.f32.mrb[83].mxu1  ;;  %10341 = vmatprep.subr.bf16.mxu1 %v17494_v46 }
 0xa0a   : > { %v10342_v8 = vpack.c.bf16 %v9835_v22, %v7150_v0  ;;  %v6811_v0 = vpop.xlane.xlu0 %6810 }
 0xa0b   : > { %11096 = vrcp.f32 %v6811_v0 }
 0xa0c   : > { %v9838_v12 = vpop.f32.mrb[84].mxu1  ;;  %10343 = vmatpush1.bf16.msra.mxu1 %v10342_v8 }
 0xa0d   : > { %v7160_v53 = vpop.f32.mrb[85].mxu1  ;;  %10344 = vmatprep.subr.bf16.mxu1 %v17494_v46 }
 0xa0e   : > { %v10345_v38 = vpack.c.bf16 %v9838_v12, %v7160_v53 }
 0xa10   : > { %v9841_v48 = vpop.f32.mrb[86].mxu1  ;;  %10346 = vmatpush1.bf16.msra.mxu1 %v10345_v38 }
 0xa11   : > { %v7170_v39 = vpop.f32.mrb[87].mxu1  ;;  %10347 = vmatprep.subr.bf16.mxu1 %v17494_v46 }
 0xa12   : > { %v10348_v54 = vpack.c.bf16 %v9841_v48, %v7170_v39  ;;  %v6814_v48 = vpop.xlane.xlu0 %6813 }
 0xa13   : > { %11098 = vrcp.f32 %v6814_v48 }
 0xa14   : > { %v9844_v42 = vpop.f32.mrb[88].mxu1  ;;  %10349 = vmatpush1.bf16.msra.mxu1 %v10348_v54 }
 0xa15   : > { %v7180_v20 = vpop.f32.mrb[89].mxu1  ;;  %10350 = vmatprep.subr.bf16.mxu1 %v17494_v46 }
 0xa16   : > { %v10351_v22 = vpack.c.bf16 %v9844_v42, %v7180_v20 }
 0xa18   : > { %v9847_v13 = vpop.f32.mrb[90].mxu1  ;;  %10352 = vmatpush1.bf16.msra.mxu1 %v10351_v22  ;;  %v6817_v22 = vpop.xlane.xlu0 %6816 }
 0xa19   : > { %v7190_v8 = vpop.f32.mrb[91].mxu1  ;;  %10353 = vmatprep.subr.bf16.mxu1 %v17494_v46  ;;  %11100 = vrcp.f32 %v6817_v22 }
 0xa1a   : > { %v10354_v12 = vpack.c.bf16 %v9847_v13, %v7190_v8  ;;  %v7547_v13 = vld [vmem:[%s16236_s6] sm:$0xff] }
 0xa1b   : > { %v10362_v8 = vpack.c.bf16 %v7548_v23, %v7547_v13  ;;  %v6829_v13 = vpop.xlane.xlu1 %6828 }
 0xa1c   : > { %v9850_v53 = vpop.f32.mrb[92].mxu1  ;;  %10355 = vmatpush1.bf16.msra.mxu1 %v10354_v12  ;;  %v6925_v12 = vmul.f32 %v15955_v43, %v15605_v45 }
 0xa1d   : > { %v7200_v38 = vpop.f32.mrb[93].mxu1  ;;  %10356 = vmatprep.subr.bf16.mxu1 %v17494_v46  ;;  %10363 = vmatprep.subr.bf16.mxu0 %v10362_v8 }
 0xa1e   : > { %v10357_v39 = vpack.c.bf16 %v9850_v53, %v7200_v38  ;;  %10365 = vmatpush3.bf16.msra.mxu0 %v10362_v8  ;;  %v6927_v53 = vmul.f32 %v11091_v4, %v15617_v58  ;;  %v6820_v38 = vpop.xlane.xlu0 %6819 }
 0xa1f   : > { %11102 = vrcp.f32 %v6820_v38 }
 0xa20   : > { %v9853_v54 = vpop.f32.mrb[94].mxu1  ;;  %10358 = vmatpush1.bf16.msra.mxu1 %v10357_v39 }
 0xa21   : > { %v7210_v42 = vpop.f32.mrb[95].mxu1  ;;  %10359 = vmatprep.subr.bf16.mxu1 %v17494_v46  ;;  %v11093_v46 = vpop.eup %11092 }
 0xa22   : > { %v10360_v20 = vpack.c.bf16 %v9853_v54, %v7210_v42  ;;  %v6930_v39 = vmul.f32 %v11093_v46, %v15629_v26  ;;  %v11095_v54 = vpop.eup %11094  ;;  %v6929_v42 = vmul.f32 %v11093_v46, %v15627_v30  ;;  %v6823_v43 = vpop.xlane.xlu0 %6822 }
 0xa23   : > { %v6932_v45 = vmul.f32 %v11095_v54, %v15637_v24  ;;  %v11097_v62 = vpop.eup %11096  ;;  %v6931_v0 = vmul.f32 %v11095_v54, %v15635_v29  ;;  %11104 = vrcp.f32 %v6823_v43 }
 0xa24   : > { %10361 = vmatpush1.bf16.msra.mxu1 %v10360_v20  ;;  %v6934_v58 = vmul.f32 %v11097_v62, %v15645_v2  ;;  %v11099_v48 = vpop.eup %11098  ;;  %v6933_v26 = vmul.f32 %v11097_v62, %v15643_v3 }
 0xa25   : > { %v6936_v30 = vmul.f32 %v11099_v48, %v15653_v33  ;;  %v11101_v4 = vpop.eup %11100  ;;  %v6935_v24 = vmul.f32 %v11099_v48, %v15651_v6  ;;  %v6835_v6 = vpop.xlane.xlu1 %6834 }
 0xa26   : > { %v6826_v20 = vpop.xlane.xlu0 %6825  ;;  %v6938_v29 = vmul.f32 %v11101_v4, %v15661_v28  ;;  %v6937_v2 = vmul.f32 %v11101_v4, %v15659_v52 }
 0xa27   : > { %7284 = vmatmul.mubr.f32.vlgmr.msra.gmra.mrb[96].mxu1 %v6925_v12  ;;  %11106 = vrcp.f32 %v6826_v20 }
 0xa28   : > { %7288 = vmatprep.mubr.f32.mxu1 %v6928_v57  ;;  %11108 = vrcp.f32 %v6829_v13 }
 0xa29   : > { %v11103_v23 = vpop.eup %11102 }
 0xa2a   : > { %v6832_v3 = vpop.xlane.xlu0 %6831  ;;  %v6940_v22 = vmul.f32 %v11103_v23, %v15669_v37  ;;  %v6939_v33 = vmul.f32 %v11103_v23, %v15667_v47  ;;  %v6841_v47 = vpop.xlane.xlu1 %6840 }
 0xa2b   : > { %7289 = vmatmul.mubr.f32.gmra.mrb[98].mxu1 %v6927_v53  ;;  %11110 = vrcp.f32 %v6832_v3 }
 0xa2c   : > { %7293 = vmatprep.mubr.f32.mxu1 %v6930_v39  ;;  %11112 = vrcp.f32 %v6835_v6 }
 0xa2d   : > { %v11105_v8 = vpop.eup %11104 }
 0xa2e   : > { %v6942_v12 = vmul.f32 %v11105_v8, %v15680_v17  ;;  %v6941_v28 = vmul.f32 %v11105_v8, %v15678_v41  ;;  %v6838_v52 = vpop.xlane.xlu0 %6837 }
 0xa2f   : > { %7294 = vmatmul.mubr.f32.gmra.mrb[100].mxu1 %v6929_v42  ;;  %11114 = vrcp.f32 %v6838_v52 }
 0xa30   : > { %7298 = vmatprep.mubr.f32.mxu1 %v6932_v45  ;;  %11116 = vrcp.f32 %v6841_v47 }
 0xa31   : > { %v11107_v57 = vpop.eup %11106 }
 0xa32   : > { %v6944_v46 = vmul.f32 %v11107_v57, %v15691_v36  ;;  %v11109_v53 = vpop.eup %11108  ;;  %v6943_v37 = vmul.f32 %v11107_v57, %v15689_v18  ;;  %v6844_v41 = vpop.xlane.xlu0 %6843 }
 0xa33   : > { %7299 = vmatmul.mubr.f32.gmra.mrb[102].mxu1 %v6931_v0  ;;  %v6946_v38 = vmul.f32 %v11109_v53, %v15702_v11  ;;  %v6945_v17 = vmul.f32 %v11109_v53, %v15700_v61  ;;  %11118 = vrcp.f32 %v6844_v41  ;;  %v6847_v18 = vpop.xlane.xlu1 %6846 }
 0xa34   : > { %7303 = vmatprep.mubr.f32.mxu1 %v6934_v58  ;;  %11120 = vrcp.f32 %v6847_v18 }
 0xa35   : > { %v11111_v39 = vpop.eup %11110 }
 0xa36   : > { %v6948_v54 = vmul.f32 %v11111_v39, %v15713_v1  ;;  %v11113_v42 = vpop.eup %11112  ;;  %v6947_v36 = vmul.f32 %v11111_v39, %v15711_v63  ;;  %v6850_v61 = vpop.xlane.xlu0 %6849 }
 0xa37   : > { %7304 = vmatmul.mubr.f32.gmra.mrb[104].mxu1 %v6933_v26  ;;  %v6950_v45 = vmul.f32 %v11113_v42, %v15724_v40  ;;  %v6949_v11 = vmul.f32 %v11113_v42, %v15722_v9  ;;  %11122 = vrcp.f32 %v6850_v61  ;;  %v6853_v63 = vpop.xlane.xlu1 %6852  ;;  %v17500_v42 = vld [vmem:[#allocation163_spill] sm:$0xff] }
 0xa38   : > { %7308 = vmatprep.mubr.f32.mxu1 %v6936_v30  ;;  %11124 = vrcp.f32 %v6853_v63 }
 0xa39   : > { %v11115_v62 = vpop.eup %11114 }
 0xa3a   : > { %v6952_v43 = vmul.f32 %v11115_v62, %v15735_v50  ;;  %v11117_v0 = vpop.eup %11116  ;;  %v6951_v1 = vmul.f32 %v11115_v62, %v15733_v51  ;;  %v6856_v9 = vpop.xlane.xlu0 %6855 }
 0xa3b   : > { %7309 = vmatmul.mubr.f32.gmra.mrb[106].mxu1 %v6935_v24  ;;  %v6954_v58 = vmul.f32 %v11117_v0, %v15746_v55  ;;  %v6953_v40 = vmul.f32 %v11117_v0, %v15744_v59  ;;  %11126 = vrcp.f32 %v6856_v9  ;;  %v6859_v51 = vpop.xlane.xlu1 %6858 }
 0xa3c   : > { %7313 = vmatprep.mubr.f32.mxu1 %v6938_v29  ;;  %11128 = vrcp.f32 %v6859_v51 }
 0xa3d   : > { %v11119_v48 = vpop.eup %11118 }
 0xa3e   : > { %v6956_v26 = vmul.f32 %v11119_v48, %v15757_v44  ;;  %v11121_v20 = vpop.eup %11120  ;;  %v6955_v50 = vmul.f32 %v11119_v48, %v15755_v19  ;;  %v6862_v59 = vpop.xlane.xlu0 %6861  ;;  %v17502_v48 = vld [vmem:[#allocation51_spill] sm:$0xff] }
 0xa3f   : > { %7314 = vmatmul.mubr.f32.gmra.mrb[108].mxu1 %v6937_v2  ;;  %v6958_v30 = vmul.f32 %v11121_v20, %v15768_v27  ;;  %v6957_v55 = vmul.f32 %v11121_v20, %v15766_v7  ;;  %11130 = vrcp.f32 %v6862_v59  ;;  %v6865_v19 = vpop.xlane.xlu1 %6864  ;;  %v17495_v27 = vld [vmem:[#allocation161_spill] sm:$0xff]  ;;  %v17507_v59 = vld [vmem:[#allocation86_spill] sm:$0xff] }
 0xa40   : > { %7318 = vmatprep.mubr.f32.mxu1 %v6940_v22  ;;  %11132 = vrcp.f32 %v6865_v19 }
 0xa41   : > { %v11123_v4 = vpop.eup %11122 }
 0xa42   : > { %v6960_v24 = vmul.f32 %v11123_v4, %v15779_v21  ;;  %v11125_v13 = vpop.eup %11124  ;;  %v6959_v44 = vmul.f32 %v11123_v4, %v15777_v49  ;;  %v6868_v7 = vpop.xlane.xlu0 %6867 }
 0xa43   : > { %7319 = vmatmul.mubr.f32.gmra.mrb[110].mxu1 %v6939_v33  ;;  %v6962_v29 = vmul.f32 %v11125_v13, %v15790_v31  ;;  %v6961_v2 = vmul.f32 %v11125_v13, %v17495_v27  ;;  %11134 = vrcp.f32 %v6868_v7  ;;  %v6871_v49 = vpop.xlane.xlu1 %6870 }
 0xa44   : > { %7323 = vmatprep.mubr.f32.mxu1 %v6942_v12  ;;  %11136 = vrcp.f32 %v6871_v49 }
 0xa45   : > { %v11127_v23 = vpop.eup %11126 }
 0xa46   : > { %v6964_v3 = vmul.f32 %v11127_v23, %v15801_v15  ;;  %v11129_v22 = vpop.eup %11128  ;;  %v6963_v21 = vmul.f32 %v11127_v23, %v15799_v14  ;;  %v6874_v6 = vpop.xlane.xlu0 %6873 }
 0xa47   : > { %7324 = vmatmul.mubr.f32.gmra.mrb[112].mxu1 %v6941_v28  ;;  %v6966_v8 = vmul.f32 %v11129_v22, %v15812_v56  ;;  %v6965_v31 = vmul.f32 %v11129_v22, %v15810_v25  ;;  %11138 = vrcp.f32 %v6874_v6  ;;  %v6877_v14 = vpop.xlane.xlu1 %6876  ;;  %v17496_v28 = vld [vmem:[#allocation46_spill] sm:$0xff] }
 0xa48   : > { %7328 = vmatprep.mubr.f32.mxu1 %v6944_v46  ;;  %v17497_v56 = vld [vmem:[#allocation154_spill] sm:$0xff]  ;;  %11140 = vrcp.f32 %v6877_v14 }
 0xa49   : > { %v11131_v33 = vpop.eup %11130 }
 0xa4a   : > { %v6968_v12 = vmul.f32 %v11131_v33, %v15823_v32  ;;  %v11133_v57 = vpop.eup %11132  ;;  %v6967_v15 = vmul.f32 %v11131_v33, %v15821_v35  ;;  %v6880_v25 = vpop.xlane.xlu0 %6879  ;;  %v7549_v32 = vld [vmem:[%s16236_s6 + $0x10] sm:$0xff]  ;;  %v7550_v35 = vld [vmem:[%s16236_s6 + $0x18] sm:$0xff]  ;;  %v16053_v33 = vld [vmem:[%s16235_s5] ss:$0 sm:$0xff] }
 0xa4b   : > { %7329 = vmatmul.mubr.f32.gmra.mrb[114].mxu1 %v6943_v37  ;;  %v6970_v52 = vmul.f32 %v11133_v57, %v17496_v28  ;;  %v6969_v53 = vmul.f32 %v11133_v57, %v17497_v56  ;;  %v17498_v37 = vld [vmem:[#allocation156_spill] sm:$0xff]  ;;  %v10366_v39 = vpack.c.bf16 %v7550_v35, %v7549_v32  ;;  %11142 = vrcp.f32 %v6880_v25 }
 0xa4c   : > { %7333 = vmatprep.mubr.f32.mxu1 %v6946_v38  ;;  %v17514_v28 = vld [vmem:[#allocation28_spill] sm:$0xff] }
 0xa4d   : > { %v11135_v46 = vpop.eup %11134  ;;  %10367 = vmatprep.subr.bf16.mxu0 %v10366_v39 }
 0xa4e   : > { %v6972_v47 = vmul.f32 %v11135_v46, %v17498_v37  ;;  %v11137_v38 = vpop.eup %11136  ;;  %10369 = vmatpush3.bf16.msra.mxu0 %v10366_v39  ;;  %v17515_v37 = vld [vmem:[#allocation30_spill] sm:$0xff] }
 0xa4f   : > { %7334 = vmatmul.mubr.f32.gmra.mrb[116].mxu1 %v6945_v17  ;;  %v17499_v17 = vld [vmem:[#allocation157_spill] sm:$0xff] }
 0xa50   : > { %7338 = vmatprep.mubr.f32.mxu1 %v6948_v54  ;;  %v6971_v41 = vmul.f32 %v11135_v46, %v17499_v17  ;;  %v6883_v54 = vpop.xlane.xlu1 %6882  ;;  %v17516_v17 = vld [vmem:[#allocation146_spill] sm:$0xff] }
 0xa51   : > { %v11139_v18 = vpop.eup %11138  ;;  %11144 = vrcp.f32 %v6883_v54 }
 0xa52   : > { %v6976_v61 = vmul.f32 %v11139_v18, %v15867_v60  ;;  %v6975_v0 = vmul.f32 %v11139_v18, %v15865_v16  ;;  %v17504_v60 = vld [vmem:[#allocation165_spill] sm:$0xff]  ;;  %v17505_v16 = vld [vmem:[#allocation84_spill] sm:$0xff] }
 0xa53   : > { %7339 = vmatmul.mubr.f32.gmra.mrb[118].mxu1 %v6947_v36  ;;  %v6974_v36 = vmul.f32 %v11137_v38, %v17500_v42 }
 0xa54   : > { %7343 = vmatprep.mubr.f32.mxu1 %v6950_v45  ;;  %v17501_v45 = vld [vmem:[#allocation49_spill] sm:$0xff] }
 0xa55   : > { %v6973_v62 = vmul.f32 %v11137_v38, %v17501_v45  ;;  %v17517_v45 = vld [vmem:[#allocation145_spill] sm:$0xff] }
 0xa57   : > { %7344 = vmatmul.mubr.f32.gmra.mrb[120].mxu1 %v6949_v11  ;;  %v6886_v11 = vpop.xlane.xlu0 %6885 }
 0xa58   : > { %7348 = vmatprep.mubr.f32.mxu1 %v6952_v43  ;;  %v11141_v43 = vpop.eup %11140  ;;  %11146 = vrcp.f32 %v6886_v11 }
 0xa59   : > { %v6978_v63 = vmul.f32 %v11141_v43, %v15878_v5  ;;  %v17506_v5 = vld [vmem:[#allocation55_spill] sm:$0xff] }
 0xa5b   : > { %7349 = vmatmul.mubr.f32.gmra.mrb[122].mxu1 %v6951_v1  ;;  %v6889_v1 = vpop.xlane.xlu1 %6888  ;;  %v6892_v9 = vpop.xlane.xlu0 %6891 }
 0xa5c   : > { %7353 = vmatprep.mubr.f32.mxu1 %v6954_v58  ;;  %v11143_v58 = vpop.eup %11142  ;;  %11148 = vrcp.f32 %v6889_v1  ;;  %v17518_v1 = vld [vmem:[#allocation34_spill] sm:$0xff] }
 0xa5d   : > { %v6979_v51 = vmul.f32 %v11143_v58, %v17504_v60  ;;  %11150 = vrcp.f32 %v6892_v9 }
 0xa5f   : > { %7354 = vmatmul.mubr.f32.gmra.mrb[124].mxu1 %v6953_v40  ;;  %v6977_v40 = vmul.f32 %v11141_v43, %v17502_v48 }
 0xa60   : > { %7358 = vmatprep.mubr.f32.mxu1 %v6956_v26  ;;  %v17503_v26 = vld [vmem:[#allocation164_spill] sm:$0xff] }
 0xa61   : > { %v6980_v20 = vmul.f32 %v11143_v58, %v17503_v26  ;;  %v17519_v26 = vld [vmem:[#allocation36_spill] sm:$0xff] }
 0xa63   : > { %7359 = vmatmul.mubr.f32.gmra.mrb[126].mxu1 %v6955_v50  ;;  %v11145_v50 = vpop.eup %11144 }
 0xa64   : > { %7363 = vmatprep.mubr.f32.mxu1 %v6958_v30  ;;  %v6982_v30 = vmul.f32 %v11145_v50, %v17505_v16  ;;  %v11147_v4 = vpop.eup %11146 }
 0xa66   : > { %v11149_v13 = vpop.eup %11148 }
 0xa67   : > { %7364 = vmatmul.mubr.f32.gmra.mrb[128].mxu1 %v6957_v55  ;;  %v6981_v55 = vmul.f32 %v11145_v50, %v17506_v5  ;;  %v11151_v27 = vpop.eup %11150 }
 0xa68   : > { %7368 = vmatprep.mubr.f32.mxu1 %v6960_v24  ;;  %v6984_v24 = vmul.f32 %v11147_v4, %v17507_v59 }
 0xa6b   : > { %7369 = vmatmul.mubr.f32.gmra.mrb[130].mxu1 %v6959_v44  ;;  %v17508_v44 = vld [vmem:[#allocation20_spill] sm:$0xff] }
 0xa6c   : > { %7373 = vmatprep.mubr.f32.mxu1 %v6962_v29  ;;  %v6983_v19 = vmul.f32 %v11147_v4, %v17508_v44  ;;  %v17509_v29 = vld [vmem:[#allocation87_spill] sm:$0xff] }
 0xa6d   : > { %v6986_v23 = vmul.f32 %v11149_v13, %v17509_v29 }
 0xa6f   : > { %7374 = vmatmul.mubr.f32.gmra.mrb[132].mxu1 %v6961_v2  ;;  %v17510_v2 = vld [vmem:[#allocation88_spill] sm:$0xff] }
 0xa70   : > { %7378 = vmatprep.mubr.f32.mxu1 %v6964_v3  ;;  %v6985_v7 = vmul.f32 %v11149_v13, %v17510_v2  ;;  %v17511_v3 = vld [vmem:[#allocation92_spill] sm:$0xff] }
 0xa71   : > { %v6988_v22 = vmul.f32 %v11151_v27, %v17511_v3  ;;  %v17521_v13 = vld [vmem:[#allocation148_spill] sm:$0xff] }
 0xa72   : > { %v17522_v2 = vld [vmem:[#allocation40_spill] sm:$0xff] }
 0xa73   : > { %7379 = vmatmul.mubr.f32.gmra.mrb[134].mxu1 %v6963_v21  ;;  %v17512_v21 = vld [vmem:[#allocation89_spill] sm:$0xff] }
 0xa74   : > { %7383 = vmatprep.mubr.f32.mxu1 %v6966_v8  ;;  %v6987_v49 = vmul.f32 %v11151_v27, %v17512_v21 }
 0xa77   : > { %7384 = vmatmul.mubr.f32.gmra.mrb[136].mxu1 %v6965_v31  ;;  %v17513_v31 = vld [vmem:[#allocation142_spill] sm:$0xff] }
 0xa78   : > { %7388 = vmatprep.mubr.f32.mxu1 %v6968_v12 }
 0xa7b   : > { %7389 = vmatmul.mubr.f32.gmra.mrb[138].mxu1 %v6967_v15 }
 0xa7c   : > { %7393 = vmatprep.mubr.f32.mxu1 %v6970_v52 }
 0xa7f   : > { %7394 = vmatmul.mubr.f32.gmra.mrb[140].mxu1 %v6969_v53 }
 0xa80   : > { %7398 = vmatprep.mubr.f32.mxu1 %v6972_v47 }
 0xa83   : > { %7399 = vmatmul.mubr.f32.gmra.mrb[142].mxu1 %v6971_v41 }
 0xa84   : > { %7403 = vmatprep.mubr.f32.mxu1 %v6974_v36 }
 0xa87   : > { %7404 = vmatmul.mubr.f32.gmra.mrb[144].mxu1 %v6973_v62 }
 0xa88   : > { %7408 = vmatprep.mubr.f32.mxu1 %v6976_v61 }
 0xa8b   : > { %7409 = vmatmul.mubr.f32.gmra.mrb[146].mxu1 %v6975_v0 }
 0xa8c   : > { %7413 = vmatprep.mubr.f32.mxu1 %v6978_v63 }
 0xa8f   : > { %7414 = vmatmul.mubr.f32.gmra.mrb[148].mxu1 %v6977_v40 }
 0xa90   : > { %7418 = vmatprep.mubr.f32.mxu1 %v6980_v20 }
 0xa93   : > { %7419 = vmatmul.mubr.f32.gmra.mrb[150].mxu1 %v6979_v51 }
 0xa94   : > { %7423 = vmatprep.mubr.f32.mxu1 %v6982_v30  ;;  %v17520_v30 = vld [vmem:[#allocation149_spill] sm:$0xff] }
 0xa97   : > { %7424 = vmatmul.mubr.f32.gmra.mrb[152].mxu1 %v6981_v55 }
 0xa98   : > { %7428 = vmatprep.mubr.f32.mxu1 %v6984_v24 }
 0xa9b   : > { %7429 = vmatmul.mubr.f32.gmra.mrb[154].mxu1 %v6983_v19 }
 0xa9c   : > { %7433 = vmatprep.mubr.f32.mxu1 %v6986_v23 }
 0xa9f   : > { %7434 = vmatmul.mubr.f32.gmra.mrb[156].mxu1 %v6985_v7 }
 0xaa0   : > { %7438 = vmatprep.mubr.f32.mxu1 %v6988_v22 }
 0xaa3   : > { %7439 = vmatmul.mubr.f32.gmra.mrb[158].mxu1 %v6987_v49 }
 0xafa   : > { %v7285_v8 = vpop.f32.mrb[96].mxu1 }
 0xafb   : > { %v7444_v6 = vadd.f32 %v7285_v8, %v17513_v31  ;;  %v7287_v12 = vpop.f32.mrb[97].mxu1  ;;  %v17523_v8 = vld [vmem:[#allocation42_spill] sm:$0xff] }
 0xafd   : > { %v7483_v57 = vadd.f32 %v16053_v33, %v7444_v6 }
 0xafe   : > { %v7290_v15 = vpop.f32.mrb[98].mxu1 }
 0xaff   : > { %v7515_v14 = vmax.f32 %v7483_v57, 0.0  ;;  %v7445_v52 = vadd.f32 %v7290_v15, %v17514_v28  ;;  %v7292_v46 = vpop.f32.mrb[99].mxu1 }
 0xb01   : > { %v7484_v56 = vadd.f32 %v16053_v33, %v7445_v52  ;;  %9862 = vmatprep.mubr.msk.f32.mxu0 %vm1249_vm0, %v7515_v14  ;;  %v17524_v14 = vld [vmem:[#allocation160_spill] sm:$0xff] }
 0xb02   : > { %v7295_v53 = vpop.f32.mrb[100].mxu1 }
 0xb03   : > { %v7516_v25 = vmax.f32 %v7484_v56, 0.0  ;;  %v7446_v47 = vadd.f32 %v7295_v53, %v17515_v37  ;;  %v7297_v38 = vpop.f32.mrb[101].mxu1 }
 0xb05   : > { %v7485_v32 = vadd.f32 %v16053_v33, %v7446_v47  ;;  %9863 = vmatmul.mubr.msk.f32.vlgmr.msra.gmra.mrb[128].mxu0 %vm1249_vm0, %v7516_v25  ;;  %v17525_v25 = vld [vmem:[#allocation44_spill] sm:$0xff] }
 0xb06   : > { %v7300_v35 = vpop.f32.mrb[102].mxu1 }
 0xb07   : > { %v7517_v39 = vmax.f32 %v7485_v32, 0.0  ;;  %v7447_v41 = vadd.f32 %v7300_v35, %v17516_v17  ;;  %v7302_v54 = vpop.f32.mrb[103].mxu1 }
 0xb09   : > { %v7486_v42 = vadd.f32 %v16053_v33, %v7447_v41  ;;  %9865 = vmatprep.mubr.msk.f32.mxu0 %vm1249_vm0, %v7517_v39  ;;  %v17526_v39 = vld [vmem:[#allocation45_spill] sm:$0xff] }
 0xb0a   : > { %v7305_v36 = vpop.f32.mrb[104].mxu1 }
 0xb0b   : > { %v7518_v18 = vmax.f32 %v7486_v42, 0.0  ;;  %v7448_v62 = vadd.f32 %v7305_v36, %v17517_v45  ;;  %v7307_v11 = vpop.f32.mrb[105].mxu1 }
 0xb0d   : > { %v7487_v61 = vadd.f32 %v16053_v33, %v7448_v62  ;;  %9866 = vmatmul.mubr.msk.f32.gmra.mrb[130].mxu0 %vm1249_vm0, %v7518_v18  ;;  %v17527_v18 = vld [vmem:[#allocation162_spill] sm:$0xff] }
 0xb0e   : > { %v7310_v43 = vpop.f32.mrb[106].mxu1 }
 0xb0f   : > { %v7519_v0 = vmax.f32 %v7487_v61, 0.0  ;;  %v7449_v63 = vadd.f32 %v7310_v43, %v17518_v1  ;;  %v7312_v58 = vpop.f32.mrb[107].mxu1 }
 0xb11   : > { %v7488_v48 = vadd.f32 %v16053_v33, %v7449_v63  ;;  %9868 = vmatprep.mubr.msk.f32.mxu0 %vm1249_vm0, %v7519_v0  ;;  %v17528_v0 = vld [vmem:[#allocation47_spill] sm:$0xff] }
 0xb12   : > { %v7315_v40 = vpop.f32.mrb[108].mxu1 }
 0xb13   : > { %v7520_v9 = vmax.f32 %v7488_v48, 0.0  ;;  %v7450_v20 = vadd.f32 %v7315_v40, %v17519_v26  ;;  %v7317_v50 = vpop.f32.mrb[109].mxu1 }
 0xb15   : > { %v7489_v60 = vadd.f32 %v16053_v33, %v7450_v20  ;;  %9869 = vmatmul.mubr.msk.f32.gmra.mrb[132].mxu0 %vm1249_vm0, %v7520_v9  ;;  %v17529_v9 = vld [vmem:[#allocation48_spill] sm:$0xff] }
 0xb16   : > { %v7320_v51 = vpop.f32.mrb[110].mxu1 }
 0xb17   : > { %v7521_v16 = vmax.f32 %v7489_v60, 0.0  ;;  %v7451_v4 = vadd.f32 %v7320_v51, %v17520_v30  ;;  %v7322_v5 = vpop.f32.mrb[111].mxu1 }
 0xb19   : > { %v7490_v55 = vadd.f32 %v16053_v33, %v7451_v4  ;;  %9871 = vmatprep.mubr.msk.f32.mxu0 %vm1249_vm0, %v7521_v16  ;;  %v17530_v16 = vld [vmem:[#allocation159_spill] sm:$0xff] }
 0xb1a   : > { %v7325_v59 = vpop.f32.mrb[112].mxu1 }
 0xb1b   : > { %v7522_v24 = vmax.f32 %v7490_v55, 0.0  ;;  %v7452_v44 = vadd.f32 %v7325_v59, %v17521_v13  ;;  %v7327_v19 = vpop.f32.mrb[113].mxu1 }
 0xb1d   : > { %v7491_v29 = vadd.f32 %v16053_v33, %v7452_v44  ;;  %9872 = vmatmul.mubr.msk.f32.gmra.mrb[134].mxu0 %vm1249_vm0, %v7522_v24  ;;  %v17531_v24 = vld [vmem:[#allocation50_spill] sm:$0xff] }
 0xb1e   : > { %v7330_v23 = vpop.f32.mrb[114].mxu1 }
 0xb1f   : > { %v7523_v27 = vmax.f32 %v7491_v29, 0.0  ;;  %v7453_v7 = vadd.f32 %v7330_v23, %v17522_v2  ;;  %v7332_v3 = vpop.f32.mrb[115].mxu1 }
 0xb21   : > { %v7492_v22 = vadd.f32 %v16053_v33, %v7453_v7  ;;  %9874 = vmatprep.mubr.msk.f32.mxu0 %vm1249_vm0, %v7523_v27  ;;  %v17532_v27 = vld [vmem:[#allocation52_spill] sm:$0xff] }
 0xb22   : > { %v7335_v21 = vpop.f32.mrb[116].mxu1 }
 0xb23   : > { %v7524_v49 = vmax.f32 %v7492_v22, 0.0  ;;  %v7454_v31 = vadd.f32 %v7335_v21, %v17523_v8  ;;  %v7337_v6 = vpop.f32.mrb[117].mxu1 }
 0xb25   : > { %v7493_v12 = vadd.f32 %v16053_v33, %v7454_v31  ;;  %9875 = vmatmul.mubr.msk.f32.gmra.mrb[136].mxu0 %vm1249_vm0, %v7524_v49  ;;  %v17533_v49 = vld [vmem:[#allocation53_spill] sm:$0xff] }
 0xb26   : > { %v7340_v57 = vpop.f32.mrb[118].mxu1 }
 0xb27   : > { %v7525_v15 = vmax.f32 %v7493_v12, 0.0  ;;  %v7455_v28 = vadd.f32 %v7340_v57, %v17524_v14  ;;  %v7342_v52 = vpop.f32.mrb[119].mxu1 }
 0xb29   : > { %v7494_v46 = vadd.f32 %v16053_v33, %v7455_v28  ;;  %9877 = vmatprep.mubr.msk.f32.mxu0 %vm1249_vm0, %v7525_v15  ;;  %v17534_v15 = vld [vmem:[#allocation83_spill] sm:$0xff] }
 0xb2a   : > { %v7345_v56 = vpop.f32.mrb[120].mxu1 }
 0xb2b   : > { %v7526_v53 = vmax.f32 %v7494_v46, 0.0  ;;  %v7456_v37 = vadd.f32 %v7345_v56, %v17525_v25  ;;  %v7347_v47 = vpop.f32.mrb[121].mxu1 }
 0xb2d   : > { %v7495_v38 = vadd.f32 %v16053_v33, %v7456_v37  ;;  %9878 = vmatmul.mubr.msk.f32.gmra.mrb[138].mxu0 %vm1249_vm0, %v7526_v53  ;;  %v17535_v53 = vld [vmem:[#allocation85_spill] sm:$0xff] }
 0xb2e   : > { %v7350_v32 = vpop.f32.mrb[122].mxu1 }
 0xb2f   : > { %v7527_v35 = vmax.f32 %v7495_v38, 0.0  ;;  %v7457_v17 = vadd.f32 %v7350_v32, %v17526_v39  ;;  %v7352_v41 = vpop.f32.mrb[123].mxu1 }
 0xb31   : > { %v7496_v54 = vadd.f32 %v16053_v33, %v7457_v17  ;;  %9880 = vmatprep.mubr.msk.f32.mxu0 %vm1249_vm0, %v7527_v35  ;;  %v17536_v35 = vld [vmem:[#allocation90_spill] sm:$0xff] }
 0xb32   : > { %v7355_v42 = vpop.f32.mrb[124].mxu1 }
 0xb33   : > { %v7528_v36 = vmax.f32 %v7496_v54, 0.0  ;;  %v7458_v45 = vadd.f32 %v7355_v42, %v17527_v18  ;;  %v7357_v62 = vpop.f32.mrb[125].mxu1 }
 0xb35   : > { %v7497_v11 = vadd.f32 %v16053_v33, %v7458_v45  ;;  %9881 = vmatmul.mubr.msk.f32.gmra.mrb[140].mxu0 %vm1249_vm0, %v7528_v36  ;;  %v17537_v36 = vld [vmem:[#allocation91_spill] sm:$0xff] }
 0xb36   : > { %v7360_v61 = vpop.f32.mrb[126].mxu1 }
 0xb37   : > { %v7529_v43 = vmax.f32 %v7497_v11, 0.0  ;;  %v7459_v1 = vadd.f32 %v7360_v61, %v17528_v0  ;;  %v7362_v63 = vpop.f32.mrb[127].mxu1 }
 0xb39   : > { %v7498_v58 = vadd.f32 %v16053_v33, %v7459_v1  ;;  %9883 = vmatprep.mubr.msk.f32.mxu0 %vm1249_vm0, %v7529_v43 }
 0xb3a   : > { %v7365_v48 = vpop.f32.mrb[128].mxu1 }
 0xb3b   : > { %v7530_v40 = vmax.f32 %v7498_v58, 0.0  ;;  %v7460_v26 = vadd.f32 %v7365_v48, %v17529_v9  ;;  %v7367_v20 = vpop.f32.mrb[129].mxu1  ;;  %v17538_v48 = vld [vmem:[#allocation97_spill] sm:$0xff] }
 0xb3d   : > { %v7499_v50 = vadd.f32 %v16053_v33, %v7460_v26  ;;  %9884 = vmatmul.mubr.msk.f32.gmra.mrb[142].mxu0 %vm1249_vm0, %v7530_v40 }
 0xb3e   : > { %v7370_v60 = vpop.f32.mrb[130].mxu1 }
 0xb3f   : > { %v7531_v51 = vmax.f32 %v7499_v50, 0.0  ;;  %v7461_v30 = vadd.f32 %v7370_v60, %v17530_v16  ;;  %v7372_v4 = vpop.f32.mrb[131].mxu1  ;;  %v17539_v60 = vld [vmem:[#allocation94_spill] sm:$0xff] }
 0xb41   : > { %v7500_v5 = vadd.f32 %v16053_v33, %v7461_v30  ;;  %9886 = vmatprep.mubr.msk.f32.mxu0 %vm1249_vm0, %v7531_v51 }
 0xb42   : > { %v7375_v55 = vpop.f32.mrb[132].mxu1 }
 0xb43   : > { %v7532_v59 = vmax.f32 %v7500_v5, 0.0  ;;  %v7462_v13 = vadd.f32 %v7375_v55, %v17531_v24  ;;  %v7377_v44 = vpop.f32.mrb[133].mxu1 }
 0xb44   : > { %v17540_v44 = vld [vmem:[#allocation98_spill] sm:$0xff] }
 0xb45   : > { %v7501_v19 = vadd.f32 %v16053_v33, %v7462_v13  ;;  %9887 = vmatmul.mubr.msk.f32.gmra.mrb[144].mxu0 %vm1249_vm0, %v7532_v59 }
 0xb46   : > { %v7380_v29 = vpop.f32.mrb[134].mxu1 }
 0xb47   : > { %v7533_v23 = vmax.f32 %v7501_v19, 0.0  ;;  %v7463_v2 = vadd.f32 %v7380_v29, %v17532_v27  ;;  %v7382_v7 = vpop.f32.mrb[135].mxu1 }
 0xb48   : > { %v17541_v7 = vld [vmem:[#allocation93_spill] sm:$0xff] }
 0xb49   : > { %v7502_v3 = vadd.f32 %v16053_v33, %v7463_v2  ;;  %9889 = vmatprep.mubr.msk.f32.mxu0 %vm1249_vm0, %v7533_v23 }
 0xb4a   : > { %v7385_v22 = vpop.f32.mrb[136].mxu1 }
 0xb4b   : > { %v7534_v21 = vmax.f32 %v7502_v3, 0.0  ;;  %v7464_v8 = vadd.f32 %v7385_v22, %v17533_v49  ;;  %v7387_v31 = vpop.f32.mrb[137].mxu1 }
 0xb4d   : > { %v7503_v6 = vadd.f32 %v16053_v33, %v7464_v8  ;;  %9890 = vmatmul.mubr.msk.f32.gmra.mrb[146].mxu0 %vm1249_vm0, %v7534_v21  ;;  %v17542_v8 = vld [vmem:[#allocation101_spill] sm:$0xff] }
 0xb4e   : > { %v7390_v12 = vpop.f32.mrb[138].mxu1 }
 0xb4f   : > { %v7535_v57 = vmax.f32 %v7503_v6, 0.0  ;;  %v7465_v14 = vadd.f32 %v7390_v12, %v17534_v15  ;;  %v7392_v28 = vpop.f32.mrb[139].mxu1  ;;  %v16154_v15 = vld [vmem:[%s16237_s7] ss:$0 sm:$0xff] }
 0xb51   : > { %v7504_v52 = vadd.f32 %v16053_v33, %v7465_v14  ;;  %9892 = vmatprep.mubr.msk.f32.mxu0 %vm1249_vm0, %v7535_v57 }
 0xb52   : > { %v7395_v46 = vpop.f32.mrb[140].mxu1 }
 0xb53   : > { %v7536_v56 = vmax.f32 %v7504_v52, 0.0  ;;  %v7466_v25 = vadd.f32 %v7395_v46, %v17535_v53  ;;  %v7397_v37 = vpop.f32.mrb[141].mxu1 }
 0xb55   : > { %v7505_v47 = vadd.f32 %v16053_v33, %v7466_v25  ;;  %9893 = vmatmul.mubr.msk.f32.gmra.mrb[148].mxu0 %vm1249_vm0, %v7536_v56 }
 0xb56   : > { %v7400_v38 = vpop.f32.mrb[142].mxu1 }
 0xb57   : > { %v7537_v32 = vmax.f32 %v7505_v47, 0.0  ;;  %v7467_v39 = vadd.f32 %v7400_v38, %v17536_v35  ;;  %v7402_v17 = vpop.f32.mrb[143].mxu1 }
 0xb59   : > { %v7506_v41 = vadd.f32 %v16053_v33, %v7467_v39  ;;  %9895 = vmatprep.mubr.msk.f32.mxu0 %vm1249_vm0, %v7537_v32 }
 0xb5a   : > { %v7405_v54 = vpop.f32.mrb[144].mxu1 }
 0xb5b   : > { %v7538_v42 = vmax.f32 %v7506_v41, 0.0  ;;  %v7468_v18 = vadd.f32 %v7405_v54, %v17537_v36  ;;  %v7407_v45 = vpop.f32.mrb[145].mxu1 }
 0xb5d   : > { %v7507_v62 = vadd.f32 %v16053_v33, %v7468_v18  ;;  %9896 = vmatmul.mubr.msk.f32.gmra.mrb[150].mxu0 %vm1249_vm0, %v7538_v42 }
 0xb5e   : > { %v7410_v11 = vpop.f32.mrb[146].mxu1 }
 0xb5f   : > { %v7539_v61 = vmax.f32 %v7507_v62, 0.0  ;;  %v7469_v43 = vadd.f32 %v7410_v11, %v15935_v34  ;;  %v7412_v0 = vpop.f32.mrb[147].mxu1 }
 0xb61   : > { %v7508_v1 = vadd.f32 %v16053_v33, %v7469_v43  ;;  %9898 = vmatprep.mubr.msk.f32.mxu0 %vm1249_vm0, %v7539_v61 }
 0xb62   : > { %v7415_v63 = vpop.f32.mrb[148].mxu1 }
 0xb63   : > { %v7540_v58 = vmax.f32 %v7508_v1, 0.0  ;;  %v7470_v40 = vadd.f32 %v7415_v63, %v17538_v48  ;;  %v7417_v9 = vpop.f32.mrb[149].mxu1 }
 0xb65   : > { %v7509_v26 = vadd.f32 %v16053_v33, %v7470_v40  ;;  %9899 = vmatmul.mubr.msk.f32.gmra.mrb[152].mxu0 %vm1249_vm0, %v7540_v58 }
 0xb66   : > { %v7420_v20 = vpop.f32.mrb[150].mxu1 }
 0xb67   : > { %v7541_v50 = vmax.f32 %v7509_v26, 0.0  ;;  %v7471_v51 = vadd.f32 %v7420_v20, %v17539_v60  ;;  %v7422_v16 = vpop.f32.mrb[151].mxu1 }
 0xb69   : > { %v7510_v34 = vadd.f32 %v16053_v33, %v7471_v51  ;;  %9901 = vmatprep.mubr.msk.f32.mxu0 %vm1249_vm0, %v7541_v50 }
 0xb6a   : > { %v7425_v30 = vpop.f32.mrb[152].mxu1 }
 0xb6b   : > { %v7542_v4 = vmax.f32 %v7510_v34, 0.0  ;;  %v7472_v5 = vadd.f32 %v7425_v30, %v15944_v10  ;;  %v7427_v55 = vpop.f32.mrb[153].mxu1 }
 0xb6d   : > { %v7511_v59 = vadd.f32 %v16053_v33, %v7472_v5  ;;  %9902 = vmatmul.mubr.msk.f32.gmra.mrb[154].mxu0 %vm1249_vm0, %v7542_v4 }
 0xb6e   : > { %v7430_v24 = vpop.f32.mrb[154].mxu1 }
 0xb6f   : > { %v7543_v13 = vmax.f32 %v7511_v59, 0.0  ;;  %v7473_v19 = vadd.f32 %v7430_v24, %v17540_v44  ;;  %v7432_v29 = vpop.f32.mrb[155].mxu1 }
 0xb71   : > { %v7512_v23 = vadd.f32 %v16053_v33, %v7473_v19  ;;  %9904 = vmatprep.mubr.msk.f32.mxu0 %vm1249_vm0, %v7543_v13 }
 0xb72   : > { %v7435_v27 = vpop.f32.mrb[156].mxu1 }
 0xb73   : > { %v7544_v2 = vmax.f32 %v7512_v23, 0.0  ;;  %v7474_v3 = vadd.f32 %v7435_v27, %v17541_v7  ;;  %v7437_v10 = vpop.f32.mrb[157].mxu1 }
 0xb75   : > { %v7513_v22 = vadd.f32 %v16053_v33, %v7474_v3  ;;  %9905 = vmatmul.mubr.msk.f32.gmra.mrb[156].mxu0 %vm1249_vm0, %v7544_v2 }
 0xb76   : > { %v7440_v21 = vpop.f32.mrb[158].mxu1 }
 0xb77   : > { %v7545_v49 = vmax.f32 %v7513_v22, 0.0  ;;  %v7475_v31 = vadd.f32 %v7440_v21, %v17542_v8  ;;  %v7442_v6 = vpop.f32.mrb[159].mxu1 }
 0xb79   : > { %v7514_v12 = vadd.f32 %v16053_v33, %v7475_v31  ;;  %9907 = vmatprep.mubr.msk.f32.mxu0 %vm1249_vm0, %v7545_v49 }
 0xb7b   : > { %v7546_v57 = vmax.f32 %v7514_v12, 0.0 }
 0xb7d   : > { %9908 = vmatmul.mubr.msk.f32.gmra.mrb[158].mxu0 %vm1249_vm0, %v7546_v57 }
 0xbd8   : > { %v9864_v33 = vpop.f32.mrb[128].mxu0 }
 0xbd9   : > { %v7726_v14 = vadd.f32 %v9864_v33, %v16154_v15  ;;  %v7720_v28 = vpop.f32.mrb[129].mxu0 }
 0xbda   : > { %v7721_v52 = vadd.f32 %v16154_v15, %v7720_v28 }
 0xbdb   : > { %7880 = vst [vmem:[%s16161_s25 + $0x8] sm:$0xff] %v7726_v14 }
 0xbdc   : > { %7879 = vst [vmem:[%s16161_s25] sm:$0xff] %v7721_v52 }
 0xbe0   : > { %v9867_v46 = vpop.f32.mrb[130].mxu0 }
 0xbe1   : > { %v7736_v56 = vadd.f32 %v9867_v46, %v16154_v15  ;;  %v7730_v53 = vpop.f32.mrb[131].mxu0 }
 0xbe2   : > { %v7731_v25 = vadd.f32 %v16154_v15, %v7730_v53 }
 0xbe3   : > { %7882 = vst [vmem:[%s16161_s25 + $0x18] sm:$0xff] %v7736_v56 }
 0xbe4   : > { %7881 = vst [vmem:[%s16161_s25 + $0x10] sm:$0xff] %v7731_v25 }
 0xbe8   : > { %v9870_v37 = vpop.f32.mrb[132].mxu0 }
 0xbe9   : > { %v7746_v47 = vadd.f32 %v9870_v37, %v16154_v15  ;;  %v7740_v38 = vpop.f32.mrb[133].mxu0 }
 0xbea   : > { %v7741_v32 = vadd.f32 %v16154_v15, %v7740_v38 }
 0xbeb   : > { %7884 = vst [vmem:[%s16161_s25 + $0x28] sm:$0xff] %v7746_v47 }
 0xbec   : > { %7883 = vst [vmem:[%s16161_s25 + $0x20] sm:$0xff] %v7741_v32 }
 0xbf0   : > { %v9873_v35 = vpop.f32.mrb[134].mxu0 }
 0xbf1   : > { %v7756_v39 = vadd.f32 %v9873_v35, %v16154_v15  ;;  %v7750_v17 = vpop.f32.mrb[135].mxu0 }
 0xbf2   : > { %v7751_v41 = vadd.f32 %v16154_v15, %v7750_v17 }
 0xbf3   : > { %7886 = vst [vmem:[%s16161_s25 + $0x38] sm:$0xff] %v7756_v39 }
 0xbf4   : > { %7885 = vst [vmem:[%s16161_s25 + $0x30] sm:$0xff] %v7751_v41 }
 0xbf8   : > { %v9876_v54 = vpop.f32.mrb[136].mxu0 }
 0xbf9   : > { %v7766_v42 = vadd.f32 %v9876_v54, %v16154_v15  ;;  %v7760_v36 = vpop.f32.mrb[137].mxu0 }
 0xbfa   : > { %v7761_v18 = vadd.f32 %v16154_v15, %v7760_v36 }
 0xbfb   : > { %7888 = vst [vmem:[%s16161_s25 + $0x48] sm:$0xff] %v7766_v42 }
 0xbfc   : > { %7887 = vst [vmem:[%s16161_s25 + $0x40] sm:$0xff] %v7761_v18 }
 0xc00   : > { %v9879_v45 = vpop.f32.mrb[138].mxu0 }
 0xc01   : > { %v7776_v62 = vadd.f32 %v9879_v45, %v16154_v15  ;;  %v7770_v11 = vpop.f32.mrb[139].mxu0 }
 0xc02   : > { %v7771_v61 = vadd.f32 %v16154_v15, %v7770_v11 }
 0xc03   : > { %7890 = vst [vmem:[%s16161_s25 + $0x58] sm:$0xff] %v7776_v62 }
 0xc04   : > { %7889 = vst [vmem:[%s16161_s25 + $0x50] sm:$0xff] %v7771_v61 }
 0xc08   : > { %v9882_v43 = vpop.f32.mrb[140].mxu0 }
 0xc09   : > { %v7786_v0 = vadd.f32 %v9882_v43, %v16154_v15  ;;  %v7780_v1 = vpop.f32.mrb[141].mxu0 }
 0xc0a   : > { %v7781_v63 = vadd.f32 %v16154_v15, %v7780_v1 }
 0xc0b   : > { %7892 = vst [vmem:[%s16161_s25 + $0x68] sm:$0xff] %v7786_v0 }
 0xc0c   : > { %7891 = vst [vmem:[%s16161_s25 + $0x60] sm:$0xff] %v7781_v63 }
 0xc10   : > { %v9885_v58 = vpop.f32.mrb[142].mxu0 }
 0xc11   : > { %v7796_v48 = vadd.f32 %v9885_v58, %v16154_v15  ;;  %v7790_v40 = vpop.f32.mrb[143].mxu0 }
 0xc12   : > { %v7791_v9 = vadd.f32 %v16154_v15, %v7790_v40 }
 0xc13   : > { %7894 = vst [vmem:[%s16161_s25 + $0x78] sm:$0xff] %v7796_v48 }
 0xc14   : > { %7893 = vst [vmem:[%s16161_s25 + $0x70] sm:$0xff] %v7791_v9 }
 0xc18   : > { %v9888_v26 = vpop.f32.mrb[144].mxu0 }
 0xc19   : > { %v7806_v20 = vadd.f32 %v9888_v26, %v16154_v15  ;;  %v7800_v50 = vpop.f32.mrb[145].mxu0 }
 0xc1a   : > { %v7801_v60 = vadd.f32 %v16154_v15, %v7800_v50 }
 0xc1b   : > { %7896 = vst [vmem:[%s16161_s25 + $0x88] sm:$0xff] %v7806_v20 }
 0xc1c   : > { %7895 = vst [vmem:[%s16161_s25 + $0x80] sm:$0xff] %v7801_v60 }
 0xc20   : > { %v9891_v51 = vpop.f32.mrb[146].mxu0 }
 0xc21   : > { %v7816_v16 = vadd.f32 %v9891_v51, %v16154_v15  ;;  %v7810_v34 = vpop.f32.mrb[147].mxu0 }
 0xc22   : > { %v7811_v30 = vadd.f32 %v16154_v15, %v7810_v34 }
 0xc23   : > { %7898 = vst [vmem:[%s16161_s25 + $0x98] sm:$0xff] %v7816_v16 }
 0xc24   : > { %7897 = vst [vmem:[%s16161_s25 + $0x90] sm:$0xff] %v7811_v30 }
 0xc28   : > { %v9894_v4 = vpop.f32.mrb[148].mxu0 }
 0xc29   : > { %v7826_v5 = vadd.f32 %v9894_v4, %v16154_v15  ;;  %v7820_v55 = vpop.f32.mrb[149].mxu0 }
 0xc2a   : > { %v7821_v59 = vadd.f32 %v16154_v15, %v7820_v55 }
 0xc2b   : > { %7900 = vst [vmem:[%s16161_s25 + $0xa8] sm:$0xff] %v7826_v5 }
 0xc2c   : > { %7899 = vst [vmem:[%s16161_s25 + $0xa0] sm:$0xff] %v7821_v59 }
 0xc30   : > { %v9897_v24 = vpop.f32.mrb[150].mxu0 }
 0xc31   : > { %v7836_v13 = vadd.f32 %v9897_v24, %v16154_v15  ;;  %v7830_v44 = vpop.f32.mrb[151].mxu0 }
 0xc32   : > { %v7831_v19 = vadd.f32 %v16154_v15, %v7830_v44 }
 0xc33   : > { %7902 = vst [vmem:[%s16161_s25 + $0xb8] sm:$0xff] %v7836_v13 }
 0xc34   : > { %7901 = vst [vmem:[%s16161_s25 + $0xb0] sm:$0xff] %v7831_v19 }
 0xc38   : > { %v9900_v29 = vpop.f32.mrb[152].mxu0 }
 0xc39   : > { %v7846_v23 = vadd.f32 %v9900_v29, %v16154_v15  ;;  %v7840_v27 = vpop.f32.mrb[153].mxu0 }
 0xc3a   : > { %v7841_v2 = vadd.f32 %v16154_v15, %v7840_v27 }
 0xc3b   : > { %7904 = vst [vmem:[%s16161_s25 + $0xc8] sm:$0xff] %v7846_v23 }
 0xc3c   : > { %7903 = vst [vmem:[%s16161_s25 + $0xc0] sm:$0xff] %v7841_v2 }
 0xc40   : > { %v9903_v7 = vpop.f32.mrb[154].mxu0 }
 0xc41   : > { %v7856_v3 = vadd.f32 %v9903_v7, %v16154_v15  ;;  %v7850_v10 = vpop.f32.mrb[155].mxu0 }
 0xc42   : > { %v7851_v22 = vadd.f32 %v16154_v15, %v7850_v10 }
 0xc43   : > { %7906 = vst [vmem:[%s16161_s25 + $0xd8] sm:$0xff] %v7856_v3 }
 0xc44   : > { %7905 = vst [vmem:[%s16161_s25 + $0xd0] sm:$0xff] %v7851_v22 }
 0xc48   : > { %v9906_v21 = vpop.f32.mrb[156].mxu0 }
 0xc49   : > { %v7866_v49 = vadd.f32 %v9906_v21, %v16154_v15  ;;  %v7860_v8 = vpop.f32.mrb[157].mxu0 }
 0xc4a   : > { %v7861_v31 = vadd.f32 %v16154_v15, %v7860_v8 }
 0xc4b   : > { %7908 = vst [vmem:[%s16161_s25 + $0xe8] sm:$0xff] %v7866_v49 }
 0xc4c   : > { %7907 = vst [vmem:[%s16161_s25 + $0xe0] sm:$0xff] %v7861_v31 }
 0xc50   : > { %v9909_v6 = vpop.f32.mrb[158].mxu0 }
 0xc51   : > { %v7876_v12 = vadd.f32 %v9909_v6, %v16154_v15  ;;  %v7870_v57 = vpop.f32.mrb[159].mxu0 }
 0xc52   : > { %v7871_v33 = vadd.f32 %v16154_v15, %v7870_v57 }
 0xc53   : > { %7910 = vst [vmem:[%s16161_s25 + $0xf8] sm:$0xff] %v7876_v12 }
 0xc54   : > { %7909 = vst [vmem:[%s16161_s25 + $0xf0] sm:$0xff] %v7871_v33 }
 0xc55 PF: > { %s18_s27 = sadd.s32 1, %s11158_s27  }
 0xc56   : > { %p15_p4 = scmp.ge.s32.totalorder %s18_s27, 4  }
 0xc58   :  { %17 = sbr.rel (!%p15_p4) target bundleno = 1 (0x1), region = 88 }

</bundles_post_ra>
